<compile_context>
chip_gen: v6e
topology: v6e:2x2x1
jax: 0.10.0
libtpu: 0.0.40
codegen_flags: <defaults>
</compile_context>

<pallas_src>
import functools

import jax
import jax.numpy as jnp
from jax import lax
from jax.experimental import pallas as pl
from jax.experimental.pallas import tpu as pltpu


def _round_up(x, m):
    return ((x + m - 1) // m) * m


def _vmem_limit_bytes():
    # ~85% of physical VMEM (~109 MiB on v5e/v6e, ~54 MiB on v7x), capped at
    # 100 MiB; fall back to 48 MiB if the query is unavailable.
    try:
        cap = pltpu.get_tpu_info().vmem_capacity_bytes
        return min(int(cap * 0.85), 100 * 1024 * 1024)
    except Exception:
        return 48 * 1024 * 1024


# Grid-invariant operands: single-buffered (default 2-deep buffering would just
# double their VMEM footprint for nothing).
_CONST = dict(pipeline_mode=pl.Buffered(1))


# ----------------------------------------------------------------------------
# Stage 1: per-edge messages (edge-tiled grid, h_all scratch persists)
# ----------------------------------------------------------------------------
def _msg_kernel(src_ref, pseudo_ref, wp_ref, bp_ref, mu_ref, isig_ref,
                x_ref, wfc_ref, msg_ref, hall_ref, *, K, F_pad, dim):
    # ---- step 0: one wide bf16 MXU matmul X @ Wfc_all into persistent scratch ----
    @pl.when(pl.program_id(0) == 0)
    def _():
        hall_ref[...] = jnp.dot(
            x_ref[...], wfc_ref[...],
            preferred_element_type=jnp.float32).astype(jnp.bfloat16)

    te = pseudo_ref.shape[0]
    n_pad = x_ref.shape[0]

    # pseudo projection: 2-wide contraction as VPU broadcast-FMAs (no MXU)
    p0 = pseudo_ref[:, 0:1]                                           # (te, 1)
    p1 = pseudo_ref[:, 1:2]
    u = jnp.tanh(p0 * wp_ref[0:1, :] + p1 * wp_ref[1:2, :] + bp_ref[...])  # (te, dim)

    # Gaussian mixture edge weights w: (te, K), kept f32 on VPU/EUP
    acc = jnp.zeros((te, K), jnp.float32)
    for d in range(dim):                                              # dim tiny & static
        diff = u[:, d:d + 1] - mu_ref[d:d + 1, :]                     # (te,1)-(1,K)
        acc = acc + (diff * isig_ref[d:d + 1, :]) ** 2
    w = jnp.exp(-0.5 * acc)

    # gather h_all[src] via in-VMEM one-hot bf16 matmul, folding the mixture
    # dimension per k (the (te, K*F_pad) intermediate is never materialized).
    src_onehot = (src_ref[...] ==
                  lax.broadcasted_iota(jnp.int32, (te, n_pad), 1)
                  ).astype(jnp.bfloat16)                              # (te, N_pad)
    msg = jnp.zeros((te, F_pad), jnp.float32)
    for k in range(K):                                                # K tiny & static
        gk = jnp.dot(src_onehot, hall_ref[:, k * F_pad:(k + 1) * F_pad],
                     preferred_element_type=jnp.float32)              # (te, F_pad)
        msg = msg + w[:, k:k + 1] * gk
    msg_ref[...] = msg.astype(msg_ref.dtype)                          # bf16 out


# ----------------------------------------------------------------------------
# Stage 2: node-tiled scatter-add  out = onehot(dst)^T @ msg + bias
# ----------------------------------------------------------------------------
def _scatter_kernel(dst_ref, msg_ref, bias_ref, out_ref, *, tm):
    e_pad = dst_ref.shape[1]
    row_ids = pl.program_id(0) * tm + lax.broadcasted_iota(
        jnp.int32, (tm, e_pad), 0)
    dst_onehot_t = (dst_ref[...] == row_ids).astype(jnp.bfloat16)     # (tm, E_pad)
    out_ref[...] = (jnp.dot(dst_onehot_t, msg_ref[...],
                            preferred_element_type=jnp.float32)
                    + bias_ref[...])


# ----------------------------------------------------------------------------
# Per-layer wrapper: two pallas_calls
# ----------------------------------------------------------------------------
def _monet_layer(x_bf16, pseudo_p, src_p, dst_p, prep, *, tm, te):
    N_pad, F_in_pad = x_bf16.shape
    E_pad = pseudo_p.shape[0]
    K, dim, F_pad = prep["K"], prep["dim"], prep["F_pad"]
    vmem_limit = _vmem_limit_bytes()

    # ---- stage 1: per-edge messages (edge-tiled; "arbitrary" because the h_all
    #      scratch written at step 0 is read by later grid steps) ----
    msg_kernel = functools.partial(_msg_kernel, K=K, F_pad=F_pad, dim=dim)
    msg = pl.pallas_call(
        msg_kernel,
        out_shape=jax.ShapeDtypeStruct((E_pad, F_pad), jnp.bfloat16),
        grid_spec=pltpu.PrefetchScalarGridSpec(
            num_scalar_prefetch=0,
            grid=(E_pad // te,),
            in_specs=[
                pl.BlockSpec((te, 1), lambda e: (e, 0)),                    # src tile
                pl.BlockSpec((te, 2), lambda e: (e, 0)),                    # pseudo tile
                pl.BlockSpec((2, dim), lambda e: (0, 0), **_CONST),         # Wp
                pl.BlockSpec((1, dim), lambda e: (0, 0), **_CONST),         # bp
                pl.BlockSpec((dim, K), lambda e: (0, 0), **_CONST),         # mu^T
                pl.BlockSpec((dim, K), lambda e: (0, 0), **_CONST),         # inv_sigma^T
                pl.BlockSpec((N_pad, F_in_pad), lambda e: (0, 0), **_CONST),       # X (bf16)
                pl.BlockSpec((F_in_pad, K * F_pad), lambda e: (0, 0), **_CONST),   # Wfc_all (bf16)
            ],
            out_specs=pl.BlockSpec((te, F_pad), lambda e: (e, 0)),
            scratch_shapes=[pltpu.VMEM((N_pad, K * F_pad), jnp.bfloat16)],  # h_all
        ),
        compiler_params=pltpu.CompilerParams(
            dimension_semantics=("arbitrary",),
            vmem_limit_bytes=vmem_limit),
    )(src_p, pseudo_p, prep["wp"], prep["bp"], prep["mu_t"], prep["isig_t"],
      x_bf16, prep["wfc_all"])

    # ---- stage 2: node-tiled scatter (independent tiles -> "parallel";
    #      shards across v7x's 2 TensorCores) ----
    scat_kernel = functools.partial(_scatter_kernel, tm=tm)
    out = pl.pallas_call(
        scat_kernel,
        out_shape=jax.ShapeDtypeStruct((N_pad, F_pad), jnp.float32),
        grid_spec=pltpu.PrefetchScalarGridSpec(
            num_scalar_prefetch=0,
            grid=(N_pad // tm,),
            in_specs=[
                pl.BlockSpec((1, E_pad), lambda i: (0, 0), **_CONST),       # dst (lane-dense)
                pl.BlockSpec((E_pad, F_pad), lambda i: (0, 0), **_CONST),   # msg (bf16)
                pl.BlockSpec((1, F_pad), lambda i: (0, 0), **_CONST),       # bias
            ],
            out_specs=pl.BlockSpec((tm, F_pad), lambda i: (i, 0)),
        ),
        compiler_params=pltpu.CompilerParams(
            dimension_semantics=("parallel",),
            vmem_limit_bytes=vmem_limit),
    )(dst_p, msg, prep["bias"])
    return out   # (N_pad, F_pad) f32; padded cols exactly zero, padded rows unused


def _prepare_layer(params, f_in_pad):
    """Pad/cast/reshape weights once per layer (outside the per-layer loop)."""
    K, f_in, f_out = params["wfc"].shape
    dim = params["wp"].shape[1]
    F_pad = _round_up(f_out, 128)          # lane-dense per-k block / output width
    wfc_p = jnp.zeros((K, f_in_pad, F_pad), jnp.float32)
    wfc_p = wfc_p.at[:, :f_in, :f_out].set(params["wfc"])
    wfc_all = wfc_p.transpose(1, 0, 2).reshape(f_in_pad, K * F_pad).astype(jnp.bfloat16)
    bias_p = jnp.zeros((1, F_pad), jnp.float32).at[:, :f_out].set(params["bias"])
    return dict(wfc_all=wfc_all, bias=bias_p, wp=params["wp"], bp=params["bp"],
                mu_t=params["mu_t"], isig_t=params["isig_t"],
                K=K, dim=dim, F_pad=F_pad, f_out=f_out)


# ----------------------------------------------------------------------------
# MoNet forward (padding / layout plumbing in plain JAX; compute in kernels)
# ----------------------------------------------------------------------------
def monet_forward(feat, pseudo, src, dst, n_nodes, layer_params, *,
                  node_tile=256, edge_tile=512):
    N = n_nodes
    E = src.shape[0]
    tm = _round_up(node_tile, 8)               # 256 fills the v6e/v7x MXU rows
    te = _round_up(min(edge_tile, E), 8)
    N_pad = _round_up(N, tm)
    E_pad = _round_up(E, te)

    # graph-level inputs padded once (padded edges: dst=-1 -> scatter to nowhere)
    pseudo_p = jnp.zeros((E_pad, 2), jnp.float32).at[:E].set(pseudo)
    src_p = jnp.zeros((E_pad, 1), jnp.int32).at[:E, 0].set(src.astype(jnp.int32))
    dst_p = jnp.full((1, E_pad), -1, jnp.int32).at[0, :E].set(dst.astype(jnp.int32))

    f_in = feat.shape[1]
    f_in_pad = _round_up(f_in, 128)
    h = jnp.zeros((N_pad, f_in_pad), jnp.float32).at[:N, :f_in].set(feat)

    # per-layer weight padding / wide-layout reshape, done once
    preps = []
    cur_pad = f_in_pad
    for p in layer_params:
        prep = _prepare_layer(p, cur_pad)
        preps.append(prep)
        cur_pad = prep["F_pad"]

    f_out = f_in
    for prep in preps:
        f_out = prep["f_out"]
        # dropout between layers is identity in eval mode
        # feature path in bf16 (MXU-native); f32 accumulation inside the kernels
        h = _monet_layer(h.astype(jnp.bfloat16), pseudo_p, src_p, dst_p, prep,
                         tm=tm, te=te)
    return h[:N, :f_out]


def monet_reference(feat, pseudo, src, dst, n_nodes, layer_params):
    """Pure-JAX f32 reference for sanity checking."""
    h = feat
    for p in layer_params:
        u = jnp.tanh(pseudo @ p["wp"] + p["bp"])                        # (E, dim)
        mu = p["mu_t"].T                                                # (K, dim)
        isig = p["isig_t"].T                                            # (K, dim)
        diff = u[:, None, :] - mu[None, :, :]
        w = jnp.exp(-0.5 * jnp.sum((diff * isig[None]) ** 2, axis=-1))  # (E, K)
        K = mu.shape[0]
        adj = jnp.zeros((K, n_nodes, n_nodes), jnp.float32).at[:, dst, src].add(w.T)
        hk = jnp.einsum("ni,kio->kno", h, p["wfc"])                     # (K, N, F_out)
        h = jnp.einsum("kmn,kno->mo", adj, hk) + p["bias"]              # (N, F_out)
    return h


def init_layer(key, in_f, out_f, dim, n_kernels):
    ks = jax.random.split(key, 5)
    return {
        # pseudo_proj: Linear(2, dim) + Tanh
        "wp": jax.random.normal(ks[0], (2, dim), jnp.float32) * 0.5,
        "bp": jax.random.normal(ks[1], (1, dim), jnp.float32) * 0.1,
        # GMMConv params (fc weight as (K, in, out), mu/inv_sigma as (dim, K))
        "wfc": jax.random.normal(ks[2], (n_kernels, in_f, out_f), jnp.float32)
        * (1.0 / jnp.sqrt(in_f)),
        "mu_t": jax.random.normal(ks[3], (dim, n_kernels), jnp.float32) * 0.1,
        "isig_t": jnp.ones((dim, n_kernels), jnp.float32),
        "bias": jnp.zeros((1, out_f), jnp.float32)
        + 0.01 * jax.random.normal(ks[4], (1, out_f), jnp.float32),
    }


if __name__ == "__main__":
    # small, module-consistent sizes (citation-style graph, a bit larger than toy
    # so both the edge-tiled and node-tiled grids take multiple steps)
    N = 512          # nodes
    in_feats = 16
    n_hidden = 32
    out_feats = 8
    dim = 2          # pseudo-coordinate projection dim
    n_kernels = 3
    n_layers = 2     # -> n_layers + 1 = 3 GMMConv layers (as in MoNet.__init__)

    key = jax.random.PRNGKey(0)
    k_feat, k_pseudo, k_params = jax.random.split(key, 3)

    # synthetic graph: bidirectional ring + self loops
    ids = jnp.arange(N, dtype=jnp.int32)
    src = jnp.concatenate([ids, (ids + 1) % N, (ids - 1) % N])
    dst = jnp.concatenate([ids, ids, ids])
    E = src.shape[0]

    feat = jax.random.normal(k_feat, (N, in_feats), jnp.float32)
    pseudo = jax.random.uniform(k_pseudo, (E, 2), jnp.float32)

    # parameters: [in->hid] + (n_layers-1) x [hid->hid] + [hid->out]
    sizes = ([(in_feats, n_hidden)]
             + [(n_hidden, n_hidden)] * (n_layers - 1)
             + [(n_hidden, out_feats)])
    pkeys = jax.random.split(k_params, len(sizes))
    layer_params = [init_layer(pk, fi, fo, dim, n_kernels)
                    for pk, (fi, fo) in zip(pkeys, sizes)]

    # node_tile=256 -> 2 node tiles, edge_tile=512 -> 3 edge tiles per layer.
    out = monet_forward(feat, pseudo, src, dst, N, layer_params,
                        node_tile=256, edge_tile=512)
    out = jax.block_until_ready(out)

    ref = monet_reference(feat, pseudo, src, dst, N, layer_params)
    assert out.shape == (N, out_feats), out.shape
    # bf16 feature path -> compare relative to the output scale
    err = float(jnp.max(jnp.abs(out - ref)))
    scale = float(jnp.max(jnp.abs(ref))) + 1e-6
    assert err / scale < 3e-2, (err, scale)

    print("KERNEL_OK")
</pallas_src>

<mosaic_0001>
module attributes {stable_mosaic.version = 11 : i64} {
  func.func @_msg_kernel(%arg0: i32, %arg1: memref<512x1xi32, #tpu.memory_space<vmem>>, %arg2: memref<512x2xf32, #tpu.memory_space<vmem>>, %arg3: memref<2x2xf32, #tpu.memory_space<vmem>>, %arg4: memref<1x2xf32, #tpu.memory_space<vmem>>, %arg5: memref<2x3xf32, #tpu.memory_space<vmem>>, %arg6: memref<2x3xf32, #tpu.memory_space<vmem>>, %arg7: memref<512x128xbf16, #tpu.memory_space<vmem>>, %arg8: memref<128x384xbf16, #tpu.memory_space<vmem>>, %arg9: memref<512x128xbf16, #tpu.memory_space<vmem>>, %arg10: memref<512x384xbf16, #tpu.memory_space<vmem>>) attributes {dimension_semantics = [#tpu.dimension_semantics<arbitrary>], iteration_bounds = array<i64: 3>, scalar_prefetch = 0 : i64, scratch_operands = 1 : i64, tpu.core_type = #tpu.core_type<tc>, window_params = [{transform_indices = @transform_0, window_bounds = array<i64: 512, 1>}, {transform_indices = @transform_1, window_bounds = array<i64: 512, 2>}, {pipeline_mode = #tpu.pipeline_mode<synchronous>, transform_indices = @transform_2, window_bounds = array<i64: 2, 2>}, {pipeline_mode = #tpu.pipeline_mode<synchronous>, transform_indices = @transform_3, window_bounds = array<i64: 1, 2>}, {pipeline_mode = #tpu.pipeline_mode<synchronous>, transform_indices = @transform_4, window_bounds = array<i64: 2, 3>}, {pipeline_mode = #tpu.pipeline_mode<synchronous>, transform_indices = @transform_5, window_bounds = array<i64: 2, 3>}, {pipeline_mode = #tpu.pipeline_mode<synchronous>, transform_indices = @transform_6, window_bounds = array<i64: 512, 128>}, {pipeline_mode = #tpu.pipeline_mode<synchronous>, transform_indices = @transform_7, window_bounds = array<i64: 128, 384>}, {transform_indices = @transform_8, window_bounds = array<i64: 512, 128>}]} {
    %c0_i32 = arith.constant 0 : i32
    %0 = arith.cmpi eq, %arg0, %c0_i32 : i32
    %1 = arith.extui %0 : i1 to i32
    %c0_i32_0 = arith.constant 0 : i32
    %2 = arith.cmpi ne, %1, %c0_i32_0 : i32
    scf.if %2 {
      %c0_30 = arith.constant 0 : index
      %c0_31 = arith.constant 0 : index
      %70 = vector.load %arg7[%c0_30, %c0_31] : memref<512x128xbf16, #tpu.memory_space<vmem>>, vector<512x128xbf16>
      %c0_32 = arith.constant 0 : index
      %c0_33 = arith.constant 0 : index
      %71 = vector.load %arg8[%c0_32, %c0_33] : memref<128x384xbf16, #tpu.memory_space<vmem>>, vector<128x384xbf16>
      %cst_34 = arith.constant dense<0.000000e+00> : vector<512x384xf32>
      %72 = tpu.matmul %70, %71, %cst_34 {dimension_numbers = #tpu.dot_dimension_numbers<[1], [0], [0], [1], [0, 0, 1, 1], [], []>} : vector<512x128xbf16>, vector<128x384xbf16>, vector<512x384xf32> -> vector<512x384xf32>
      %73 = arith.truncf %72 : vector<512x384xf32> to vector<512x384xbf16>
      %c0_35 = arith.constant 0 : index
      %c0_36 = arith.constant 0 : index
      %74 = vector.load %arg10[%c0_35, %c0_36] : memref<512x384xbf16, #tpu.memory_space<vmem>>, vector<512x384xbf16>
      tpu.vector_store %arg10[%c0_35, %c0_36], %73 {strides = array<i32>} : memref<512x384xbf16, #tpu.memory_space<vmem>>, vector<512x384xbf16>,
    } else {
    }
    %c0 = arith.constant 0 : index
    %c0_1 = arith.constant 0 : index
    %3 = vector.load %arg2[%c0, %c0_1] : memref<512x2xf32, #tpu.memory_space<vmem>>, vector<512x1xf32>
    %c0_2 = arith.constant 0 : index
    %c1 = arith.constant 1 : index
    %4 = vector.load %arg2[%c0_2, %c1] : memref<512x2xf32, #tpu.memory_space<vmem>>, vector<512x1xf32>
    %c0_3 = arith.constant 0 : index
    %c0_4 = arith.constant 0 : index
    %5 = vector.load %arg3[%c0_3, %c0_4] : memref<2x2xf32, #tpu.memory_space<vmem>>, vector<1x2xf32>
    %6 = vector.broadcast %3 : vector<512x1xf32> to vector<512x2xf32>
    %7 = vector.broadcast %5 : vector<1x2xf32> to vector<512x2xf32>
    %8 = arith.mulf %6, %7 : vector<512x2xf32>
    %c1_5 = arith.constant 1 : index
    %c0_6 = arith.constant 0 : index
    %9 = vector.load %arg3[%c1_5, %c0_6] : memref<2x2xf32, #tpu.memory_space<vmem>>, vector<1x2xf32>
    %10 = vector.broadcast %4 : vector<512x1xf32> to vector<512x2xf32>
    %11 = vector.broadcast %9 : vector<1x2xf32> to vector<512x2xf32>
    %12 = arith.mulf %10, %11 : vector<512x2xf32>
    %13 = arith.addf %8, %12 : vector<512x2xf32>
    %c0_7 = arith.constant 0 : index
    %c0_8 = arith.constant 0 : index
    %14 = vector.load %arg4[%c0_7, %c0_8] : memref<1x2xf32, #tpu.memory_space<vmem>>, vector<1x2xf32>
    %15 = vector.broadcast %14 : vector<1x2xf32> to vector<512x2xf32>
    %16 = arith.addf %13, %15 : vector<512x2xf32>
    %17 = math.tanh %16 : vector<512x2xf32>
    %cst = arith.constant 0.000000e+00 : f32
    %18 = vector.broadcast %cst : f32 to vector<512x3xf32>
    %19 = vector.extract_strided_slice %17 {offsets = [0, 0], sizes = [512, 1], strides = [1, 1]} : vector<512x2xf32> to vector<512x1xf32>
    %c0_9 = arith.constant 0 : index
    %c0_10 = arith.constant 0 : index
    %20 = vector.load %arg5[%c0_9, %c0_10] : memref<2x3xf32, #tpu.memory_space<vmem>>, vector<1x3xf32>
    %21 = vector.broadcast %19 : vector<512x1xf32> to vector<512x3xf32>
    %22 = vector.broadcast %20 : vector<1x3xf32> to vector<512x3xf32>
    %23 = arith.subf %21, %22 : vector<512x3xf32>
    %c0_11 = arith.constant 0 : index
    %c0_12 = arith.constant 0 : index
    %24 = vector.load %arg6[%c0_11, %c0_12] : memref<2x3xf32, #tpu.memory_space<vmem>>, vector<1x3xf32>
    %25 = vector.broadcast %24 : vector<1x3xf32> to vector<512x3xf32>
    %26 = arith.mulf %23, %25 : vector<512x3xf32>
    %27 = arith.mulf %26, %26 : vector<512x3xf32>
    %28 = arith.addf %18, %27 : vector<512x3xf32>
    %29 = vector.extract_strided_slice %17 {offsets = [0, 1], sizes = [512, 1], strides = [1, 1]} : vector<512x2xf32> to vector<512x1xf32>
    %c1_13 = arith.constant 1 : index
    %c0_14 = arith.constant 0 : index
    %30 = vector.load %arg5[%c1_13, %c0_14] : memref<2x3xf32, #tpu.memory_space<vmem>>, vector<1x3xf32>
    %31 = vector.broadcast %29 : vector<512x1xf32> to vector<512x3xf32>
    %32 = vector.broadcast %30 : vector<1x3xf32> to vector<512x3xf32>
    %33 = arith.subf %31, %32 : vector<512x3xf32>
    %c1_15 = arith.constant 1 : index
    %c0_16 = arith.constant 0 : index
    %34 = vector.load %arg6[%c1_15, %c0_16] : memref<2x3xf32, #tpu.memory_space<vmem>>, vector<1x3xf32>
    %35 = vector.broadcast %34 : vector<1x3xf32> to vector<512x3xf32>
    %36 = arith.mulf %33, %35 : vector<512x3xf32>
    %37 = arith.mulf %36, %36 : vector<512x3xf32>
    %38 = arith.addf %28, %37 : vector<512x3xf32>
    %cst_17 = arith.constant -5.000000e-01 : f32
    %39 = vector.broadcast %cst_17 : f32 to vector<512x3xf32>
    %40 = arith.mulf %39, %38 : vector<512x3xf32>
    %41 = math.exp %40 : vector<512x3xf32>
    %c0_18 = arith.constant 0 : index
    %c0_19 = arith.constant 0 : index
    %42 = vector.load %arg1[%c0_18, %c0_19] : memref<512x1xi32, #tpu.memory_space<vmem>>, vector<512x1xi32>
    %43 = tpu.iota {dimensions = array<i32: 1>} : vector<512x512xi32>
    %44 = vector.broadcast %42 : vector<512x1xi32> to vector<512x512xi32>
    %45 = arith.cmpi eq, %44, %43 : vector<512x512xi32>
    %46 = arith.extui %45 : vector<512x512xi1> to vector<512x512xi32>
    %47 = arith.sitofp %46 : vector<512x512xi32> to vector<512x512xf32>
    %48 = arith.truncf %47 : vector<512x512xf32> to vector<512x512xbf16>
    %cst_20 = arith.constant 0.000000e+00 : f32
    %49 = vector.broadcast %cst_20 : f32 to vector<512x128xf32>
    %c0_21 = arith.constant 0 : index
    %c0_22 = arith.constant 0 : index
    %50 = vector.load %arg10[%c0_21, %c0_22] : memref<512x384xbf16, #tpu.memory_space<vmem>>, vector<512x128xbf16>
    %cst_23 = arith.constant dense<0.000000e+00> : vector<512x128xf32>
    %51 = tpu.matmul %48, %50, %cst_23 {dimension_numbers = #tpu.dot_dimension_numbers<[1], [0], [0], [1], [0, 0, 1, 1], [], []>} : vector<512x512xbf16>, vector<512x128xbf16>, vector<512x128xf32> -> vector<512x128xf32>
    %52 = vector.extract_strided_slice %41 {offsets = [0, 0], sizes = [512, 1], strides = [1, 1]} : vector<512x3xf32> to vector<512x1xf32>
    %53 = vector.broadcast %52 : vector<512x1xf32> to vector<512x128xf32>
    %54 = arith.mulf %53, %51 : vector<512x128xf32>
    %55 = arith.addf %49, %54 : vector<512x128xf32>
    %c0_24 = arith.constant 0 : index
    %c128 = arith.constant 128 : index
    %56 = vector.load %arg10[%c0_24, %c128] : memref<512x384xbf16, #tpu.memory_space<vmem>>, vector<512x128xbf16>
    %cst_25 = arith.constant dense<0.000000e+00> : vector<512x128xf32>
    %57 = tpu.matmul %48, %56, %cst_25 {dimension_numbers = #tpu.dot_dimension_numbers<[1], [0], [0], [1], [0, 0, 1, 1], [], []>} : vector<512x512xbf16>, vector<512x128xbf16>, vector<512x128xf32> -> vector<512x128xf32>
    %58 = vector.extract_strided_slice %41 {offsets = [0, 1], sizes = [512, 1], strides = [1, 1]} : vector<512x3xf32> to vector<512x1xf32>
    %59 = vector.broadcast %58 : vector<512x1xf32> to vector<512x128xf32>
    %60 = arith.mulf %59, %57 : vector<512x128xf32>
    %61 = arith.addf %55, %60 : vector<512x128xf32>
    %c0_26 = arith.constant 0 : index
    %c256 = arith.constant 256 : index
    %62 = vector.load %arg10[%c0_26, %c256] : memref<512x384xbf16, #tpu.memory_space<vmem>>, vector<512x128xbf16>
    %cst_27 = arith.constant dense<0.000000e+00> : vector<512x128xf32>
    %63 = tpu.matmul %48, %62, %cst_27 {dimension_numbers = #tpu.dot_dimension_numbers<[1], [0], [0], [1], [0, 0, 1, 1], [], []>} : vector<512x512xbf16>, vector<512x128xbf16>, vector<512x128xf32> -> vector<512x128xf32>
    %64 = vector.extract_strided_slice %41 {offsets = [0, 2], sizes = [512, 1], strides = [1, 1]} : vector<512x3xf32> to vector<512x1xf32>
    %65 = vector.broadcast %64 : vector<512x1xf32> to vector<512x128xf32>
    %66 = arith.mulf %65, %63 : vector<512x128xf32>
    %67 = arith.addf %61, %66 : vector<512x128xf32>
    %68 = arith.truncf %67 : vector<512x128xf32> to vector<512x128xbf16>
    %c0_28 = arith.constant 0 : index
    %c0_29 = arith.constant 0 : index
    %69 = vector.load %arg9[%c0_28, %c0_29] : memref<512x128xbf16, #tpu.memory_space<vmem>>, vector<512x128xbf16>
    tpu.vector_store %arg9[%c0_28, %c0_29], %68 {strides = array<i32>} : memref<512x128xbf16, #tpu.memory_space<vmem>>, vector<512x128xbf16>,
    return
  }
  func.func @transform_0(%arg0: i32) -> (i32, i32) {
    %c0_i32 = arith.constant 0 : i32
    %c0_i32_0 = arith.constant 0 : i32
    return %arg0, %c0_i32 : i32, i32
  }
  func.func @transform_1(%arg0: i32) -> (i32, i32) {
    %c0_i32 = arith.constant 0 : i32
    %c0_i32_0 = arith.constant 0 : i32
    return %arg0, %c0_i32 : i32, i32
  }
  func.func @transform_2(%arg0: i32) -> (i32, i32) {
    %c0_i32 = arith.constant 0 : i32
    %c0_i32_0 = arith.constant 0 : i32
    %c0_i32_1 = arith.constant 0 : i32
    return %c0_i32, %c0_i32_0 : i32, i32
  }
  func.func @transform_3(%arg0: i32) -> (i32, i32) {
    %c0_i32 = arith.constant 0 : i32
    %c0_i32_0 = arith.constant 0 : i32
    %c0_i32_1 = arith.constant 0 : i32
    return %c0_i32, %c0_i32_0 : i32, i32
  }
  func.func @transform_4(%arg0: i32) -> (i32, i32) {
    %c0_i32 = arith.constant 0 : i32
    %c0_i32_0 = arith.constant 0 : i32
    %c0_i32_1 = arith.constant 0 : i32
    return %c0_i32, %c0_i32_0 : i32, i32
  }
  func.func @transform_5(%arg0: i32) -> (i32, i32) {
    %c0_i32 = arith.constant 0 : i32
    %c0_i32_0 = arith.constant 0 : i32
    %c0_i32_1 = arith.constant 0 : i32
    return %c0_i32, %c0_i32_0 : i32, i32
  }
  func.func @transform_6(%arg0: i32) -> (i32, i32) {
    %c0_i32 = arith.constant 0 : i32
    %c0_i32_0 = arith.constant 0 : i32
    %c0_i32_1 = arith.constant 0 : i32
    return %c0_i32, %c0_i32_0 : i32, i32
  }
  func.func @transform_7(%arg0: i32) -> (i32, i32) {
    %c0_i32 = arith.constant 0 : i32
    %c0_i32_0 = arith.constant 0 : i32
    %c0_i32_1 = arith.constant 0 : i32
    return %c0_i32, %c0_i32_0 : i32, i32
  }
  func.func @transform_8(%arg0: i32) -> (i32, i32) {
    %c0_i32 = arith.constant 0 : i32
    %c0_i32_0 = arith.constant 0 : i32
    return %arg0, %c0_i32 : i32, i32
  }
}

</mosaic_0001>

<bundles_post_ra>
// kernel: tpu_custom_call.1
= control target key start
LH: loop header
LB: loop body
LE: loop exit
PB: predicated region body
PF: predicated region fallthrough
CT: control target
= control target key end

     0   :  { %13 = vsyncpa [#allocation4], 0  ;;  %s17895_s0 = inlined_call_operand.vmem [shape: s32[1536,1], index: 0, kind: input, shape index: {}]   ;;  %s17896_s1 = inlined_call_operand.vmem [shape: f32[1536,2], index: 1, kind: input, shape index: {}]   ;;  %s17897_s2 = inlined_call_operand.vmem [shape: f32[2,2], index: 2, kind: input, shape index: {}]   ;;  %s17898_s3 = inlined_call_operand.vmem [shape: f32[1,2], index: 3, kind: input, shape index: {}]   ;;  %s17899_s4 = inlined_call_operand.vmem [shape: f32[2,3], index: 4, kind: input, shape index: {}]   ;;  %s17900_s5 = inlined_call_operand.vmem [shape: f32[2,3], index: 5, kind: input, shape index: {}]   ;;  %s17901_s6 = inlined_call_operand.vmem [shape: bf16[512,128], index: 6, kind: input, shape index: {}]   ;;  %s17902_s7 = inlined_call_operand.vmem [shape: bf16[128,384], index: 7, kind: input, shape index: {}]   ;;  %s17903_s8 = inlined_call_operand.hbm [shape: bf16[1536,128], index: 8, kind: output, shape index: {}]  }
   0x1   :  { %15 = vsyncpa [#allocation4 + $0x1], 0  ;;  %s12228_s27 = smov 0   ;;  %s12230_s28 = smov 0  }
   0x2   :  { %s12232_s29 = smov 0   ;;  %s12234_s30 = smov 0  }
   0x3 LB: > { %s12249_s9 = sadd.s32 4294967295, %s12173_s30   ;;  %s9720_s10 = sadd.s32 4294967294, %s12173_s30   ;;  %s12173_s30 = sphi %s12234_s30, %s20142_s30   ;;  %s12169_s29 = sphi %s12232_s29, %s20141_s29   ;;  %s12165_s28 = sphi %s12230_s28, %s20140_s28   ;;  %s12161_s27 = sphi %s12228_s27, %s20139_s27  }
   0x4   : > { %s12253_s11 = sadd.s32 1, %s12173_s30   ;;  %s206_s12 = sadd.s32 1, %s12169_s29 }
   0x5   : > { %s203_s13 = ssub.s32 %s12173_s30, %s12253_s11  ;;  %p216_p0 = scmp.ne.s32.totalorder %s12169_s29, %s12165_s28 }
   0x6   : > { %p204_p1 = scmp.eq.s32.totalorder %s203_s13, 0  ;;  %p217_p2 = scmp.eq.s32.totalorder %s12249_s9, 2 }
   0x7   : > { %p222_p3 = scmp.ne.s32.totalorder %s12165_s28, %s12161_s27  ;;  %p223_p4 = scmp.eq.s32.totalorder %s9720_s10, 2 }
   0x8   : > { %s12264_s14 = scalar_select %p204_p1, %s12169_s29, %s206_s12  }
   0x9   : > { %p12266_p5 = por %p217_p2, %p216_p0  ;;  %p12270_p6 = por %p223_p4, %p222_p3 }
   0xa   : > { %p9723_p7 = scmp.ge.s32.totalorder %s12173_s30, 1  ;;  %p277_p8 = scmp.lt.s32.totalorder %s12173_s30, 4 }
   0xc   : > { %p278_p9 = pnand %p9723_p7, %p277_p8 }
   0xe   : > { %281 = sbr.rel (%p278_p9) target bundleno = 2123 (0x84b), region = 52 }
  0x13   : > { %s17904_s17 = sand.u32 1, %s12165_s28   ;;  %s9725_s18 = sshll.u32 %s12249_s9, 6 }
  0x14   : > { %s9724_s19 = sshll.u32 %s17904_s17, 8  ;;  %p317_p10 = scmp.lt.s32.totalorder %s9725_s18, 191 }
  0x15   : > { %s12290_s10 = scalar_lea.vmem [#allocation3], %s9724_s19  ;;  %p9729_p11 = scmp.ne.s32.totalorder %s12249_s9, 0 }
  0x16   : > { %s20144_s18 = smov (!%p317_p10, %s9725_s18), 191 }
  0x17   : > { %s9726_s20 = sshll.u32 %s20144_s18, 3  ;;  %333 = sbr.rel (%p9729_p11) target bundleno = 448 (0x1c0), region = 56 }
  0x18   : > { %s12283_s23 = scalar_lea.vmem %s17895_s0, %s9726_s20  ;;  %s12288_s26 = scalar_lea.vmem %s17896_s1, %s9726_s20 }
  0x1c   : > { %v11676_v0 = vld [vmem:[%s17902_s7 + $0xac] ss:$12 sps:$4 sm:$0xff]   ;;  %v11678_v1 = vld [vmem:[%s17902_s7 + $0xa8] ss:$12 sps:$4 sm:$0xff]   ;;  %v12175_v2 = vmov 0   ;;  %v12349_v18 = vld [vmem:[%s17901_s6] sm:$0xff]  }
  0x1d   : > { %782 = vmatprep.mubr.bf16.mxu0 %v12175_v2  ;;  %1022 = vmatprep.mubr.bf16.mxu1 %v12175_v2  ;;  %v11679_v3 = vld [vmem:[%s17902_s7 + $0x94] ss:$12 sps:$4 sm:$0xff]   ;;  %v11681_v4 = vld [vmem:[%s17902_s7 + $0x90] ss:$12 sps:$4 sm:$0xff]   ;;  %v11684_v6 = vld [vmem:[%s17902_s7 + $0x78] ss:$12 sps:$4 sm:$0xff]  }
  0x1e   : > { %750 = vmatprep.subr.bf16.mxu0 %v11676_v0  ;;  %11614 = vmatprep.subr.bf16.mxu1 %v11676_v0  ;;  %v11682_v5 = vld [vmem:[%s17902_s7 + $0x7c] ss:$12 sps:$4 sm:$0xff]   ;;  %v11685_v7 = vld [vmem:[%s17902_s7 + $0x64] ss:$12 sps:$4 sm:$0xff]   ;;  %v11687_v8 = vld [vmem:[%s17902_s7 + $0x60] ss:$12 sps:$4 sm:$0xff]  }
  0x1f   : > { %751 = vmatpush1.bf16.msra.mxu0 %v11678_v1  ;;  %11622 = vmatpush1.bf16.msra.mxu1 %v11678_v1  ;;  %v11688_v9 = vld [vmem:[%s17902_s7 + $0x4c] ss:$12 sps:$4 sm:$0xff]   ;;  %v11690_v10 = vld [vmem:[%s17902_s7 + $0x48] ss:$12 sps:$4 sm:$0xff]   ;;  %v11693_v12 = vld [vmem:[%s17902_s7 + $0x30] ss:$12 sps:$4 sm:$0xff]  }
  0x20   : > { %752 = vmatprep.subr.bf16.mxu0 %v11679_v3  ;;  %11615 = vmatprep.subr.bf16.mxu1 %v11679_v3  ;;  %v11691_v11 = vld [vmem:[%s17902_s7 + $0x34] ss:$12 sps:$4 sm:$0xff]   ;;  %v11694_v13 = vld [vmem:[%s17902_s7 + $0x1c] ss:$12 sps:$4 sm:$0xff]   ;;  %v11696_v14 = vld [vmem:[%s17902_s7 + $0x18] ss:$12 sps:$4 sm:$0xff]  }
  0x21   : > { %v11697_v15 = vld [vmem:[%s17902_s7 + $0x4] ss:$12 sps:$4 sm:$0xff]   ;;  %v11699_v16 = vld [vmem:[%s17902_s7] ss:$12 sps:$4 sm:$0xff]   ;;  %v11711_v24 = vld [vmem:[%s17902_s7 + $0x68] ss:$12 sps:$4 sm:$0xff]  }
  0x22   : > { %v11702_v17 = vld [vmem:[%s17902_s7 + $0xb0] ss:$12 sps:$4 sm:$0xff]   ;;  %v12354_v19 = vld [vmem:[%s17901_s6 + $0xc0] sm:$0xff]   ;;  %v11703_v22 = vld [vmem:[%s17901_s6 + $0x8] sm:$0xff]  }
  0x23   : > { %753 = vmatpush1.bf16.msra.mxu0 %v11681_v4  ;;  %11623 = vmatpush1.bf16.msra.mxu1 %v11681_v4  ;;  %v11705_v20 = vld [vmem:[%s17902_s7 + $0x98] ss:$12 sps:$4 sm:$0xff]   ;;  %v11708_v21 = vld [vmem:[%s17902_s7 + $0x80] ss:$12 sps:$4 sm:$0xff]   ;;  %v11706_v25 = vld [vmem:[%s17901_s6 + $0x10] sm:$0xff]  }
  0x24   : > { %754 = vmatprep.subr.bf16.mxu0 %v11682_v5  ;;  %11616 = vmatprep.subr.bf16.mxu1 %v11682_v5  ;;  %v12372_v23 = vld [vmem:[%s17901_s6 + $0xc8] sm:$0xff]   ;;  %v11714_v26 = vld [vmem:[%s17902_s7 + $0x50] ss:$12 sps:$4 sm:$0xff]   ;;  %v11717_v28 = vld [vmem:[%s17902_s7 + $0x38] ss:$12 sps:$4 sm:$0xff]  }
  0x25   : > { %v12389_v27 = vld [vmem:[%s17901_s6 + $0xd0] sm:$0xff]   ;;  %v11720_v29 = vld [vmem:[%s17902_s7 + $0x20] ss:$12 sps:$4 sm:$0xff]   ;;  %v11709_v30 = vld [vmem:[%s17901_s6 + $0x18] sm:$0xff]  }
  0x26   : > { %v12406_v31 = vld [vmem:[%s17901_s6 + $0xd8] sm:$0xff]   ;;  %v11723_v32 = vld [vmem:[%s17902_s7 + $0x8] ss:$12 sps:$4 sm:$0xff]   ;;  %v11712_v33 = vld [vmem:[%s17901_s6 + $0x20] sm:$0xff]  }
  0x27   : > { %755 = vmatpush1.bf16.msra.mxu0 %v11684_v6  ;;  %11624 = vmatpush1.bf16.msra.mxu1 %v11684_v6  ;;  %v12420_v34 = vld [vmem:[%s17901_s6 + $0xe0] sm:$0xff]   ;;  %v11715_v35 = vld [vmem:[%s17901_s6 + $0x28] sm:$0xff]   ;;  %v11718_v37 = vld [vmem:[%s17901_s6 + $0x30] sm:$0xff]  }
  0x28   : > { %756 = vmatprep.subr.bf16.mxu0 %v11685_v7  ;;  %11617 = vmatprep.subr.bf16.mxu1 %v11685_v7  ;;  %v12431_v36 = vld [vmem:[%s17901_s6 + $0xe8] sm:$0xff]   ;;  %v12442_v38 = vld [vmem:[%s17901_s6 + $0xf0] sm:$0xff]   ;;  %v11721_v39 = vld [vmem:[%s17901_s6 + $0x38] sm:$0xff]  }
  0x29   : > { %v12453_v40 = vld [vmem:[%s17901_s6 + $0xf8] sm:$0xff]   ;;  %v11724_v41 = vld [vmem:[%s17901_s6 + $0x40] sm:$0xff]   ;;  %v11725_v42 = vld [vmem:[%s17901_s6 + $0x48] sm:$0xff]  }
  0x2a   : > { %v11726_v43 = vld [vmem:[%s17901_s6 + $0x50] sm:$0xff]   ;;  %v11727_v44 = vld [vmem:[%s17901_s6 + $0x58] sm:$0xff]   ;;  %v11728_v45 = vld [vmem:[%s17901_s6 + $0x60] sm:$0xff]  }
  0x2b   : > { %757 = vmatpush1.bf16.msra.mxu0 %v11687_v8  ;;  %11625 = vmatpush1.bf16.msra.mxu1 %v11687_v8  ;;  %v11729_v46 = vld [vmem:[%s17901_s6 + $0x68] sm:$0xff]   ;;  %v11730_v47 = vld [vmem:[%s17901_s6 + $0x70] sm:$0xff]   ;;  %v11731_v48 = vld [vmem:[%s17901_s6 + $0x78] sm:$0xff]  }
  0x2c   : > { %758 = vmatprep.subr.bf16.mxu0 %v11688_v9  ;;  %11618 = vmatprep.subr.bf16.mxu1 %v11688_v9  ;;  %v11732_v49 = vld [vmem:[%s17901_s6 + $0x80] sm:$0xff]   ;;  %v11733_v50 = vld [vmem:[%s17901_s6 + $0x88] sm:$0xff]   ;;  %v11734_v51 = vld [vmem:[%s17901_s6 + $0x90] sm:$0xff]  }
  0x2d   : > { %v11735_v52 = vld [vmem:[%s17901_s6 + $0x98] sm:$0xff]   ;;  %v11736_v53 = vld [vmem:[%s17901_s6 + $0xa0] sm:$0xff]   ;;  %v11737_v54 = vld [vmem:[%s17901_s6 + $0xa8] sm:$0xff]  }
  0x2e   : > { %v11738_v55 = vld [vmem:[%s17901_s6 + $0xb0] sm:$0xff]   ;;  %v11739_v56 = vld [vmem:[%s17901_s6 + $0xb8] sm:$0xff]  }
  0x2f   : > { %759 = vmatpush1.bf16.msra.mxu0 %v11690_v10  ;;  %11626 = vmatpush1.bf16.msra.mxu1 %v11690_v10 }
  0x30   : > { %760 = vmatprep.subr.bf16.mxu0 %v11691_v11  ;;  %11619 = vmatprep.subr.bf16.mxu1 %v11691_v11 }
  0x33   : > { %761 = vmatpush1.bf16.msra.mxu0 %v11693_v12  ;;  %11627 = vmatpush1.bf16.msra.mxu1 %v11693_v12 }
  0x34   : > { %762 = vmatprep.subr.bf16.mxu0 %v11694_v13  ;;  %11620 = vmatprep.subr.bf16.mxu1 %v11694_v13 }
  0x37   : > { %763 = vmatpush1.bf16.msra.mxu0 %v11696_v14  ;;  %11628 = vmatpush1.bf16.msra.mxu1 %v11696_v14 }
  0x38   : > { %764 = vmatprep.subr.bf16.mxu0 %v11697_v15  ;;  %11621 = vmatprep.subr.bf16.mxu1 %v11697_v15 }
  0x3b   : > { %765 = vmatpush1.bf16.msra.mxu0 %v11699_v16  ;;  %11629 = vmatpush1.bf16.msra.mxu1 %v11699_v16 }
  0x3c   : > { %11534 = vmatprep.subr.bf16.mxu1 %v11702_v17 }
  0x3e   : > { %783 = vmatmul.mubr.bf16.vlgmr.msra.gmra.mxu0 %v12349_v18  ;;  %1023 = vmatmul.mubr.bf16.vlgmr.msra.gmra.mxu1 %v12354_v19 }
  0x3f   : > { %11535 = vmatpush3.bf16.msra.mxu1 %v11702_v17  ;;  %792 = vmatprep.mubr.bf16.mxu0 %v12175_v2 }
  0x40   : > { %1032 = vmatprep.mubr.bf16.mxu1 %v12175_v2  ;;  %11536 = vmatprep.subr.bf16.mxu1 %v11705_v20 }
  0x43   : > { %11537 = vmatpush3.bf16.msra.mxu1 %v11705_v20 }
  0x44   : > { %11538 = vmatprep.subr.bf16.mxu1 %v11708_v21 }
  0x46   : > { %793 = vmatmul.mubr.bf16.gmra.mxu0 %v11703_v22  ;;  %1033 = vmatmul.mubr.bf16.gmra.mxu1 %v12372_v23 }
  0x47   : > { %802 = vmatprep.mubr.bf16.mxu0 %v12175_v2  ;;  %1042 = vmatprep.mubr.bf16.mxu1 %v12175_v2 }
  0x48   : > { %11539 = vmatpush3.bf16.msra.mxu1 %v11708_v21 }
  0x49   : > { %11540 = vmatprep.subr.bf16.mxu1 %v11711_v24 }
  0x4c   : > { %11541 = vmatpush3.bf16.msra.mxu1 %v11711_v24 }
  0x4d   : > { %11542 = vmatprep.subr.bf16.mxu1 %v11714_v26 }
  0x4e   : > { %803 = vmatmul.mubr.bf16.gmra.mxu0 %v11706_v25  ;;  %1043 = vmatmul.mubr.bf16.gmra.mxu1 %v12389_v27 }
  0x4f   : > { %812 = vmatprep.mubr.bf16.mxu0 %v12175_v2  ;;  %1052 = vmatprep.mubr.bf16.mxu1 %v12175_v2 }
  0x50   : > { %11543 = vmatpush3.bf16.msra.mxu1 %v11714_v26 }
  0x51   : > { %11544 = vmatprep.subr.bf16.mxu1 %v11717_v28 }
  0x54   : > { %11545 = vmatpush3.bf16.msra.mxu1 %v11717_v28 }
  0x55   : > { %11546 = vmatprep.subr.bf16.mxu1 %v11720_v29 }
  0x56   : > { %813 = vmatmul.mubr.bf16.gmra.mxu0 %v11709_v30  ;;  %1053 = vmatmul.mubr.bf16.gmra.mxu1 %v12406_v31 }
  0x57   : > { %822 = vmatprep.mubr.bf16.mxu0 %v12175_v2  ;;  %1062 = vmatprep.mubr.bf16.mxu1 %v12175_v2 }
  0x58   : > { %11547 = vmatpush3.bf16.msra.mxu1 %v11720_v29 }
  0x59   : > { %11548 = vmatprep.subr.bf16.mxu1 %v11723_v32 }
  0x5c   : > { %11549 = vmatpush3.bf16.msra.mxu1 %v11723_v32 }
  0x5e   : > { %823 = vmatmul.mubr.bf16.gmra.mxu0 %v11712_v33  ;;  %1063 = vmatmul.mubr.bf16.gmra.mxu1 %v12420_v34 }
  0x5f   : > { %832 = vmatprep.mubr.bf16.mxu0 %v12175_v2  ;;  %1072 = vmatprep.mubr.bf16.mxu1 %v12175_v2 }
  0x66   : > { %833 = vmatmul.mubr.bf16.gmra.mxu0 %v11715_v35  ;;  %1073 = vmatmul.mubr.bf16.gmra.mxu1 %v12431_v36 }
  0x67   : > { %842 = vmatprep.mubr.bf16.mxu0 %v12175_v2  ;;  %1082 = vmatprep.mubr.bf16.mxu1 %v12175_v2 }
  0x6e   : > { %843 = vmatmul.mubr.bf16.gmra.mxu0 %v11718_v37  ;;  %1083 = vmatmul.mubr.bf16.gmra.mxu1 %v12442_v38 }
  0x6f   : > { %852 = vmatprep.mubr.bf16.mxu0 %v12175_v2  ;;  %1092 = vmatprep.mubr.bf16.mxu1 %v12175_v2 }
  0x76   : > { %853 = vmatmul.mubr.bf16.gmra.mxu0 %v11721_v39  ;;  %1093 = vmatmul.mubr.bf16.gmra.mxu1 %v12453_v40 }
  0x77   : > { %862 = vmatprep.mubr.bf16.mxu0 %v12175_v2  ;;  %11550 = vmatprep.mubr.bf16.mxu1 %v12349_v18 }
  0x7e   : > { %863 = vmatmul.mubr.bf16.gmra.mxu0 %v11724_v41  ;;  %11551 = vmatmul.mubr.bf16.vlgmr.msra.gmra.mxu1 %v11703_v22 }
  0x7f   : > { %872 = vmatprep.mubr.bf16.mxu0 %v12175_v2  ;;  %11554 = vmatprep.mubr.bf16.mxu1 %v11706_v25 }
  0x86   : > { %873 = vmatmul.mubr.bf16.gmra.mxu0 %v11725_v42  ;;  %11555 = vmatmul.mubr.bf16.gmra.mxu1 %v11709_v30 }
  0x87   : > { %882 = vmatprep.mubr.bf16.mxu0 %v12175_v2  ;;  %11558 = vmatprep.mubr.bf16.mxu1 %v11712_v33 }
  0x8e   : > { %883 = vmatmul.mubr.bf16.gmra.mxu0 %v11726_v43  ;;  %11559 = vmatmul.mubr.bf16.gmra.mxu1 %v11715_v35 }
  0x8f   : > { %892 = vmatprep.mubr.bf16.mxu0 %v12175_v2  ;;  %11562 = vmatprep.mubr.bf16.mxu1 %v11718_v37 }
  0x96   : > { %893 = vmatmul.mubr.bf16.gmra.mxu0 %v11727_v44  ;;  %11563 = vmatmul.mubr.bf16.gmra.mxu1 %v11721_v39 }
  0x97   : > { %902 = vmatprep.mubr.bf16.mxu0 %v12175_v2  ;;  %11566 = vmatprep.mubr.bf16.mxu1 %v11724_v41 }
  0x9e   : > { %903 = vmatmul.mubr.bf16.gmra.mxu0 %v11728_v45  ;;  %11567 = vmatmul.mubr.bf16.gmra.mxu1 %v11725_v42 }
  0x9f   : > { %912 = vmatprep.mubr.bf16.mxu0 %v12175_v2  ;;  %11570 = vmatprep.mubr.bf16.mxu1 %v11726_v43 }
  0xa6   : > { %913 = vmatmul.mubr.bf16.gmra.mxu0 %v11729_v46  ;;  %11571 = vmatmul.mubr.bf16.gmra.mxu1 %v11727_v44 }
  0xa7   : > { %922 = vmatprep.mubr.bf16.mxu0 %v12175_v2  ;;  %11574 = vmatprep.mubr.bf16.mxu1 %v11728_v45 }
  0xae   : > { %923 = vmatmul.mubr.bf16.gmra.mxu0 %v11730_v47  ;;  %11575 = vmatmul.mubr.bf16.gmra.mxu1 %v11729_v46 }
  0xaf   : > { %932 = vmatprep.mubr.bf16.mxu0 %v12175_v2  ;;  %11578 = vmatprep.mubr.bf16.mxu1 %v11730_v47 }
  0xb6   : > { %933 = vmatmul.mubr.bf16.gmra.mxu0 %v11731_v48  ;;  %11579 = vmatmul.mubr.bf16.gmra.mxu1 %v11731_v48 }
  0xb7   : > { %942 = vmatprep.mubr.bf16.mxu0 %v12175_v2  ;;  %11582 = vmatprep.mubr.bf16.mxu1 %v11732_v49 }
  0xbe   : > { %943 = vmatmul.mubr.bf16.gmra.mxu0 %v11732_v49  ;;  %11583 = vmatmul.mubr.bf16.gmra.mxu1 %v11733_v50 }
  0xbf   : > { %952 = vmatprep.mubr.bf16.mxu0 %v12175_v2  ;;  %11586 = vmatprep.mubr.bf16.mxu1 %v11734_v51 }
  0xc6   : > { %953 = vmatmul.mubr.bf16.gmra.mxu0 %v11733_v50  ;;  %11587 = vmatmul.mubr.bf16.gmra.mxu1 %v11735_v52 }
  0xc7   : > { %962 = vmatprep.mubr.bf16.mxu0 %v12175_v2  ;;  %11590 = vmatprep.mubr.bf16.mxu1 %v11736_v53 }
  0xce   : > { %963 = vmatmul.mubr.bf16.gmra.mxu0 %v11734_v51  ;;  %11591 = vmatmul.mubr.bf16.gmra.mxu1 %v11737_v54 }
  0xcf   : > { %972 = vmatprep.mubr.bf16.mxu0 %v12175_v2  ;;  %11594 = vmatprep.mubr.bf16.mxu1 %v11738_v55 }
  0xd6   : > { %973 = vmatmul.mubr.bf16.gmra.mxu0 %v11735_v52  ;;  %11595 = vmatmul.mubr.bf16.gmra.mxu1 %v11739_v56 }
  0xd7   : > { %982 = vmatprep.mubr.bf16.mxu0 %v12175_v2  ;;  %11598 = vmatprep.mubr.bf16.mxu1 %v12354_v19 }
  0xde   : > { %983 = vmatmul.mubr.bf16.gmra.mxu0 %v11736_v53  ;;  %11599 = vmatmul.mubr.bf16.gmra.mxu1 %v12372_v23 }
  0xdf   : > { %992 = vmatprep.mubr.bf16.mxu0 %v12175_v2  ;;  %11602 = vmatprep.mubr.bf16.mxu1 %v12389_v27 }
  0xe6   : > { %993 = vmatmul.mubr.bf16.gmra.mxu0 %v11737_v54  ;;  %11603 = vmatmul.mubr.bf16.gmra.mxu1 %v12406_v31 }
  0xe7   : > { %1002 = vmatprep.mubr.bf16.mxu0 %v12175_v2  ;;  %11606 = vmatprep.mubr.bf16.mxu1 %v12420_v34 }
  0xee   : > { %1003 = vmatmul.mubr.bf16.gmra.mxu0 %v11738_v55  ;;  %11607 = vmatmul.mubr.bf16.gmra.mxu1 %v12431_v36 }
  0xef   : > { %1012 = vmatprep.mubr.bf16.mxu0 %v12175_v2  ;;  %11610 = vmatprep.mubr.bf16.mxu1 %v12442_v38 }
  0xf6   : > { %1013 = vmatmul.mubr.bf16.gmra.mxu0 %v11739_v56  ;;  %11611 = vmatmul.mubr.bf16.gmra.mxu1 %v12453_v40 }
  0xfe   : > { %v784_v57 = vpop.f32.mrf.mxu0  ;;  %v1024_v58 = vpop.f32.mrf.mxu1 }
 0x100   : > { %v786_v59 = vpop.f32.mrf.mxu0  ;;  %v1026_v60 = vpop.f32.mrf.mxu1 }
 0x101   : > { %v11110_v61 = vpack.c.bf16 %v786_v59, %v784_v57  ;;  %v11206_v62 = vpack.c.bf16 %v1026_v60, %v1024_v58 }
 0x102   : > { %v788_v63 = vpop.f32.mrf.mxu0  ;;  %v1028_v0 = vpop.f32.mrf.mxu1 }
 0x103   : > { %2032 = vst [vmem:[#allocation2] sm:$0xff] %v11110_v61  ;;  %2128 = vst [vmem:[#allocation2 + $0x240] sm:$0xff] %v11206_v62 }
 0x104   : > { %v790_v1 = vpop.f32.mrf.mxu0  ;;  %v1030_v3 = vpop.f32.mrf.mxu1 }
 0x105   : > { %v11112_v4 = vpack.c.bf16 %v790_v1, %v788_v63  ;;  %v11208_v5 = vpack.c.bf16 %v1030_v3, %v1028_v0 }
 0x106   : > { %v794_v2 = vpop.f32.mrf.mxu0  ;;  %v1034_v6 = vpop.f32.mrf.mxu1 }
 0x107   : > { %2034 = vst [vmem:[#allocation2 + $0xc] sm:$0xff] %v11112_v4  ;;  %2130 = vst [vmem:[#allocation2 + $0x24c] sm:$0xff] %v11208_v5 }
 0x108   : > { %v796_v7 = vpop.f32.mrf.mxu0  ;;  %v1036_v8 = vpop.f32.mrf.mxu1 }
 0x109   : > { %v11114_v9 = vpack.c.bf16 %v796_v7, %v794_v2  ;;  %v11210_v10 = vpack.c.bf16 %v1036_v8, %v1034_v6 }
 0x10a   : > { %v798_v11 = vpop.f32.mrf.mxu0  ;;  %v1038_v12 = vpop.f32.mrf.mxu1 }
 0x10b   : > { %2036 = vst [vmem:[#allocation2 + $0x18] sm:$0xff] %v11114_v9  ;;  %2132 = vst [vmem:[#allocation2 + $0x258] sm:$0xff] %v11210_v10 }
 0x10c   : > { %v800_v13 = vpop.f32.mrf.mxu0  ;;  %v1040_v14 = vpop.f32.mrf.mxu1 }
 0x10d   : > { %v11116_v15 = vpack.c.bf16 %v800_v13, %v798_v11  ;;  %v11212_v16 = vpack.c.bf16 %v1040_v14, %v1038_v12 }
 0x10e   : > { %v804_v17 = vpop.f32.mrf.mxu0  ;;  %v1044_v18 = vpop.f32.mrf.mxu1 }
 0x10f   : > { %2038 = vst [vmem:[#allocation2 + $0x24] sm:$0xff] %v11116_v15  ;;  %2134 = vst [vmem:[#allocation2 + $0x264] sm:$0xff] %v11212_v16 }
 0x110   : > { %v806_v19 = vpop.f32.mrf.mxu0  ;;  %v1046_v20 = vpop.f32.mrf.mxu1 }
 0x111   : > { %v11118_v21 = vpack.c.bf16 %v806_v19, %v804_v17  ;;  %v11214_v22 = vpack.c.bf16 %v1046_v20, %v1044_v18 }
 0x112   : > { %v808_v23 = vpop.f32.mrf.mxu0  ;;  %v1048_v24 = vpop.f32.mrf.mxu1 }
 0x113   : > { %2040 = vst [vmem:[#allocation2 + $0x30] sm:$0xff] %v11118_v21  ;;  %2136 = vst [vmem:[#allocation2 + $0x270] sm:$0xff] %v11214_v22 }
 0x114   : > { %v810_v25 = vpop.f32.mrf.mxu0  ;;  %v1050_v26 = vpop.f32.mrf.mxu1 }
 0x115   : > { %v11120_v27 = vpack.c.bf16 %v810_v25, %v808_v23  ;;  %v11216_v28 = vpack.c.bf16 %v1050_v26, %v1048_v24 }
 0x116   : > { %v814_v29 = vpop.f32.mrf.mxu0  ;;  %v1054_v30 = vpop.f32.mrf.mxu1 }
 0x117   : > { %2042 = vst [vmem:[#allocation2 + $0x3c] sm:$0xff] %v11120_v27  ;;  %2138 = vst [vmem:[#allocation2 + $0x27c] sm:$0xff] %v11216_v28 }
 0x118   : > { %v816_v31 = vpop.f32.mrf.mxu0  ;;  %v1056_v32 = vpop.f32.mrf.mxu1 }
 0x119   : > { %v11122_v33 = vpack.c.bf16 %v816_v31, %v814_v29  ;;  %v11218_v34 = vpack.c.bf16 %v1056_v32, %v1054_v30 }
 0x11a   : > { %v818_v35 = vpop.f32.mrf.mxu0  ;;  %v1058_v36 = vpop.f32.mrf.mxu1 }
 0x11b   : > { %2044 = vst [vmem:[#allocation2 + $0x48] sm:$0xff] %v11122_v33  ;;  %2140 = vst [vmem:[#allocation2 + $0x288] sm:$0xff] %v11218_v34 }
 0x11c   : > { %v820_v37 = vpop.f32.mrf.mxu0  ;;  %v1060_v38 = vpop.f32.mrf.mxu1 }
 0x11d   : > { %v11124_v39 = vpack.c.bf16 %v820_v37, %v818_v35  ;;  %v11220_v40 = vpack.c.bf16 %v1060_v38, %v1058_v36 }
 0x11e   : > { %v824_v41 = vpop.f32.mrf.mxu0  ;;  %v1064_v42 = vpop.f32.mrf.mxu1 }
 0x11f   : > { %2046 = vst [vmem:[#allocation2 + $0x54] sm:$0xff] %v11124_v39  ;;  %2142 = vst [vmem:[#allocation2 + $0x294] sm:$0xff] %v11220_v40 }
 0x120   : > { %v826_v43 = vpop.f32.mrf.mxu0  ;;  %v1066_v44 = vpop.f32.mrf.mxu1 }
 0x121   : > { %v11126_v45 = vpack.c.bf16 %v826_v43, %v824_v41  ;;  %v11222_v46 = vpack.c.bf16 %v1066_v44, %v1064_v42 }
 0x122   : > { %v828_v47 = vpop.f32.mrf.mxu0  ;;  %v1068_v48 = vpop.f32.mrf.mxu1 }
 0x123   : > { %2048 = vst [vmem:[#allocation2 + $0x60] sm:$0xff] %v11126_v45  ;;  %2144 = vst [vmem:[#allocation2 + $0x2a0] sm:$0xff] %v11222_v46 }
 0x124   : > { %v830_v49 = vpop.f32.mrf.mxu0  ;;  %v1070_v50 = vpop.f32.mrf.mxu1 }
 0x125   : > { %v11128_v51 = vpack.c.bf16 %v830_v49, %v828_v47  ;;  %v11224_v52 = vpack.c.bf16 %v1070_v50, %v1068_v48 }
 0x126   : > { %v834_v53 = vpop.f32.mrf.mxu0  ;;  %v1074_v54 = vpop.f32.mrf.mxu1 }
 0x127   : > { %2050 = vst [vmem:[#allocation2 + $0x6c] sm:$0xff] %v11128_v51  ;;  %2146 = vst [vmem:[#allocation2 + $0x2ac] sm:$0xff] %v11224_v52 }
 0x128   : > { %v836_v55 = vpop.f32.mrf.mxu0  ;;  %v1076_v56 = vpop.f32.mrf.mxu1 }
 0x129   : > { %v11130_v57 = vpack.c.bf16 %v836_v55, %v834_v53  ;;  %v11226_v58 = vpack.c.bf16 %v1076_v56, %v1074_v54 }
 0x12a   : > { %v838_v59 = vpop.f32.mrf.mxu0  ;;  %v1078_v60 = vpop.f32.mrf.mxu1 }
 0x12b   : > { %2052 = vst [vmem:[#allocation2 + $0x78] sm:$0xff] %v11130_v57  ;;  %2148 = vst [vmem:[#allocation2 + $0x2b8] sm:$0xff] %v11226_v58 }
 0x12c   : > { %v840_v61 = vpop.f32.mrf.mxu0  ;;  %v1080_v62 = vpop.f32.mrf.mxu1 }
 0x12d   : > { %v11132_v63 = vpack.c.bf16 %v840_v61, %v838_v59  ;;  %v11228_v0 = vpack.c.bf16 %v1080_v62, %v1078_v60 }
 0x12e   : > { %v844_v1 = vpop.f32.mrf.mxu0  ;;  %v1084_v3 = vpop.f32.mrf.mxu1 }
 0x12f   : > { %2054 = vst [vmem:[#allocation2 + $0x84] sm:$0xff] %v11132_v63  ;;  %2150 = vst [vmem:[#allocation2 + $0x2c4] sm:$0xff] %v11228_v0 }
 0x130   : > { %v846_v4 = vpop.f32.mrf.mxu0  ;;  %v1086_v5 = vpop.f32.mrf.mxu1 }
 0x131   : > { %v11134_v2 = vpack.c.bf16 %v846_v4, %v844_v1  ;;  %v11230_v6 = vpack.c.bf16 %v1086_v5, %v1084_v3 }
 0x132   : > { %v848_v7 = vpop.f32.mrf.mxu0  ;;  %v1088_v8 = vpop.f32.mrf.mxu1 }
 0x133   : > { %2056 = vst [vmem:[#allocation2 + $0x90] sm:$0xff] %v11134_v2  ;;  %2152 = vst [vmem:[#allocation2 + $0x2d0] sm:$0xff] %v11230_v6 }
 0x134   : > { %v850_v9 = vpop.f32.mrf.mxu0  ;;  %v1090_v10 = vpop.f32.mrf.mxu1 }
 0x135   : > { %v11136_v11 = vpack.c.bf16 %v850_v9, %v848_v7  ;;  %v11232_v12 = vpack.c.bf16 %v1090_v10, %v1088_v8 }
 0x136   : > { %v854_v13 = vpop.f32.mrf.mxu0  ;;  %v1094_v14 = vpop.f32.mrf.mxu1 }
 0x137   : > { %2058 = vst [vmem:[#allocation2 + $0x9c] sm:$0xff] %v11136_v11  ;;  %2154 = vst [vmem:[#allocation2 + $0x2dc] sm:$0xff] %v11232_v12 }
 0x138   : > { %v856_v15 = vpop.f32.mrf.mxu0  ;;  %v1096_v16 = vpop.f32.mrf.mxu1 }
 0x139   : > { %v11138_v17 = vpack.c.bf16 %v856_v15, %v854_v13  ;;  %v11234_v18 = vpack.c.bf16 %v1096_v16, %v1094_v14 }
 0x13a   : > { %v858_v19 = vpop.f32.mrf.mxu0  ;;  %v1098_v20 = vpop.f32.mrf.mxu1 }
 0x13b   : > { %2060 = vst [vmem:[#allocation2 + $0xa8] sm:$0xff] %v11138_v17  ;;  %2156 = vst [vmem:[#allocation2 + $0x2e8] sm:$0xff] %v11234_v18 }
 0x13c   : > { %v860_v21 = vpop.f32.mrf.mxu0  ;;  %v1100_v22 = vpop.f32.mrf.mxu1 }
 0x13d   : > { %v11140_v23 = vpack.c.bf16 %v860_v21, %v858_v19  ;;  %v11236_v24 = vpack.c.bf16 %v1100_v22, %v1098_v20 }
 0x13e   : > { %v864_v25 = vpop.f32.mrf.mxu0  ;;  %v11552_v26 = vpop.f32.mrf.mxu1 }
 0x13f   : > { %2062 = vst [vmem:[#allocation2 + $0xb4] sm:$0xff] %v11140_v23  ;;  %2158 = vst [vmem:[#allocation2 + $0x2f4] sm:$0xff] %v11236_v24  ;;  %v11115_v27 = vpack.c.bf16 %v11552_v26, %v11552_v26 }
 0x140   : > { %v866_v28 = vpop.f32.mrf.mxu0  ;;  %v1137_v29 = vpop.f32.mrf.mxu1 }
 0x141   : > { %2037 = vst [vmem:[#allocation2 + $0x20] sm:$0xf] %v11115_v27  ;;  %v11142_v30 = vpack.c.bf16 %v866_v28, %v864_v25  ;;  %v11111_v31 = vpack.c.bf16 %v1137_v29, %v1137_v29 }
 0x142   : > { %v868_v32 = vpop.f32.mrf.mxu0  ;;  %v11553_v33 = vpop.f32.mrf.mxu1 }
 0x143   : > { %2064 = vst [vmem:[#allocation2 + $0xc0] sm:$0xff] %v11142_v30  ;;  %2033 = vst [vmem:[#allocation2 + $0x8] sm:$0xf] %v11111_v31  ;;  %v11117_v34 = vpack.c.bf16 %v11553_v33, %v11553_v33 }
 0x144   : > { %v870_v35 = vpop.f32.mrf.mxu0  ;;  %v1140_v36 = vpop.f32.mrf.mxu1 }
 0x145   : > { %2039 = vst [vmem:[#allocation2 + $0x2c] sm:$0xf] %v11117_v34  ;;  %v11144_v37 = vpack.c.bf16 %v870_v35, %v868_v32  ;;  %v11113_v38 = vpack.c.bf16 %v1140_v36, %v1140_v36 }
 0x146   : > { %v874_v39 = vpop.f32.mrf.mxu0  ;;  %v11556_v40 = vpop.f32.mrf.mxu1 }
 0x147   : > { %2066 = vst [vmem:[#allocation2 + $0xcc] sm:$0xff] %v11144_v37  ;;  %2035 = vst [vmem:[#allocation2 + $0x14] sm:$0xf] %v11113_v38  ;;  %v11123_v41 = vpack.c.bf16 %v11556_v40, %v11556_v40 }
 0x148   : > { %v876_v42 = vpop.f32.mrf.mxu0  ;;  %v1153_v43 = vpop.f32.mrf.mxu1 }
 0x149   : > { %2045 = vst [vmem:[#allocation2 + $0x50] sm:$0xf] %v11123_v41  ;;  %v11146_v44 = vpack.c.bf16 %v876_v42, %v874_v39  ;;  %v11119_v45 = vpack.c.bf16 %v1153_v43, %v1153_v43 }
 0x14a   : > { %v878_v46 = vpop.f32.mrf.mxu0  ;;  %v11557_v47 = vpop.f32.mrf.mxu1 }
 0x14b   : > { %2068 = vst [vmem:[#allocation2 + $0xd8] sm:$0xff] %v11146_v44  ;;  %2041 = vst [vmem:[#allocation2 + $0x38] sm:$0xf] %v11119_v45  ;;  %v11125_v48 = vpack.c.bf16 %v11557_v47, %v11557_v47 }
 0x14c   : > { %v880_v49 = vpop.f32.mrf.mxu0  ;;  %v1156_v50 = vpop.f32.mrf.mxu1 }
 0x14d   : > { %2047 = vst [vmem:[#allocation2 + $0x5c] sm:$0xf] %v11125_v48  ;;  %v11148_v51 = vpack.c.bf16 %v880_v49, %v878_v46  ;;  %v11121_v52 = vpack.c.bf16 %v1156_v50, %v1156_v50 }
 0x14e   : > { %v884_v53 = vpop.f32.mrf.mxu0  ;;  %v11560_v54 = vpop.f32.mrf.mxu1 }
 0x14f   : > { %2070 = vst [vmem:[#allocation2 + $0xe4] sm:$0xff] %v11148_v51  ;;  %2043 = vst [vmem:[#allocation2 + $0x44] sm:$0xf] %v11121_v52  ;;  %v11131_v55 = vpack.c.bf16 %v11560_v54, %v11560_v54 }
 0x150   : > { %v886_v56 = vpop.f32.mrf.mxu0  ;;  %v1169_v57 = vpop.f32.mrf.mxu1 }
 0x151   : > { %2053 = vst [vmem:[#allocation2 + $0x80] sm:$0xf] %v11131_v55  ;;  %v11150_v58 = vpack.c.bf16 %v886_v56, %v884_v53  ;;  %v11127_v59 = vpack.c.bf16 %v1169_v57, %v1169_v57 }
 0x152   : > { %v888_v60 = vpop.f32.mrf.mxu0  ;;  %v11561_v61 = vpop.f32.mrf.mxu1 }
 0x153   : > { %2072 = vst [vmem:[#allocation2 + $0xf0] sm:$0xff] %v11150_v58  ;;  %2049 = vst [vmem:[#allocation2 + $0x68] sm:$0xf] %v11127_v59  ;;  %v11133_v62 = vpack.c.bf16 %v11561_v61, %v11561_v61 }
 0x154   : > { %v890_v63 = vpop.f32.mrf.mxu0  ;;  %v1172_v0 = vpop.f32.mrf.mxu1 }
 0x155   : > { %2055 = vst [vmem:[#allocation2 + $0x8c] sm:$0xf] %v11133_v62  ;;  %v11152_v1 = vpack.c.bf16 %v890_v63, %v888_v60  ;;  %v11129_v3 = vpack.c.bf16 %v1172_v0, %v1172_v0 }
 0x156   : > { %v894_v4 = vpop.f32.mrf.mxu0  ;;  %v11564_v5 = vpop.f32.mrf.mxu1 }
 0x157   : > { %2074 = vst [vmem:[#allocation2 + $0xfc] sm:$0xff] %v11152_v1  ;;  %2051 = vst [vmem:[#allocation2 + $0x74] sm:$0xf] %v11129_v3  ;;  %v11139_v2 = vpack.c.bf16 %v11564_v5, %v11564_v5 }
 0x158   : > { %v896_v6 = vpop.f32.mrf.mxu0  ;;  %v1185_v7 = vpop.f32.mrf.mxu1 }
 0x159   : > { %2061 = vst [vmem:[#allocation2 + $0xb0] sm:$0xf] %v11139_v2  ;;  %v11154_v8 = vpack.c.bf16 %v896_v6, %v894_v4  ;;  %v11135_v9 = vpack.c.bf16 %v1185_v7, %v1185_v7 }
 0x15a   : > { %v898_v10 = vpop.f32.mrf.mxu0  ;;  %v11565_v11 = vpop.f32.mrf.mxu1 }
 0x15b   : > { %2076 = vst [vmem:[#allocation2 + $0x108] sm:$0xff] %v11154_v8  ;;  %2057 = vst [vmem:[#allocation2 + $0x98] sm:$0xf] %v11135_v9  ;;  %v11141_v12 = vpack.c.bf16 %v11565_v11, %v11565_v11 }
 0x15c   : > { %v900_v13 = vpop.f32.mrf.mxu0  ;;  %v1188_v14 = vpop.f32.mrf.mxu1 }
 0x15d   : > { %2063 = vst [vmem:[#allocation2 + $0xbc] sm:$0xf] %v11141_v12  ;;  %v11156_v15 = vpack.c.bf16 %v900_v13, %v898_v10  ;;  %v11137_v16 = vpack.c.bf16 %v1188_v14, %v1188_v14 }
 0x15e   : > { %v904_v17 = vpop.f32.mrf.mxu0  ;;  %v11568_v18 = vpop.f32.mrf.mxu1 }
 0x15f   : > { %2078 = vst [vmem:[#allocation2 + $0x114] sm:$0xff] %v11156_v15  ;;  %2059 = vst [vmem:[#allocation2 + $0xa4] sm:$0xf] %v11137_v16  ;;  %v11147_v19 = vpack.c.bf16 %v11568_v18, %v11568_v18 }
 0x160   : > { %v906_v20 = vpop.f32.mrf.mxu0  ;;  %v1201_v21 = vpop.f32.mrf.mxu1 }
 0x161   : > { %2069 = vst [vmem:[#allocation2 + $0xe0] sm:$0xf] %v11147_v19  ;;  %v11158_v22 = vpack.c.bf16 %v906_v20, %v904_v17  ;;  %v11143_v23 = vpack.c.bf16 %v1201_v21, %v1201_v21 }
 0x162   : > { %v908_v24 = vpop.f32.mrf.mxu0  ;;  %v11569_v25 = vpop.f32.mrf.mxu1 }
 0x163   : > { %2080 = vst [vmem:[#allocation2 + $0x120] sm:$0xff] %v11158_v22  ;;  %2065 = vst [vmem:[#allocation2 + $0xc8] sm:$0xf] %v11143_v23  ;;  %v11149_v26 = vpack.c.bf16 %v11569_v25, %v11569_v25 }
 0x164   : > { %v910_v27 = vpop.f32.mrf.mxu0  ;;  %v1204_v28 = vpop.f32.mrf.mxu1 }
 0x165   : > { %2071 = vst [vmem:[#allocation2 + $0xec] sm:$0xf] %v11149_v26  ;;  %v11160_v29 = vpack.c.bf16 %v910_v27, %v908_v24  ;;  %v11145_v30 = vpack.c.bf16 %v1204_v28, %v1204_v28 }
 0x166   : > { %v914_v31 = vpop.f32.mrf.mxu0  ;;  %v11572_v32 = vpop.f32.mrf.mxu1 }
 0x167   : > { %2082 = vst [vmem:[#allocation2 + $0x12c] sm:$0xff] %v11160_v29  ;;  %2067 = vst [vmem:[#allocation2 + $0xd4] sm:$0xf] %v11145_v30  ;;  %v11155_v33 = vpack.c.bf16 %v11572_v32, %v11572_v32 }
 0x168   : > { %v916_v34 = vpop.f32.mrf.mxu0  ;;  %v1217_v35 = vpop.f32.mrf.mxu1 }
 0x169   : > { %2077 = vst [vmem:[#allocation2 + $0x110] sm:$0xf] %v11155_v33  ;;  %v11162_v36 = vpack.c.bf16 %v916_v34, %v914_v31  ;;  %v11151_v37 = vpack.c.bf16 %v1217_v35, %v1217_v35 }
 0x16a   : > { %v918_v38 = vpop.f32.mrf.mxu0  ;;  %v11573_v39 = vpop.f32.mrf.mxu1 }
 0x16b   : > { %2084 = vst [vmem:[#allocation2 + $0x138] sm:$0xff] %v11162_v36  ;;  %2073 = vst [vmem:[#allocation2 + $0xf8] sm:$0xf] %v11151_v37  ;;  %v11157_v40 = vpack.c.bf16 %v11573_v39, %v11573_v39 }
 0x16c   : > { %v920_v41 = vpop.f32.mrf.mxu0  ;;  %v1220_v42 = vpop.f32.mrf.mxu1 }
 0x16d   : > { %2079 = vst [vmem:[#allocation2 + $0x11c] sm:$0xf] %v11157_v40  ;;  %v11164_v43 = vpack.c.bf16 %v920_v41, %v918_v38  ;;  %v11153_v44 = vpack.c.bf16 %v1220_v42, %v1220_v42 }
 0x16e   : > { %v924_v45 = vpop.f32.mrf.mxu0  ;;  %v11576_v46 = vpop.f32.mrf.mxu1 }
 0x16f   : > { %2086 = vst [vmem:[#allocation2 + $0x144] sm:$0xff] %v11164_v43  ;;  %2075 = vst [vmem:[#allocation2 + $0x104] sm:$0xf] %v11153_v44  ;;  %v11163_v47 = vpack.c.bf16 %v11576_v46, %v11576_v46 }
 0x170   : > { %v926_v48 = vpop.f32.mrf.mxu0  ;;  %v1233_v49 = vpop.f32.mrf.mxu1 }
 0x171   : > { %2085 = vst [vmem:[#allocation2 + $0x140] sm:$0xf] %v11163_v47  ;;  %v11166_v50 = vpack.c.bf16 %v926_v48, %v924_v45  ;;  %v11159_v51 = vpack.c.bf16 %v1233_v49, %v1233_v49 }
 0x172   : > { %v928_v52 = vpop.f32.mrf.mxu0  ;;  %v11577_v53 = vpop.f32.mrf.mxu1 }
 0x173   : > { %2088 = vst [vmem:[#allocation2 + $0x150] sm:$0xff] %v11166_v50  ;;  %2081 = vst [vmem:[#allocation2 + $0x128] sm:$0xf] %v11159_v51  ;;  %v11165_v54 = vpack.c.bf16 %v11577_v53, %v11577_v53 }
 0x174   : > { %v930_v55 = vpop.f32.mrf.mxu0  ;;  %v1236_v56 = vpop.f32.mrf.mxu1 }
 0x175   : > { %2087 = vst [vmem:[#allocation2 + $0x14c] sm:$0xf] %v11165_v54  ;;  %v11168_v57 = vpack.c.bf16 %v930_v55, %v928_v52  ;;  %v11161_v58 = vpack.c.bf16 %v1236_v56, %v1236_v56 }
 0x176   : > { %v934_v59 = vpop.f32.mrf.mxu0  ;;  %v11580_v60 = vpop.f32.mrf.mxu1 }
 0x177   : > { %2090 = vst [vmem:[#allocation2 + $0x15c] sm:$0xff] %v11168_v57  ;;  %2083 = vst [vmem:[#allocation2 + $0x134] sm:$0xf] %v11161_v58  ;;  %v11171_v61 = vpack.c.bf16 %v11580_v60, %v11580_v60 }
 0x178   : > { %v936_v62 = vpop.f32.mrf.mxu0  ;;  %v1249_v63 = vpop.f32.mrf.mxu1 }
 0x179   : > { %2093 = vst [vmem:[#allocation2 + $0x170] sm:$0xf] %v11171_v61  ;;  %v11170_v0 = vpack.c.bf16 %v936_v62, %v934_v59  ;;  %v11167_v1 = vpack.c.bf16 %v1249_v63, %v1249_v63 }
 0x17a   : > { %v938_v3 = vpop.f32.mrf.mxu0  ;;  %v11581_v4 = vpop.f32.mrf.mxu1 }
 0x17b   : > { %2092 = vst [vmem:[#allocation2 + $0x168] sm:$0xff] %v11170_v0  ;;  %2089 = vst [vmem:[#allocation2 + $0x158] sm:$0xf] %v11167_v1  ;;  %v11173_v5 = vpack.c.bf16 %v11581_v4, %v11581_v4 }
 0x17c   : > { %v940_v2 = vpop.f32.mrf.mxu0  ;;  %v1252_v6 = vpop.f32.mrf.mxu1 }
 0x17d   : > { %2095 = vst [vmem:[#allocation2 + $0x17c] sm:$0xf] %v11173_v5  ;;  %v11172_v7 = vpack.c.bf16 %v940_v2, %v938_v3  ;;  %v11169_v8 = vpack.c.bf16 %v1252_v6, %v1252_v6 }
 0x17e   : > { %v944_v9 = vpop.f32.mrf.mxu0  ;;  %v11584_v10 = vpop.f32.mrf.mxu1 }
 0x17f   : > { %2094 = vst [vmem:[#allocation2 + $0x174] sm:$0xff] %v11172_v7  ;;  %2091 = vst [vmem:[#allocation2 + $0x164] sm:$0xf] %v11169_v8  ;;  %v11179_v11 = vpack.c.bf16 %v11584_v10, %v11584_v10 }
 0x180   : > { %v946_v12 = vpop.f32.mrf.mxu0  ;;  %v1265_v13 = vpop.f32.mrf.mxu1 }
 0x181   : > { %2101 = vst [vmem:[#allocation2 + $0x1a0] sm:$0xf] %v11179_v11  ;;  %v11174_v14 = vpack.c.bf16 %v946_v12, %v944_v9  ;;  %v11175_v15 = vpack.c.bf16 %v1265_v13, %v1265_v13 }
 0x182   : > { %v948_v16 = vpop.f32.mrf.mxu0  ;;  %v11585_v17 = vpop.f32.mrf.mxu1 }
 0x183   : > { %2096 = vst [vmem:[#allocation2 + $0x180] sm:$0xff] %v11174_v14  ;;  %2097 = vst [vmem:[#allocation2 + $0x188] sm:$0xf] %v11175_v15  ;;  %v11181_v18 = vpack.c.bf16 %v11585_v17, %v11585_v17 }
 0x184   : > { %v950_v19 = vpop.f32.mrf.mxu0  ;;  %v1268_v20 = vpop.f32.mrf.mxu1 }
 0x185   : > { %2103 = vst [vmem:[#allocation2 + $0x1ac] sm:$0xf] %v11181_v18  ;;  %v11176_v21 = vpack.c.bf16 %v950_v19, %v948_v16  ;;  %v11177_v22 = vpack.c.bf16 %v1268_v20, %v1268_v20 }
 0x186   : > { %v954_v23 = vpop.f32.mrf.mxu0  ;;  %v11588_v24 = vpop.f32.mrf.mxu1 }
 0x187   : > { %2098 = vst [vmem:[#allocation2 + $0x18c] sm:$0xff] %v11176_v21  ;;  %2099 = vst [vmem:[#allocation2 + $0x194] sm:$0xf] %v11177_v22  ;;  %v11187_v25 = vpack.c.bf16 %v11588_v24, %v11588_v24 }
 0x188   : > { %v956_v26 = vpop.f32.mrf.mxu0  ;;  %v1281_v27 = vpop.f32.mrf.mxu1 }
 0x189   : > { %2109 = vst [vmem:[#allocation2 + $0x1d0] sm:$0xf] %v11187_v25  ;;  %v11178_v28 = vpack.c.bf16 %v956_v26, %v954_v23  ;;  %v11183_v29 = vpack.c.bf16 %v1281_v27, %v1281_v27 }
 0x18a   : > { %v958_v30 = vpop.f32.mrf.mxu0  ;;  %v11589_v31 = vpop.f32.mrf.mxu1 }
 0x18b   : > { %2100 = vst [vmem:[#allocation2 + $0x198] sm:$0xff] %v11178_v28  ;;  %2105 = vst [vmem:[#allocation2 + $0x1b8] sm:$0xf] %v11183_v29  ;;  %v11189_v32 = vpack.c.bf16 %v11589_v31, %v11589_v31 }
 0x18c   : > { %v960_v33 = vpop.f32.mrf.mxu0  ;;  %v1284_v34 = vpop.f32.mrf.mxu1 }
 0x18d   : > { %2111 = vst [vmem:[#allocation2 + $0x1dc] sm:$0xf] %v11189_v32  ;;  %v11180_v35 = vpack.c.bf16 %v960_v33, %v958_v30  ;;  %v11185_v36 = vpack.c.bf16 %v1284_v34, %v1284_v34 }
 0x18e   : > { %v964_v37 = vpop.f32.mrf.mxu0  ;;  %v11592_v38 = vpop.f32.mrf.mxu1 }
 0x18f   : > { %2102 = vst [vmem:[#allocation2 + $0x1a4] sm:$0xff] %v11180_v35  ;;  %2107 = vst [vmem:[#allocation2 + $0x1c4] sm:$0xf] %v11185_v36  ;;  %v11195_v39 = vpack.c.bf16 %v11592_v38, %v11592_v38 }
 0x190   : > { %v966_v40 = vpop.f32.mrf.mxu0  ;;  %v1297_v41 = vpop.f32.mrf.mxu1 }
 0x191   : > { %2117 = vst [vmem:[#allocation2 + $0x200] sm:$0xf] %v11195_v39  ;;  %v11182_v42 = vpack.c.bf16 %v966_v40, %v964_v37  ;;  %v11191_v43 = vpack.c.bf16 %v1297_v41, %v1297_v41 }
 0x192   : > { %v968_v44 = vpop.f32.mrf.mxu0  ;;  %v11593_v45 = vpop.f32.mrf.mxu1 }
 0x193   : > { %2104 = vst [vmem:[#allocation2 + $0x1b0] sm:$0xff] %v11182_v42  ;;  %2113 = vst [vmem:[#allocation2 + $0x1e8] sm:$0xf] %v11191_v43  ;;  %v11197_v46 = vpack.c.bf16 %v11593_v45, %v11593_v45 }
 0x194   : > { %v970_v47 = vpop.f32.mrf.mxu0  ;;  %v1300_v48 = vpop.f32.mrf.mxu1 }
 0x195   : > { %2119 = vst [vmem:[#allocation2 + $0x20c] sm:$0xf] %v11197_v46  ;;  %v11184_v49 = vpack.c.bf16 %v970_v47, %v968_v44  ;;  %v11193_v50 = vpack.c.bf16 %v1300_v48, %v1300_v48 }
 0x196   : > { %v974_v51 = vpop.f32.mrf.mxu0  ;;  %v11596_v52 = vpop.f32.mrf.mxu1 }
 0x197   : > { %2106 = vst [vmem:[#allocation2 + $0x1bc] sm:$0xff] %v11184_v49  ;;  %2115 = vst [vmem:[#allocation2 + $0x1f4] sm:$0xf] %v11193_v50  ;;  %v11203_v53 = vpack.c.bf16 %v11596_v52, %v11596_v52 }
 0x198   : > { %v976_v54 = vpop.f32.mrf.mxu0  ;;  %v1313_v55 = vpop.f32.mrf.mxu1 }
 0x199   : > { %2125 = vst [vmem:[#allocation2 + $0x230] sm:$0xf] %v11203_v53  ;;  %v11186_v56 = vpack.c.bf16 %v976_v54, %v974_v51  ;;  %v11199_v57 = vpack.c.bf16 %v1313_v55, %v1313_v55 }
 0x19a   : > { %v978_v58 = vpop.f32.mrf.mxu0  ;;  %v11597_v59 = vpop.f32.mrf.mxu1 }
 0x19b   : > { %2108 = vst [vmem:[#allocation2 + $0x1c8] sm:$0xff] %v11186_v56  ;;  %2121 = vst [vmem:[#allocation2 + $0x218] sm:$0xf] %v11199_v57  ;;  %v11205_v60 = vpack.c.bf16 %v11597_v59, %v11597_v59 }
 0x19c   : > { %v980_v61 = vpop.f32.mrf.mxu0  ;;  %v1316_v62 = vpop.f32.mrf.mxu1 }
 0x19d   : > { %2127 = vst [vmem:[#allocation2 + $0x23c] sm:$0xf] %v11205_v60  ;;  %v11188_v63 = vpack.c.bf16 %v980_v61, %v978_v58  ;;  %v11201_v0 = vpack.c.bf16 %v1316_v62, %v1316_v62 }
 0x19e   : > { %v984_v1 = vpop.f32.mrf.mxu0  ;;  %v11600_v3 = vpop.f32.mrf.mxu1 }
 0x19f   : > { %2110 = vst [vmem:[#allocation2 + $0x1d4] sm:$0xff] %v11188_v63  ;;  %2123 = vst [vmem:[#allocation2 + $0x224] sm:$0xf] %v11201_v0  ;;  %v11211_v4 = vpack.c.bf16 %v11600_v3, %v11600_v3 }
 0x1a0   : > { %v986_v5 = vpop.f32.mrf.mxu0  ;;  %v1329_v2 = vpop.f32.mrf.mxu1 }
 0x1a1   : > { %2133 = vst [vmem:[#allocation2 + $0x260] sm:$0xf] %v11211_v4  ;;  %v11190_v6 = vpack.c.bf16 %v986_v5, %v984_v1  ;;  %v11207_v7 = vpack.c.bf16 %v1329_v2, %v1329_v2 }
 0x1a2   : > { %v988_v8 = vpop.f32.mrf.mxu0  ;;  %v11601_v9 = vpop.f32.mrf.mxu1 }
 0x1a3   : > { %2112 = vst [vmem:[#allocation2 + $0x1e0] sm:$0xff] %v11190_v6  ;;  %2129 = vst [vmem:[#allocation2 + $0x248] sm:$0xf] %v11207_v7  ;;  %v11213_v10 = vpack.c.bf16 %v11601_v9, %v11601_v9 }
 0x1a4   : > { %v990_v11 = vpop.f32.mrf.mxu0  ;;  %v1332_v12 = vpop.f32.mrf.mxu1 }
 0x1a5   : > { %2135 = vst [vmem:[#allocation2 + $0x26c] sm:$0xf] %v11213_v10  ;;  %v11192_v13 = vpack.c.bf16 %v990_v11, %v988_v8  ;;  %v11209_v14 = vpack.c.bf16 %v1332_v12, %v1332_v12 }
 0x1a6   : > { %v994_v15 = vpop.f32.mrf.mxu0  ;;  %v11604_v16 = vpop.f32.mrf.mxu1 }
 0x1a7   : > { %2114 = vst [vmem:[#allocation2 + $0x1ec] sm:$0xff] %v11192_v13  ;;  %2131 = vst [vmem:[#allocation2 + $0x254] sm:$0xf] %v11209_v14  ;;  %v11219_v17 = vpack.c.bf16 %v11604_v16, %v11604_v16 }
 0x1a8   : > { %v996_v18 = vpop.f32.mrf.mxu0  ;;  %v1345_v19 = vpop.f32.mrf.mxu1 }
 0x1a9   : > { %2141 = vst [vmem:[#allocation2 + $0x290] sm:$0xf] %v11219_v17  ;;  %v11194_v20 = vpack.c.bf16 %v996_v18, %v994_v15  ;;  %v11215_v21 = vpack.c.bf16 %v1345_v19, %v1345_v19 }
 0x1aa   : > { %v998_v22 = vpop.f32.mrf.mxu0  ;;  %v11605_v23 = vpop.f32.mrf.mxu1 }
 0x1ab   : > { %2116 = vst [vmem:[#allocation2 + $0x1f8] sm:$0xff] %v11194_v20  ;;  %2137 = vst [vmem:[#allocation2 + $0x278] sm:$0xf] %v11215_v21  ;;  %v11221_v24 = vpack.c.bf16 %v11605_v23, %v11605_v23 }
 0x1ac   : > { %v1000_v25 = vpop.f32.mrf.mxu0  ;;  %v1348_v26 = vpop.f32.mrf.mxu1 }
 0x1ad   : > { %2143 = vst [vmem:[#allocation2 + $0x29c] sm:$0xf] %v11221_v24  ;;  %v11196_v27 = vpack.c.bf16 %v1000_v25, %v998_v22  ;;  %v11217_v28 = vpack.c.bf16 %v1348_v26, %v1348_v26 }
 0x1ae   : > { %v1004_v29 = vpop.f32.mrf.mxu0  ;;  %v11608_v30 = vpop.f32.mrf.mxu1 }
 0x1af   : > { %2118 = vst [vmem:[#allocation2 + $0x204] sm:$0xff] %v11196_v27  ;;  %2139 = vst [vmem:[#allocation2 + $0x284] sm:$0xf] %v11217_v28  ;;  %v11227_v31 = vpack.c.bf16 %v11608_v30, %v11608_v30 }
 0x1b0   : > { %v1006_v32 = vpop.f32.mrf.mxu0  ;;  %v1361_v33 = vpop.f32.mrf.mxu1 }
 0x1b1   : > { %2149 = vst [vmem:[#allocation2 + $0x2c0] sm:$0xf] %v11227_v31  ;;  %v11198_v34 = vpack.c.bf16 %v1006_v32, %v1004_v29  ;;  %v11223_v35 = vpack.c.bf16 %v1361_v33, %v1361_v33 }
 0x1b2   : > { %v1008_v36 = vpop.f32.mrf.mxu0  ;;  %v11609_v37 = vpop.f32.mrf.mxu1 }
 0x1b3   : > { %2120 = vst [vmem:[#allocation2 + $0x210] sm:$0xff] %v11198_v34  ;;  %2145 = vst [vmem:[#allocation2 + $0x2a8] sm:$0xf] %v11223_v35  ;;  %v11229_v38 = vpack.c.bf16 %v11609_v37, %v11609_v37 }
 0x1b4   : > { %v1010_v39 = vpop.f32.mrf.mxu0  ;;  %v1364_v40 = vpop.f32.mrf.mxu1 }
 0x1b5   : > { %2151 = vst [vmem:[#allocation2 + $0x2cc] sm:$0xf] %v11229_v38  ;;  %v11200_v41 = vpack.c.bf16 %v1010_v39, %v1008_v36  ;;  %v11225_v42 = vpack.c.bf16 %v1364_v40, %v1364_v40 }
 0x1b6   : > { %v1014_v43 = vpop.f32.mrf.mxu0  ;;  %v11612_v44 = vpop.f32.mrf.mxu1 }
 0x1b7   : > { %2122 = vst [vmem:[#allocation2 + $0x21c] sm:$0xff] %v11200_v41  ;;  %2147 = vst [vmem:[#allocation2 + $0x2b4] sm:$0xf] %v11225_v42  ;;  %v11235_v45 = vpack.c.bf16 %v11612_v44, %v11612_v44 }
 0x1b8   : > { %v1016_v46 = vpop.f32.mrf.mxu0  ;;  %v1377_v47 = vpop.f32.mrf.mxu1 }
 0x1b9   : > { %2157 = vst [vmem:[#allocation2 + $0x2f0] sm:$0xf] %v11235_v45  ;;  %v11202_v48 = vpack.c.bf16 %v1016_v46, %v1014_v43  ;;  %v11231_v49 = vpack.c.bf16 %v1377_v47, %v1377_v47 }
 0x1ba   : > { %v1018_v50 = vpop.f32.mrf.mxu0  ;;  %v11613_v51 = vpop.f32.mrf.mxu1 }
 0x1bb   : > { %2124 = vst [vmem:[#allocation2 + $0x228] sm:$0xff] %v11202_v48  ;;  %2153 = vst [vmem:[#allocation2 + $0x2d8] sm:$0xf] %v11231_v49  ;;  %v11237_v52 = vpack.c.bf16 %v11613_v51, %v11613_v51 }
 0x1bc   : > { %v1020_v53 = vpop.f32.mrf.mxu0  ;;  %v1380_v54 = vpop.f32.mrf.mxu1 }
 0x1bd   : > { %2159 = vst [vmem:[#allocation2 + $0x2fc] sm:$0xf] %v11237_v52  ;;  %v11204_v55 = vpack.c.bf16 %v1020_v53, %v1018_v50  ;;  %v11233_v56 = vpack.c.bf16 %v1380_v54, %v1380_v54 }
 0x1bf   : > { %2126 = vst [vmem:[#allocation2 + $0x234] sm:$0xff] %v11204_v55  ;;  %2155 = vst [vmem:[#allocation2 + $0x2e4] sm:$0xf] %v11233_v56 }
 0x1c0 PF: > { %v12530_v57 = vld [vmem:[%s12288_s26 + $0x10] sm:$0xff]  ;;  %v12533_v58 = vld [vmem:[%s12288_s26] sm:$0xff]  ;;  %v17905_v59 = vmov 1   ;;  %v17907_v60 = vmov 0   ;;  %v2163_v61 = vld [vmem:[%s12288_s26 + $0x18] sm:$0xff]  ;;  %s9646_s20 = sshll.u32 %s12290_s10, 4  ;;  %s17850_s20 = int_to_ptr.vmem [resolvable:$true] %s9646_s20 }
 0x1c1   : > { %11741 = vset.pattern.permute.xlu0 %v17905_v59  ;;  %11740 = vset.pattern.permute.xlu1 %v17907_v60  ;;  %v2165_v62 = vld [vmem:[%s12288_s26 + $0x28] sm:$0xff]  ;;  %v2167_v63 = vld [vmem:[%s12288_s26 + $0x38] sm:$0xff]  ;;  %v2164_v35 = vld [vmem:[%s12288_s26 + $0x20] sm:$0xff]  ;;  %s20138_s17 = sand.u32 1, %s12165_s28   ;;  %s12180_s25 = smov [#allocation3]  }
 0x1c2   : > { %2237 = vperm.xlu1 %11740, %v12530_v57   ;;  %2615 = vperm.xlu0 %11741, %v12533_v58   ;;  %v2169_v0 = vld [vmem:[%s12288_s26 + $0x48] sm:$0xff]  ;;  %v2171_v1 = vld [vmem:[%s12288_s26 + $0x58] sm:$0xff]  ;;  %v2166_v38 = vld [vmem:[%s12288_s26 + $0x30] sm:$0xff]  ;;  %s17855_s24 = scalar_lea.sflag [#allocation4], %s20138_s17  ;;  %s12117_s12 = sshll.u32 %s12180_s25, 4  ;;  %s12118_s12 = int_to_ptr.vmem [resolvable:$false] %s12117_s12 }
 0x1c3   : > { %5850 = vmatprep.subr.bf16.mxu0 %v17907_v60  ;;  %6139 = vmatprep.subr.bf16.mxu1 %v17907_v60  ;;  %v2173_v3 = vld [vmem:[%s12288_s26 + $0x68] sm:$0xff]  ;;  %v2175_v4 = vld [vmem:[%s12288_s26 + $0x78] sm:$0xff]  ;;  %v2168_v41 = vld [vmem:[%s12288_s26 + $0x40] sm:$0xff]  ;;  %s12119_s13 = scalar_lea.vmem %s12118_s12, 8192  ;;  %p12120_p1 = scmp.lt.s32.totalorder %s17850_s20, %s12118_s12 }
 0x1c4   : > { %v2177_v5 = vld [vmem:[%s12288_s26 + $0x88] sm:$0xff]  ;;  %v2179_v2 = vld [vmem:[%s12288_s26 + $0x98] sm:$0xff]  ;;  %v2170_v44 = vld [vmem:[%s12288_s26 + $0x50] sm:$0xff] }
 0x1c5   : > { %v2181_v6 = vld [vmem:[%s12288_s26 + $0xa8] sm:$0xff]  ;;  %v2183_v7 = vld [vmem:[%s12288_s26 + $0xb8] sm:$0xff]  ;;  %v2172_v47 = vld [vmem:[%s12288_s26 + $0x60] sm:$0xff] }
 0x1c6   : > { %2242 = vperm.xlu1 %11740, %v2163_v61   ;;  %2627 = vperm.xlu0 %11741, %v2163_v61   ;;  %v2185_v8 = vld [vmem:[%s12288_s26 + $0xc8] sm:$0xff]  ;;  %v2187_v9 = vld [vmem:[%s12288_s26 + $0xd8] sm:$0xff]  ;;  %v2174_v50 = vld [vmem:[%s12288_s26 + $0x70] sm:$0xff] }
 0x1c7   : > { %v2189_v10 = vld [vmem:[%s12288_s26 + $0xe8] sm:$0xff]  ;;  %v2191_v11 = vld [vmem:[%s12288_s26 + $0xf8] sm:$0xff]  ;;  %v2176_v53 = vld [vmem:[%s12288_s26 + $0x80] sm:$0xff] }
 0x1c8   : > { %v2193_v12 = vld [vmem:[%s12288_s26 + $0x108] sm:$0xff]  ;;  %v2195_v13 = vld [vmem:[%s12288_s26 + $0x118] sm:$0xff]  ;;  %v2178_v56 = vld [vmem:[%s12288_s26 + $0x90] sm:$0xff] }
 0x1c9   : > { %v2197_v14 = vld [vmem:[%s12288_s26 + $0x128] sm:$0xff]  ;;  %v2199_v15 = vld [vmem:[%s12288_s26 + $0x138] sm:$0xff]  ;;  %v2180_v61 = vld [vmem:[%s12288_s26 + $0xa0] sm:$0xff] }
 0x1ca   : > { %2252 = vperm.xlu1 %11740, %v2165_v62   ;;  %2635 = vperm.xlu0 %11741, %v2165_v62   ;;  %v2201_v16 = vld [vmem:[%s12288_s26 + $0x148] sm:$0xff]  ;;  %v2203_v17 = vld [vmem:[%s12288_s26 + $0x158] sm:$0xff] }
 0x1cb   : > { %v2205_v18 = vld [vmem:[%s12288_s26 + $0x168] sm:$0xff]  ;;  %v2207_v19 = vld [vmem:[%s12288_s26 + $0x178] sm:$0xff] }
 0x1cc   : > { %v2209_v20 = vld [vmem:[%s12288_s26 + $0x188] sm:$0xff]  ;;  %v2211_v21 = vld [vmem:[%s12288_s26 + $0x198] sm:$0xff] }
 0x1cd   : > { %v2213_v22 = vld [vmem:[%s12288_s26 + $0x1a8] sm:$0xff]  ;;  %v2215_v23 = vld [vmem:[%s12288_s26 + $0x1b8] sm:$0xff] }
 0x1ce   : > { %2262 = vperm.xlu1 %11740, %v2167_v63   ;;  %2643 = vperm.xlu0 %11741, %v2167_v63   ;;  %v2217_v24 = vld [vmem:[%s12288_s26 + $0x1c8] sm:$0xff]  ;;  %v2219_v25 = vld [vmem:[%s12288_s26 + $0x1d8] sm:$0xff] }
 0x1cf   : > { %v2221_v26 = vld [vmem:[%s12288_s26 + $0x1e8] sm:$0xff]  ;;  %v2223_v27 = vld [vmem:[%s12288_s26 + $0x1f8] sm:$0xff] }
 0x1d0   : > { %v2161_v30 = vld [vmem:[%s12288_s26 + $0x8] sm:$0xff] }
 0x1d2   : > { %2272 = vperm.xlu1 %11740, %v2169_v0   ;;  %2651 = vperm.xlu0 %11741, %v2169_v0   ;;  %v2182_v0 = vld [vmem:[%s12288_s26 + $0xb0] sm:$0xff] }
 0x1d6   : > { %2282 = vperm.xlu1 %11740, %v2171_v1   ;;  %2659 = vperm.xlu0 %11741, %v2171_v1  }
 0x1da   : > { %2292 = vperm.xlu1 %11740, %v2173_v3   ;;  %2667 = vperm.xlu0 %11741, %v2173_v3  }
 0x1de   : > { %2302 = vperm.xlu1 %11740, %v2175_v4   ;;  %2675 = vperm.xlu0 %11741, %v2175_v4   ;;  %v2184_v4 = vld [vmem:[%s12288_s26 + $0xc0] sm:$0xff] }
 0x1e2   : > { %2312 = vperm.xlu1 %11740, %v2177_v5   ;;  %2683 = vperm.xlu0 %11741, %v2177_v5  }
 0x1e6   : > { %2322 = vperm.xlu1 %11740, %v2179_v2   ;;  %2691 = vperm.xlu0 %11741, %v2179_v2  }
 0x1ea   : > { %2332 = vperm.xlu1 %11740, %v2181_v6   ;;  %2699 = vperm.xlu0 %11741, %v2181_v6   ;;  %v2186_v6 = vld [vmem:[%s12288_s26 + $0xd0] sm:$0xff] }
 0x1ee   : > { %2342 = vperm.xlu1 %11740, %v2183_v7   ;;  %2707 = vperm.xlu0 %11741, %v2183_v7  }
 0x1f2   : > { %2352 = vperm.xlu1 %11740, %v2185_v8   ;;  %2715 = vperm.xlu0 %11741, %v2185_v8  }
 0x1f6   : > { %2362 = vperm.xlu1 %11740, %v2187_v9   ;;  %2723 = vperm.xlu0 %11741, %v2187_v9   ;;  %v2188_v9 = vld [vmem:[%s12288_s26 + $0xe0] sm:$0xff] }
 0x1fa   : > { %2372 = vperm.xlu1 %11740, %v2189_v10   ;;  %2731 = vperm.xlu0 %11741, %v2189_v10  }
 0x1fe   : > { %2382 = vperm.xlu1 %11740, %v2191_v11   ;;  %2739 = vperm.xlu0 %11741, %v2191_v11  }
 0x202   : > { %2392 = vperm.xlu1 %11740, %v2193_v12   ;;  %2747 = vperm.xlu0 %11741, %v2193_v12   ;;  %v2190_v12 = vld [vmem:[%s12288_s26 + $0xf0] sm:$0xff] }
 0x206   : > { %2402 = vperm.xlu1 %11740, %v2195_v13   ;;  %2755 = vperm.xlu0 %11741, %v2195_v13  }
 0x20a   : > { %2412 = vperm.xlu1 %11740, %v2197_v14   ;;  %2763 = vperm.xlu0 %11741, %v2197_v14  }
 0x20e   : > { %2422 = vperm.xlu1 %11740, %v2199_v15   ;;  %2771 = vperm.xlu0 %11741, %v2199_v15   ;;  %v2192_v15 = vld [vmem:[%s12288_s26 + $0x100] sm:$0xff] }
 0x212   : > { %2432 = vperm.xlu1 %11740, %v2201_v16   ;;  %2779 = vperm.xlu0 %11741, %v2201_v16  }
 0x216   : > { %2442 = vperm.xlu1 %11740, %v2203_v17   ;;  %2787 = vperm.xlu0 %11741, %v2203_v17  }
 0x21a   : > { %2452 = vperm.xlu1 %11740, %v2205_v18   ;;  %2795 = vperm.xlu0 %11741, %v2205_v18   ;;  %v2194_v18 = vld [vmem:[%s12288_s26 + $0x110] sm:$0xff] }
 0x21e   : > { %2462 = vperm.xlu1 %11740, %v2207_v19   ;;  %2803 = vperm.xlu0 %11741, %v2207_v19  }
 0x222   : > { %2472 = vperm.xlu1 %11740, %v2209_v20   ;;  %2811 = vperm.xlu0 %11741, %v2209_v20  }
 0x226   : > { %2482 = vperm.xlu1 %11740, %v2211_v21   ;;  %2819 = vperm.xlu0 %11741, %v2211_v21   ;;  %v2196_v21 = vld [vmem:[%s12288_s26 + $0x120] sm:$0xff] }
 0x22a   : > { %2492 = vperm.xlu1 %11740, %v2213_v22   ;;  %2827 = vperm.xlu0 %11741, %v2213_v22  }
 0x22e   : > { %2502 = vperm.xlu1 %11740, %v2215_v23   ;;  %2835 = vperm.xlu0 %11741, %v2215_v23  }
 0x232   : > { %2512 = vperm.xlu1 %11740, %v2217_v24   ;;  %2843 = vperm.xlu0 %11741, %v2217_v24   ;;  %v2198_v24 = vld [vmem:[%s12288_s26 + $0x130] sm:$0xff] }
 0x236   : > { %2522 = vperm.xlu1 %11740, %v2219_v25   ;;  %2851 = vperm.xlu0 %11741, %v2219_v25  }
 0x23a   : > { %2532 = vperm.xlu1 %11740, %v2221_v26   ;;  %2859 = vperm.xlu0 %11741, %v2221_v26  }
 0x23d   : > { %v12572_v28 = vpop.permute.xlu1 %2237  ;;  %v12574_v29 = vpop.permute.xlu0 %2615 }
 0x23e   : > { %2542 = vperm.xlu1 %11740, %v2223_v27   ;;  %2867 = vperm.xlu0 %11741, %v2223_v27   ;;  %v2200_v27 = vld [vmem:[%s12288_s26 + $0x140] sm:$0xff] }
 0x241   : > { %v12577_v31 = vpop.permute.xlu1 %2242  ;;  %v12579_v32 = vpop.permute.xlu0 %2627 }
 0x242   : > { %11742 = vset.pattern.permute.xlu1 %v17905_v59  ;;  %11743 = vset.pattern.permute.xlu0 %v17907_v60  ;;  %v2218_v60 = vld [vmem:[%s12288_s26 + $0x1d0] sm:$0xff] }
 0x243   : > { %2619 = vperm.xlu1 %11742, %v2161_v30   ;;  %2227 = vperm.xlu0 %11743, %v12533_v58  }
 0x245   : > { %v12584_v33 = vpop.permute.xlu1 %2252  ;;  %v12586_v34 = vpop.permute.xlu0 %2635 }
 0x247   : > { %2623 = vperm.xlu1 %11742, %v12530_v57   ;;  %2232 = vperm.xlu0 %11743, %v2161_v30  }
 0x249   : > { %v12590_v36 = vpop.permute.xlu1 %2262  ;;  %v12592_v37 = vpop.permute.xlu0 %2643 }
 0x24b   : > { %2631 = vperm.xlu1 %11742, %v2164_v35   ;;  %2247 = vperm.xlu0 %11743, %v2164_v35  }
 0x24d   : > { %v12595_v39 = vpop.permute.xlu1 %2272  ;;  %v12597_v40 = vpop.permute.xlu0 %2651 }
 0x24f   : > { %2639 = vperm.xlu1 %11742, %v2166_v38   ;;  %2257 = vperm.xlu0 %11743, %v2166_v38   ;;  %v2202_v38 = vld [vmem:[%s12288_s26 + $0x150] sm:$0xff] }
 0x251   : > { %v12600_v42 = vpop.permute.xlu1 %2282  ;;  %v12602_v43 = vpop.permute.xlu0 %2659 }
 0x253   : > { %2647 = vperm.xlu1 %11742, %v2168_v41   ;;  %2267 = vperm.xlu0 %11743, %v2168_v41  }
 0x255   : > { %v12605_v45 = vpop.permute.xlu1 %2292  ;;  %v12607_v46 = vpop.permute.xlu0 %2667 }
 0x257   : > { %2655 = vperm.xlu1 %11742, %v2170_v44   ;;  %2277 = vperm.xlu0 %11743, %v2170_v44  }
 0x259   : > { %v12610_v48 = vpop.permute.xlu1 %2302  ;;  %v12612_v49 = vpop.permute.xlu0 %2675 }
 0x25b   : > { %2663 = vperm.xlu1 %11742, %v2172_v47   ;;  %2287 = vperm.xlu0 %11743, %v2172_v47   ;;  %v2204_v47 = vld [vmem:[%s12288_s26 + $0x160] sm:$0xff] }
 0x25d   : > { %v12615_v51 = vpop.permute.xlu1 %2312  ;;  %v12617_v52 = vpop.permute.xlu0 %2683 }
 0x25f   : > { %2671 = vperm.xlu1 %11742, %v2174_v50   ;;  %2297 = vperm.xlu0 %11743, %v2174_v50  }
 0x261   : > { %v12620_v54 = vpop.permute.xlu1 %2322  ;;  %v12622_v55 = vpop.permute.xlu0 %2691 }
 0x263   : > { %2679 = vperm.xlu1 %11742, %v2176_v53   ;;  %2307 = vperm.xlu0 %11743, %v2176_v53  }
 0x265   : > { %v12625_v57 = vpop.permute.xlu1 %2332  ;;  %v12627_v58 = vpop.permute.xlu0 %2699 }
 0x267   : > { %2687 = vperm.xlu1 %11742, %v2178_v56   ;;  %2317 = vperm.xlu0 %11743, %v2178_v56   ;;  %v2206_v56 = vld [vmem:[%s12288_s26 + $0x170] sm:$0xff] }
 0x269   : > { %v12630_v62 = vpop.permute.xlu1 %2342  ;;  %v12632_v63 = vpop.permute.xlu0 %2707 }
 0x26b   : > { %2695 = vperm.xlu1 %11742, %v2180_v61   ;;  %2327 = vperm.xlu0 %11743, %v2180_v61  }
 0x26d   : > { %v12635_v1 = vpop.permute.xlu1 %2352  ;;  %v12637_v3 = vpop.permute.xlu0 %2715 }
 0x26f   : > { %2703 = vperm.xlu1 %11742, %v2182_v0   ;;  %2337 = vperm.xlu0 %11743, %v2182_v0  }
 0x271   : > { %v12640_v5 = vpop.permute.xlu1 %2362  ;;  %v12642_v2 = vpop.permute.xlu0 %2723 }
 0x273   : > { %2711 = vperm.xlu1 %11742, %v2184_v4   ;;  %2347 = vperm.xlu0 %11743, %v2184_v4   ;;  %v2208_v4 = vld [vmem:[%s12288_s26 + $0x180] sm:$0xff] }
 0x275   : > { %v12645_v7 = vpop.permute.xlu1 %2372  ;;  %v12647_v8 = vpop.permute.xlu0 %2731 }
 0x277   : > { %2719 = vperm.xlu1 %11742, %v2186_v6   ;;  %2357 = vperm.xlu0 %11743, %v2186_v6  }
 0x279   : > { %v12650_v10 = vpop.permute.xlu1 %2382  ;;  %v12652_v11 = vpop.permute.xlu0 %2739 }
 0x27b   : > { %2727 = vperm.xlu1 %11742, %v2188_v9   ;;  %2367 = vperm.xlu0 %11743, %v2188_v9  }
 0x27d   : > { %v12655_v13 = vpop.permute.xlu1 %2392  ;;  %v12657_v14 = vpop.permute.xlu0 %2747 }
 0x27f   : > { %2735 = vperm.xlu1 %11742, %v2190_v12   ;;  %2377 = vperm.xlu0 %11743, %v2190_v12   ;;  %v2210_v12 = vld [vmem:[%s12288_s26 + $0x190] sm:$0xff] }
 0x281   : > { %v12660_v16 = vpop.permute.xlu1 %2402  ;;  %v12662_v17 = vpop.permute.xlu0 %2755 }
 0x283   : > { %2743 = vperm.xlu1 %11742, %v2192_v15   ;;  %2387 = vperm.xlu0 %11743, %v2192_v15  }
 0x285   : > { %v12665_v19 = vpop.permute.xlu1 %2412  ;;  %v12667_v20 = vpop.permute.xlu0 %2763 }
 0x287   : > { %2751 = vperm.xlu1 %11742, %v2194_v18   ;;  %2397 = vperm.xlu0 %11743, %v2194_v18  }
 0x289   : > { %v12670_v22 = vpop.permute.xlu1 %2422  ;;  %v12672_v23 = vpop.permute.xlu0 %2771 }
 0x28b   : > { %2759 = vperm.xlu1 %11742, %v2196_v21   ;;  %2407 = vperm.xlu0 %11743, %v2196_v21   ;;  %v2212_v21 = vld [vmem:[%s12288_s26 + $0x1a0] sm:$0xff] }
 0x28d   : > { %v12675_v25 = vpop.permute.xlu1 %2432  ;;  %v12677_v26 = vpop.permute.xlu0 %2779 }
 0x28f   : > { %2767 = vperm.xlu1 %11742, %v2198_v24   ;;  %2417 = vperm.xlu0 %11743, %v2198_v24  }
 0x291   : > { %v12680_v30 = vpop.permute.xlu1 %2442  ;;  %v12682_v35 = vpop.permute.xlu0 %2787 }
 0x293   : > { %2775 = vperm.xlu1 %11742, %v2200_v27   ;;  %2427 = vperm.xlu0 %11743, %v2200_v27  }
 0x295   : > { %v12685_v41 = vpop.permute.xlu1 %2452  ;;  %v12687_v44 = vpop.permute.xlu0 %2795 }
 0x297   : > { %2783 = vperm.xlu1 %11742, %v2202_v38   ;;  %2437 = vperm.xlu0 %11743, %v2202_v38   ;;  %v2214_v38 = vld [vmem:[%s12288_s26 + $0x1b0] sm:$0xff] }
 0x299   : > { %v12690_v50 = vpop.permute.xlu1 %2462  ;;  %v12692_v53 = vpop.permute.xlu0 %2803 }
 0x29b   : > { %2791 = vperm.xlu1 %11742, %v2204_v47   ;;  %2447 = vperm.xlu0 %11743, %v2204_v47  }
 0x29d   : > { %v12695_v61 = vpop.permute.xlu1 %2472  ;;  %v12697_v0 = vpop.permute.xlu0 %2811 }
 0x29e   : > { %18530 = vst [vmem:[#allocation6_spill] sm:$0xff] %v12695_v61  ;;  %18531 = vst [vmem:[#allocation7_spill] sm:$0xff] %v12697_v0 }
 0x29f   : > { %2799 = vperm.xlu1 %11742, %v2206_v56   ;;  %2457 = vperm.xlu0 %11743, %v2206_v56  }
 0x2a1   : > { %v12700_v6 = vpop.permute.xlu1 %2482  ;;  %v12702_v9 = vpop.permute.xlu0 %2819 }
 0x2a2   : > { %18532 = vst [vmem:[#allocation8_spill] sm:$0xff] %v12700_v6  ;;  %18533 = vst [vmem:[#allocation9_spill] sm:$0xff] %v12702_v9 }
 0x2a3   : > { %2807 = vperm.xlu1 %11742, %v2208_v4   ;;  %2467 = vperm.xlu0 %11743, %v2208_v4   ;;  %v2216_v4 = vld [vmem:[%s12288_s26 + $0x1c0] sm:$0xff] }
 0x2a5   : > { %v12705_v15 = vpop.permute.xlu1 %2492  ;;  %v12707_v18 = vpop.permute.xlu0 %2827 }
 0x2a6   : > { %18534 = vst [vmem:[#allocation10_spill] sm:$0xff] %v12705_v15  ;;  %18535 = vst [vmem:[#allocation11_spill] sm:$0xff] %v12707_v18  ;;  %v12757_v15 = vld [vmem:[%s17898_s3] ss:$0 sm:$0xff] }
 0x2a7   : > { %2815 = vperm.xlu1 %11742, %v2210_v12   ;;  %2477 = vperm.xlu0 %11743, %v2210_v12  }
 0x2a9   : > { %v12710_v24 = vpop.permute.xlu1 %2502  ;;  %v12712_v27 = vpop.permute.xlu0 %2835 }
 0x2aa   : > { %18536 = vst [vmem:[#allocation12_spill] sm:$0xff] %v12710_v24  ;;  %18537 = vst [vmem:[#allocation13_spill] sm:$0xff] %v12712_v27 }
 0x2ab   : > { %2823 = vperm.xlu1 %11742, %v2212_v21   ;;  %2487 = vperm.xlu0 %11743, %v2212_v21  }
 0x2ad   : > { %v12715_v47 = vpop.permute.xlu1 %2512  ;;  %v12717_v56 = vpop.permute.xlu0 %2843 }
 0x2ae   : > { %18538 = vst [vmem:[#allocation14_spill] sm:$0xff] %v12715_v47  ;;  %18539 = vst [vmem:[#allocation15_spill] sm:$0xff] %v12717_v56  ;;  %v2220_v47 = vld [vmem:[%s12288_s26 + $0x1e0] sm:$0xff] }
 0x2af   : > { %2831 = vperm.xlu1 %11742, %v2214_v38   ;;  %2497 = vperm.xlu0 %11743, %v2214_v38   ;;  %v12737_v38 = vld [vmem:[%s17897_s2 + $0x1] ss:$0 sm:$0xff] }
 0x2b1   : > { %v12720_v59 = vpop.permute.xlu1 %2522  ;;  %v12722_v12 = vpop.permute.xlu0 %2851 }
 0x2b2   : > { %18540 = vst [vmem:[#allocation16_spill] sm:$0xff] %v12720_v59  ;;  %18541 = vst [vmem:[#allocation17_spill] sm:$0xff] %v12722_v12  ;;  %v2877_v12 = vmul.f32 %v12737_v38, %v12579_v32  ;;  %v18546_v32 = vmov 0  }
 0x2b3   : > { %2839 = vperm.xlu1 %11742, %v2216_v4   ;;  %2507 = vperm.xlu0 %11743, %v2216_v4   ;;  %v2222_v4 = vld [vmem:[%s12288_s26 + $0x1f0] sm:$0xff] }
 0x2b5   : > { %v12725_v27 = vpop.permute.xlu1 %2532  ;;  %v12727_v21 = vpop.permute.xlu0 %2859 }
 0x2b6   : > { %18542 = vst [vmem:[#allocation18_spill] sm:$0xff] %v12725_v27  ;;  %18543 = vst [vmem:[#allocation19_spill] sm:$0xff] %v12727_v21  ;;  %v12743_v27 = vld [vmem:[%s17897_s2] ss:$0 sm:$0xff] }
 0x2b7   : > { %2847 = vperm.xlu1 %11742, %v2218_v60   ;;  %2517 = vperm.xlu0 %11743, %v2218_v60   ;;  %v2551_v18 = vmul.f32 %v12743_v27, %v12572_v28  ;;  %v2554_v28 = vmul.f32 %v12743_v27, %v12584_v33 }
 0x2b9   : > { %v12730_v24 = vpop.permute.xlu1 %2542  ;;  %v12732_v56 = vpop.permute.xlu0 %2867 }
 0x2ba   : > { %18544 = vst [vmem:[#allocation20_spill] sm:$0xff] %v12730_v24  ;;  %18545 = vst [vmem:[#allocation21_spill] sm:$0xff] %v12732_v56  ;;  %v2874_v24 = vmul.f32 %v12737_v38, %v12574_v29 }
 0x2bb   : > { %2855 = vperm.xlu1 %11742, %v2220_v47   ;;  %2527 = vperm.xlu0 %11743, %v2220_v47   ;;  %v2552_v47 = vmul.f32 %v12743_v27, %v12577_v31 }
 0x2be   : > { %v2620_v21 = vpop.permute.xlu1 %2619  ;;  %v2228_v60 = vpop.permute.xlu0 %2227 }
 0x2bf   : > { %v2549_v56 = vmul.f32 %v12743_v27, %v2228_v60  ;;  %2863 = vperm.xlu1 %11742, %v2222_v4   ;;  %2537 = vperm.xlu0 %11743, %v2222_v4   ;;  %v2875_v60 = vmul.f32 %v12737_v38, %v2620_v21  ;;  %v2556_v21 = vmul.f32 %v12743_v27, %v12590_v36 }
 0x2c1   : > { %v2938_v59 = vadd.f32 %v2874_v24, %v2549_v56  ;;  %v2941_v24 = vadd.f32 %v2877_v12, %v2552_v47  ;;  %v2879_v56 = vmul.f32 %v12737_v38, %v12586_v34 }
 0x2c2   : > { %v2624_v29 = vpop.permute.xlu1 %2623  ;;  %v2233_v9 = vpop.permute.xlu0 %2232 }
 0x2c3   : > { %v3009_v4 = vadd.f32 %v12757_v15, %v2938_v59  ;;  %v2876_v31 = vmul.f32 %v12737_v38, %v2624_v29  ;;  %v2550_v6 = vmul.f32 %v12743_v27, %v2233_v9  ;;  %11744 = vset.pattern.permute.xlu1 %v18546_v32  ;;  %v2881_v59 = vmul.f32 %v12737_v38, %v12592_v37 }
 0x2c4   : > { %v3012_v34 = vadd.f32 %v12757_v15, %v2941_v24 }
 0x2c5   : > { %11851 = vtanh.f32 %v3009_v4  ;;  %v2940_v0 = vadd.f32 %v2876_v31, %v2551_v18  ;;  %v2939_v61 = vadd.f32 %v2875_v60, %v2550_v6  ;;  %v2943_v18 = vadd.f32 %v2879_v56, %v2554_v28 }
 0x2c6   : > { %v2632_v29 = vpop.permute.xlu1 %2631  ;;  %v2248_v9 = vpop.permute.xlu0 %2247  ;;  %v2945_v4 = vadd.f32 %v2881_v59, %v2556_v21 }
 0x2c7   : > { %v3011_v32 = vadd.f32 %v12757_v15, %v2940_v0  ;;  %v3010_v12 = vadd.f32 %v12757_v15, %v2939_v61  ;;  %v2878_v33 = vmul.f32 %v12737_v38, %v2632_v29  ;;  %v2553_v47 = vmul.f32 %v12743_v27, %v2248_v9 }
 0x2c8   : > { %v3014_v61 = vadd.f32 %v12757_v15, %v2943_v18  ;;  %v2558_v29 = vmul.f32 %v12743_v27, %v12595_v39  ;;  %v3016_v21 = vadd.f32 %v12757_v15, %v2945_v4  ;;  %v2560_v39 = vmul.f32 %v12743_v27, %v12600_v42 }
 0x2c9   : > { %11853 = vtanh.f32 %v3011_v32  ;;  %v2942_v6 = vadd.f32 %v2878_v33, %v2553_v47  ;;  %v2883_v32 = vmul.f32 %v12737_v38, %v12597_v40  ;;  %v2885_v40 = vmul.f32 %v12737_v38, %v12602_v43 }
 0x2ca   : > { %11855 = vtanh.f32 %v3010_v12  ;;  %v2640_v36 = vpop.permute.xlu1 %2639  ;;  %v2258_v60 = vpop.permute.xlu0 %2257  ;;  %v2562_v43 = vmul.f32 %v12743_v27, %v12605_v45 }
 0x2cb   : > { %v3013_v37 = vadd.f32 %v12757_v15, %v2942_v6  ;;  %v2880_v31 = vmul.f32 %v12737_v38, %v2640_v36  ;;  %v2555_v0 = vmul.f32 %v12743_v27, %v2258_v60  ;;  %11857 = vtanh.f32 %v3012_v34 }
 0x2cc   : > { %v2947_v33 = vadd.f32 %v2883_v32, %v2558_v29  ;;  %v2564_v29 = vmul.f32 %v12743_v27, %v12610_v48 }
 0x2cd   : > { %11859 = vtanh.f32 %v3013_v37  ;;  %v2944_v24 = vadd.f32 %v2880_v31, %v2555_v0  ;;  %v2949_v37 = vadd.f32 %v2885_v40, %v2560_v39  ;;  %v2887_v31 = vmul.f32 %v12737_v38, %v12607_v46 }
 0x2ce   : > { %v2648_v28 = vpop.permute.xlu1 %2647  ;;  %v2268_v56 = vpop.permute.xlu0 %2267  ;;  %11861 = vtanh.f32 %v3014_v61  ;;  %v3018_v42 = vadd.f32 %v12757_v15, %v2947_v33 }
 0x2cf   : > { %v3015_v59 = vadd.f32 %v12757_v15, %v2944_v24  ;;  %v2882_v9 = vmul.f32 %v12737_v38, %v2648_v28  ;;  %v2557_v12 = vmul.f32 %v12743_v27, %v2268_v56  ;;  %v2889_v56 = vmul.f32 %v12737_v38, %v12612_v49 }
 0x2d1   : > { %11863 = vtanh.f32 %v3015_v59  ;;  %v2946_v47 = vadd.f32 %v2882_v9, %v2557_v12  ;;  %v3020_v59 = vadd.f32 %v12757_v15, %v2949_v37  ;;  %v2951_v9 = vadd.f32 %v2887_v31, %v2562_v43 }
 0x2d2   : > { %v12793_v34 = vpop.eup %11851  ;;  %v2656_v18 = vpop.permute.xlu1 %2655  ;;  %11865 = vtanh.f32 %v3016_v21  ;;  %v2953_v40 = vadd.f32 %v2889_v56, %v2564_v29 }
 0x2d3   : > { %v2278_v6 = vpop.permute.xlu0 %2277  ;;  %v3017_v36 = vadd.f32 %v12757_v15, %v2946_v47  ;;  %v2884_v60 = vmul.f32 %v12737_v38, %v2656_v18  ;;  %3140 = vperm.xlu1 %11744, %v12793_v34  }
 0x2d4   : > { %v2559_v4 = vmul.f32 %v12743_v27, %v2278_v6  ;;  %v3024_v29 = vadd.f32 %v12757_v15, %v2953_v40 }
 0x2d5   : > { %11867 = vtanh.f32 %v3017_v36  ;;  %v3022_v36 = vadd.f32 %v12757_v15, %v2951_v9 }
 0x2d6   : > { %v2948_v0 = vadd.f32 %v2884_v60, %v2559_v4  ;;  %v12804_v61 = vpop.eup %11853  ;;  %v2664_v32 = vpop.permute.xlu1 %2663  ;;  %11869 = vtanh.f32 %v3018_v42  ;;  %v2566_v60 = vmul.f32 %v12743_v27, %v12615_v51  ;;  %v2891_v4 = vmul.f32 %v12737_v38, %v12617_v52 }
 0x2d7   : > { %v2288_v24 = vpop.permute.xlu0 %2287  ;;  %v12808_v28 = vpop.eup %11855  ;;  %v2886_v45 = vmul.f32 %v12737_v38, %v2664_v32  ;;  %3150 = vperm.xlu1 %11744, %v12804_v61  }
 0x2d8   : > { %v3019_v21 = vadd.f32 %v12757_v15, %v2948_v0  ;;  %v2561_v46 = vmul.f32 %v12743_v27, %v2288_v24  ;;  %3145 = vperm.xlu0 %11743, %v12808_v28   ;;  %v12818_v48 = vpop.eup %11857  ;;  %v2955_v56 = vadd.f32 %v2891_v4, %v2566_v60  ;;  %v2572_v4 = vmul.f32 %v12743_v27, %v12630_v62 }
 0x2da   : > { %11871 = vtanh.f32 %v3019_v21  ;;  %v2950_v12 = vadd.f32 %v2886_v45, %v2561_v46  ;;  %v12820_v33 = vpop.eup %11859  ;;  %v2672_v49 = vpop.permute.xlu1 %2671  ;;  %v2568_v21 = vmul.f32 %v12743_v27, %v12620_v54  ;;  %v2893_v45 = vmul.f32 %v12737_v38, %v12622_v55 }
 0x2db   : > { %v2298_v39 = vpop.permute.xlu0 %2297  ;;  %v2888_v18 = vmul.f32 %v12737_v38, %v2672_v49  ;;  %3155 = vperm.xlu1 %11744, %v12818_v48   ;;  %11873 = vtanh.f32 %v3020_v59  ;;  %v12832_v42 = vpop.eup %11861  ;;  %v3026_v54 = vadd.f32 %v12757_v15, %v2955_v56 }
 0x2dc   : > { %v3021_v47 = vadd.f32 %v12757_v15, %v2950_v12  ;;  %v2563_v6 = vmul.f32 %v12743_v27, %v2298_v39  ;;  %3160 = vperm.xlu0 %11743, %v12820_v33   ;;  %v2957_v55 = vadd.f32 %v2893_v45, %v2568_v21 }
 0x2de   : > { %11875 = vtanh.f32 %v3021_v47  ;;  %v2952_v37 = vadd.f32 %v2888_v18, %v2563_v6  ;;  %v12834_v43 = vpop.eup %11863  ;;  %v2680_v31 = vpop.permute.xlu1 %2679  ;;  %v2570_v47 = vmul.f32 %v12743_v27, %v12625_v57  ;;  %v2895_v18 = vmul.f32 %v12737_v38, %v12627_v58 }
 0x2df   : > { %v2308_v0 = vpop.permute.xlu0 %2307  ;;  %v2890_v24 = vmul.f32 %v12737_v38, %v2680_v31  ;;  %3165 = vperm.xlu1 %11744, %v12832_v42   ;;  %v12841_v52 = vpop.eup %11865  ;;  %11877 = vtanh.f32 %v3022_v36 }
 0x2e0   : > { %v3023_v32 = vadd.f32 %v12757_v15, %v2952_v37  ;;  %v2565_v51 = vmul.f32 %v12743_v27, %v2308_v0  ;;  %3170 = vperm.xlu0 %11743, %v12834_v43   ;;  %v2897_v0 = vmul.f32 %v12737_v38, %v12632_v63 }
 0x2e2   : > { %11879 = vtanh.f32 %v3023_v32  ;;  %v2954_v46 = vadd.f32 %v2890_v24, %v2565_v51  ;;  %v12848_v59 = vpop.eup %11867  ;;  %v2688_v9 = vpop.permute.xlu1 %2687  ;;  %v3028_v32 = vadd.f32 %v12757_v15, %v2957_v55  ;;  %v2959_v24 = vadd.f32 %v2895_v18, %v2570_v47 }
 0x2e3   : > { %v2318_v12 = vpop.permute.xlu0 %2317  ;;  %11881 = vtanh.f32 %v3024_v29  ;;  %v2892_v39 = vmul.f32 %v12737_v38, %v2688_v9  ;;  %3175 = vperm.xlu1 %11744, %v12841_v52   ;;  %v12860_v6 = vpop.eup %11869  ;;  %v2961_v45 = vadd.f32 %v2897_v0, %v2572_v4 }
 0x2e4   : > { %v3025_v49 = vadd.f32 %v12757_v15, %v2954_v46  ;;  %v2567_v40 = vmul.f32 %v12743_v27, %v2318_v12  ;;  %3180 = vperm.xlu0 %11743, %v12848_v59  }
 0x2e5   : > { %v3032_v4 = vadd.f32 %v12757_v15, %v2961_v45 }
 0x2e6   : > { %11883 = vtanh.f32 %v3025_v49  ;;  %v2956_v36 = vadd.f32 %v2892_v39, %v2567_v40  ;;  %v2696_v37 = vpop.permute.xlu1 %2695  ;;  %v3030_v49 = vadd.f32 %v12757_v15, %v2959_v24  ;;  %v2574_v39 = vmul.f32 %v12743_v27, %v12635_v1 }
 0x2e7   : > { %v12862_v60 = vpop.eup %11871  ;;  %v2328_v31 = vpop.permute.xlu0 %2327  ;;  %v2894_v58 = vmul.f32 %v12737_v38, %v2696_v37  ;;  %3185 = vperm.xlu1 %11744, %v12860_v6   ;;  %11885 = vtanh.f32 %v3026_v54  ;;  %v2899_v40 = vmul.f32 %v12737_v38, %v12637_v3 }
 0x2e8   : > { %v3027_v57 = vadd.f32 %v12757_v15, %v2956_v36  ;;  %v2569_v29 = vmul.f32 %v12743_v27, %v2328_v31  ;;  %3190 = vperm.xlu0 %11743, %v12862_v60   ;;  %v12874_v62 = vpop.eup %11873 }
 0x2e9   : > { %v2963_v0 = vadd.f32 %v2899_v40, %v2574_v39  ;;  %v2580_v40 = vmul.f32 %v12743_v27, %v12650_v10 }
 0x2ea   : > { %11887 = vtanh.f32 %v3027_v57  ;;  %v2958_v51 = vadd.f32 %v2894_v58, %v2569_v29  ;;  %v2704_v63 = vpop.permute.xlu1 %2703  ;;  %v2576_v57 = vmul.f32 %v12743_v27, %v12640_v5  ;;  %v2901_v58 = vmul.f32 %v12737_v38, %v12642_v2 }
 0x2eb   : > { %v12876_v56 = vpop.eup %11875  ;;  %v2338_v21 = vpop.permute.xlu0 %2337  ;;  %v2896_v9 = vmul.f32 %v12737_v38, %v2704_v63  ;;  %3195 = vperm.xlu1 %11744, %v12874_v62   ;;  %11889 = vtanh.f32 %v3028_v32  ;;  %v3034_v5 = vadd.f32 %v12757_v15, %v2963_v0 }
 0x2ec   : > { %v3029_v46 = vadd.f32 %v12757_v15, %v2958_v51  ;;  %v2571_v12 = vmul.f32 %v12743_v27, %v2338_v21  ;;  %3200 = vperm.xlu0 %11743, %v12876_v56   ;;  %v12888_v54 = vpop.eup %11877  ;;  %v2965_v2 = vadd.f32 %v2901_v58, %v2576_v57 }
 0x2ee   : > { %11891 = vtanh.f32 %v3029_v46  ;;  %v2960_v55 = vadd.f32 %v2896_v9, %v2571_v12  ;;  %v2712_v18 = vpop.permute.xlu1 %2711  ;;  %v2578_v46 = vmul.f32 %v12743_v27, %v12645_v7  ;;  %v2903_v9 = vmul.f32 %v12737_v38, %v12647_v8 }
 0x2ef   : > { %v12890_v47 = vpop.eup %11879  ;;  %v2348_v36 = vpop.permute.xlu0 %2347  ;;  %v2898_v31 = vmul.f32 %v12737_v38, %v2712_v18  ;;  %3205 = vperm.xlu1 %11744, %v12888_v54   ;;  %11893 = vtanh.f32 %v3030_v49 }
 0x2f0   : > { %v3031_v37 = vadd.f32 %v12757_v15, %v2960_v55  ;;  %v2573_v1 = vmul.f32 %v12743_v27, %v2348_v36  ;;  %v12897_v3 = vpop.eup %11881  ;;  %3210 = vperm.xlu0 %11743, %v12890_v47   ;;  %v2905_v36 = vmul.f32 %v12737_v38, %v12652_v11 }
 0x2f2   : > { %11895 = vtanh.f32 %v3031_v37  ;;  %v2962_v29 = vadd.f32 %v2898_v31, %v2573_v1  ;;  %v2720_v24 = vpop.permute.xlu1 %2719  ;;  %v3036_v37 = vadd.f32 %v12757_v15, %v2965_v2  ;;  %v2967_v31 = vadd.f32 %v2903_v9, %v2578_v46 }
 0x2f3   : > { %v12904_v32 = vpop.eup %11883  ;;  %v2358_v51 = vpop.permute.xlu0 %2357  ;;  %11897 = vtanh.f32 %v3032_v4  ;;  %v2900_v21 = vmul.f32 %v12737_v38, %v2720_v24  ;;  %3215 = vperm.xlu1 %11744, %v12897_v3   ;;  %v2969_v58 = vadd.f32 %v2905_v36, %v2580_v40 }
 0x2f4   : > { %v3033_v63 = vadd.f32 %v12757_v15, %v2962_v29  ;;  %v2575_v45 = vmul.f32 %v12743_v27, %v2358_v51  ;;  %3220 = vperm.xlu0 %11743, %v12904_v32   ;;  %v12916_v12 = vpop.eup %11885 }
 0x2f5   : > { %v3040_v40 = vadd.f32 %v12757_v15, %v2969_v58 }
 0x2f6   : > { %11899 = vtanh.f32 %v3033_v63  ;;  %v2964_v49 = vadd.f32 %v2900_v21, %v2575_v45  ;;  %v2728_v55 = vpop.permute.xlu1 %2727  ;;  %v3038_v63 = vadd.f32 %v12757_v15, %v2967_v31  ;;  %v2582_v21 = vmul.f32 %v12743_v27, %v12655_v13 }
 0x2f7   : > { %v12918_v39 = vpop.eup %11887  ;;  %v2368_v18 = vpop.permute.xlu0 %2367  ;;  %v2902_v8 = vmul.f32 %v12737_v38, %v2728_v55  ;;  %3225 = vperm.xlu1 %11744, %v12916_v12   ;;  %11901 = vtanh.f32 %v3034_v5  ;;  %v2907_v45 = vmul.f32 %v12737_v38, %v12657_v14 }
 0x2f8   : > { %v3035_v7 = vadd.f32 %v12757_v15, %v2964_v49  ;;  %v2577_v4 = vmul.f32 %v12743_v27, %v2368_v18  ;;  %3230 = vperm.xlu0 %11743, %v12918_v39   ;;  %v12930_v10 = vpop.eup %11889 }
 0x2f9   : > { %v2971_v36 = vadd.f32 %v2907_v45, %v2582_v21  ;;  %v2588_v45 = vmul.f32 %v12743_v27, %v12670_v22 }
 0x2fa   : > { %11903 = vtanh.f32 %v3035_v7  ;;  %v2966_v1 = vadd.f32 %v2902_v8, %v2577_v4  ;;  %v2736_v11 = vpop.permute.xlu1 %2735  ;;  %v2584_v7 = vmul.f32 %v12743_v27, %v12660_v16  ;;  %v2909_v8 = vmul.f32 %v12737_v38, %v12662_v17 }
 0x2fb   : > { %v12932_v0 = vpop.eup %11891  ;;  %v2378_v57 = vpop.permute.xlu0 %2377  ;;  %v2904_v24 = vmul.f32 %v12737_v38, %v2736_v11  ;;  %3235 = vperm.xlu1 %11744, %v12930_v10   ;;  %11905 = vtanh.f32 %v3036_v37  ;;  %v3042_v16 = vadd.f32 %v12757_v15, %v2971_v36 }
 0x2fc   : > { %v3037_v29 = vadd.f32 %v12757_v15, %v2966_v1  ;;  %v2579_v51 = vmul.f32 %v12743_v27, %v2378_v57  ;;  %3240 = vperm.xlu0 %11743, %v12932_v0   ;;  %v12944_v5 = vpop.eup %11893  ;;  %v2973_v17 = vadd.f32 %v2909_v8, %v2584_v7 }
 0x2fe   : > { %11907 = vtanh.f32 %v3037_v29  ;;  %v2968_v2 = vadd.f32 %v2904_v24, %v2579_v51  ;;  %v2744_v9 = vpop.permute.xlu1 %2743  ;;  %v2586_v29 = vmul.f32 %v12743_v27, %v12665_v19  ;;  %v2911_v24 = vmul.f32 %v12737_v38, %v12667_v20 }
 0x2ff   : > { %v12946_v46 = vpop.eup %11895  ;;  %v2388_v49 = vpop.permute.xlu0 %2387  ;;  %v2906_v18 = vmul.f32 %v12737_v38, %v2744_v9  ;;  %3245 = vperm.xlu1 %11744, %v12944_v5   ;;  %11909 = vtanh.f32 %v3038_v63 }
 0x300   : > { %v3039_v55 = vadd.f32 %v12757_v15, %v2968_v2  ;;  %v2581_v13 = vmul.f32 %v12743_v27, %v2388_v49  ;;  %v12953_v14 = vpop.eup %11897  ;;  %3250 = vperm.xlu0 %11743, %v12946_v46   ;;  %v2913_v49 = vmul.f32 %v12737_v38, %v12672_v23 }
 0x302   : > { %11911 = vtanh.f32 %v3039_v55  ;;  %v2970_v4 = vadd.f32 %v2906_v18, %v2581_v13  ;;  %v2752_v31 = vpop.permute.xlu1 %2751  ;;  %v3044_v55 = vadd.f32 %v12757_v15, %v2973_v17  ;;  %v2975_v18 = vadd.f32 %v2911_v24, %v2586_v29 }
 0x303   : > { %v12960_v37 = vpop.eup %11899  ;;  %v2398_v1 = vpop.permute.xlu0 %2397  ;;  %11913 = vtanh.f32 %v3040_v40  ;;  %v2908_v57 = vmul.f32 %v12737_v38, %v2752_v31  ;;  %3255 = vperm.xlu1 %11744, %v12953_v14   ;;  %v2977_v8 = vadd.f32 %v2913_v49, %v2588_v45 }
 0x304   : > { %v3041_v11 = vadd.f32 %v12757_v15, %v2970_v4  ;;  %v2583_v58 = vmul.f32 %v12743_v27, %v2398_v1  ;;  %3260 = vperm.xlu0 %11743, %v12960_v37   ;;  %v12972_v51 = vpop.eup %11901 }
 0x305   : > { %v3048_v45 = vadd.f32 %v12757_v15, %v2977_v8 }
 0x306   : > { %11915 = vtanh.f32 %v3041_v11  ;;  %v2972_v63 = vadd.f32 %v2908_v57, %v2583_v58  ;;  %v2760_v2 = vpop.permute.xlu1 %2759  ;;  %v3046_v11 = vadd.f32 %v12757_v15, %v2975_v18  ;;  %v2590_v57 = vmul.f32 %v12743_v27, %v12675_v25 }
 0x307   : > { %v12974_v21 = vpop.eup %11903  ;;  %v2408_v9 = vpop.permute.xlu0 %2407  ;;  %v2910_v20 = vmul.f32 %v12737_v38, %v2760_v2  ;;  %3265 = vperm.xlu1 %11744, %v12972_v51   ;;  %11917 = vtanh.f32 %v3042_v16  ;;  %v2915_v58 = vmul.f32 %v12737_v38, %v12677_v26 }
 0x308   : > { %v3043_v19 = vadd.f32 %v12757_v15, %v2972_v63  ;;  %v2585_v40 = vmul.f32 %v12743_v27, %v2408_v9  ;;  %3270 = vperm.xlu0 %11743, %v12974_v21   ;;  %v12986_v22 = vpop.eup %11905 }
 0x309   : > { %v2979_v49 = vadd.f32 %v2915_v58, %v2590_v57  ;;  %v2596_v58 = vmul.f32 %v12743_v27, %v12690_v50 }
 0x30a   : > { %11919 = vtanh.f32 %v3043_v19  ;;  %v2974_v13 = vadd.f32 %v2910_v20, %v2585_v40  ;;  %v2768_v23 = vpop.permute.xlu1 %2767  ;;  %v2592_v19 = vmul.f32 %v12743_v27, %v12680_v30  ;;  %v2917_v20 = vmul.f32 %v12737_v38, %v12682_v35 }
 0x30b   : > { %v12988_v36 = vpop.eup %11907  ;;  %v2418_v7 = vpop.permute.xlu0 %2417  ;;  %v2912_v31 = vmul.f32 %v12737_v38, %v2768_v23  ;;  %3275 = vperm.xlu1 %11744, %v12986_v22   ;;  %11921 = vtanh.f32 %v3044_v55  ;;  %v3050_v30 = vadd.f32 %v12757_v15, %v2979_v49 }
 0x30c   : > { %v3045_v4 = vadd.f32 %v12757_v15, %v2974_v13  ;;  %v2587_v1 = vmul.f32 %v12743_v27, %v2418_v7  ;;  %3280 = vperm.xlu0 %11743, %v12988_v36   ;;  %v13000_v16 = vpop.eup %11909  ;;  %v2981_v35 = vadd.f32 %v2917_v20, %v2592_v19 }
 0x30e   : > { %11923 = vtanh.f32 %v3045_v4  ;;  %v2976_v17 = vadd.f32 %v2912_v31, %v2587_v1  ;;  %v2776_v24 = vpop.permute.xlu1 %2775  ;;  %v2594_v4 = vmul.f32 %v12743_v27, %v12685_v41  ;;  %v2919_v31 = vmul.f32 %v12737_v38, %v12687_v44 }
 0x30f   : > { %v13002_v29 = vpop.eup %11911  ;;  %v2428_v63 = vpop.permute.xlu0 %2427  ;;  %v2914_v9 = vmul.f32 %v12737_v38, %v2776_v24  ;;  %3285 = vperm.xlu1 %11744, %v13000_v16   ;;  %11925 = vtanh.f32 %v3046_v11 }
 0x310   : > { %v3047_v2 = vadd.f32 %v12757_v15, %v2976_v17  ;;  %v2589_v25 = vmul.f32 %v12743_v27, %v2428_v63  ;;  %v13009_v26 = vpop.eup %11913  ;;  %3290 = vperm.xlu0 %11743, %v13002_v29   ;;  %v2921_v63 = vmul.f32 %v12737_v38, %v12692_v53 }
 0x312   : > { %11927 = vtanh.f32 %v3047_v2  ;;  %v2978_v40 = vadd.f32 %v2914_v9, %v2589_v25  ;;  %v2784_v18 = vpop.permute.xlu1 %2783  ;;  %v3052_v2 = vadd.f32 %v12757_v15, %v2981_v35  ;;  %v2983_v9 = vadd.f32 %v2919_v31, %v2594_v4 }
 0x313   : > { %v13016_v55 = vpop.eup %11915  ;;  %v2438_v13 = vpop.permute.xlu0 %2437  ;;  %11929 = vtanh.f32 %v3048_v45  ;;  %v2916_v7 = vmul.f32 %v12737_v38, %v2784_v18  ;;  %3295 = vperm.xlu1 %11744, %v13009_v26   ;;  %v2985_v20 = vadd.f32 %v2921_v63, %v2596_v58 }
 0x314   : > { %v3049_v23 = vadd.f32 %v12757_v15, %v2978_v40  ;;  %v2591_v8 = vmul.f32 %v12743_v27, %v2438_v13  ;;  %3300 = vperm.xlu0 %11743, %v13016_v55   ;;  %v13028_v1 = vpop.eup %11917 }
 0x316   : > { %11931 = vtanh.f32 %v3049_v23  ;;  %v2980_v11 = vadd.f32 %v2916_v7, %v2591_v8  ;;  %v2792_v17 = vpop.permute.xlu1 %2791  ;;  %v3054_v23 = vadd.f32 %v12757_v15, %v2983_v9  ;;  %v18548_v7 = vld [vmem:[#allocation6_spill] sm:$0xff]  ;;  %v18552_v9 = vld [vmem:[#allocation8_spill] sm:$0xff] }
 0x317   : > { %v13030_v57 = vpop.eup %11919  ;;  %v2448_v24 = vpop.permute.xlu0 %2447  ;;  %v2918_v44 = vmul.f32 %v12737_v38, %v2792_v17  ;;  %3305 = vperm.xlu1 %11744, %v13028_v1   ;;  %11933 = vtanh.f32 %v3050_v30  ;;  %v2598_v8 = vmul.f32 %v12743_v27, %v18548_v7  ;;  %v18549_v30 = vld [vmem:[#allocation7_spill] sm:$0xff] }
 0x318   : > { %v3051_v41 = vadd.f32 %v12757_v15, %v2980_v11  ;;  %v2593_v45 = vmul.f32 %v12743_v27, %v2448_v24  ;;  %3310 = vperm.xlu0 %11743, %v13030_v57   ;;  %v13042_v50 = vpop.eup %11921  ;;  %v2923_v35 = vmul.f32 %v12737_v38, %v18549_v30  ;;  %v3056_v24 = vadd.f32 %v12757_v15, %v2985_v20 }
 0x319   : > { %18547 = vst [vmem:[#allocation22_spill] sm:$0xff] %v13042_v50 }
 0x31a   : > { %11935 = vtanh.f32 %v3051_v41  ;;  %v2982_v25 = vadd.f32 %v2918_v44, %v2593_v45  ;;  %v2800_v53 = vpop.permute.xlu1 %2799 }
 0x31b   : > { %v13044_v49 = vpop.eup %11923  ;;  %v2458_v19 = vpop.permute.xlu0 %2457  ;;  %v2920_v18 = vmul.f32 %v12737_v38, %v2800_v53  ;;  %3315 = vperm.xlu1 %11744, %v13042_v50   ;;  %11937 = vtanh.f32 %v3052_v2  ;;  %v2987_v2 = vadd.f32 %v2923_v35, %v2598_v8  ;;  %v18553_v53 = vld [vmem:[#allocation9_spill] sm:$0xff] }
 0x31c   : > { %v3053_v40 = vadd.f32 %v12757_v15, %v2982_v25  ;;  %v2595_v13 = vmul.f32 %v12743_v27, %v2458_v19  ;;  %3320 = vperm.xlu0 %11743, %v13044_v49   ;;  %v13056_v4 = vpop.eup %11925  ;;  %v2600_v25 = vmul.f32 %v12743_v27, %v18552_v9  ;;  %v2925_v19 = vmul.f32 %v12737_v38, %v18553_v53  ;;  %v18557_v9 = vld [vmem:[#allocation12_spill] sm:$0xff] }
 0x31d   : > { %18550 = vst [vmem:[#allocation6_spill] sm:$0xff] %v13056_v4  ;;  %v3058_v30 = vadd.f32 %v12757_v15, %v2987_v2  ;;  %v2604_v53 = vmul.f32 %v12743_v27, %v18557_v9 }
 0x31e   : > { %11939 = vtanh.f32 %v3053_v40  ;;  %v2984_v31 = vadd.f32 %v2920_v18, %v2595_v13  ;;  %v2808_v58 = vpop.permute.xlu1 %2807  ;;  %v2989_v35 = vadd.f32 %v2925_v19, %v2600_v25  ;;  %v18558_v25 = vld [vmem:[#allocation13_spill] sm:$0xff] }
 0x31f   : > { %v13058_v11 = vpop.eup %11927  ;;  %v2468_v17 = vpop.permute.xlu0 %2467  ;;  %v2922_v41 = vmul.f32 %v12737_v38, %v2808_v58  ;;  %3325 = vperm.xlu1 %11744, %v13056_v4   ;;  %11941 = vtanh.f32 %v3054_v23  ;;  %v2929_v19 = vmul.f32 %v12737_v38, %v18558_v25 }
 0x320   : > { %v3055_v63 = vadd.f32 %v12757_v15, %v2984_v31  ;;  %v2597_v44 = vmul.f32 %v12743_v27, %v2468_v17  ;;  %v13065_v45 = vpop.eup %11929  ;;  %3330 = vperm.xlu0 %11743, %v13058_v11   ;;  %v18554_v31 = vld [vmem:[#allocation10_spill] sm:$0xff]  ;;  %v18555_v17 = vld [vmem:[#allocation11_spill] sm:$0xff] }
 0x321   : > { %18551 = vst [vmem:[#allocation7_spill] sm:$0xff] %v13065_v45  ;;  %v2602_v58 = vmul.f32 %v12743_v27, %v18554_v31 }
 0x322   : > { %11943 = vtanh.f32 %v3055_v63  ;;  %v2986_v20 = vadd.f32 %v2922_v41, %v2597_v44  ;;  %v2816_v18 = vpop.permute.xlu1 %2815  ;;  %v2927_v63 = vmul.f32 %v12737_v38, %v18555_v17 }
 0x323   : > { %v13072_v40 = vpop.eup %11931  ;;  %v2478_v13 = vpop.permute.xlu0 %2477  ;;  %11945 = vtanh.f32 %v3056_v24  ;;  %v2924_v23 = vmul.f32 %v12737_v38, %v2816_v18  ;;  %3335 = vperm.xlu1 %11744, %v13065_v45   ;;  %v2993_v45 = vadd.f32 %v2929_v19, %v2604_v53 }
 0x324   : > { %v3057_v7 = vadd.f32 %v12757_v15, %v2986_v20  ;;  %v2599_v8 = vmul.f32 %v12743_v27, %v2478_v13  ;;  %3340 = vperm.xlu0 %11743, %v13072_v40   ;;  %v13084_v24 = vpop.eup %11933 }
 0x325   : > { %18556 = vst [vmem:[#allocation8_spill] sm:$0xff] %v13084_v24 }
 0x326   : > { %11947 = vtanh.f32 %v3057_v7  ;;  %v2988_v41 = vadd.f32 %v2924_v23, %v2599_v8  ;;  %v2824_v20 = vpop.permute.xlu1 %2823  ;;  %v3060_v7 = vadd.f32 %v12757_v15, %v2989_v35  ;;  %v2991_v23 = vadd.f32 %v2927_v63, %v2602_v58  ;;  %v18560_v58 = vld [vmem:[#allocation14_spill] sm:$0xff] }
 0x327   : > { %v13086_v44 = vpop.eup %11935  ;;  %v2488_v2 = vpop.permute.xlu0 %2487  ;;  %v2926_v13 = vmul.f32 %v12737_v38, %v2824_v20  ;;  %3345 = vperm.xlu1 %11744, %v13084_v24   ;;  %11949 = vtanh.f32 %v3058_v30  ;;  %v2606_v63 = vmul.f32 %v12743_v27, %v18560_v58 }
 0x328   : > { %v3059_v18 = vadd.f32 %v12757_v15, %v2988_v41  ;;  %v2601_v31 = vmul.f32 %v12743_v27, %v2488_v2  ;;  %3350 = vperm.xlu0 %11743, %v13086_v44   ;;  %v13098_v8 = vpop.eup %11937  ;;  %v3062_v35 = vadd.f32 %v12757_v15, %v2991_v23 }
 0x329   : > { %18559 = vst [vmem:[#allocation9_spill] sm:$0xff] %v13098_v8 }
 0x32a   : > { %11951 = vtanh.f32 %v3059_v18  ;;  %v2990_v17 = vadd.f32 %v2926_v13, %v2601_v31  ;;  %v2832_v25 = vpop.permute.xlu1 %2831  ;;  %v18561_v18 = vld [vmem:[#allocation15_spill] sm:$0xff] }
 0x32b   : > { %v13100_v9 = vpop.eup %11939  ;;  %v2498_v41 = vpop.permute.xlu0 %2497  ;;  %v2928_v2 = vmul.f32 %v12737_v38, %v2832_v25  ;;  %3355 = vperm.xlu1 %11744, %v13098_v8   ;;  %11953 = vtanh.f32 %v3060_v7  ;;  %v2931_v13 = vmul.f32 %v12737_v38, %v18561_v18  ;;  %v3064_v7 = vadd.f32 %v12757_v15, %v2993_v45 }
 0x32c   : > { %v3061_v20 = vadd.f32 %v12757_v15, %v2990_v17  ;;  %v2603_v30 = vmul.f32 %v12743_v27, %v2498_v41  ;;  %3360 = vperm.xlu0 %11743, %v13100_v9   ;;  %v13112_v53 = vpop.eup %11941 }
 0x32d   : > { %18562 = vst [vmem:[#allocation10_spill] sm:$0xff] %v13112_v53  ;;  %v2995_v8 = vadd.f32 %v2931_v13, %v2606_v63 }
 0x32e   : > { %11955 = vtanh.f32 %v3061_v20  ;;  %v2992_v19 = vadd.f32 %v2928_v2, %v2603_v30  ;;  %v2840_v17 = vpop.permute.xlu1 %2839  ;;  %v18564_v20 = vld [vmem:[#allocation16_spill] sm:$0xff]  ;;  %v18565_v30 = vld [vmem:[#allocation17_spill] sm:$0xff] }
 0x32f   : > { %v13114_v31 = vpop.eup %11943  ;;  %v2508_v25 = vpop.permute.xlu0 %2507  ;;  %v2930_v41 = vmul.f32 %v12737_v38, %v2840_v17  ;;  %3365 = vperm.xlu1 %11744, %v13112_v53   ;;  %11957 = vtanh.f32 %v3062_v35  ;;  %v2608_v2 = vmul.f32 %v12743_v27, %v18564_v20  ;;  %v2933_v24 = vmul.f32 %v12737_v38, %v18565_v30  ;;  %v18566_v30 = vld [vmem:[#allocation18_spill] sm:$0xff] }
 0x330   : > { %v3063_v23 = vadd.f32 %v12757_v15, %v2992_v19  ;;  %v2605_v58 = vmul.f32 %v12743_v27, %v2508_v25  ;;  %v13121_v18 = vpop.eup %11945  ;;  %3370 = vperm.xlu0 %11743, %v13114_v31   ;;  %v3066_v13 = vadd.f32 %v12757_v15, %v2995_v8 }
 0x331   : > { %18563 = vst [vmem:[#allocation11_spill] sm:$0xff] %v13121_v18  ;;  %v2997_v20 = vadd.f32 %v2933_v24, %v2608_v2 }
 0x332   : > { %11959 = vtanh.f32 %v3063_v23  ;;  %v2994_v45 = vadd.f32 %v2930_v41, %v2605_v58  ;;  %v2848_v17 = vpop.permute.xlu1 %2847  ;;  %v2610_v23 = vmul.f32 %v12743_v27, %v18566_v30  ;;  %v18567_v41 = vld [vmem:[#allocation19_spill] sm:$0xff] }
 0x333   : > { %v13128_v19 = vpop.eup %11947  ;;  %v2518_v25 = vpop.permute.xlu0 %2517  ;;  %11961 = vtanh.f32 %v3064_v7  ;;  %v2932_v35 = vmul.f32 %v12737_v38, %v2848_v17  ;;  %3375 = vperm.xlu1 %11744, %v13121_v18   ;;  %v2935_v58 = vmul.f32 %v12737_v38, %v18567_v41  ;;  %v3068_v2 = vadd.f32 %v12757_v15, %v2997_v20  ;;  %v18571_v41 = vld [vmem:[#allocation21_spill] sm:$0xff] }
 0x334   : > { %v3065_v53 = vadd.f32 %v12757_v15, %v2994_v45  ;;  %v2607_v63 = vmul.f32 %v12743_v27, %v2518_v25  ;;  %3380 = vperm.xlu0 %11743, %v13128_v19   ;;  %v13140_v7 = vpop.eup %11949 }
 0x335   : > { %18568 = vst [vmem:[#allocation12_spill] sm:$0xff] %v13140_v7  ;;  %v2999_v30 = vadd.f32 %v2935_v58, %v2610_v23 }
 0x336   : > { %11963 = vtanh.f32 %v3065_v53  ;;  %v2996_v45 = vadd.f32 %v2932_v35, %v2607_v63  ;;  %v2856_v25 = vpop.permute.xlu1 %2855  ;;  %v18570_v35 = vld [vmem:[#allocation20_spill] sm:$0xff] }
 0x337   : > { %v13142_v17 = vpop.eup %11951  ;;  %v2528_v4 = vpop.permute.xlu0 %2527  ;;  %v2934_v24 = vmul.f32 %v12737_v38, %v2856_v25  ;;  %3385 = vperm.xlu1 %11744, %v13140_v7   ;;  %11965 = vtanh.f32 %v3066_v13  ;;  %v2612_v63 = vmul.f32 %v12743_v27, %v18570_v35  ;;  %v3070_v58 = vadd.f32 %v12757_v15, %v2999_v30 }
 0x338   : > { %v3067_v18 = vadd.f32 %v12757_v15, %v2996_v45  ;;  %v2609_v8 = vmul.f32 %v12743_v27, %v2528_v4  ;;  %3390 = vperm.xlu0 %11743, %v13142_v17   ;;  %v13150_v53 = vpop.eup %11953  ;;  %v2937_v45 = vmul.f32 %v12737_v38, %v18571_v41 }
 0x339   : > { %18569 = vst [vmem:[#allocation13_spill] sm:$0xff] %v13150_v53 }
 0x33a   : > { %11967 = vtanh.f32 %v3067_v18  ;;  %v2998_v25 = vadd.f32 %v2934_v24, %v2609_v8  ;;  %v2864_v4 = vpop.permute.xlu1 %2863  ;;  %v3001_v18 = vadd.f32 %v2937_v45, %v2612_v63 }
 0x33b   : > { %v13156_v50 = vpop.eup %11955  ;;  %v2538_v7 = vpop.permute.xlu0 %2537  ;;  %v2936_v20 = vmul.f32 %v12737_v38, %v2864_v4  ;;  %3395 = vperm.xlu1 %11744, %v13150_v53   ;;  %11969 = vtanh.f32 %v3068_v2 }
 0x33c   : > { %v3069_v13 = vadd.f32 %v12757_v15, %v2998_v25  ;;  %v2611_v23 = vmul.f32 %v12743_v27, %v2538_v7  ;;  %3400 = vperm.xlu0 %11743, %v13156_v50   ;;  %v13164_v35 = vpop.eup %11957  ;;  %v3072_v27 = vadd.f32 %v12757_v15, %v3001_v18  ;;  %v4441_v18 = vld [vmem:[%s12283_s23 + $0x20] sm:$0xff] }
 0x33d   : > { %18572 = vst [vmem:[#allocation14_spill] sm:$0xff] %v13164_v35 }
 0x33e   : > { %11971 = vtanh.f32 %v3069_v13  ;;  %v3000_v24 = vadd.f32 %v2936_v20, %v2611_v23  ;;  %v4438_v13 = vld [vmem:[%s12283_s23 + $0x8] sm:$0xff] }
 0x33f   : > { %v13166_v8 = vpop.eup %11959  ;;  %3405 = vperm.xlu1 %11744, %v13164_v35   ;;  %11973 = vtanh.f32 %v3070_v58 }
 0x340   : > { %v3071_v41 = vadd.f32 %v12757_v15, %v3000_v24  ;;  %v13170_v38 = vpop.eup %11961  ;;  %3410 = vperm.xlu0 %11743, %v13166_v8  }
 0x341   : > { %18573 = vst [vmem:[#allocation15_spill] sm:$0xff] %v13170_v38 }
 0x342   : > { %11975 = vtanh.f32 %v3071_v41 }
 0x343   : > { %v13174_v7 = vpop.eup %11963  ;;  %3415 = vperm.xlu1 %11744, %v13170_v38   ;;  %11977 = vtanh.f32 %v3072_v27  ;;  %v18579_v27 = vmov 1  }
 0x344   : > { %3420 = vperm.xlu0 %11743, %v13174_v7   ;;  %v13178_v2 = vpop.eup %11965 }
 0x345   : > { %18574 = vst [vmem:[#allocation16_spill] sm:$0xff] %v13178_v2 }
 0x347   : > { %v13180_v30 = vpop.eup %11967  ;;  %3425 = vperm.xlu1 %11744, %v13178_v2  }
 0x348   : > { %3430 = vperm.xlu0 %11743, %v13180_v30   ;;  %v13184_v63 = vpop.eup %11969 }
 0x349   : > { %18575 = vst [vmem:[#allocation17_spill] sm:$0xff] %v13184_v63 }
 0x34b   : > { %v13186_v15 = vpop.eup %11971  ;;  %3435 = vperm.xlu1 %11744, %v13184_v63  }
 0x34c   : > { %3440 = vperm.xlu0 %11743, %v13186_v15   ;;  %v13190_v45 = vpop.eup %11973 }
 0x34d   : > { %18576 = vst [vmem:[#allocation18_spill] sm:$0xff] %v13190_v45 }
 0x34e   : > { %v13194_v4 = vpop.permute.xlu1 %3140 }
 0x34f   : > { %v13192_v25 = vpop.eup %11975  ;;  %3445 = vperm.xlu1 %11744, %v13190_v45  }
 0x350   : > { %18577 = vst [vmem:[#allocation19_spill] sm:$0xff] %v13192_v25  ;;  %3450 = vperm.xlu0 %11743, %v13192_v25   ;;  %v13199_v20 = vpop.eup %11977  ;;  %v4443_v25 = vld [vmem:[%s12283_s23 + $0x30] sm:$0xff] }
 0x351   : > { %18578 = vst [vmem:[#allocation20_spill] sm:$0xff] %v13199_v20 }
 0x352   : > { %v13201_v23 = vpop.permute.xlu1 %3150 }
 0x353   : > { %v13203_v58 = vpop.permute.xlu0 %3145  ;;  %3455 = vperm.xlu1 %11744, %v13199_v20  }
 0x354   : > { %4510 = vperm.xlu0 %11743, %v4438_v13   ;;  %v4445_v13 = vld [vmem:[%s12283_s23 + $0x40] sm:$0xff] }
 0x356   : > { %v13207_v24 = vpop.permute.xlu1 %3155 }
 0x357   : > { %v13209_v41 = vpop.permute.xlu0 %3160  ;;  %11745 = vset.pattern.permute.xlu1 %v18579_v27 }
 0x358   : > { %4519 = vperm.xlu0 %11743, %v4441_v18   ;;  %3729 = vperm.xlu1 %11745, %v12808_v28   ;;  %v4447_v28 = vld [vmem:[%s12283_s23 + $0x50] sm:$0xff] }
 0x35a   : > { %v13214_v45 = vpop.permute.xlu1 %3165 }
 0x35b   : > { %v13216_v63 = vpop.permute.xlu0 %3170 }
 0x35c   : > { %4525 = vperm.xlu0 %11743, %v4443_v25   ;;  %3733 = vperm.xlu1 %11745, %v12804_v61   ;;  %v4449_v61 = vld [vmem:[%s12283_s23 + $0x60] sm:$0xff] }
 0x35e   : > { %v13220_v20 = vpop.permute.xlu1 %3175 }
 0x35f   : > { %v13222_v2 = vpop.permute.xlu0 %3180 }
 0x360   : > { %4531 = vperm.xlu0 %11743, %v4445_v13   ;;  %3741 = vperm.xlu1 %11745, %v12820_v33   ;;  %v4451_v33 = vld [vmem:[%s12283_s23 + $0x70] sm:$0xff] }
 0x362   : > { %v13226_v18 = vpop.permute.xlu1 %3185 }
 0x363   : > { %v13228_v38 = vpop.permute.xlu0 %3190 }
 0x364   : > { %18580 = vst [vmem:[#allocation21_spill] sm:$0xff] %v13228_v38  ;;  %4537 = vperm.xlu0 %11743, %v4447_v28   ;;  %3749 = vperm.xlu1 %11745, %v12834_v43   ;;  %v4453_v43 = vld [vmem:[%s12283_s23 + $0x80] sm:$0xff] }
 0x366   : > { %v13232_v25 = vpop.permute.xlu1 %3195 }
 0x367   : > { %v13234_v35 = vpop.permute.xlu0 %3200 }
 0x368   : > { %18581 = vst [vmem:[#allocation23_spill] sm:$0xff] %v13234_v35  ;;  %4543 = vperm.xlu0 %11743, %v4449_v61   ;;  %3757 = vperm.xlu1 %11745, %v12848_v59   ;;  %v4455_v59 = vld [vmem:[%s12283_s23 + $0x90] sm:$0xff] }
 0x36a   : > { %v13238_v13 = vpop.permute.xlu1 %3205 }
 0x36b   : > { %v13240_v53 = vpop.permute.xlu0 %3210 }
 0x36c   : > { %18582 = vst [vmem:[#allocation24_spill] sm:$0xff] %v13240_v53  ;;  %4549 = vperm.xlu0 %11743, %v4451_v33   ;;  %3765 = vperm.xlu1 %11745, %v12862_v60   ;;  %v4457_v60 = vld [vmem:[%s12283_s23 + $0xa0] sm:$0xff] }
 0x36e   : > { %v13244_v28 = vpop.permute.xlu1 %3215 }
 0x36f   : > { %v13246_v38 = vpop.permute.xlu0 %3220 }
 0x370   : > { %18583 = vst [vmem:[#allocation25_spill] sm:$0xff] %v13246_v38  ;;  %4555 = vperm.xlu0 %11743, %v4453_v43   ;;  %3773 = vperm.xlu1 %11745, %v12876_v56   ;;  %v4459_v56 = vld [vmem:[%s12283_s23 + $0xb0] sm:$0xff] }
 0x372   : > { %v13250_v61 = vpop.permute.xlu1 %3225 }
 0x373   : > { %v13252_v35 = vpop.permute.xlu0 %3230 }
 0x374   : > { %18584 = vst [vmem:[#allocation26_spill] sm:$0xff] %v13252_v35  ;;  %4561 = vperm.xlu0 %11743, %v4455_v59   ;;  %3781 = vperm.xlu1 %11745, %v12890_v47   ;;  %v4461_v47 = vld [vmem:[%s12283_s23 + $0xc0] sm:$0xff] }
 0x376   : > { %v13256_v33 = vpop.permute.xlu1 %3235 }
 0x377   : > { %v13258_v53 = vpop.permute.xlu0 %3240 }
 0x378   : > { %18585 = vst [vmem:[#allocation27_spill] sm:$0xff] %v13258_v53  ;;  %4567 = vperm.xlu0 %11743, %v4457_v60   ;;  %3789 = vperm.xlu1 %11745, %v12904_v32   ;;  %v4463_v32 = vld [vmem:[%s12283_s23 + $0xd0] sm:$0xff] }
 0x37a   : > { %v13262_v43 = vpop.permute.xlu1 %3245 }
 0x37b   : > { %v13264_v38 = vpop.permute.xlu0 %3250 }
 0x37c   : > { %18586 = vst [vmem:[#allocation28_spill] sm:$0xff] %v13264_v38  ;;  %4573 = vperm.xlu0 %11743, %v4459_v56   ;;  %3797 = vperm.xlu1 %11745, %v12918_v39   ;;  %v4465_v39 = vld [vmem:[%s12283_s23 + $0xe0] sm:$0xff] }
 0x37e   : > { %v13268_v59 = vpop.permute.xlu1 %3255 }
 0x37f   : > { %v13270_v35 = vpop.permute.xlu0 %3260 }
 0x380   : > { %18587 = vst [vmem:[#allocation29_spill] sm:$0xff] %v13270_v35  ;;  %4579 = vperm.xlu0 %11743, %v4461_v47   ;;  %3805 = vperm.xlu1 %11745, %v12932_v0   ;;  %v4467_v47 = vld [vmem:[%s12283_s23 + $0xf0] sm:$0xff] }
 0x382   : > { %v13274_v60 = vpop.permute.xlu1 %3265 }
 0x383   : > { %v13276_v53 = vpop.permute.xlu0 %3270 }
 0x384   : > { %18588 = vst [vmem:[#allocation30_spill] sm:$0xff] %v13276_v53  ;;  %4585 = vperm.xlu0 %11743, %v4463_v32   ;;  %3813 = vperm.xlu1 %11745, %v12946_v46   ;;  %v4469_v32 = vld [vmem:[%s12283_s23 + $0x100] sm:$0xff] }
 0x386   : > { %v13280_v56 = vpop.permute.xlu1 %3275 }
 0x387   : > { %v13282_v38 = vpop.permute.xlu0 %3280 }
 0x388   : > { %18589 = vst [vmem:[#allocation31_spill] sm:$0xff] %v13282_v38  ;;  %4591 = vperm.xlu0 %11743, %v4465_v39   ;;  %3821 = vperm.xlu1 %11745, %v12960_v37   ;;  %v4471_v39 = vld [vmem:[%s12283_s23 + $0x110] sm:$0xff] }
 0x38a   : > { %v13286_v0 = vpop.permute.xlu1 %3285 }
 0x38b   : > { %18590 = vst [vmem:[#allocation32_spill] sm:$0xff] %v13286_v0  ;;  %v13288_v35 = vpop.permute.xlu0 %3290 }
 0x38c   : > { %18591 = vst [vmem:[#allocation33_spill] sm:$0xff] %v13288_v35  ;;  %4597 = vperm.xlu0 %11743, %v4467_v47   ;;  %3829 = vperm.xlu1 %11745, %v12974_v21   ;;  %v11755_v47 = vld [vmem:[#allocation2 + $0xa8] ss:$12 sps:$4 sm:$0xff]   ;;  %v4473_v21 = vld [vmem:[%s12283_s23 + $0x120] sm:$0xff] }
 0x38d   : > { %v11756_v35 = vld [vmem:[#allocation2 + $0x228] ss:$12 sps:$4 sm:$0xff]   ;;  %5851 = vmatpush1.bf16.msra.mxu0 %v11755_v47  ;;  %v11760_v47 = vld [vmem:[#allocation2 + $0x1f8] ss:$12 sps:$4 sm:$0xff]  }
 0x38e   : > { %v13292_v46 = vpop.permute.xlu1 %3295  ;;  %6140 = vmatpush1.bf16.msra.mxu1 %v11756_v35  ;;  %v11759_v35 = vld [vmem:[#allocation2 + $0x78] ss:$12 sps:$4 sm:$0xff]  }
 0x38f   : > { %v13294_v53 = vpop.permute.xlu0 %3300 }
 0x390   : > { %18592 = vst [vmem:[#allocation34_spill] sm:$0xff] %v13294_v53  ;;  %4603 = vperm.xlu0 %11743, %v4469_v32   ;;  %3837 = vperm.xlu1 %11745, %v12988_v36   ;;  %v18595_v32 = vmov 0   ;;  %v11757_v36 = vld [vmem:[#allocation2 + $0x90] ss:$12 sps:$4 sm:$0xff]  }
 0x391   : > { %5852 = vmatprep.subr.bf16.mxu0 %v18595_v32  ;;  %6141 = vmatprep.subr.bf16.mxu1 %v18595_v32 }
 0x392   : > { %v13298_v38 = vpop.permute.xlu1 %3305  ;;  %5853 = vmatpush1.bf16.msra.mxu0 %v11757_v36  ;;  %v11761_v36 = vld [vmem:[#allocation2 + $0x60] ss:$12 sps:$4 sm:$0xff]  }
 0x393   : > { %v13300_v37 = vpop.permute.xlu0 %3310  ;;  %5854 = vmatprep.subr.bf16.mxu0 %v18595_v32 }
 0x394   : > { %18593 = vst [vmem:[#allocation35_spill] sm:$0xff] %v13300_v37  ;;  %4609 = vperm.xlu0 %11743, %v4471_v39   ;;  %3845 = vperm.xlu1 %11745, %v13002_v29   ;;  %v11758_v39 = vld [vmem:[#allocation2 + $0x210] ss:$12 sps:$4 sm:$0xff]  }
 0x395   : > { %v4475_v29 = vld [vmem:[%s12283_s23 + $0x130] sm:$0xff]  ;;  %6142 = vmatpush1.bf16.msra.mxu1 %v11758_v39  ;;  %v11762_v39 = vld [vmem:[#allocation2 + $0x1e0] ss:$12 sps:$4 sm:$0xff]  }
 0x396   : > { %v13304_v0 = vpop.permute.xlu1 %3315  ;;  %6143 = vmatprep.subr.bf16.mxu1 %v18595_v32  ;;  %5855 = vmatpush1.bf16.msra.mxu0 %v11759_v35  ;;  %v11763_v35 = vld [vmem:[#allocation2 + $0x48] ss:$12 sps:$4 sm:$0xff]  }
 0x397   : > { %18594 = vst [vmem:[#allocation36_spill] sm:$0xff] %v13304_v0  ;;  %v13306_v53 = vpop.permute.xlu0 %3320  ;;  %5856 = vmatprep.subr.bf16.mxu0 %v18595_v32 }
 0x398   : > { %4615 = vperm.xlu0 %11743, %v4473_v21   ;;  %3853 = vperm.xlu1 %11745, %v13016_v55   ;;  %v4477_v55 = vld [vmem:[%s12283_s23 + $0x140] sm:$0xff] }
 0x399   : > { %6144 = vmatpush1.bf16.msra.mxu1 %v11760_v47  ;;  %v11764_v47 = vld [vmem:[#allocation2 + $0x1c8] ss:$12 sps:$4 sm:$0xff]  }
 0x39a   : > { %v13312_v37 = vpop.permute.xlu1 %3325  ;;  %6145 = vmatprep.subr.bf16.mxu1 %v18595_v32  ;;  %5857 = vmatpush1.bf16.msra.mxu0 %v11761_v36  ;;  %v11765_v36 = vld [vmem:[#allocation2 + $0x30] ss:$12 sps:$4 sm:$0xff]  }
 0x39b   : > { %18596 = vst [vmem:[#allocation37_spill] sm:$0xff] %v13312_v37  ;;  %v13314_v0 = vpop.permute.xlu0 %3330  ;;  %5858 = vmatprep.subr.bf16.mxu0 %v18595_v32 }
 0x39c   : > { %4621 = vperm.xlu0 %11743, %v4475_v29   ;;  %3861 = vperm.xlu1 %11745, %v13030_v57   ;;  %v4479_v57 = vld [vmem:[%s12283_s23 + $0x150] sm:$0xff] }
 0x39d   : > { %6146 = vmatpush1.bf16.msra.mxu1 %v11762_v39  ;;  %v11766_v39 = vld [vmem:[#allocation2 + $0x1b0] ss:$12 sps:$4 sm:$0xff]  }
 0x39e   : > { %v13320_v21 = vpop.permute.xlu1 %3335  ;;  %6147 = vmatprep.subr.bf16.mxu1 %v18595_v32  ;;  %5859 = vmatpush1.bf16.msra.mxu0 %v11763_v35  ;;  %v11767_v35 = vld [vmem:[#allocation2 + $0x18] ss:$12 sps:$4 sm:$0xff]  }
 0x39f   : > { %18597 = vst [vmem:[#allocation38_spill] sm:$0xff] %v13320_v21  ;;  %v13322_v37 = vpop.permute.xlu0 %3340  ;;  %5860 = vmatprep.subr.bf16.mxu0 %v18595_v32 }
 0x3a0   : > { %4627 = vperm.xlu0 %11743, %v4477_v55   ;;  %3869 = vperm.xlu1 %11745, %v13044_v49   ;;  %v4481_v49 = vld [vmem:[%s12283_s23 + $0x160] sm:$0xff] }
 0x3a1   : > { %6148 = vmatpush1.bf16.msra.mxu1 %v11764_v47  ;;  %v11768_v47 = vld [vmem:[#allocation2 + $0x198] ss:$12 sps:$4 sm:$0xff]  }
 0x3a2   : > { %v13328_v29 = vpop.permute.xlu1 %3345  ;;  %6149 = vmatprep.subr.bf16.mxu1 %v18595_v32  ;;  %5861 = vmatpush1.bf16.msra.mxu0 %v11765_v36  ;;  %v11769_v36 = vld [vmem:[#allocation2] ss:$12 sps:$4 sm:$0xff]  }
 0x3a3   : > { %18598 = vst [vmem:[#allocation39_spill] sm:$0xff] %v13328_v29  ;;  %v13330_v21 = vpop.permute.xlu0 %3350  ;;  %5862 = vmatprep.subr.bf16.mxu0 %v18595_v32 }
 0x3a4   : > { %4633 = vperm.xlu0 %11743, %v4479_v57   ;;  %3877 = vperm.xlu1 %11745, %v13058_v11   ;;  %v4483_v11 = vld [vmem:[%s12283_s23 + $0x170] sm:$0xff] }
 0x3a5   : > { %6150 = vmatpush1.bf16.msra.mxu1 %v11766_v39  ;;  %v11770_v39 = vld [vmem:[#allocation2 + $0x180] ss:$12 sps:$4 sm:$0xff]  }
 0x3a6   : > { %v13336_v55 = vpop.permute.xlu1 %3355  ;;  %6151 = vmatprep.subr.bf16.mxu1 %v18595_v32  ;;  %5863 = vmatpush1.bf16.msra.mxu0 %v11767_v35  ;;  %v11771_v35 = vld [vmem:[#allocation2 + $0x168] ss:$12 sps:$4 sm:$0xff]  }
 0x3a7   : > { %18599 = vst [vmem:[#allocation40_spill] sm:$0xff] %v13336_v55  ;;  %v13338_v29 = vpop.permute.xlu0 %3360  ;;  %5864 = vmatprep.subr.bf16.mxu0 %v18595_v32 }
 0x3a8   : > { %4639 = vperm.xlu0 %11743, %v4481_v49   ;;  %3885 = vperm.xlu1 %11745, %v13072_v40   ;;  %v4485_v40 = vld [vmem:[%s12283_s23 + $0x180] sm:$0xff] }
 0x3a9   : > { %6152 = vmatpush1.bf16.msra.mxu1 %v11768_v47  ;;  %v11772_v47 = vld [vmem:[#allocation2 + $0x2e8] ss:$12 sps:$4 sm:$0xff]  }
 0x3aa   : > { %v13344_v57 = vpop.permute.xlu1 %3365  ;;  %6153 = vmatprep.subr.bf16.mxu1 %v18595_v32  ;;  %5865 = vmatpush1.bf16.msra.mxu0 %v11769_v36  ;;  %v11773_v36 = vld [vmem:[#allocation2 + $0x150] ss:$12 sps:$4 sm:$0xff]  }
 0x3ab   : > { %18600 = vst [vmem:[#allocation41_spill] sm:$0xff] %v13344_v57  ;;  %v13346_v55 = vpop.permute.xlu0 %3370  ;;  %5866 = vmatprep.subr.bf16.mxu0 %v18595_v32 }
 0x3ac   : > { %4645 = vperm.xlu0 %11743, %v4483_v11   ;;  %3893 = vperm.xlu1 %11745, %v13086_v44   ;;  %v4487_v44 = vld [vmem:[%s12283_s23 + $0x190] sm:$0xff] }
 0x3ad   : > { %6154 = vmatpush1.bf16.msra.mxu1 %v11770_v39  ;;  %v11774_v39 = vld [vmem:[#allocation2 + $0x2d0] ss:$12 sps:$4 sm:$0xff]  }
 0x3ae   : > { %v13352_v49 = vpop.permute.xlu1 %3375  ;;  %6155 = vmatprep.subr.bf16.mxu1 %v18595_v32  ;;  %5867 = vmatpush2.bf16.msra.mxu0 %v11771_v35  ;;  %v11775_v35 = vld [vmem:[#allocation2 + $0x138] ss:$12 sps:$4 sm:$0xff]  }
 0x3af   : > { %18601 = vst [vmem:[#allocation42_spill] sm:$0xff] %v13352_v49  ;;  %v13354_v57 = vpop.permute.xlu0 %3380  ;;  %5868 = vmatprep.subr.bf16.mxu0 %v18595_v32 }
 0x3b0   : > { %4651 = vperm.xlu0 %11743, %v4485_v40   ;;  %3901 = vperm.xlu1 %11745, %v13100_v9   ;;  %v4489_v9 = vld [vmem:[%s12283_s23 + $0x1a0] sm:$0xff] }
 0x3b1   : > { %6156 = vmatpush2.bf16.msra.mxu1 %v11772_v47  ;;  %v11776_v47 = vld [vmem:[#allocation2 + $0x2b8] ss:$12 sps:$4 sm:$0xff]  }
 0x3b2   : > { %v13360_v11 = vpop.permute.xlu1 %3385  ;;  %6157 = vmatprep.subr.bf16.mxu1 %v18595_v32  ;;  %5869 = vmatpush2.bf16.msra.mxu0 %v11773_v36  ;;  %v11777_v36 = vld [vmem:[#allocation2 + $0x120] ss:$12 sps:$4 sm:$0xff]  }
 0x3b3   : > { %18602 = vst [vmem:[#allocation43_spill] sm:$0xff] %v13360_v11  ;;  %v13362_v49 = vpop.permute.xlu0 %3390  ;;  %5870 = vmatprep.subr.bf16.mxu0 %v18595_v32 }
 0x3b4   : > { %4657 = vperm.xlu0 %11743, %v4487_v44   ;;  %3909 = vperm.xlu1 %11745, %v13114_v31   ;;  %v4491_v31 = vld [vmem:[%s12283_s23 + $0x1b0] sm:$0xff] }
 0x3b5   : > { %6158 = vmatpush2.bf16.msra.mxu1 %v11774_v39  ;;  %v11778_v39 = vld [vmem:[#allocation2 + $0x2a0] ss:$12 sps:$4 sm:$0xff]  }
 0x3b6   : > { %v13368_v40 = vpop.permute.xlu1 %3395  ;;  %6159 = vmatprep.subr.bf16.mxu1 %v18595_v32  ;;  %5871 = vmatpush2.bf16.msra.mxu0 %v11775_v35  ;;  %v11779_v35 = vld [vmem:[#allocation2 + $0x108] ss:$12 sps:$4 sm:$0xff]  }
 0x3b7   : > { %18603 = vst [vmem:[#allocation44_spill] sm:$0xff] %v13368_v40  ;;  %v13370_v11 = vpop.permute.xlu0 %3400  ;;  %5872 = vmatprep.subr.bf16.mxu0 %v18595_v32 }
 0x3b8   : > { %4663 = vperm.xlu0 %11743, %v4489_v9   ;;  %3917 = vperm.xlu1 %11745, %v13128_v19   ;;  %v4493_v19 = vld [vmem:[%s12283_s23 + $0x1c0] sm:$0xff] }
 0x3b9   : > { %6160 = vmatpush2.bf16.msra.mxu1 %v11776_v47  ;;  %v11780_v47 = vld [vmem:[#allocation2 + $0x288] ss:$12 sps:$4 sm:$0xff]  }
 0x3ba   : > { %v13376_v44 = vpop.permute.xlu1 %3405  ;;  %6161 = vmatprep.subr.bf16.mxu1 %v18595_v32  ;;  %5873 = vmatpush2.bf16.msra.mxu0 %v11777_v36  ;;  %v11781_v36 = vld [vmem:[#allocation2 + $0xf0] ss:$12 sps:$4 sm:$0xff]  }
 0x3bb   : > { %18604 = vst [vmem:[#allocation45_spill] sm:$0xff] %v13376_v44  ;;  %v13378_v40 = vpop.permute.xlu0 %3410  ;;  %5874 = vmatprep.subr.bf16.mxu0 %v18595_v32 }
 0x3bc   : > { %4669 = vperm.xlu0 %11743, %v4491_v31   ;;  %3925 = vperm.xlu1 %11745, %v13142_v17   ;;  %v4495_v17 = vld [vmem:[%s12283_s23 + $0x1d0] sm:$0xff] }
 0x3bd   : > { %6162 = vmatpush2.bf16.msra.mxu1 %v11778_v39  ;;  %v11782_v39 = vld [vmem:[#allocation2 + $0x270] ss:$12 sps:$4 sm:$0xff]  }
 0x3be   : > { %v13384_v9 = vpop.permute.xlu1 %3415  ;;  %6163 = vmatprep.subr.bf16.mxu1 %v18595_v32  ;;  %5875 = vmatpush2.bf16.msra.mxu0 %v11779_v35  ;;  %v11783_v35 = vld [vmem:[#allocation2 + $0xd8] ss:$12 sps:$4 sm:$0xff]  }
 0x3bf   : > { %18605 = vst [vmem:[#allocation46_spill] sm:$0xff] %v13384_v9  ;;  %v13386_v44 = vpop.permute.xlu0 %3420  ;;  %5876 = vmatprep.subr.bf16.mxu0 %v18595_v32 }
 0x3c0   : > { %4675 = vperm.xlu0 %11743, %v4493_v19   ;;  %3933 = vperm.xlu1 %11745, %v13156_v50   ;;  %v4497_v50 = vld [vmem:[%s12283_s23 + $0x1e0] sm:$0xff] }
 0x3c1   : > { %6164 = vmatpush2.bf16.msra.mxu1 %v11780_v47  ;;  %v11784_v47 = vld [vmem:[#allocation2 + $0x258] ss:$12 sps:$4 sm:$0xff]  }
 0x3c2   : > { %v13392_v31 = vpop.permute.xlu1 %3425  ;;  %6165 = vmatprep.subr.bf16.mxu1 %v18595_v32  ;;  %5877 = vmatpush2.bf16.msra.mxu0 %v11781_v36  ;;  %v11785_v36 = vld [vmem:[#allocation2 + $0xc0] ss:$12 sps:$4 sm:$0xff]  }
 0x3c3   : > { %18606 = vst [vmem:[#allocation47_spill] sm:$0xff] %v13392_v31  ;;  %v13394_v9 = vpop.permute.xlu0 %3430  ;;  %5878 = vmatprep.subr.bf16.mxu0 %v18595_v32 }
 0x3c4   : > { %18607 = vst [vmem:[#allocation48_spill] sm:$0xff] %v13394_v9  ;;  %4681 = vperm.xlu0 %11743, %v4495_v17   ;;  %3941 = vperm.xlu1 %11745, %v13166_v8   ;;  %v4499_v17 = vld [vmem:[%s12283_s23 + $0x1f0] sm:$0xff] }
 0x3c5   : > { %6166 = vmatpush2.bf16.msra.mxu1 %v11782_v39  ;;  %v11786_v39 = vld [vmem:[#allocation2 + $0x240] ss:$12 sps:$4 sm:$0xff]  }
 0x3c6   : > { %v13400_v19 = vpop.permute.xlu1 %3435  ;;  %6167 = vmatprep.subr.bf16.mxu1 %v18595_v32  ;;  %5879 = vmatpush2.bf16.msra.mxu0 %v11783_v35 }
 0x3c7   : > { %18608 = vst [vmem:[#allocation49_spill] sm:$0xff] %v13400_v19  ;;  %v13402_v31 = vpop.permute.xlu0 %3440  ;;  %5880 = vmatprep.subr.bf16.mxu0 %v18595_v32 }
 0x3c8   : > { %4687 = vperm.xlu0 %11743, %v4497_v50   ;;  %3949 = vperm.xlu1 %11745, %v13174_v7  }
 0x3c9   : > { %6168 = vmatpush2.bf16.msra.mxu1 %v11784_v47 }
 0x3ca   : > { %v13408_v8 = vpop.permute.xlu1 %3445  ;;  %6169 = vmatprep.subr.bf16.mxu1 %v18595_v32  ;;  %5881 = vmatpush2.bf16.msra.mxu0 %v11785_v36  ;;  %v4440_v36 = vld [vmem:[%s12283_s23 + $0x18] sm:$0xff] }
 0x3cb   : > { %18609 = vst [vmem:[#allocation50_spill] sm:$0xff] %v13408_v8  ;;  %v13410_v9 = vpop.permute.xlu0 %3450  ;;  %7132 = vmatprep.subr.bf16.mxu0 %v18595_v32 }
 0x3cc   : > { %18610 = vst [vmem:[#allocation51_spill] sm:$0xff] %v13410_v9  ;;  %4693 = vperm.xlu0 %11743, %v4499_v17   ;;  %3957 = vperm.xlu1 %11745, %v13180_v30   ;;  %v4437_v30 = vld [vmem:[%s12283_s23] sm:$0xff] }
 0x3cd   : > { %6170 = vmatpush2.bf16.msra.mxu1 %v11786_v39 }
 0x3ce   : > { %v13415_v7 = vpop.permute.xlu1 %3455  ;;  %7421 = vmatprep.subr.bf16.mxu1 %v18595_v32 }
 0x3cf   : > { %18611 = vst [vmem:[#allocation52_spill] sm:$0xff] %v13415_v7  ;;  %v13417_v50 = vpop.permute.xlu0 %4510 }
 0x3d0   : > { %11747 = vset.pattern.permute.xlu0 %v18579_v27  ;;  %3965 = vperm.xlu1 %11745, %v13186_v15  }
 0x3d1   : > { %3725 = vperm.xlu0 %11747, %v12793_v34   ;;  %v4439_v34 = vld [vmem:[%s12283_s23 + $0x10] sm:$0xff] }
 0x3d3   : > { %v13425_v17 = vpop.permute.xlu0 %4519  ;;  %v13427_v35 = vpop.permute.xlu1 %3729 }
 0x3d4   : > { %18612 = vst [vmem:[#allocation53_spill] sm:$0xff] %v13425_v17  ;;  %11746 = vset.pattern.permute.xlu1 %v18595_v32  ;;  %v4478_v32 = vld [vmem:[%s12283_s23 + $0x148] sm:$0xff] }
 0x3d5   : > { %3737 = vperm.xlu0 %11747, %v12818_v48   ;;  %4507 = vperm.xlu1 %11746, %v4437_v30   ;;  %v4442_v48 = vld [vmem:[%s12283_s23 + $0x28] sm:$0xff] }
 0x3d7   : > { %v13434_v15 = vpop.permute.xlu0 %4525  ;;  %v13436_v47 = vpop.permute.xlu1 %3733 }
 0x3d8   : > { %18613 = vst [vmem:[#allocation54_spill] sm:$0xff] %v13434_v15 }
 0x3d9   : > { %3745 = vperm.xlu0 %11747, %v12832_v42   ;;  %4513 = vperm.xlu1 %11746, %v4439_v34   ;;  %v4444_v42 = vld [vmem:[%s12283_s23 + $0x38] sm:$0xff] }
 0x3db   : > { %v13440_v39 = vpop.permute.xlu0 %4531  ;;  %v13442_v7 = vpop.permute.xlu1 %3741 }
 0x3dc   : > { %18614 = vst [vmem:[#allocation55_spill] sm:$0xff] %v13440_v39 }
 0x3dd   : > { %3753 = vperm.xlu0 %11747, %v12841_v52   ;;  %4516 = vperm.xlu1 %11746, %v4440_v36   ;;  %v4446_v52 = vld [vmem:[%s12283_s23 + $0x48] sm:$0xff] }
 0x3df   : > { %v13446_v30 = vpop.permute.xlu0 %4537  ;;  %v13448_v9 = vpop.permute.xlu1 %3749 }
 0x3e0   : > { %18615 = vst [vmem:[#allocation56_spill] sm:$0xff] %v13446_v30 }
 0x3e1   : > { %3761 = vperm.xlu0 %11747, %v12860_v6   ;;  %4522 = vperm.xlu1 %11746, %v4442_v48   ;;  %v4448_v6 = vld [vmem:[%s12283_s23 + $0x58] sm:$0xff] }
 0x3e3   : > { %v13452_v34 = vpop.permute.xlu0 %4543  ;;  %v13454_v8 = vpop.permute.xlu1 %3757 }
 0x3e4   : > { %18616 = vst [vmem:[#allocation57_spill] sm:$0xff] %v13452_v34 }
 0x3e5   : > { %3769 = vperm.xlu0 %11747, %v12874_v62   ;;  %4528 = vperm.xlu1 %11746, %v4444_v42   ;;  %v4450_v62 = vld [vmem:[%s12283_s23 + $0x68] sm:$0xff] }
 0x3e7   : > { %v13458_v36 = vpop.permute.xlu0 %4549  ;;  %v13460_v19 = vpop.permute.xlu1 %3765 }
 0x3e8   : > { %18617 = vst [vmem:[#allocation58_spill] sm:$0xff] %v13458_v36 }
 0x3e9   : > { %3777 = vperm.xlu0 %11747, %v12888_v54   ;;  %4534 = vperm.xlu1 %11746, %v4446_v52   ;;  %v4452_v54 = vld [vmem:[%s12283_s23 + $0x78] sm:$0xff] }
 0x3eb   : > { %v13464_v48 = vpop.permute.xlu0 %4555  ;;  %v13466_v30 = vpop.permute.xlu1 %3773 }
 0x3ec   : > { %18618 = vst [vmem:[#allocation59_spill] sm:$0xff] %v13464_v48 }
 0x3ed   : > { %3785 = vperm.xlu0 %11747, %v12897_v3   ;;  %4540 = vperm.xlu1 %11746, %v4448_v6   ;;  %v4454_v3 = vld [vmem:[%s12283_s23 + $0x88] sm:$0xff] }
 0x3ef   : > { %v13470_v42 = vpop.permute.xlu0 %4561  ;;  %v13472_v34 = vpop.permute.xlu1 %3781 }
 0x3f0   : > { %18619 = vst [vmem:[#allocation60_spill] sm:$0xff] %v13470_v42 }
 0x3f1   : > { %3793 = vperm.xlu0 %11747, %v12916_v12   ;;  %4546 = vperm.xlu1 %11746, %v4450_v62   ;;  %v4456_v12 = vld [vmem:[%s12283_s23 + $0x98] sm:$0xff] }
 0x3f3   : > { %v13476_v52 = vpop.permute.xlu0 %4567  ;;  %v13478_v36 = vpop.permute.xlu1 %3789 }
 0x3f4   : > { %18620 = vst [vmem:[#allocation61_spill] sm:$0xff] %v13476_v52 }
 0x3f5   : > { %3801 = vperm.xlu0 %11747, %v12930_v10   ;;  %4552 = vperm.xlu1 %11746, %v4452_v54   ;;  %v4458_v10 = vld [vmem:[%s12283_s23 + $0xa8] sm:$0xff] }
 0x3f7   : > { %v13482_v6 = vpop.permute.xlu0 %4573  ;;  %v13484_v48 = vpop.permute.xlu1 %3797 }
 0x3f8   : > { %18621 = vst [vmem:[#allocation62_spill] sm:$0xff] %v13482_v6 }
 0x3f9   : > { %3809 = vperm.xlu0 %11747, %v12944_v5   ;;  %4558 = vperm.xlu1 %11746, %v4454_v3   ;;  %v4460_v5 = vld [vmem:[%s12283_s23 + $0xb8] sm:$0xff] }
 0x3fb   : > { %v13488_v62 = vpop.permute.xlu0 %4579  ;;  %v13490_v42 = vpop.permute.xlu1 %3805 }
 0x3fc   : > { %18622 = vst [vmem:[#allocation63_spill] sm:$0xff] %v13488_v62 }
 0x3fd   : > { %3817 = vperm.xlu0 %11747, %v12953_v14   ;;  %4564 = vperm.xlu1 %11746, %v4456_v12   ;;  %v4462_v14 = vld [vmem:[%s12283_s23 + $0xc8] sm:$0xff] }
 0x3ff   : > { %v13494_v54 = vpop.permute.xlu0 %4585  ;;  %v13496_v52 = vpop.permute.xlu1 %3813 }
 0x400   : > { %18623 = vst [vmem:[#allocation64_spill] sm:$0xff] %v13494_v54 }
 0x401   : > { %3825 = vperm.xlu0 %11747, %v12972_v51   ;;  %4570 = vperm.xlu1 %11746, %v4458_v10   ;;  %v13514_v51 = vld [vmem:[%s17899_s4] ss:$0 sm:$0xff]  ;;  %v4464_v10 = vld [vmem:[%s12283_s23 + $0xd8] sm:$0xff] }
 0x403   : > { %v13500_v3 = vpop.permute.xlu0 %4591  ;;  %v13502_v6 = vpop.permute.xlu1 %3821 }
 0x404   : > { %18624 = vst [vmem:[#allocation65_spill] sm:$0xff] %v13500_v3 }
 0x405   : > { %3833 = vperm.xlu0 %11747, %v12986_v22   ;;  %4576 = vperm.xlu1 %11746, %v4460_v5   ;;  %v3462_v22 = vsub.f32 %v13194_v4, %v13514_v51  ;;  %v4466_v5 = vld [vmem:[%s12283_s23 + $0xe8] sm:$0xff]  ;;  %v3463_v4 = vsub.f32 %v13203_v58, %v13514_v51  ;;  %v3469_v58 = vsub.f32 %v13220_v20, %v13514_v51 }
 0x407   : > { %v13506_v12 = vpop.permute.xlu0 %4597  ;;  %v13508_v62 = vpop.permute.xlu1 %3829 }
 0x408   : > { %18625 = vst [vmem:[#allocation66_spill] sm:$0xff] %v13506_v12  ;;  %18626 = vst [vmem:[#allocation67_spill] sm:$0xff] %v13508_v62  ;;  %v4472_v62 = vld [vmem:[%s12283_s23 + $0x118] sm:$0xff] }
 0x409   : > { %3841 = vperm.xlu0 %11747, %v13000_v16   ;;  %4582 = vperm.xlu1 %11746, %v4462_v14   ;;  %v13527_v16 = vld [vmem:[%s17900_s5] ss:$0 sm:$0xff]  ;;  %v3464_v14 = vsub.f32 %v13201_v23, %v13514_v51  ;;  %v3467_v23 = vsub.f32 %v13214_v45, %v13514_v51 }
 0x40a   : > { %v3531_v39 = vmul.f32 %v13527_v16, %v3462_v22 }
 0x40b   : > { %v13517_v3 = vpop.permute.xlu0 %4603  ;;  %v13519_v54 = vpop.permute.xlu1 %3837  ;;  %v3533_v22 = vmul.f32 %v13527_v16, %v3464_v14  ;;  %v18634_v14 = vld [vmem:[#allocation22_spill] sm:$0xff] }
 0x40c   : > { %18627 = vst [vmem:[#allocation68_spill] sm:$0xff] %v13517_v3  ;;  %18628 = vst [vmem:[#allocation69_spill] sm:$0xff] %v13519_v54  ;;  %v13560_v45 = vmul.f32 %v3531_v39, %v3531_v39  ;;  %v4470_v54 = vld [vmem:[%s12283_s23 + $0x108] sm:$0xff]  ;;  %v3538_v39 = vmul.f32 %v13527_v16, %v3469_v58  ;;  %v18639_v58 = vld [vmem:[#allocation24_spill] sm:$0xff] }
 0x40d   : > { %3849 = vperm.xlu0 %11747, %v13009_v26   ;;  %4588 = vperm.xlu1 %11746, %v4464_v10   ;;  %v3465_v26 = vsub.f32 %v13207_v24, %v13514_v51  ;;  %v3466_v10 = vsub.f32 %v13209_v41, %v13514_v51  ;;  %v3471_v24 = vsub.f32 %v13226_v18, %v13514_v51  ;;  %v18635_v18 = vld [vmem:[#allocation21_spill] sm:$0xff] }
 0x40e   : > { %18633 = vst [vmem:[#allocation74_spill] sm:$0xff] %v13560_v45 }
 0x40f   : > { %v13532_v12 = vpop.permute.xlu0 %4609  ;;  %v13534_v3 = vpop.permute.xlu1 %3845  ;;  %v3534_v15 = vmul.f32 %v13527_v16, %v3465_v26  ;;  %v3535_v20 = vmul.f32 %v13527_v16, %v3466_v10  ;;  %v3540_v26 = vmul.f32 %v13527_v16, %v3471_v24 }
 0x410   : > { %18629 = vst [vmem:[#allocation70_spill] sm:$0xff] %v13532_v12  ;;  %18630 = vst [vmem:[#allocation71_spill] sm:$0xff] %v13534_v3  ;;  %v3468_v12 = vsub.f32 %v13216_v63, %v13514_v51  ;;  %v4468_v3 = vld [vmem:[%s12283_s23 + $0xf8] sm:$0xff]  ;;  %v3532_v63 = vmul.f32 %v13527_v16, %v3463_v4 }
 0x411   : > { %3857 = vperm.xlu0 %11747, %v13028_v1   ;;  %4594 = vperm.xlu1 %11746, %v4466_v5   ;;  %v3470_v1 = vsub.f32 %v13222_v2, %v13514_v51  ;;  %v3536_v2 = vmul.f32 %v13527_v16, %v3467_v23  ;;  %v18638_v23 = vld [vmem:[#allocation23_spill] sm:$0xff]  ;;  %v13590_v24 = vmul.f32 %v3534_v15, %v3534_v15 }
 0x412   : > { %v3537_v27 = vmul.f32 %v13527_v16, %v3468_v12  ;;  %v3473_v12 = vsub.f32 %v13232_v25, %v13514_v51  ;;  %v13595_v25 = vmul.f32 %v3535_v20, %v3535_v20  ;;  %v13607_v15 = vmul.f32 %v3540_v26, %v3540_v26 }
 0x413   : > { %v13556_v41 = vpop.permute.xlu0 %4615  ;;  %v13558_v5 = vpop.permute.xlu1 %3853  ;;  %v3539_v4 = vmul.f32 %v13527_v16, %v3470_v1  ;;  %v13588_v1 = vmul.f32 %v3532_v63, %v3532_v63  ;;  %18640 = vst [vmem:[#allocation23_spill] sm:$0xff] %v13590_v24  ;;  %v13597_v17 = vmul.f32 %v3536_v2, %v3536_v2  ;;  %v3479_v26 = vsub.f32 %v13250_v61, %v13514_v51 }
 0x414   : > { %18631 = vst [vmem:[#allocation72_spill] sm:$0xff] %v13556_v41  ;;  %18632 = vst [vmem:[#allocation73_spill] sm:$0xff] %v13558_v5  ;;  %v3472_v41 = vsub.f32 %v18635_v18, %v13514_v51  ;;  %v13571_v5 = vmul.f32 %v3533_v22, %v3533_v22  ;;  %v3475_v22 = vsub.f32 %v13238_v13, %v13514_v51 }
 0x415   : > { %3865 = vperm.xlu0 %11747, %v18634_v14   ;;  %4600 = vperm.xlu1 %11746, %v4468_v3   ;;  %v3474_v14 = vsub.f32 %v18638_v23, %v13514_v51  ;;  %v3476_v18 = vsub.f32 %v18639_v58, %v13514_v51  ;;  %18642 = vst [vmem:[#allocation24_spill] sm:$0xff] %v13597_v17  ;;  %18644 = vst [vmem:[#allocation75_spill] sm:$0xff] %v13607_v15  ;;  %v18649_v15 = vld [vmem:[#allocation7_spill] sm:$0xff] }
 0x416   : > { %v13599_v23 = vmul.f32 %v3537_v27, %v3537_v27  ;;  %v3541_v13 = vmul.f32 %v13527_v16, %v3472_v41  ;;  %v13603_v58 = vmul.f32 %v3538_v39, %v3538_v39  ;;  %v13605_v63 = vmul.f32 %v3539_v4, %v3539_v4 }
 0x417   : > { %v13576_v3 = vpop.permute.xlu0 %4621  ;;  %v13578_v10 = vpop.permute.xlu1 %3861  ;;  %v3542_v27 = vmul.f32 %v13527_v16, %v3473_v12  ;;  %v3543_v2 = vmul.f32 %v13527_v16, %v3474_v14  ;;  %v3544_v41 = vmul.f32 %v13527_v16, %v3475_v22  ;;  %v3545_v39 = vmul.f32 %v13527_v16, %v3476_v18  ;;  %v18650_v14 = vld [vmem:[#allocation27_spill] sm:$0xff] }
 0x418   : > { %18636 = vst [vmem:[#allocation22_spill] sm:$0xff] %v13576_v3  ;;  %18637 = vst [vmem:[#allocation21_spill] sm:$0xff] %v13578_v10  ;;  %v3477_v3 = vsub.f32 %v13244_v28, %v13514_v51  ;;  %v18641_v10 = vld [vmem:[#allocation6_spill] sm:$0xff]  ;;  %v18645_v28 = vld [vmem:[#allocation25_spill] sm:$0xff]  ;;  %v3481_v12 = vsub.f32 %v13256_v33, %v13514_v51  ;;  %v3482_v22 = vsub.f32 %v18650_v14, %v13514_v51 }
 0x419   : > { %3873 = vperm.xlu0 %11747, %v18641_v10   ;;  %4606 = vperm.xlu1 %11746, %v4470_v54   ;;  %18643 = vst [vmem:[#allocation6_spill] sm:$0xff] %v13603_v58  ;;  %v3478_v24 = vsub.f32 %v18645_v28, %v13514_v51  ;;  %v18648_v10 = vld [vmem:[#allocation26_spill] sm:$0xff]  ;;  %v4474_v18 = vld [vmem:[%s12283_s23 + $0x128] sm:$0xff]  ;;  %v13645_v14 = vmul.f32 %v3542_v27, %v3542_v27 }
 0x41a   : > { %v3546_v4 = vmul.f32 %v13527_v16, %v3477_v3  ;;  %v3480_v28 = vsub.f32 %v18648_v10, %v13514_v51  ;;  %v3483_v3 = vsub.f32 %v13262_v43, %v13514_v51  ;;  %v13647_v43 = vmul.f32 %v3543_v2, %v3543_v2 }
 0x41b   : > { %v13611_v54 = vpop.permute.xlu0 %4627  ;;  %v13613_v20 = vpop.permute.xlu1 %3869  ;;  %v3547_v61 = vmul.f32 %v13527_v16, %v3478_v24  ;;  %18655 = vst [vmem:[#allocation27_spill] sm:$0xff] %v13645_v14  ;;  %v13649_v17 = vmul.f32 %v3544_v41, %v3544_v41  ;;  %v13651_v24 = vmul.f32 %v3545_v39, %v3545_v39  ;;  %v3551_v27 = vmul.f32 %v13527_v16, %v3482_v22  ;;  %v4476_v39 = vld [vmem:[%s12283_s23 + $0x138] sm:$0xff]  ;;  %v18661_v22 = vld [vmem:[#allocation30_spill] sm:$0xff] }
 0x41c   : > { %18646 = vst [vmem:[#allocation25_spill] sm:$0xff] %v13611_v54  ;;  %18647 = vst [vmem:[#allocation76_spill] sm:$0xff] %v13613_v20  ;;  %v13625_v54 = vmul.f32 %v3541_v13, %v3541_v13  ;;  %v18651_v20 = vld [vmem:[#allocation28_spill] sm:$0xff]  ;;  %v18652_v13 = vld [vmem:[#allocation29_spill] sm:$0xff]  ;;  %v3549_v45 = vmul.f32 %v13527_v16, %v3480_v28  ;;  %v3552_v2 = vmul.f32 %v13527_v16, %v3483_v3 }
 0x41d   : > { %3881 = vperm.xlu0 %11747, %v18649_v15   ;;  %4612 = vperm.xlu1 %11746, %v4472_v62   ;;  %v3484_v10 = vsub.f32 %v18651_v20, %v13514_v51  ;;  %v3485_v62 = vsub.f32 %v13268_v59, %v13514_v51  ;;  %v3486_v15 = vsub.f32 %v18652_v13, %v13514_v51  ;;  %v18658_v13 = vld [vmem:[#allocation8_spill] sm:$0xff] }
 0x41e   : > { %18656 = vst [vmem:[#allocation28_spill] sm:$0xff] %v13649_v17  ;;  %v13653_v20 = vmul.f32 %v3546_v4, %v3546_v4  ;;  %v3548_v59 = vmul.f32 %v13527_v16, %v3479_v26  ;;  %v3487_v41 = vsub.f32 %v13274_v60, %v13514_v51  ;;  %v3488_v3 = vsub.f32 %v18661_v22, %v13514_v51 }
 0x41f   : > { %v13641_v33 = vpop.permute.xlu0 %4633  ;;  %v13643_v58 = vpop.permute.xlu1 %3877  ;;  %v3553_v4 = vmul.f32 %v13527_v16, %v3484_v10  ;;  %v3554_v26 = vmul.f32 %v13527_v16, %v3485_v62  ;;  %v3555_v28 = vmul.f32 %v13527_v16, %v3486_v15  ;;  %v3489_v60 = vsub.f32 %v13280_v56, %v13514_v51  ;;  %v18663_v10 = vld [vmem:[#allocation32_spill] sm:$0xff] }
 0x420   : > { %18653 = vst [vmem:[#allocation26_spill] sm:$0xff] %v13641_v33  ;;  %18654 = vst [vmem:[#allocation7_spill] sm:$0xff] %v13643_v58  ;;  %v3550_v33 = vmul.f32 %v13527_v16, %v3481_v12  ;;  %v13664_v58 = vmul.f32 %v3547_v61, %v3547_v61  ;;  %v18662_v61 = vld [vmem:[#allocation31_spill] sm:$0xff]  ;;  %v13681_v62 = vmul.f32 %v3548_v59, %v3548_v59 }
 0x421   : > { %18657 = vst [vmem:[#allocation29_spill] sm:$0xff] %v13653_v20  ;;  %3889 = vperm.xlu0 %11747, %v18658_v13   ;;  %4618 = vperm.xlu1 %11746, %v4474_v18   ;;  %v3490_v13 = vsub.f32 %v18662_v61, %v13514_v51  ;;  %v3491_v20 = vsub.f32 %v18663_v10, %v13514_v51 }
 0x422   : > { %18664 = vst [vmem:[#allocation30_spill] sm:$0xff] %v13681_v62  ;;  %v13683_v15 = vmul.f32 %v3549_v45, %v3549_v45  ;;  %v13688_v22 = vmul.f32 %v3550_v33, %v3550_v33  ;;  %v13690_v14 = vmul.f32 %v3551_v27, %v3551_v27  ;;  %v13692_v56 = vmul.f32 %v3552_v2, %v3552_v2  ;;  %v4482_v62 = vld [vmem:[%s12283_s23 + $0x168] sm:$0xff] }
 0x423   : > { %v13669_v18 = vpop.permute.xlu0 %4639  ;;  %v13671_v12 = vpop.permute.xlu1 %3885  ;;  %v3556_v61 = vmul.f32 %v13527_v16, %v3487_v41  ;;  %v13696_v10 = vmul.f32 %v3553_v4, %v3553_v4  ;;  %v13698_v59 = vmul.f32 %v3554_v26, %v3554_v26  ;;  %v13700_v45 = vmul.f32 %v3555_v28, %v3555_v28  ;;  %v13715_v4 = vld [vmem:[%s17899_s4 + $0x1] ss:$0 sm:$0xff] }
 0x424   : > { %18659 = vst [vmem:[#allocation8_spill] sm:$0xff] %v13669_v18  ;;  %18660 = vst [vmem:[#allocation77_spill] sm:$0xff] %v13671_v12  ;;  %v18665_v18 = vld [vmem:[#allocation33_spill] sm:$0xff]  ;;  %v3557_v27 = vmul.f32 %v13527_v16, %v3488_v3  ;;  %v3558_v2 = vmul.f32 %v13527_v16, %v3489_v60  ;;  %v3559_v41 = vmul.f32 %v13527_v16, %v3490_v13  ;;  %v18672_v26 = vld [vmem:[#allocation34_spill] sm:$0xff] }
 0x425   : > { %v3492_v17 = vsub.f32 %v18665_v18, %v13514_v51  ;;  %v18666_v12 = vld [vmem:[#allocation9_spill] sm:$0xff]  ;;  %4624 = vperm.xlu1 %11746, %v4476_v39   ;;  %18667 = vst [vmem:[#allocation31_spill] sm:$0xff] %v13688_v22  ;;  %18668 = vst [vmem:[#allocation32_spill] sm:$0xff] %v13692_v56  ;;  %v3493_v18 = vsub.f32 %v13292_v46, %v13514_v51  ;;  %v3560_v39 = vmul.f32 %v13527_v16, %v3491_v20  ;;  %v18673_v3 = vld [vmem:[#allocation10_spill] sm:$0xff] }
 0x426   : > { %3897 = vperm.xlu0 %11747, %v18666_v12   ;;  %18669 = vst [vmem:[#allocation33_spill] sm:$0xff] %v13698_v59  ;;  %v3494_v28 = vsub.f32 %v18672_v26, %v13514_v51  ;;  %v13723_v60 = vmul.f32 %v3556_v61, %v3556_v61  ;;  %v18675_v20 = vld [vmem:[#allocation35_spill] sm:$0xff]  ;;  %v18676_v59 = vld [vmem:[#allocation36_spill] sm:$0xff]  ;;  %v4480_v56 = vld [vmem:[%s12283_s23 + $0x158] sm:$0xff]  ;;  %v3985_v61 = vsub.f32 %v13427_v35, %v13715_v4 }
 0x427   : > { %v13704_v12 = vpop.permute.xlu0 %4645  ;;  %v13706_v33 = vpop.permute.xlu1 %3893  ;;  %v3561_v46 = vmul.f32 %v13527_v16, %v3492_v17  ;;  %v3496_v13 = vsub.f32 %v18675_v20, %v13514_v51  ;;  %v3498_v17 = vsub.f32 %v13306_v53, %v13514_v51  ;;  %v3562_v26 = vmul.f32 %v13527_v16, %v3493_v18  ;;  %v18677_v22 = vld [vmem:[#allocation37_spill] sm:$0xff] }
 0x428   : > { %18670 = vst [vmem:[#allocation9_spill] sm:$0xff] %v13704_v12  ;;  %18671 = vst [vmem:[#allocation78_spill] sm:$0xff] %v13706_v33  ;;  %v3495_v12 = vsub.f32 %v13298_v38, %v13514_v51  ;;  %v3497_v33 = vsub.f32 %v18676_v59, %v13514_v51  ;;  %v3499_v38 = vsub.f32 %v18677_v22, %v13514_v51 }
 0x429   : > { %4630 = vperm.xlu1 %11746, %v4478_v32   ;;  %18674 = vst [vmem:[#allocation34_spill] sm:$0xff] %v13723_v60  ;;  %v3500_v32 = vsub.f32 %v13314_v0, %v13514_v51  ;;  %v13743_v59 = vmul.f32 %v3557_v27, %v3557_v27  ;;  %v13745_v53 = vmul.f32 %v3558_v2, %v3558_v2  ;;  %v13754_v0 = vld [vmem:[%s17900_s5 + $0x1] ss:$0 sm:$0xff]  ;;  %v4501_v27 = vlaneseq }
 0x42a   : > { %3905 = vperm.xlu0 %11747, %v18673_v3   ;;  %v13747_v60 = vmul.f32 %v3559_v41, %v3559_v41  ;;  %v13749_v18 = vmul.f32 %v3560_v39, %v3560_v39  ;;  %v13756_v22 = vmul.f32 %v3561_v46, %v3561_v46  ;;  %v3563_v35 = vmul.f32 %v13527_v16, %v3494_v28 }
 0x42b   : > { %v13739_v3 = vpop.permute.xlu0 %4651  ;;  %v13741_v20 = vpop.permute.xlu1 %3901  ;;  %18680 = vst [vmem:[#allocation36_spill] sm:$0xff] %v13745_v53  ;;  %v3565_v2 = vmul.f32 %v13527_v16, %v3496_v13  ;;  %v3566_v41 = vmul.f32 %v13527_v16, %v3497_v33  ;;  %v3567_v39 = vmul.f32 %v13527_v16, %v3498_v17  ;;  %v13767_v46 = vmul.f32 %v3562_v26, %v3562_v26  ;;  %v18688_v17 = vld [vmem:[#allocation39_spill] sm:$0xff] }
 0x42c   : > { %18678 = vst [vmem:[#allocation10_spill] sm:$0xff] %v13739_v3  ;;  %18679 = vst [vmem:[#allocation35_spill] sm:$0xff] %v13741_v20  ;;  %v3564_v3 = vmul.f32 %v13527_v16, %v3495_v12  ;;  %v18683_v20 = vld [vmem:[#allocation11_spill] sm:$0xff]  ;;  %v3568_v28 = vmul.f32 %v13527_v16, %v3499_v38  ;;  %v3569_v12 = vmul.f32 %v13527_v16, %v3500_v32  ;;  %v18689_v38 = vld [vmem:[#allocation40_spill] sm:$0xff] }
 0x42d   : > { %18681 = vst [vmem:[#allocation37_spill] sm:$0xff] %v13749_v18  ;;  %18682 = vst [vmem:[#allocation79_spill] sm:$0xff] %v13756_v22  ;;  %4636 = vperm.xlu1 %11746, %v4480_v56   ;;  %v18684_v18 = vld [vmem:[#allocation38_spill] sm:$0xff]  ;;  %v3502_v33 = vsub.f32 %v13322_v37, %v13514_v51  ;;  %v3504_v26 = vsub.f32 %v13330_v21, %v13514_v51  ;;  %v13784_v32 = vmul.f32 %v3563_v35, %v3563_v35  ;;  %v4484_v35 = vld [vmem:[%s12283_s23 + $0x178] sm:$0xff] }
 0x42e   : > { %3913 = vperm.xlu0 %11747, %v18683_v20   ;;  %v3501_v53 = vsub.f32 %v18684_v18, %v13514_v51  ;;  %18685 = vst [vmem:[#allocation11_spill] sm:$0xff] %v13767_v46  ;;  %v4054_v20 = vmul.f32 %v13754_v0, %v3985_v61  ;;  %v3503_v18 = vsub.f32 %v18688_v17, %v13514_v51  ;;  %v13791_v37 = vand.u32 127, %v4501_v27 }
 0x42f   : > { %v13772_v56 = vpop.permute.xlu0 %4657  ;;  %v13774_v13 = vpop.permute.xlu1 %3909  ;;  %v3505_v46 = vsub.f32 %v18689_v38, %v13514_v51  ;;  %18690 = vst [vmem:[#allocation39_spill] sm:$0xff] %v13784_v32  ;;  %v13786_v61 = vmul.f32 %v3564_v3, %v3564_v3  ;;  %v13793_v22 = vmul.f32 %v3565_v2, %v3565_v2  ;;  %v13795_v17 = vmul.f32 %v3566_v41, %v3566_v41 }
 0x430   : > { %18686 = vst [vmem:[#allocation38_spill] sm:$0xff] %v13772_v56  ;;  %18687 = vst [vmem:[#allocation80_spill] sm:$0xff] %v13774_v13  ;;  %v3988_v56 = vsub.f32 %v13442_v7, %v13715_v4  ;;  %v18692_v13 = vld [vmem:[#allocation12_spill] sm:$0xff]  ;;  %v13797_v21 = vmul.f32 %v3567_v39, %v3567_v39  ;;  %v3570_v38 = vmul.f32 %v13527_v16, %v3501_v53 }
 0x431   : > { %18691 = vst [vmem:[#allocation40_spill] sm:$0xff] %v13786_v61  ;;  %4642 = vperm.xlu1 %11746, %v4482_v62   ;;  %18693 = vst [vmem:[#allocation12_spill] sm:$0xff] %v13795_v17  ;;  %v13801_v32 = vmul.f32 %v3568_v28, %v3568_v28  ;;  %v13803_v3 = vmul.f32 %v3569_v12, %v3569_v12  ;;  %v3506_v7 = vsub.f32 %v13338_v29, %v13514_v51  ;;  %v18696_v28 = vld [vmem:[#allocation41_spill] sm:$0xff] }
 0x432   : > { %3921 = vperm.xlu0 %11747, %v18692_v13   ;;  %v4118_v13 = vmul.f32 %v4054_v20, %v4054_v20  ;;  %v3571_v2 = vmul.f32 %v13527_v16, %v3502_v33  ;;  %v3572_v41 = vmul.f32 %v13527_v16, %v3503_v18  ;;  %v3573_v53 = vmul.f32 %v13527_v16, %v3504_v26  ;;  %v18697_v20 = vld [vmem:[#allocation13_spill] sm:$0xff] }
 0x433   : > { %18694 = vst [vmem:[#allocation81_spill] sm:$0xff] %v13801_v32  ;;  %v13807_v62 = vpop.permute.xlu0 %4663  ;;  %v13809_v27 = vpop.permute.xlu1 %3917  ;;  %v3574_v39 = vmul.f32 %v13527_v16, %v3505_v46  ;;  %v3507_v12 = vsub.f32 %v18696_v28, %v13514_v51  ;;  %v4057_v32 = vmul.f32 %v13754_v0, %v3988_v56  ;;  %v3990_v29 = vsub.f32 %v13448_v9, %v13715_v4  ;;  %v18699_v46 = vld [vmem:[#allocation42_spill] sm:$0xff]  ;;  %v4486_v28 = vld [vmem:[%s12283_s23 + $0x188] sm:$0xff] }
 0x434   : > { %18695 = vst [vmem:[#allocation82_spill] sm:$0xff] %v13807_v62  ;;  %v13822_v62 = vadd.s32 128, %v13791_v37  ;;  %v13824_v33 = vmul.f32 %v3570_v38, %v3570_v38  ;;  %v3508_v18 = vsub.f32 %v13346_v55, %v13514_v51  ;;  %v3509_v26 = vsub.f32 %v18699_v46, %v13514_v51 }
 0x435   : > { %4648 = vperm.xlu1 %11746, %v4484_v35   ;;  %v3986_v56 = vsub.f32 %v13436_v47, %v13715_v4  ;;  %v3575_v9 = vmul.f32 %v13527_v16, %v3506_v7  ;;  %v3510_v35 = vsub.f32 %v13354_v57, %v13514_v51  ;;  %v3992_v38 = vsub.f32 %v13454_v8, %v13715_v4 }
 0x436   : > { %3929 = vperm.xlu0 %11747, %v18697_v20   ;;  %18698 = vst [vmem:[#allocation41_spill] sm:$0xff] %v13824_v33  ;;  %v4182_v20 = vadd.f32 %v4118_v13, %v13588_v1  ;;  %v13843_v46 = vmul.f32 %v3571_v2, %v3571_v2  ;;  %v13845_v17 = vmul.f32 %v3572_v41, %v3572_v41  ;;  %v18704_v13 = vld [vmem:[#allocation14_spill] sm:$0xff]  ;;  %v13855_v8 = vadd.s32 384, %v13791_v37 }
 0x437   : > { %v13839_v33 = vpop.permute.xlu0 %4669  ;;  %v13841_v55 = vpop.permute.xlu1 %3925  ;;  %v13847_v47 = vmul.f32 %v3573_v53, %v3573_v53  ;;  %v13849_v7 = vmul.f32 %v3574_v39, %v3574_v39  ;;  %v3576_v57 = vmul.f32 %v13527_v16, %v3507_v12  ;;  %v4121_v61 = vmul.f32 %v4057_v32, %v4057_v32  ;;  %v18705_v53 = vld [vmem:[#allocation43_spill] sm:$0xff] }
 0x438   : > { %18700 = vst [vmem:[#allocation13_spill] sm:$0xff] %v13839_v33  ;;  %18701 = vst [vmem:[#allocation42_spill] sm:$0xff] %v13841_v55  ;;  %v4059_v1 = vmul.f32 %v13754_v0, %v3990_v29  ;;  %v3577_v2 = vmul.f32 %v13527_v16, %v3508_v18  ;;  %v3578_v41 = vmul.f32 %v13527_v16, %v3509_v26  ;;  %v4246_v29 = vmul.f32 -0.5, %v4182_v20  ;;  %v4490_v55 = vld [vmem:[%s12283_s23 + $0x1a8] sm:$0xff] }
 0x439   : > { %18702 = vst [vmem:[#allocation83_spill] sm:$0xff] %v13845_v17  ;;  %18703 = vst [vmem:[#allocation84_spill] sm:$0xff] %v13849_v7  ;;  %4654 = vperm.xlu1 %11746, %v4486_v28   ;;  %v3511_v33 = vsub.f32 %v18705_v53, %v13514_v51  ;;  %v4055_v39 = vmul.f32 %v13754_v0, %v3986_v56  ;;  %v4488_v7 = vld [vmem:[%s12283_s23 + $0x198] sm:$0xff]  ;;  %v13863_v12 = vmul.f32 %v3575_v9, %v3575_v9  ;;  %v18708_v53 = vld [vmem:[#allocation15_spill] sm:$0xff] }
 0x43a   : > { %3937 = vperm.xlu0 %11747, %v18704_v13   ;;  %v3579_v32 = vmul.f32 %v13527_v16, %v3510_v35  ;;  %v4061_v28 = vmul.f32 %v13754_v0, %v3992_v38  ;;  %v3512_v18 = vsub.f32 %v13362_v49, %v13514_v51  ;;  %v3994_v26 = vsub.f32 %v13460_v19, %v13715_v4 }
 0x43b   : > { %v13867_v13 = vpop.permute.xlu0 %4675  ;;  %v13869_v17 = vpop.permute.xlu1 %3933  ;;  %v3996_v56 = vsub.f32 %v13466_v30, %v13715_v4  ;;  %v3998_v9 = vsub.f32 %v13472_v34, %v13715_v4  ;;  %v13879_v35 = vmul.f32 %v3576_v57, %v3576_v57  ;;  %v4185_v20 = vadd.f32 %v4121_v61, %v13595_v25 }
 0x43c   : > { %18706 = vst [vmem:[#allocation14_spill] sm:$0xff] %v13867_v13  ;;  %18707 = vst [vmem:[#allocation43_spill] sm:$0xff] %v13869_v17  ;;  %v4123_v38 = vmul.f32 %v4059_v1, %v4059_v1  ;;  %v13884_v13 = vadd.s32 256, %v13791_v37  ;;  %v13886_v49 = vmul.f32 %v3577_v2, %v3577_v2  ;;  %v13888_v19 = vmul.f32 %v3578_v41, %v3578_v41 }
 0x43d   : > { %4660 = vperm.xlu1 %11746, %v4488_v7   ;;  %v3580_v30 = vmul.f32 %v13527_v16, %v3511_v33  ;;  %v4119_v17 = vmul.f32 %v4055_v39, %v4055_v39  ;;  %v13892_v34 = vmul.f32 %v3579_v32, %v3579_v32  ;;  %v3514_v25 = vsub.f32 %v13370_v11, %v13514_v51 }
 0x43e   : > { %3945 = vperm.xlu0 %11747, %v18708_v53   ;;  %v4311_v61 = vmul.f32 1.442695, %v4246_v29  ;;  %v4125_v57 = vmul.f32 %v4061_v28, %v4061_v28  ;;  %v3581_v2 = vmul.f32 %v13527_v16, %v3512_v18  ;;  %v4063_v41 = vmul.f32 %v13754_v0, %v3994_v26  ;;  %v18710_v28 = vld [vmem:[#allocation16_spill] sm:$0xff] }
 0x43f   : > { %v13896_v1 = vpop.permute.xlu0 %4681  ;;  %v13898_v7 = vpop.permute.xlu1 %3941  ;;  %v4065_v33 = vmul.f32 %v13754_v0, %v3996_v56  ;;  %v4067_v39 = vmul.f32 %v13754_v0, %v3998_v9  ;;  %v3516_v32 = vsub.f32 %v13378_v40, %v13514_v51  ;;  %v4249_v53 = vmul.f32 -0.5, %v4185_v20  ;;  %v18712_v18 = vld [vmem:[#allocation44_spill] sm:$0xff]  ;;  %v4492_v40 = vld [vmem:[%s12283_s23 + $0x1b8] sm:$0xff] }
 0x440   : > { %18709 = vst [vmem:[#allocation15_spill] sm:$0xff] %v13896_v1  ;;  %v4187_v11 = vadd.f32 %v4123_v38, %v13599_v23  ;;  %v4000_v29 = vsub.f32 %v13478_v36, %v13715_v4  ;;  %v13910_v1 = vmul.f32 %v3580_v30, %v3580_v30  ;;  %v3513_v26 = vsub.f32 %v18712_v18, %v13514_v51  ;;  %v18713_v23 = vld [vmem:[#allocation48_spill] sm:$0xff] }
 0x441   : > { %4666 = vperm.xlu1 %11746, %v4490_v55   ;;  %v3518_v56 = vsub.f32 %v13386_v44, %v13514_v51  ;;  %v4183_v9 = vadd.f32 %v4119_v17, %v13571_v5  ;;  %v3583_v20 = vmul.f32 %v13527_v16, %v3514_v25  ;;  %v3520_v38 = vsub.f32 %v18713_v23, %v13514_v51 }
 0x442   : > { %3953 = vperm.xlu0 %11747, %v18710_v28   ;;  %18711 = vst [vmem:[#allocation16_spill] sm:$0xff] %v13910_v1  ;;  %11979 = vpow2.f32 %v4311_v61  ;;  %v4189_v36 = vadd.f32 %v4125_v57, %v13605_v63  ;;  %v4127_v28 = vmul.f32 %v4063_v41, %v4063_v41  ;;  %v4129_v18 = vmul.f32 %v4065_v33, %v4065_v33  ;;  %v18715_v61 = vld [vmem:[#allocation17_spill] sm:$0xff] }
 0x443   : > { %v13922_v55 = vpop.permute.xlu0 %4687  ;;  %v13924_v30 = vpop.permute.xlu1 %3949  ;;  %v4131_v1 = vmul.f32 %v4067_v39, %v4067_v39  ;;  %v4002_v44 = vsub.f32 %v13484_v48, %v13715_v4  ;;  %v3585_v5 = vmul.f32 %v13527_v16, %v3516_v32  ;;  %v4317_v17 = vmul.f32 1.442695, %v4249_v53  ;;  %v4494_v39 = vld [vmem:[%s12283_s23 + $0x1c8] sm:$0xff]  ;;  %v18716_v48 = vld [vmem:[#allocation45_spill] sm:$0xff] }
 0x444   : > { %18714 = vst [vmem:[#allocation44_spill] sm:$0xff] %v13922_v55  ;;  %v4251_v25 = vmul.f32 -0.5, %v4187_v11  ;;  %v4069_v23 = vmul.f32 %v13754_v0, %v4000_v29  ;;  %v13931_v63 = vmul.f32 %v3581_v2, %v3581_v2  ;;  %v13934_v57 = vmul.f32 %v13527_v16, %v3513_v26 }
 0x445   : > { %4672 = vperm.xlu1 %11746, %v4492_v40   ;;  %v3587_v41 = vmul.f32 %v13527_v16, %v3518_v56  ;;  %v4247_v33 = vmul.f32 -0.5, %v4183_v9  ;;  %v13938_v55 = vmul.f32 %v3583_v20, %v3583_v20  ;;  %v3589_v53 = vmul.f32 %v13527_v16, %v3520_v38  ;;  %v18718_v16 = vld [vmem:[#allocation18_spill] sm:$0xff] }
 0x446   : > { %3961 = vperm.xlu0 %11747, %v18715_v61   ;;  %v4253_v11 = vmul.f32 -0.5, %v4189_v36  ;;  %v4191_v26 = vadd.f32 %v4127_v28, %v13625_v54  ;;  %v4193_v40 = vadd.f32 %v4129_v18, %v13647_v43  ;;  %v4195_v56 = vadd.f32 %v4131_v1, %v13651_v24  ;;  %v4496_v24 = vld [vmem:[%s12283_s23 + $0x1d8] sm:$0xff] }
 0x447   : > { %v13943_v29 = vpop.permute.xlu0 %4693  ;;  %v13945_v2 = vpop.permute.xlu1 %3957  ;;  %v4071_v9 = vmul.f32 %v13754_v0, %v4002_v44  ;;  %v13951_v20 = vmul.f32 %v3585_v5, %v3585_v5  ;;  %11981 = vpow2.f32 %v4317_v17  ;;  %v4321_v61 = vmul.f32 1.442695, %v4251_v25 }
 0x448   : > { %18717 = vst [vmem:[#allocation48_spill] sm:$0xff] %v13943_v29  ;;  %v4133_v32 = vmul.f32 %v4069_v23, %v4069_v23  ;;  %v13954_v38 = vmul.f32 %v3587_v41, %v3587_v41  ;;  %v4313_v36 = vmul.f32 1.442695, %v4247_v33  ;;  %v4004_v54 = vsub.f32 %v13490_v42, %v13715_v4  ;;  %v18719_v33 = vld [vmem:[#allocation19_spill] sm:$0xff] }
 0x449   : > { %4678 = vperm.xlu1 %11746, %v4494_v39   ;;  %v4006_v43 = vsub.f32 %v13496_v52, %v13715_v4  ;;  %v13961_v1 = vmul.f32 %v3589_v53, %v3589_v53  ;;  %v4325_v18 = vmul.f32 1.442695, %v4253_v11  ;;  %vm4703_vm0 = vcmp.eq.s32.totalorder %v13417_v50, %v13822_v62  ;;  %v4498_v11 = vld [vmem:[%s12283_s23 + $0x1e8] sm:$0xff] }
 0x44a   : > { %3969 = vperm.xlu0 %11747, %v18718_v16   ;;  %v4255_v5 = vmul.f32 -0.5, %v4191_v26  ;;  %v4257_v17 = vmul.f32 -0.5, %v4193_v40  ;;  %v4259_v25 = vmul.f32 -0.5, %v4195_v56  ;;  %v4135_v42 = vmul.f32 %v4071_v9, %v4071_v9 }
 0x44b   : > { %v13965_v44 = vpop.permute.xlu1 %3965  ;;  %11983 = vpow2.f32 %v4321_v61  ;;  %v4197_v52 = vadd.f32 %v4133_v32, %v13664_v58  ;;  %vm4705_vm1 = vcmp.eq.s32.totalorder %v13417_v50, %v13855_v8  ;;  %v4073_v39 = vmul.f32 %v13754_v0, %v4004_v54 }
 0x44c   : > { %v3726_v23 = vpop.permute.xlu0 %3725  ;;  %11985 = vpow2.f32 %v4313_v36  ;;  %v4075_v53 = vmul.f32 %v13754_v0, %v4006_v43  ;;  %vm4702_vm2 = vcmp.eq.s32.totalorder %v13417_v50, %v13791_v37  ;;  %v4008_v58 = vsub.f32 %v13502_v6, %v13715_v4 }
 0x44d   : > { %v3984_v41 = vsub.f32 %v3726_v23, %v13715_v4  ;;  %4684 = vperm.xlu1 %11746, %v4496_v24   ;;  %11987 = vpow2.f32 %v4325_v18  ;;  %v4329_v40 = vmul.f32 1.442695, %v4255_v5  ;;  %v4333_v56 = vmul.f32 1.442695, %v4257_v17  ;;  %v11787_v5 = vld [vmem:[#allocation2 + $0xac] ss:$12 sps:$4 sm:$0xff]  }
 0x44e   : > { %3973 = vperm.xlu0 %11747, %v18719_v33   ;;  %v4337_v9 = vmul.f32 1.442695, %v4259_v25  ;;  %v4199_v61 = vadd.f32 %v4135_v42, %v13683_v15  ;;  %v4261_v54 = vmul.f32 -0.5, %v4197_v52  ;;  %v18721_v18 = vmov 0   ;;  %v4500_v17 = vld [vmem:[%s12283_s23 + $0x1f8] sm:$0xff]  ;;  %v18725_v42 = vld [vmem:[#allocation74_spill] sm:$0xff] }
 0x44f   : > { %v4053_v32 = vmul.f32 %v13754_v0, %v3984_v41  ;;  %v13982_v26 = vpop.eup %11979  ;;  %v4137_v6 = vmul.f32 %v4073_v39, %v4073_v39  ;;  %v4139_v23 = vmul.f32 %v4075_v53, %v4075_v53  ;;  %v18722_v15 = vmov 0  ;;  %v11788_v53 = vld [vmem:[#allocation2 + $0x22c] ss:$12 sps:$4 sm:$0xff]   ;;  %s11302_s23 = sshll.u32 %s12249_s9, 12  ;;  %s12113_s9 = scalar_lea.vmem %s17850_s20, 4096 }
 0x450   : > { %18720 = vst [vmem:[#allocation17_spill] sm:$0xff] %v13982_v26  ;;  %v3738_v16 = vpop.permute.xlu0 %3737  ;;  %v4508_v36 = vpop.permute.xlu1 %4507  ;;  %v4077_v25 = vmul.f32 %v13754_v0, %v4008_v58  ;;  %v17978_v33 = vmov 1.0|1.0   ;;  %v18726_v39 = vmov 0  ;;  %11989 = vpow2.f32 %v4329_v40  ;;  %v18729_v58 = vld [vmem:[#allocation67_spill] sm:$0xff]  ;;  %s17848_s22 = scalar_lea.hbm %s17903_s8, %s11302_s23  ;;  %p12114_p12 = scmp.ne.s32.totalorder %s17850_s20, %s12113_s9 }
 0x451   : > { %v4117_v43 = vmul.f32 %v4053_v32, %v4053_v32  ;;  %v3987_v24 = vsub.f32 %v3738_v16, %v13715_v4  ;;  %4690 = vperm.xlu1 %11746, %v4498_v11   ;;  %vm4699_vm3 = vcmp.eq.s32.totalorder %v4508_v36, %v13822_v62  ;;  %vm4701_vm5 = vcmp.eq.s32.totalorder %v4508_v36, %v13855_v8  ;;  %p12121_p2 = scmp.lt.s32.totalorder %s12119_s13, %s12113_s9 }
 0x452   : > { %11750 = vset.pattern.permute.xlu0 %v18721_v18  ;;  %vm13992_vm4 = vmpackc.low %vm4703_vm0, %vm4699_vm3  ;;  %vm4698_vm6 = vcmp.eq.s32.totalorder %v4508_v36, %v13791_v37  ;;  %vm4700_vm8 = vcmp.eq.s32.totalorder %v4508_v36, %v13884_v13  ;;  %v4263_v11 = vmul.f32 -0.5, %v4199_v61  ;;  %v4010_v32 = vsub.f32 %v18729_v58, %v13715_v4  ;;  %v18737_v36 = vld [vmem:[#allocation53_spill] sm:$0xff]  ;;  %p12115_p13 = pnand %p12114_p12, %p12266_p5 }
 0x453   : > { %6435 = vperm.xlu0 %11750, %v13982_v26   ;;  %v18723_v15 = vsel %vm13992_vm4, 4294967295, %v18722_v15  ;;  %v4181_v52 = vadd.f32 %v4117_v43, %v18725_v42  ;;  %v4056_v41 = vmul.f32 %v13754_v0, %v3987_v24  ;;  %10210 = vmatprep.mubr.msk.bf16.mxu0 %vm13992_vm4, %v17978_v33  ;;  %vm14008_vm7 = vmpackc.low %vm4705_vm1, %vm4701_vm5  ;;  %v18730_v24 = vmov 0  ;;  %v18810_v26 = vld [vmem:[#allocation56_spill] sm:$0xff]  ;;  %p12122_p3 = por %p12121_p2, %p12120_p1 }
 0x454   : > { %18724 = vst [vmem:[#allocation45_spill] sm:$0xff] %v18723_v15  ;;  %v18727_v39 = vsel %vm14008_vm7, 4294967295, %v18726_v39  ;;  %10338 = vmatprep.mubr.msk.bf16.mxu1 %vm14008_vm7, %v17978_v33  ;;  %v3746_v16 = vpop.permute.xlu0 %3745  ;;  %v14018_v43 = vpop.permute.xlu1 %4513  ;;  %vm14025_vm9 = vmpackc.low %vm4702_vm2, %vm4698_vm6  ;;  %vm4704_vm10 = vcmp.eq.s32.totalorder %v13417_v50, %v13884_v13  ;;  %11991 = vpow2.f32 %v4333_v56  ;;  %v18733_v58 = vmov 0  ;;  %v18769_v15 = vld [vmem:[#allocation73_spill] sm:$0xff]  ;;  %p12116_p0 = pneg %p12115_p13 }
 0x455   : > { %18728 = vst [vmem:[#allocation18_spill] sm:$0xff] %v18727_v39  ;;  %v18731_v24 = vsel %vm14025_vm9, 4294967295, %v18730_v24  ;;  %v4245_v40 = vmul.f32 -0.5, %v4181_v52  ;;  %v4120_v61 = vmul.f32 %v4056_v41, %v4056_v41  ;;  %v3989_v42 = vsub.f32 %v3746_v16, %v13715_v4  ;;  %10212 = vmatmul.mubr.msk.bf16.vlgmr.msra.gmra.mxu0 %vm14025_vm9, %v17978_v33  ;;  %vm14037_vm11 = vmpackc.low %vm4704_vm10, %vm4700_vm8  ;;  %4696 = vperm.xlu1 %11746, %v4500_v17   ;;  %v14041_v28 = vpop.eup %11981  ;;  %v18738_v17 = vld [vmem:[#allocation23_spill] sm:$0xff]  ;;  %v18755_v39 = vld [vmem:[#allocation54_spill] sm:$0xff] }
 0x456   : > { %18732 = vst [vmem:[#allocation19_spill] sm:$0xff] %v18731_v24  ;;  %v18734_v58 = vsel %vm14037_vm11, 4294967295, %v18733_v58  ;;  %18736 = vst [vmem:[#allocation67_spill] sm:$0xff] %v14041_v28  ;;  %11993 = vpow2.f32 %v4337_v9  ;;  %v4341_v50 = vmul.f32 1.442695, %v4261_v54  ;;  %v4201_v56 = vadd.f32 %v4137_v6, %v13690_v14  ;;  %10340 = vmatmul.mubr.msk.bf16.vlgmr.msra.gmra.mxu1 %vm14037_vm11, %v17978_v33  ;;  %7133 = vmatpush1.bf16.msra.mxu0 %v11787_v5  ;;  %v18739_v6 = vld [vmem:[#allocation69_spill] sm:$0xff]  ;;  %p12123_p4 = pnand %p12122_p3, %p12116_p0 }
 0x457   : > { %18735 = vst [vmem:[#allocation74_spill] sm:$0xff] %v18734_v58  ;;  %v4203_v52 = vadd.f32 %v4139_v23, %v13696_v10  ;;  %vm4715_vm12 = vcmp.eq.s32.totalorder %v18737_v36, %v13822_v62  ;;  %v14050_v41 = vmul.f32 %v4077_v25, %v4077_v25  ;;  %v4309_v16 = vmul.f32 1.442695, %v4245_v40  ;;  %7422 = vmatpush1.bf16.msra.mxu1 %v11788_v53  ;;  %v11789_v14 = vld [vmem:[#allocation2 + $0x94] ss:$12 sps:$4 sm:$0xff]  }
 0x458   : > { %v4184_v24 = vadd.f32 %v4120_v61, %v18738_v17  ;;  %v4058_v9 = vmul.f32 %v13754_v0, %v3989_v42  ;;  %6450 = vperm.xlu0 %11750, %v14041_v28   ;;  %vm4717_vm13 = vcmp.eq.s32.totalorder %v18737_v36, %v13855_v8  ;;  %v4345_v10 = vmul.f32 1.442695, %v4263_v11  ;;  %v3754_v5 = vpop.permute.xlu0 %3753  ;;  %v4517_v25 = vpop.permute.xlu1 %4516  ;;  %7134 = vmatprep.subr.bf16.mxu0 %v18721_v18  ;;  %v11790_v53 = vld [vmem:[#allocation2 + $0x214] ss:$12 sps:$4 sm:$0xff]  }
 0x459   : > { %v4079_v54 = vmul.f32 %v13754_v0, %v4010_v32  ;;  %v4012_v23 = vsub.f32 %v18739_v6, %v13715_v4  ;;  %vm4707_vm14 = vcmp.eq.s32.totalorder %v14018_v43, %v13822_v62  ;;  %7423 = vmatprep.subr.bf16.mxu1 %v18721_v18  ;;  %11995 = vpow2.f32 %v4309_v16  ;;  %v14068_v32 = vpop.eup %11983  ;;  %v18742_v17 = vld [vmem:[#allocation20_spill] sm:$0xff] }
 0x45a   : > { %v4122_v40 = vmul.f32 %v4058_v9, %v4058_v9  ;;  %v3991_v61 = vsub.f32 %v3754_v5, %v13715_v4  ;;  %v18740_v11 = vmov 1   ;;  %vm4709_vm15 = vcmp.eq.s32.totalorder %v14018_v43, %v13855_v8  ;;  %18741 = vst [vmem:[#allocation53_spill] sm:$0xff] %v14068_v32  ;;  %v14074_v16 = vpop.eup %11985  ;;  %v18744_v9 = vld [vmem:[#allocation24_spill] sm:$0xff]  ;;  %7135 = vmatpush1.bf16.msra.mxu0 %v11789_v14 }
 0x45b   : > { %11748 = vset.pattern.permute.xlu1 %v18740_v11  ;;  %v4248_v42 = vmul.f32 -0.5, %v4184_v24  ;;  %vm4711_vm0 = vcmp.eq.s32.totalorder %v4517_v25, %v13822_v62  ;;  %vm4713_vm1 = vcmp.eq.s32.totalorder %v4517_v25, %v13855_v8  ;;  %vm4710_vm2 = vcmp.eq.s32.totalorder %v4517_v25, %v13791_v37  ;;  %18743 = vst [vmem:[#allocation23_spill] sm:$0xff] %v14074_v16 }
 0x45c   : > { %3977 = vperm.xlu1 %11748, %v18742_v17   ;;  %11997 = vpow2.f32 %v4341_v50  ;;  %v4186_v6 = vadd.f32 %v4122_v40, %v18744_v9  ;;  %v4060_v5 = vmul.f32 %v13754_v0, %v3991_v61  ;;  %6460 = vperm.xlu0 %11750, %v14068_v32   ;;  %vm14082_vm3 = vmpackc.low %vm4711_vm0, %vm4707_vm14  ;;  %v18745_v24 = vmov 0  ;;  %v14089_v50 = vpop.eup %11987  ;;  %v3762_v14 = vpop.permute.xlu0 %3761 }
 0x45d   : > { %v18746_v24 = vsel %vm14082_vm3, 4294967295, %v18745_v24  ;;  %vm4712_vm5 = vcmp.eq.s32.totalorder %v4517_v25, %v13884_v13  ;;  %vm4714_vm6 = vcmp.eq.s32.totalorder %v18737_v36, %v13791_v37  ;;  %18748 = vst [vmem:[#allocation20_spill] sm:$0xff] %v14089_v50  ;;  %v4265_v40 = vmul.f32 -0.5, %v4201_v56  ;;  %10214 = vmatprep.mubr.msk.bf16.mxu0 %vm14082_vm3, %v17978_v33  ;;  %vm14100_vm8 = vmpackc.low %vm4713_vm1, %vm4709_vm15  ;;  %v14104_v58 = vpop.permute.xlu1 %4522  ;;  %7424 = vmatpush1.bf16.msra.mxu1 %v11790_v53 }
 0x45e   : > { %18747 = vst [vmem:[#allocation69_spill] sm:$0xff] %v18746_v24  ;;  %v4143_v17 = vmul.f32 %v4079_v54, %v4079_v54  ;;  %v4081_v61 = vmul.f32 %v13754_v0, %v4012_v23  ;;  %v18749_v9 = vmov 0  ;;  %vm4706_vm10 = vcmp.eq.s32.totalorder %v14018_v43, %v13791_v37  ;;  %10342 = vmatprep.mubr.msk.bf16.mxu1 %vm14100_vm8, %v17978_v33 }
 0x45f   : > { %v18750_v9 = vsel %vm14100_vm8, 4294967295, %v18749_v9  ;;  %v4267_v56 = vmul.f32 -0.5, %v4203_v52  ;;  %v4124_v54 = vmul.f32 %v4060_v5, %v4060_v5  ;;  %v3993_v23 = vsub.f32 %v3762_v14, %v13715_v4  ;;  %vm14116_vm15 = vmpackc.low %vm4710_vm2, %vm4706_vm10  ;;  %7136 = vmatprep.subr.bf16.mxu0 %v18721_v18  ;;  %v18759_v5 = vld [vmem:[#allocation6_spill] sm:$0xff]  ;;  %7425 = vmatprep.subr.bf16.mxu1 %v18721_v18 }
 0x460   : > { %18751 = vst [vmem:[#allocation24_spill] sm:$0xff] %v18750_v9  ;;  %v18752_v24 = vmov 0  ;;  %vm4708_vm0 = vcmp.eq.s32.totalorder %v14018_v43, %v13884_v13  ;;  %11999 = vpow2.f32 %v4345_v10  ;;  %v4315_v52 = vmul.f32 1.442695, %v4248_v42  ;;  %10216 = vmatmul.mubr.msk.bf16.gmra.mxu0 %vm14116_vm15, %v17978_v33  ;;  %v11791_v43 = vld [vmem:[#allocation2 + $0x7c] ss:$12 sps:$4 sm:$0xff]   ;;  %6470 = vperm.xlu0 %11750, %v14089_v50  }
 0x461   : > { %v18753_v24 = vsel %vm14116_vm15, 4294967295, %v18752_v24  ;;  %vm14130_vm2 = vmpackc.low %vm4712_vm5, %vm4708_vm0  ;;  %v18756_v53 = vmov 0  ;;  %vm4719_vm10 = vcmp.eq.s32.totalorder %v14104_v58, %v13822_v62  ;;  %vm4721_vm1 = vcmp.eq.s32.totalorder %v14104_v58, %v13855_v8  ;;  %v11792_v9 = vld [vmem:[#allocation2 + $0x1fc] ss:$12 sps:$4 sm:$0xff]   ;;  %11749 = vset.pattern.permute.xlu1 %v18721_v18  ;;  %7137 = vmatpush1.bf16.msra.mxu0 %v11791_v43 }
 0x462   : > { %18754 = vst [vmem:[#allocation85_spill] sm:$0xff] %v18753_v24  ;;  %v18757_v53 = vsel %vm14130_vm2, 4294967295, %v18756_v53  ;;  %v4205_v10 = vadd.f32 %v14050_v41, %v13700_v45  ;;  %v4250_v42 = vmul.f32 -0.5, %v4186_v6  ;;  %v4188_v25 = vadd.f32 %v4124_v54, %v18759_v5  ;;  %10344 = vmatmul.mubr.msk.bf16.gmra.mxu1 %vm14130_vm2, %v17978_v33  ;;  %vm14151_vm5 = vmpackc.low %vm4719_vm10, %vm4715_vm12  ;;  %v18763_v54 = vld [vmem:[#allocation71_spill] sm:$0xff]  ;;  %7138 = vmatprep.subr.bf16.mxu0 %v18721_v18 }
 0x463   : > { %18758 = vst [vmem:[#allocation54_spill] sm:$0xff] %v18757_v53  ;;  %v4062_v14 = vmul.f32 %v13754_v0, %v3993_v23  ;;  %v18760_v24 = vmov 0  ;;  %v4349_v45 = vmul.f32 1.442695, %v4265_v40  ;;  %v4207_v41 = vadd.f32 %v4143_v17, %v13743_v59  ;;  %10218 = vmatprep.mubr.msk.bf16.mxu0 %vm14151_vm5, %v17978_v33  ;;  %vm14167_vm12 = vmpackc.low %vm4721_vm1, %vm4717_vm13  ;;  %v3770_v40 = vpop.permute.xlu0 %3769  ;;  %v14171_v59 = vpop.permute.xlu1 %4528  ;;  %7426 = vmatpush1.bf16.msra.mxu1 %v11792_v9 }
 0x464   : > { %v18761_v24 = vsel %vm14151_vm5, 4294967295, %v18760_v24  ;;  %v4145_v6 = vmul.f32 %v4081_v61, %v4081_v61  ;;  %v4014_v23 = vsub.f32 %v18763_v54, %v13715_v4  ;;  %v18764_v5 = vmov 0  ;;  %v14174_v17 = vpop.eup %11989  ;;  %10346 = vmatprep.mubr.msk.bf16.mxu1 %vm14167_vm12, %v17978_v33  ;;  %7427 = vmatprep.subr.bf16.mxu1 %v18721_v18 }
 0x465   : > { %18762 = vst [vmem:[#allocation6_spill] sm:$0xff] %v18761_v24  ;;  %v18765_v5 = vsel %vm14167_vm12, 4294967295, %v18764_v5  ;;  %18767 = vst [vmem:[#allocation86_spill] sm:$0xff] %v14174_v17  ;;  %v4353_v61 = vmul.f32 1.442695, %v4267_v56  ;;  %v4126_v54 = vmul.f32 %v4062_v14, %v4062_v14  ;;  %v3995_v24 = vsub.f32 %v3770_v40, %v13715_v4  ;;  %v14183_v53 = vpop.eup %11991  ;;  %v18771_v40 = vld [vmem:[#allocation75_spill] sm:$0xff]  ;;  %6480 = vperm.xlu0 %11750, %v14174_v17  }
 0x466   : > { %18766 = vst [vmem:[#allocation71_spill] sm:$0xff] %v18765_v5  ;;  %vm4718_vm13 = vcmp.eq.s32.totalorder %v14104_v58, %v13791_v37  ;;  %18768 = vst [vmem:[#allocation87_spill] sm:$0xff] %v14183_v53  ;;  %v4016_v29 = vsub.f32 %v18769_v15, %v13715_v4  ;;  %12001 = vpow2.f32 %v4315_v52  ;;  %v4252_v50 = vmul.f32 -0.5, %v4188_v25  ;;  %v14189_v56 = vpop.eup %11993 }
 0x467   : > { %vm4720_vm0 = vcmp.eq.s32.totalorder %v14104_v58, %v13884_v13  ;;  %18770 = vst [vmem:[#allocation73_spill] sm:$0xff] %v14189_v56  ;;  %v4319_v14 = vmul.f32 1.442695, %v4250_v42  ;;  %v4190_v33 = vadd.f32 %v4126_v54, %v18771_v40  ;;  %v4064_v5 = vmul.f32 %v13754_v0, %v3995_v24  ;;  %v3778_v25 = vpop.permute.xlu0 %3777  ;;  %v14199_v32 = vpop.permute.xlu1 %4534  ;;  %vm14207_vm14 = vmpackc.low %vm4718_vm13, %vm4714_vm6  ;;  %v11793_v54 = vld [vmem:[#allocation2 + $0x64] ss:$12 sps:$4 sm:$0xff]  }
 0x468   : > { %v4269_v15 = vmul.f32 -0.5, %v4205_v10  ;;  %v4271_v52 = vmul.f32 -0.5, %v4207_v41  ;;  %v4083_v43 = vmul.f32 %v13754_v0, %v4014_v23  ;;  %v18772_v24 = vmov 0  ;;  %v18779_v23 = vld [vmem:[#allocation55_spill] sm:$0xff]  ;;  %7139 = vmatpush1.bf16.msra.mxu0 %v11793_v54 }
 0x469   : > { %v18773_v24 = vsel %vm14207_vm14, 4294967295, %v18772_v24  ;;  %12003 = vpow2.f32 %v4349_v45  ;;  %v4209_v9 = vadd.f32 %v4145_v6, %v13747_v60  ;;  %v4128_v10 = vmul.f32 %v4064_v5, %v4064_v5  ;;  %v14231_v45 = vpop.eup %11995  ;;  %6490 = vperm.xlu0 %11750, %v14183_v53   ;;  %7140 = vmatprep.subr.bf16.mxu0 %v18721_v18 }
 0x46a   : > { %18774 = vst [vmem:[#allocation75_spill] sm:$0xff] %v18773_v24  ;;  %v3997_v42 = vsub.f32 %v3778_v25, %v13715_v4  ;;  %vm18775_vm6 = vcmp.eq.s32.totalorder %v18737_v36, %v13884_v13  ;;  %v18776_v41 = vmov 0  ;;  %18780 = vst [vmem:[#allocation55_spill] sm:$0xff] %v14231_v45  ;;  %12005 = vpow2.f32 %v4353_v61  ;;  %v11794_v36 = vld [vmem:[#allocation2 + $0x1e4] ss:$12 sps:$4 sm:$0xff]   ;;  %6430 = vperm.xlu1 %11749, %v14231_v45  }
 0x46b   : > { %vm14225_vm13 = vmpackc.low %vm4720_vm0, %vm18775_vm6  ;;  %v4085_v60 = vmul.f32 %v13754_v0, %v4016_v29  ;;  %v4323_v6 = vmul.f32 1.442695, %v4252_v50  ;;  %v18781_v5 = vmov 1.0|1.0   ;;  %vm18782_vm0 = vcmp.eq.s32.totalorder %v18755_v39, %v13822_v62  ;;  %v18787_v50 = vld [vmem:[#allocation27_spill] sm:$0xff]  ;;  %v14275_v24 = vpop.permute.xlu1 %4540  ;;  %7428 = vmatpush1.bf16.msra.mxu1 %v11794_v36 }
 0x46c   : > { %v18777_v41 = vsel %vm14225_vm13, 4294967295, %v18776_v41  ;;  %10220 = vmatmul.mubr.msk.bf16.gmra.mxu0 %vm14207_vm14, %v18781_v5  ;;  %vm18783_vm6 = vcmp.eq.s32.totalorder %v14171_v59, %v13822_v62  ;;  %v18784_v58 = vmov 0  ;;  %12007 = vpow2.f32 %v4319_v14  ;;  %10348 = vmatmul.mubr.msk.bf16.gmra.mxu1 %vm14225_vm13, %v18781_v5  ;;  %v14267_v14 = vpop.eup %11997  ;;  %v18798_v36 = vld [vmem:[#allocation7_spill] sm:$0xff] }
 0x46d   : > { %18778 = vst [vmem:[#allocation88_spill] sm:$0xff] %v18777_v41  ;;  %vm14243_vm10 = vmpackc.low %vm18783_vm6, %vm18782_vm0  ;;  %v4254_v29 = vmul.f32 -0.5, %v4190_v33  ;;  %v4192_v61 = vadd.f32 %v4128_v10, %v18787_v50  ;;  %v4066_v40 = vmul.f32 %v13754_v0, %v3997_v42  ;;  %vm18788_vm0 = vcmp.eq.s32.totalorder %v18755_v39, %v13855_v8  ;;  %v18794_v50 = vld [vmem:[#allocation21_spill] sm:$0xff]  ;;  %7429 = vmatprep.subr.bf16.mxu1 %v18721_v18 }
 0x46e   : > { %v18785_v58 = vsel %vm14243_vm10, 4294967295, %v18784_v58  ;;  %10222 = vmatprep.mubr.msk.bf16.mxu0 %vm14243_vm10, %v18781_v5  ;;  %vm18789_vm6 = vcmp.eq.s32.totalorder %v14171_v59, %v13855_v8  ;;  %v18790_v33 = vmov 0  ;;  %18793 = vst [vmem:[#allocation90_spill] sm:$0xff] %v14267_v14  ;;  %v4357_v25 = vmul.f32 1.442695, %v4269_v15  ;;  %6500 = vperm.xlu0 %11750, %v14189_v56  }
 0x46f   : > { %18786 = vst [vmem:[#allocation89_spill] sm:$0xff] %v18785_v58  ;;  %vm14263_vm1 = vmpackc.low %vm18789_vm6, %vm18788_vm0  ;;  %v4361_v10 = vmul.f32 1.442695, %v4271_v52  ;;  %v4147_v42 = vmul.f32 %v4083_v43, %v4083_v43  ;;  %v4018_v41 = vsub.f32 %v18794_v50, %v13715_v4  ;;  %v3786_v58 = vpop.permute.xlu0 %3785  ;;  %v4273_v17 = vmul.f32 -0.5, %v4209_v9  ;;  %v11795_v52 = vld [vmem:[#allocation2 + $0x4c] ss:$12 sps:$4 sm:$0xff]   ;;  %v14285_v9 = vpop.eup %11999  ;;  %6440 = vperm.xlu1 %11749, %v14074_v16  }
 0x470   : > { %v18791_v33 = vsel %vm14263_vm1, 4294967295, %v18790_v33  ;;  %10350 = vmatprep.mubr.msk.bf16.mxu1 %vm14263_vm1, %v18781_v5  ;;  %v4130_v28 = vmul.f32 %v4066_v40, %v4066_v40  ;;  %v3999_v15 = vsub.f32 %v3786_v58, %v13715_v4  ;;  %v4149_v43 = vmul.f32 %v4085_v60, %v4085_v60  ;;  %18795 = vst [vmem:[#allocation21_spill] sm:$0xff] %v14285_v9  ;;  %v18797_v60 = vld [vmem:[#allocation76_spill] sm:$0xff] }
 0x471   : > { %18792 = vst [vmem:[#allocation27_spill] sm:$0xff] %v18791_v33  ;;  %12009 = vpow2.f32 %v4323_v6  ;;  %v4327_v40 = vmul.f32 1.442695, %v4254_v29  ;;  %v4256_v50 = vmul.f32 -0.5, %v4192_v61  ;;  %v18796_v33 = vld [vmem:[#allocation28_spill] sm:$0xff]  ;;  %v4087_v54 = vmul.f32 %v13754_v0, %v4018_v41  ;;  %v14299_v61 = vpop.permute.xlu1 %4546  ;;  %v18804_v41 = vld [vmem:[#allocation79_spill] sm:$0xff]  ;;  %7141 = vmatpush1.bf16.msra.mxu0 %v11795_v52 }
 0x472   : > { %v4194_v58 = vadd.f32 %v4130_v28, %v18796_v33  ;;  %v4068_v53 = vmul.f32 %v13754_v0, %v3999_v15  ;;  %v4020_v6 = vsub.f32 %v18797_v60, %v13715_v4  ;;  %v4022_v29 = vsub.f32 %v18798_v36, %v13715_v4  ;;  %v18818_v52 = vld [vmem:[#allocation29_spill] sm:$0xff]  ;;  %6510 = vperm.xlu0 %11750, %v14267_v14  }
 0x473   : > { %v3794_v28 = vpop.permute.xlu0 %3793  ;;  %vm18799_vm0 = vcmp.eq.s32.totalorder %v18755_v39, %v13791_v37  ;;  %vm18800_vm1 = vcmp.eq.s32.totalorder %v14171_v59, %v13791_v37  ;;  %v18801_v33 = vmov 0  ;;  %12011 = vpow2.f32 %v4357_v25  ;;  %v11796_v25 = vld [vmem:[#allocation2 + $0x1cc] ss:$12 sps:$4 sm:$0xff]   ;;  %7142 = vmatprep.subr.bf16.mxu0 %v18721_v18 }
 0x474   : > { %vm14307_vm6 = vmpackc.low %vm18800_vm1, %vm18799_vm0  ;;  %v4211_v15 = vadd.f32 %v4147_v42, %v18804_v41  ;;  %v4132_v60 = vmul.f32 %v4068_v53, %v4068_v53  ;;  %v4001_v36 = vsub.f32 %v3794_v28, %v13715_v4  ;;  %vm18805_vm1 = vcmp.eq.s32.totalorder %v18755_v39, %v13884_v13  ;;  %v18811_v53 = vld [vmem:[#allocation39_spill] sm:$0xff]  ;;  %7430 = vmatpush1.bf16.msra.mxu1 %v11796_v25  ;;  %v18827_v25 = vld [vmem:[#allocation30_spill] sm:$0xff] }
 0x475   : > { %v18802_v33 = vsel %vm14307_vm6, 4294967295, %v18801_v33  ;;  %vm18806_vm0 = vcmp.eq.s32.totalorder %v14171_v59, %v13884_v13  ;;  %v18807_v56 = vmov 0  ;;  %12013 = vpow2.f32 %v4361_v10  ;;  %10224 = vmatmul.mubr.msk.bf16.gmra.mxu0 %vm14307_vm6, %v18781_v5  ;;  %v14346_v59 = vpop.eup %12001  ;;  %7431 = vmatprep.subr.bf16.mxu1 %v18721_v18 }
 0x476   : > { %18803 = vst [vmem:[#allocation28_spill] sm:$0xff] %v18802_v33  ;;  %vm14324_vm14 = vmpackc.low %vm18806_vm0, %vm18805_vm1  ;;  %v4213_v42 = vadd.f32 %v4149_v43, %v18811_v53  ;;  %v4258_v41 = vmul.f32 -0.5, %v4194_v58  ;;  %vm18812_vm10 = vcmp.eq.s32.totalorder %v18779_v23, %v13822_v62  ;;  %vm18813_vm1 = vcmp.eq.s32.totalorder %v14199_v32, %v13822_v62  ;;  %6445 = vperm.xlu1 %11749, %v14346_v59  }
 0x477   : > { %v18808_v56 = vsel %vm14324_vm14, 4294967295, %v18807_v56  ;;  %vm14340_vm0 = vmpackc.low %vm18813_vm1, %vm18812_vm10  ;;  %v18814_v39 = vmov 0  ;;  %18817 = vst [vmem:[#allocation79_spill] sm:$0xff] %v14346_v59  ;;  %12015 = vpow2.f32 %v4327_v40  ;;  %v4331_v10 = vmul.f32 1.442695, %v4256_v50  ;;  %10352 = vmatmul.mubr.msk.bf16.gmra.mxu1 %vm14324_vm14, %v18781_v5  ;;  %6520 = vperm.xlu0 %11750, %v14285_v9  }
 0x478   : > { %18809 = vst [vmem:[#allocation76_spill] sm:$0xff] %v18808_v56  ;;  %v18815_v39 = vsel %vm14340_vm0, 4294967295, %v18814_v39  ;;  %v4196_v43 = vadd.f32 %v4132_v60, %v18818_v52  ;;  %v4070_v58 = vmul.f32 %v13754_v0, %v4001_v36  ;;  %10226 = vmatprep.mubr.msk.bf16.mxu0 %vm14340_vm0, %v18781_v5  ;;  %vm18819_vm10 = vcmp.eq.s32.totalorder %v18779_v23, %v13855_v8  ;;  %v11797_v50 = vld [vmem:[#allocation2 + $0x34] ss:$12 sps:$4 sm:$0xff]   ;;  %v3802_v52 = vpop.permute.xlu0 %3801 }
 0x479   : > { %18816 = vst [vmem:[#allocation7_spill] sm:$0xff] %v18815_v39  ;;  %vm18820_vm1 = vcmp.eq.s32.totalorder %v14199_v32, %v13855_v8  ;;  %v18821_v40 = vmov 0  ;;  %v4365_v28 = vmul.f32 1.442695, %v4273_v17  ;;  %v4151_v60 = vmul.f32 %v4087_v54, %v4087_v54  ;;  %v14372_v39 = vpop.permute.xlu1 %4552  ;;  %v11798_v54 = vld [vmem:[#allocation2 + $0x1b4] ss:$12 sps:$4 sm:$0xff]   ;;  %7143 = vmatpush1.bf16.msra.mxu0 %v11797_v50 }
 0x47a   : > { %vm14362_vm13 = vmpackc.low %vm18820_vm1, %vm18819_vm10  ;;  %v4089_v36 = vmul.f32 %v13754_v0, %v4020_v6  ;;  %v4091_v53 = vmul.f32 %v13754_v0, %v4022_v29  ;;  %v4275_v56 = vmul.f32 -0.5, %v4211_v15  ;;  %v4134_v33 = vmul.f32 %v4070_v58, %v4070_v58  ;;  %v14378_v6 = vpop.eup %12003  ;;  %v18825_v29 = vld [vmem:[#allocation77_spill] sm:$0xff]  ;;  %7144 = vmatprep.subr.bf16.mxu0 %v18721_v18  ;;  %7432 = vmatpush1.bf16.msra.mxu1 %v11798_v54 }
 0x47b   : > { %v18822_v40 = vsel %vm14362_vm13, 4294967295, %v18821_v40  ;;  %10354 = vmatprep.mubr.msk.bf16.mxu1 %vm14362_vm13, %v18781_v5  ;;  %v4003_v17 = vsub.f32 %v3802_v52, %v13715_v4  ;;  %18824 = vst [vmem:[#allocation39_spill] sm:$0xff] %v14378_v6  ;;  %v4335_v14 = vmul.f32 1.442695, %v4258_v41  ;;  %v14387_v15 = vpop.eup %12005  ;;  %12017 = vpow2.f32 %v4331_v10  ;;  %6530 = vperm.xlu0 %11750, %v14378_v6  }
 0x47c   : > { %18823 = vst [vmem:[#allocation56_spill] sm:$0xff] %v18822_v40  ;;  %v4024_v40 = vsub.f32 %v18825_v29, %v13715_v4  ;;  %18826 = vst [vmem:[#allocation29_spill] sm:$0xff] %v14387_v15  ;;  %v4260_v58 = vmul.f32 -0.5, %v4196_v43  ;;  %v4198_v52 = vadd.f32 %v4134_v33, %v18827_v25  ;;  %v14394_v41 = vpop.eup %12007  ;;  %v4277_v29 = vmul.f32 -0.5, %v4213_v42  ;;  %v3810_v11 = vpop.permute.xlu0 %3809  ;;  %7433 = vmatprep.subr.bf16.mxu1 %v18721_v18 }
 0x47d   : > { %v4072_v16 = vmul.f32 %v13754_v0, %v4003_v17  ;;  %v4153_v59 = vmul.f32 %v4089_v36, %v4089_v36  ;;  %v4155_v45 = vmul.f32 %v4091_v53, %v4091_v53  ;;  %v14397_v10 = vpop.permute.xlu1 %4558  ;;  %vm18828_vm13 = vcmp.eq.s32.totalorder %v18779_v23, %v13791_v37  ;;  %6455 = vperm.xlu1 %11749, %v14394_v41   ;;  %v11800_v17 = vld [vmem:[#allocation2 + $0x19c] ss:$12 sps:$4 sm:$0xff]  }
 0x47e   : > { %vm18829_vm1 = vcmp.eq.s32.totalorder %v14199_v32, %v13791_v37  ;;  %v18830_v33 = vmov 0  ;;  %12019 = vpow2.f32 %v4365_v28  ;;  %v4215_v42 = vadd.f32 %v4151_v60, %v13793_v22  ;;  %v18843_v22 = vld [vmem:[#allocation57_spill] sm:$0xff]  ;;  %7434 = vmatpush1.bf16.msra.mxu1 %v11800_v17 }
 0x47f   : > { %vm14405_vm10 = vmpackc.low %vm18829_vm1, %vm18828_vm13  ;;  %v4136_v43 = vmul.f32 %v4072_v16, %v4072_v16  ;;  %v4005_v50 = vsub.f32 %v3810_v11, %v13715_v4  ;;  %vm18833_vm13 = vcmp.eq.s32.totalorder %v18779_v23, %v13884_v13  ;;  %vm18834_vm1 = vcmp.eq.s32.totalorder %v14199_v32, %v13884_v13  ;;  %v11799_v11 = vld [vmem:[#allocation2 + $0x1c] ss:$12 sps:$4 sm:$0xff]   ;;  %v14445_v32 = vpop.eup %12009  ;;  %6540 = vperm.xlu0 %11750, %v14387_v15  }
 0x480   : > { %v18831_v33 = vsel %vm14405_vm10, 4294967295, %v18830_v33  ;;  %vm14423_vm0 = vmpackc.low %vm18834_vm1, %vm18833_vm13  ;;  %v18835_v36 = vmov 0  ;;  %v4093_v28 = vmul.f32 %v13754_v0, %v4024_v40  ;;  %12021 = vpow2.f32 %v4335_v14  ;;  %10228 = vmatmul.mubr.msk.bf16.gmra.mxu0 %vm14405_vm10, %v18781_v5  ;;  %v18844_v14 = vld [vmem:[#allocation31_spill] sm:$0xff]  ;;  %7435 = vmatprep.subr.bf16.mxu1 %v18721_v18 }
 0x481   : > { %18832 = vst [vmem:[#allocation77_spill] sm:$0xff] %v18831_v33  ;;  %v18836_v36 = vsel %vm14423_vm0, 4294967295, %v18835_v36  ;;  %vm18838_vm14 = vcmp.eq.s32.totalorder %v18810_v26, %v13822_v62  ;;  %vm18839_vm6 = vcmp.eq.s32.totalorder %v14275_v24, %v13822_v62  ;;  %v18840_v4 = vmov 0  ;;  %10356 = vmatmul.mubr.msk.bf16.gmra.mxu1 %vm14423_vm0, %v18781_v5  ;;  %6465 = vperm.xlu1 %11749, %v14445_v32   ;;  %v18864_v33 = vld [vmem:[#allocation58_spill] sm:$0xff] }
 0x482   : > { %18837 = vst [vmem:[#allocation30_spill] sm:$0xff] %v18836_v36  ;;  %vm14437_vm12 = vmpackc.low %vm18839_vm6, %vm18838_vm14  ;;  %v4339_v16 = vmul.f32 1.442695, %v4260_v58  ;;  %v4262_v23 = vmul.f32 -0.5, %v4198_v52  ;;  %v4200_v40 = vadd.f32 %v4136_v43, %v18844_v14  ;;  %v4074_v60 = vmul.f32 %v13754_v0, %v4005_v50  ;;  %v3818_v52 = vpop.permute.xlu0 %3817  ;;  %v14471_v43 = vpop.permute.xlu1 %4564  ;;  %7145 = vmatpush1.bf16.msra.mxu0 %v11799_v11 }
 0x483   : > { %v18841_v4 = vsel %vm14437_vm12, 4294967295, %v18840_v4  ;;  %10230 = vmatprep.mubr.msk.bf16.mxu0 %vm14437_vm12, %v18781_v5  ;;  %vm18845_vm14 = vcmp.eq.s32.totalorder %v18810_v26, %v13855_v8  ;;  %vm18846_vm6 = vcmp.eq.s32.totalorder %v14275_v24, %v13855_v8  ;;  %v18847_v53 = vmov 0  ;;  %7146 = vmatprep.subr.bf16.mxu0 %v18721_v18 }
 0x484   : > { %18842 = vst [vmem:[#allocation91_spill] sm:$0xff] %v18841_v4  ;;  %vm14461_vm1 = vmpackc.low %vm18846_vm6, %vm18845_vm14  ;;  %v4369_v0 = vmul.f32 1.442695, %v4275_v56  ;;  %v4373_v54 = vmul.f32 1.442695, %v4277_v29  ;;  %v4217_v58 = vadd.f32 %v4153_v59, %v13797_v21  ;;  %v4219_v25 = vadd.f32 %v4155_v45, %v13803_v3  ;;  %v14483_v3 = vpop.eup %12011 }
 0x485   : > { %v18848_v53 = vsel %vm14461_vm1, 4294967295, %v18847_v53  ;;  %10358 = vmatprep.mubr.msk.bf16.mxu1 %vm14461_vm1, %v18781_v5  ;;  %v4279_v50 = vmul.f32 -0.5, %v4215_v42  ;;  %v4138_v14 = vmul.f32 %v4074_v60, %v4074_v60  ;;  %v14477_v56 = vld [vmem:[%s17899_s4 + $0x1] ss:$0 sm:$0xff]  ;;  %vm4742_vm14 = vcmp.eq.s32.totalorder %v14275_v24, %v13791_v37  ;;  %18850 = vst [vmem:[#allocation31_spill] sm:$0xff] %v14483_v3  ;;  %v14489_v29 = vpop.eup %12013  ;;  %v18852_v60 = vld [vmem:[#allocation32_spill] sm:$0xff]  ;;  %6550 = vperm.xlu0 %11750, %v14483_v3  }
 0x486   : > { %18849 = vst [vmem:[#allocation57_spill] sm:$0xff] %v18848_v53  ;;  %v4007_v21 = vsub.f32 %v3818_v52, %v14477_v56  ;;  %v4157_v45 = vmul.f32 %v4093_v28, %v4093_v28  ;;  %v4264_v59 = vmul.f32 -0.5, %v4200_v40  ;;  %18851 = vst [vmem:[#allocation92_spill] sm:$0xff] %v14489_v29  ;;  %12023 = vpow2.f32 %v4339_v16  ;;  %v14495_v53 = vld [vmem:[%s17900_s5 + $0x1] ss:$0 sm:$0xff]  ;;  %v14501_v11 = vpop.eup %12015  ;;  %v3826_v4 = vpop.permute.xlu0 %3825 }
 0x487   : > { %v4343_v42 = vmul.f32 1.442695, %v4262_v23  ;;  %v4202_v52 = vadd.f32 %v4138_v14, %v18852_v60  ;;  %v4281_v40 = vmul.f32 -0.5, %v4217_v58  ;;  %v18853_v16 = vld [vmem:[#allocation78_spill] sm:$0xff]  ;;  %v18854_v14 = vld [vmem:[#allocation35_spill] sm:$0xff]  ;;  %v14508_v36 = vpop.permute.xlu1 %4570  ;;  %vm18855_vm6 = vcmp.eq.s32.totalorder %v18810_v26, %v13791_v37  ;;  %6475 = vperm.xlu1 %11749, %v14501_v11  }
 0x488   : > { %v4076_v28 = vmul.f32 %v14495_v53, %v4007_v21  ;;  %v4026_v23 = vsub.f32 %v18853_v16, %v14477_v56  ;;  %v4028_v60 = vsub.f32 %v18854_v14, %v14477_v56  ;;  %vm14516_vm13 = vmpackc.low %vm4742_vm14, %vm18855_vm6  ;;  %v18856_v17 = vmov 0 }
 0x489   : > { %v18857_v17 = vsel %vm14516_vm13, 4294967295, %v18856_v17  ;;  %12025 = vpow2.f32 %v4369_v0  ;;  %v4283_v58 = vmul.f32 -0.5, %v4219_v25  ;;  %v4009_v16 = vsub.f32 %v3826_v4, %v14477_v56  ;;  %v11801_v0 = vld [vmem:[#allocation2 + $0x4] ss:$12 sps:$4 sm:$0xff]   ;;  %10232 = vmatmul.mubr.msk.bf16.gmra.mxu0 %vm14516_vm13, %v18781_v5  ;;  %6560 = vperm.xlu0 %11750, %v14489_v29  }
 0x48a   : > { %18858 = vst [vmem:[#allocation32_spill] sm:$0xff] %v18857_v17  ;;  %v4140_v21 = vmul.f32 %v4076_v28, %v4076_v28  ;;  %vm18859_vm14 = vcmp.eq.s32.totalorder %v18810_v26, %v13884_v13  ;;  %vm18860_vm6 = vcmp.eq.s32.totalorder %v14275_v24, %v13884_v13  ;;  %v18861_v14 = vmov 0  ;;  %v11802_v24 = vld [vmem:[#allocation2 + $0x184] ss:$12 sps:$4 sm:$0xff]   ;;  %7147 = vmatpush1.bf16.msra.mxu0 %v11801_v0 }
 0x48b   : > { %vm14533_vm0 = vmpackc.low %vm18860_vm6, %vm18859_vm14  ;;  %12027 = vpow2.f32 %v4373_v54  ;;  %v4377_v25 = vmul.f32 1.442695, %v4279_v50  ;;  %v4347_v28 = vmul.f32 1.442695, %v4264_v59  ;;  %vm18865_vm1 = vcmp.eq.s32.totalorder %v18843_v22, %v13822_v62  ;;  %v18870_v54 = vld [vmem:[#allocation33_spill] sm:$0xff]  ;;  %v14581_v17 = vpop.permute.xlu1 %4576  ;;  %7436 = vmatpush1.bf16.msra.mxu1 %v11802_v24  ;;  %7148 = vmatprep.subr.bf16.mxu0 %v18721_v18 }
 0x48c   : > { %v18862_v14 = vsel %vm14533_vm0, 4294967295, %v18861_v14  ;;  %vm18866_vm14 = vcmp.eq.s32.totalorder %v14299_v61, %v13822_v62  ;;  %v18867_v26 = vmov 0  ;;  %12029 = vpow2.f32 %v4343_v42  ;;  %10360 = vmatmul.mubr.msk.bf16.gmra.mxu1 %vm14533_vm0, %v18781_v5  ;;  %7437 = vmatprep.subr.bf16.mxu1 %v18721_v18 }
 0x48d   : > { %18863 = vst [vmem:[#allocation78_spill] sm:$0xff] %v18862_v14  ;;  %vm14548_vm6 = vmpackc.low %vm18866_vm14, %vm18865_vm1  ;;  %v4266_v4 = vmul.f32 -0.5, %v4202_v52  ;;  %v4204_v50 = vadd.f32 %v4140_v21, %v18870_v54  ;;  %v4078_v59 = vmul.f32 %v14495_v53, %v4009_v16  ;;  %vm18871_vm1 = vcmp.eq.s32.totalorder %v18843_v22, %v13855_v8  ;;  %v14572_v52 = vpop.eup %12017  ;;  %v3834_v14 = vpop.permute.xlu0 %3833 }
 0x48e   : > { %v18868_v26 = vsel %vm14548_vm6, 4294967295, %v18867_v26  ;;  %10234 = vmatprep.mubr.msk.bf16.mxu0 %vm14548_vm6, %v18781_v5  ;;  %vm18872_vm14 = vcmp.eq.s32.totalorder %v14299_v61, %v13855_v8  ;;  %v18873_v42 = vmov 0  ;;  %v4381_v21 = vmul.f32 1.442695, %v4281_v40  ;;  %6485 = vperm.xlu1 %11749, %v14572_v52  }
 0x48f   : > { %18869 = vst [vmem:[#allocation35_spill] sm:$0xff] %v18868_v26  ;;  %vm14568_vm12 = vmpackc.low %vm18872_vm14, %vm18871_vm1  ;;  %v4221_v16 = vadd.f32 %v4157_v45, %v13843_v46  ;;  %v4095_v54 = vmul.f32 %v14495_v53, %v4026_v23  ;;  %v4097_v26 = vmul.f32 %v14495_v53, %v4028_v60  ;;  %v4385_v15 = vmul.f32 1.442695, %v4283_v58  ;;  %v11803_v46 = vld [vmem:[#allocation2 + $0x16c] ss:$12 sps:$4 sm:$0xff]   ;;  %v14587_v45 = vpop.eup %12019  ;;  %v18877_v23 = vld [vmem:[#allocation80_spill] sm:$0xff] }
 0x490   : > { %v18874_v42 = vsel %vm14568_vm12, 4294967295, %v18873_v42  ;;  %10362 = vmatprep.mubr.msk.bf16.mxu1 %vm14568_vm12, %v18781_v5  ;;  %v4142_v6 = vmul.f32 %v4078_v59, %v4078_v59  ;;  %v4011_v40 = vsub.f32 %v3834_v14, %v14477_v56  ;;  %18876 = vst [vmem:[#allocation33_spill] sm:$0xff] %v14587_v45  ;;  %v4030_v60 = vsub.f32 %v18877_v23, %v14477_v56  ;;  %v14595_v58 = vpop.eup %12021 }
 0x491   : > { %18875 = vst [vmem:[#allocation58_spill] sm:$0xff] %v18874_v42  ;;  %12031 = vpow2.f32 %v4347_v28  ;;  %v4351_v14 = vmul.f32 1.442695, %v4266_v4  ;;  %v4268_v59 = vmul.f32 -0.5, %v4204_v50  ;;  %v18878_v42 = vld [vmem:[#allocation34_spill] sm:$0xff]  ;;  %v4159_v28 = vmul.f32 %v4095_v54, %v4095_v54  ;;  %v3842_v4 = vpop.permute.xlu0 %3841  ;;  %v14606_v50 = vpop.permute.xlu1 %4582  ;;  %7149 = vmatpush2.bf16.msra.mxu0 %v11803_v46  ;;  %6570 = vperm.xlu0 %11750, %v14587_v45  }
 0x492   : > { %v4206_v0 = vadd.f32 %v4142_v6, %v18878_v42  ;;  %v4080_v3 = vmul.f32 %v14495_v53, %v4011_v40  ;;  %v4161_v23 = vmul.f32 %v4097_v26, %v4097_v26  ;;  %v4032_v24 = vsub.f32 %v13809_v27, %v14477_v56  ;;  %6495 = vperm.xlu1 %11749, %v14595_v58   ;;  %v18889_v40 = vld [vmem:[#allocation59_spill] sm:$0xff]  ;;  %v18904_v45 = vld [vmem:[#allocation42_spill] sm:$0xff] }
 0x493   : > { %vm18879_vm12 = vcmp.eq.s32.totalorder %v18843_v22, %v13791_v37  ;;  %vm18880_vm1 = vcmp.eq.s32.totalorder %v14299_v61, %v13791_v37  ;;  %v18881_v6 = vmov 0  ;;  %12033 = vpow2.f32 %v4377_v25  ;;  %v11804_v25 = vld [vmem:[#allocation2 + $0x2ec] ss:$12 sps:$4 sm:$0xff]   ;;  %7150 = vmatprep.subr.bf16.mxu0 %v18721_v18 }
 0x494   : > { %vm14614_vm14 = vmpackc.low %vm18880_vm1, %vm18879_vm12  ;;  %v4285_v27 = vmul.f32 -0.5, %v4221_v16  ;;  %v4144_v26 = vmul.f32 %v4080_v3, %v4080_v3  ;;  %v4013_v42 = vsub.f32 %v3842_v4, %v14477_v56  ;;  %vm18884_vm13 = vcmp.eq.s32.totalorder %v18843_v22, %v13884_v13  ;;  %7438 = vmatpush2.bf16.msra.mxu1 %v11804_v25 }
 0x495   : > { %v18882_v6 = vsel %vm14614_vm14, 4294967295, %v18881_v6  ;;  %vm18885_vm12 = vcmp.eq.s32.totalorder %v14299_v61, %v13884_v13  ;;  %v18886_v54 = vmov 0  ;;  %12035 = vpow2.f32 %v4381_v21  ;;  %10236 = vmatmul.mubr.msk.bf16.gmra.mxu0 %vm14614_vm14, %v18781_v5  ;;  %v18895_v21 = vld [vmem:[#allocation36_spill] sm:$0xff]  ;;  %7439 = vmatprep.subr.bf16.mxu1 %v18721_v18 }
 0x496   : > { %18883 = vst [vmem:[#allocation80_spill] sm:$0xff] %v18882_v6  ;;  %vm14630_vm1 = vmpackc.low %vm18885_vm12, %vm18884_vm13  ;;  %v4099_v3 = vmul.f32 %v14495_v53, %v4030_v60  ;;  %v4270_v16 = vmul.f32 -0.5, %v4206_v0  ;;  %vm18890_vm6 = vcmp.eq.s32.totalorder %v18864_v33, %v13822_v62  ;;  %vm18891_vm13 = vcmp.eq.s32.totalorder %v14372_v39, %v13822_v62  ;;  %v14670_v0 = vpop.eup %12023 }
 0x497   : > { %v18887_v54 = vsel %vm14630_vm1, 4294967295, %v18886_v54  ;;  %vm14646_vm12 = vmpackc.low %vm18891_vm13, %vm18890_vm6  ;;  %v18892_v61 = vmov 0  ;;  %12037 = vpow2.f32 %v4351_v14  ;;  %v4355_v22 = vmul.f32 1.442695, %v4268_v59  ;;  %10364 = vmatmul.mubr.msk.bf16.gmra.mxu1 %vm14630_vm1, %v18781_v5  ;;  %v11805_v59 = vld [vmem:[#allocation2 + $0x154] ss:$12 sps:$4 sm:$0xff]   ;;  %6505 = vperm.xlu1 %11749, %v14670_v0  }
 0x498   : > { %18888 = vst [vmem:[#allocation34_spill] sm:$0xff] %v18887_v54  ;;  %v18893_v61 = vsel %vm14646_vm12, 4294967295, %v18892_v61  ;;  %v4208_v46 = vadd.f32 %v4144_v26, %v18895_v21  ;;  %v4082_v60 = vmul.f32 %v14495_v53, %v4013_v42  ;;  %10238 = vmatprep.mubr.msk.bf16.mxu0 %vm14646_vm12, %v18781_v5  ;;  %vm18896_vm6 = vcmp.eq.s32.totalorder %v18864_v33, %v13855_v8  ;;  %v3850_v21 = vpop.permute.xlu0 %3849 }
 0x499   : > { %18894 = vst [vmem:[#allocation59_spill] sm:$0xff] %v18893_v61  ;;  %vm18897_vm13 = vcmp.eq.s32.totalorder %v14372_v39, %v13855_v8  ;;  %v18898_v14 = vmov 0  ;;  %12039 = vpow2.f32 %v4385_v15  ;;  %v4223_v4 = vadd.f32 %v4159_v28, %v13847_v47  ;;  %v14679_v61 = vpop.permute.xlu1 %4588  ;;  %v11806_v47 = vld [vmem:[#allocation2 + $0x2d4] ss:$12 sps:$4 sm:$0xff]   ;;  %7151 = vmatpush2.bf16.msra.mxu0 %v11805_v59 }
 0x49a   : > { %vm14666_vm0 = vmpackc.low %vm18897_vm13, %vm18896_vm6  ;;  %v4225_v26 = vadd.f32 %v4161_v23, %v13863_v12  ;;  %v4101_v42 = vmul.f32 %v14495_v53, %v4032_v24  ;;  %v4389_v54 = vmul.f32 1.442695, %v4285_v27  ;;  %v4146_v6 = vmul.f32 %v4082_v60, %v4082_v60  ;;  %v14685_v12 = vpop.eup %12025  ;;  %v18903_v60 = vld [vmem:[#allocation37_spill] sm:$0xff]  ;;  %7152 = vmatprep.subr.bf16.mxu0 %v18721_v18  ;;  %7440 = vmatpush2.bf16.msra.mxu1 %v11806_v47 }
 0x49b   : > { %v18899_v14 = vsel %vm14666_vm0, 4294967295, %v18898_v14  ;;  %10366 = vmatprep.mubr.msk.bf16.mxu1 %vm14666_vm0, %v18781_v5  ;;  %v4015_v15 = vsub.f32 %v3850_v21, %v14477_v56  ;;  %18901 = vst [vmem:[#allocation93_spill] sm:$0xff] %v14685_v12  ;;  %v4163_v28 = vmul.f32 %v4099_v3, %v4099_v3  ;;  %v4359_v23 = vmul.f32 1.442695, %v4270_v16  ;;  %v14692_v24 = vpop.eup %12027  ;;  %6580 = vperm.xlu0 %11750, %v14685_v12  }
 0x49c   : > { %18900 = vst [vmem:[#allocation36_spill] sm:$0xff] %v18899_v14  ;;  %18902 = vst [vmem:[#allocation94_spill] sm:$0xff] %v14692_v24  ;;  %12041 = vpow2.f32 %v4355_v22  ;;  %v4272_v27 = vmul.f32 -0.5, %v4208_v46  ;;  %v4210_v21 = vadd.f32 %v4146_v6, %v18903_v60  ;;  %v14699_v3 = vpop.eup %12029  ;;  %v4287_v16 = vmul.f32 -0.5, %v4223_v4  ;;  %v3858_v22 = vpop.permute.xlu0 %3857  ;;  %7441 = vmatprep.subr.bf16.mxu1 %v18721_v18 }
 0x49d   : > { %v4084_v25 = vmul.f32 %v14495_v53, %v4015_v15  ;;  %v4165_v14 = vmul.f32 %v4101_v42, %v4101_v42  ;;  %v4034_v29 = vsub.f32 %v18904_v45, %v14477_v56  ;;  %v14704_v46 = vpop.permute.xlu1 %4594  ;;  %vm18905_vm0 = vcmp.eq.s32.totalorder %v18864_v33, %v13791_v37  ;;  %6515 = vperm.xlu1 %11749, %v14699_v3   ;;  %v18915_v15 = vld [vmem:[#allocation43_spill] sm:$0xff] }
 0x49e   : > { %vm18906_vm6 = vcmp.eq.s32.totalorder %v14372_v39, %v13791_v37  ;;  %v18907_v6 = vmov 0  ;;  %12043 = vpow2.f32 %v4389_v54  ;;  %v4289_v45 = vmul.f32 -0.5, %v4225_v26  ;;  %v11807_v26 = vld [vmem:[#allocation2 + $0x13c] ss:$12 sps:$4 sm:$0xff]   ;;  %v14752_v47 = vpop.eup %12031 }
 0x49f   : > { %vm14712_vm13 = vmpackc.low %vm18906_vm6, %vm18905_vm0  ;;  %v4148_v59 = vmul.f32 %v4084_v25, %v4084_v25  ;;  %v4017_v4 = vsub.f32 %v3858_v22, %v14477_v56  ;;  %vm18910_vm0 = vcmp.eq.s32.totalorder %v18864_v33, %v13884_v13  ;;  %vm18911_vm6 = vcmp.eq.s32.totalorder %v14372_v39, %v13884_v13  ;;  %v18921_v33 = vld [vmem:[#allocation60_spill] sm:$0xff]  ;;  %v18922_v25 = vld [vmem:[#allocation11_spill] sm:$0xff]  ;;  %6590 = vperm.xlu0 %11750, %v14692_v24  }
 0x4a0   : > { %v18908_v6 = vsel %vm14712_vm13, 4294967295, %v18907_v6  ;;  %vm14729_vm14 = vmpackc.low %vm18911_vm6, %vm18910_vm0  ;;  %v18912_v42 = vmov 0  ;;  %v4036_v54 = vsub.f32 %v18915_v15, %v14477_v56  ;;  %12045 = vpow2.f32 %v4359_v23  ;;  %10240 = vmatmul.mubr.msk.bf16.gmra.mxu0 %vm14712_vm13, %v18781_v5 }
 0x4a1   : > { %18909 = vst [vmem:[#allocation37_spill] sm:$0xff] %v18908_v6  ;;  %v18913_v42 = vsel %vm14729_vm14, 4294967295, %v18912_v42  ;;  %vm18916_vm1 = vcmp.eq.s32.totalorder %v18889_v40, %v13822_v62  ;;  %vm18917_vm12 = vcmp.eq.s32.totalorder %v14397_v10, %v13822_v62  ;;  %v18918_v39 = vmov 0  ;;  %10368 = vmatmul.mubr.msk.bf16.gmra.mxu1 %vm14729_vm14, %v18781_v5  ;;  %v14779_v6 = vpop.permute.xlu1 %4600  ;;  %6525 = vperm.xlu1 %11749, %v14752_v47  }
 0x4a2   : > { %18914 = vst [vmem:[#allocation42_spill] sm:$0xff] %v18913_v42  ;;  %vm14744_vm10 = vmpackc.low %vm18917_vm12, %vm18916_vm1  ;;  %v4363_v23 = vmul.f32 1.442695, %v4272_v27  ;;  %v4274_v60 = vmul.f32 -0.5, %v4210_v21  ;;  %v4212_v22 = vadd.f32 %v4148_v59, %v18922_v25  ;;  %v4086_v15 = vmul.f32 %v14495_v53, %v4017_v4  ;;  %v11808_v21 = vld [vmem:[#allocation2 + $0x2bc] ss:$12 sps:$4 sm:$0xff]   ;;  %7153 = vmatpush2.bf16.msra.mxu0 %v11807_v26 }
 0x4a3   : > { %v18919_v39 = vsel %vm14744_vm10, 4294967295, %v18918_v39  ;;  %10242 = vmatprep.mubr.msk.bf16.mxu0 %vm14744_vm10, %v18781_v5  ;;  %vm18923_vm1 = vcmp.eq.s32.totalorder %v18889_v40, %v13855_v8  ;;  %vm18924_vm12 = vcmp.eq.s32.totalorder %v14397_v10, %v13855_v8  ;;  %v18925_v27 = vmov 0  ;;  %7442 = vmatpush2.bf16.msra.mxu1 %v11808_v21 }
 0x4a4   : > { %18920 = vst [vmem:[#allocation43_spill] sm:$0xff] %v18919_v39  ;;  %vm14768_vm6 = vmpackc.low %vm18924_vm12, %vm18923_vm1  ;;  %v4393_v59 = vmul.f32 1.442695, %v4287_v16  ;;  %v4227_v4 = vadd.f32 %v4163_v28, %v13886_v49  ;;  %v4229_v25 = vadd.f32 %v4165_v14, %v13892_v34  ;;  %v4103_v42 = vmul.f32 %v14495_v53, %v4034_v29  ;;  %v3866_v39 = vpop.permute.xlu0 %3865  ;;  %v14786_v49 = vpop.eup %12033  ;;  %7154 = vmatprep.subr.bf16.mxu0 %v18721_v18 }
 0x4a5   : > { %v18926_v27 = vsel %vm14768_vm6, 4294967295, %v18925_v27  ;;  %10370 = vmatprep.mubr.msk.bf16.mxu1 %vm14768_vm6, %v18781_v5  ;;  %v4397_v12 = vmul.f32 1.442695, %v4289_v45  ;;  %v4150_v9 = vmul.f32 %v4086_v15, %v4086_v15  ;;  %v4019_v16 = vsub.f32 %v3866_v39, %v14477_v56  ;;  %18928 = vst [vmem:[#allocation11_spill] sm:$0xff] %v14786_v49  ;;  %v14793_v14 = vpop.eup %12035  ;;  %v18929_v45 = vld [vmem:[#allocation40_spill] sm:$0xff]  ;;  %6600 = vperm.xlu0 %11750, %v14786_v49  }
 0x4a6   : > { %18927 = vst [vmem:[#allocation60_spill] sm:$0xff] %v18926_v27  ;;  %v4105_v34 = vmul.f32 %v14495_v53, %v4036_v54  ;;  %v4276_v29 = vmul.f32 -0.5, %v4212_v22  ;;  %12047 = vpow2.f32 %v4363_v23  ;;  %v4367_v28 = vmul.f32 1.442695, %v4274_v60  ;;  %v14800_v54 = vpop.eup %12037  ;;  %v14805_v60 = vpop.permute.xlu1 %4606  ;;  %7443 = vmatprep.subr.bf16.mxu1 %v18721_v18 }
 0x4a7   : > { %v4214_v39 = vadd.f32 %v4150_v9, %v18929_v45  ;;  %v4088_v15 = vmul.f32 %v14495_v53, %v4019_v16  ;;  %v4291_v22 = vmul.f32 -0.5, %v4227_v4  ;;  %v4167_v27 = vmul.f32 %v4103_v42, %v4103_v42  ;;  %6535 = vperm.xlu1 %11749, %v14800_v54   ;;  %v18941_v45 = vld [vmem:[#allocation61_spill] sm:$0xff] }
 0x4a8   : > { %v4038_v26 = vsub.f32 %v13898_v7, %v14477_v56  ;;  %v3874_v23 = vpop.permute.xlu0 %3873  ;;  %vm18930_vm0 = vcmp.eq.s32.totalorder %v18889_v40, %v13791_v37  ;;  %vm18931_vm1 = vcmp.eq.s32.totalorder %v14397_v10, %v13791_v37  ;;  %v18932_v9 = vmov 0  ;;  %v14822_v7 = vpop.eup %12039 }
 0x4a9   : > { %vm14813_vm12 = vmpackc.low %vm18931_vm1, %vm18930_vm0  ;;  %18935 = vst [vmem:[#allocation95_spill] sm:$0xff] %v14822_v7  ;;  %12049 = vpow2.f32 %v4393_v59  ;;  %v4293_v42 = vmul.f32 -0.5, %v4229_v25  ;;  %v4152_v21 = vmul.f32 %v4088_v15, %v4088_v15  ;;  %v4021_v4 = vsub.f32 %v3874_v23, %v14477_v56  ;;  %v11809_v59 = vld [vmem:[#allocation2 + $0x124] ss:$12 sps:$4 sm:$0xff]   ;;  %6610 = vperm.xlu0 %11750, %v14793_v14  }
 0x4aa   : > { %v18933_v9 = vsel %vm14813_vm12, 4294967295, %v18932_v9  ;;  %vm18936_vm0 = vcmp.eq.s32.totalorder %v18889_v40, %v13884_v13  ;;  %vm18937_vm1 = vcmp.eq.s32.totalorder %v14397_v10, %v13884_v13  ;;  %v18938_v16 = vmov 0  ;;  %10244 = vmatmul.mubr.msk.bf16.gmra.mxu0 %vm14813_vm12, %v18781_v5  ;;  %v11810_v40 = vld [vmem:[#allocation2 + $0x2a4] ss:$12 sps:$4 sm:$0xff]  }
 0x4ab   : > { %18934 = vst [vmem:[#allocation40_spill] sm:$0xff] %v18933_v9  ;;  %vm14832_vm6 = vmpackc.low %vm18937_vm1, %vm18936_vm0  ;;  %12051 = vpow2.f32 %v4397_v12  ;;  %v4169_v25 = vmul.f32 %v4105_v34, %v4105_v34  ;;  %v4371_v15 = vmul.f32 1.442695, %v4276_v29  ;;  %vm18942_vm14 = vcmp.eq.s32.totalorder %v18921_v33, %v13822_v62  ;;  %v18947_v34 = vld [vmem:[#allocation12_spill] sm:$0xff]  ;;  %v14881_v9 = vpop.permute.xlu1 %4612  ;;  %7155 = vmatpush2.bf16.msra.mxu0 %v11809_v59  ;;  %7444 = vmatpush2.bf16.msra.mxu1 %v11810_v40 }
 0x4ac   : > { %v18939_v16 = vsel %vm14832_vm6, 4294967295, %v18938_v16  ;;  %vm18943_vm0 = vcmp.eq.s32.totalorder %v14471_v43, %v13822_v62  ;;  %v18944_v10 = vmov 0  ;;  %12053 = vpow2.f32 %v4367_v28  ;;  %10372 = vmatmul.mubr.msk.bf16.gmra.mxu1 %vm14832_vm6, %v18781_v5  ;;  %7156 = vmatprep.subr.bf16.mxu0 %v18721_v18 }
 0x4ad   : > { %18940 = vst [vmem:[#allocation96_spill] sm:$0xff] %v18939_v16  ;;  %vm14847_vm1 = vmpackc.low %vm18943_vm0, %vm18942_vm14  ;;  %v4278_v12 = vmul.f32 -0.5, %v4214_v39  ;;  %v4216_v29 = vadd.f32 %v4152_v21, %v18947_v34  ;;  %v4090_v23 = vmul.f32 %v14495_v53, %v4021_v4  ;;  %vm18948_vm14 = vcmp.eq.s32.totalorder %v18921_v33, %v13855_v8  ;;  %v14871_v39 = vpop.eup %12041  ;;  %v3882_v16 = vpop.permute.xlu0 %3881  ;;  %7445 = vmatprep.subr.bf16.mxu1 %v18721_v18 }
 0x4ae   : > { %v18945_v10 = vsel %vm14847_vm1, 4294967295, %v18944_v10  ;;  %10246 = vmatprep.mubr.msk.bf16.mxu0 %vm14847_vm1, %v18781_v5  ;;  %vm18949_vm0 = vcmp.eq.s32.totalorder %v14471_v43, %v13855_v8  ;;  %v18950_v28 = vmov 0  ;;  %18953 = vst [vmem:[#allocation97_spill] sm:$0xff] %v14871_v39  ;;  %v4401_v21 = vmul.f32 1.442695, %v4291_v22  ;;  %6545 = vperm.xlu1 %11749, %v14871_v39  }
 0x4af   : > { %18946 = vst [vmem:[#allocation61_spill] sm:$0xff] %v18945_v10  ;;  %vm14867_vm10 = vmpackc.low %vm18949_vm0, %vm18948_vm14  ;;  %v4231_v4 = vadd.f32 %v4167_v27, %v13931_v63  ;;  %v4107_v34 = vmul.f32 %v14495_v53, %v4038_v26  ;;  %v4040_v10 = vsub.f32 %v13924_v30, %v14477_v56  ;;  %v4405_v49 = vmul.f32 1.442695, %v4293_v42  ;;  %v11811_v30 = vld [vmem:[#allocation2 + $0x10c] ss:$12 sps:$4 sm:$0xff]   ;;  %v14887_v27 = vpop.eup %12043  ;;  %6620 = vperm.xlu0 %11750, %v14822_v7  }
 0x4b0   : > { %v18951_v28 = vsel %vm14867_vm10, 4294967295, %v18950_v28  ;;  %10374 = vmatprep.mubr.msk.bf16.mxu1 %vm14867_vm10, %v18781_v5  ;;  %v4154_v24 = vmul.f32 %v4090_v23, %v4090_v23  ;;  %v4023_v63 = vsub.f32 %v3882_v16, %v14477_v56  ;;  %18954 = vst [vmem:[#allocation98_spill] sm:$0xff] %v14887_v27  ;;  %v4233_v22 = vadd.f32 %v4169_v25, %v13938_v55  ;;  %v14894_v26 = vpop.eup %12045  ;;  %v18955_v23 = vld [vmem:[#allocation81_spill] sm:$0xff] }
 0x4b1   : > { %18952 = vst [vmem:[#allocation12_spill] sm:$0xff] %v18951_v28  ;;  %12055 = vpow2.f32 %v4371_v15  ;;  %v4375_v42 = vmul.f32 1.442695, %v4278_v12  ;;  %v4280_v16 = vmul.f32 -0.5, %v4216_v29  ;;  %v4171_v55 = vmul.f32 %v4107_v34, %v4107_v34  ;;  %v3890_v40 = vpop.permute.xlu0 %3889  ;;  %v14906_v12 = vpop.permute.xlu1 %4618  ;;  %7157 = vmatpush2.bf16.msra.mxu0 %v11811_v30 }
 0x4b2   : > { %v4218_v28 = vadd.f32 %v4154_v24, %v18955_v23  ;;  %v4092_v59 = vmul.f32 %v14495_v53, %v4023_v63  ;;  %v4109_v25 = vmul.f32 %v14495_v53, %v4040_v10  ;;  %v4042_v15 = vsub.f32 %v13945_v2, %v14477_v56  ;;  %6555 = vperm.xlu1 %11749, %v14894_v26   ;;  %v11812_v63 = vld [vmem:[#allocation2 + $0x28c] ss:$12 sps:$4 sm:$0xff]  }
 0x4b3   : > { %vm18956_vm10 = vcmp.eq.s32.totalorder %v18921_v33, %v13791_v37  ;;  %vm18957_vm14 = vcmp.eq.s32.totalorder %v14471_v43, %v13791_v37  ;;  %v18958_v24 = vmov 0  ;;  %12057 = vpow2.f32 %v4401_v21  ;;  %6630 = vperm.xlu0 %11750, %v14887_v27   ;;  %7446 = vmatpush2.bf16.msra.mxu1 %v11812_v63 }
 0x4b4   : > { %vm14914_vm0 = vmpackc.low %vm18957_vm14, %vm18956_vm10  ;;  %v4295_v2 = vmul.f32 -0.5, %v4231_v4  ;;  %v4156_v10 = vmul.f32 %v4092_v59, %v4092_v59  ;;  %v4025_v29 = vsub.f32 %v3890_v40, %v14477_v56  ;;  %vm18961_vm6 = vcmp.eq.s32.totalorder %v18921_v33, %v13884_v13  ;;  %v18971_v33 = vld [vmem:[#allocation62_spill] sm:$0xff]  ;;  %7158 = vmatprep.subr.bf16.mxu0 %v18721_v18  ;;  %7447 = vmatprep.subr.bf16.mxu1 %v18721_v18 }
 0x4b5   : > { %v18959_v24 = vsel %vm14914_vm0, 4294967295, %v18958_v24  ;;  %vm18962_vm12 = vcmp.eq.s32.totalorder %v14471_v43, %v13884_v13  ;;  %v18963_v34 = vmov 0  ;;  %12059 = vpow2.f32 %v4405_v49  ;;  %10248 = vmatmul.mubr.msk.bf16.gmra.mxu0 %vm14914_vm0, %v18781_v5 }
 0x4b6   : > { %18960 = vst [vmem:[#allocation81_spill] sm:$0xff] %v18959_v24  ;;  %vm14928_vm10 = vmpackc.low %vm18962_vm12, %vm18961_vm6  ;;  %v4282_v21 = vmul.f32 -0.5, %v4218_v28  ;;  %vm18966_vm14 = vcmp.eq.s32.totalorder %v18941_v45, %v13822_v62  ;;  %vm18967_vm1 = vcmp.eq.s32.totalorder %v14508_v36, %v13822_v62  ;;  %v18968_v43 = vmov 0  ;;  %v18972_v28 = vld [vmem:[#allocation41_spill] sm:$0xff] }
 0x4b7   : > { %v18964_v34 = vsel %vm14928_vm10, 4294967295, %v18963_v34  ;;  %vm14941_vm13 = vmpackc.low %vm18967_vm1, %vm18966_vm14  ;;  %12061 = vpow2.f32 %v4375_v42  ;;  %v4379_v49 = vmul.f32 1.442695, %v4280_v16  ;;  %v4220_v4 = vadd.f32 %v4156_v10, %v18972_v28  ;;  %10376 = vmatmul.mubr.msk.bf16.gmra.mxu1 %vm14928_vm10, %v18781_v5  ;;  %v14967_v16 = vpop.eup %12047  ;;  %v14975_v28 = vpop.permute.xlu1 %4624 }
 0x4b8   : > { %18965 = vst [vmem:[#allocation99_spill] sm:$0xff] %v18964_v34  ;;  %v18969_v43 = vsel %vm14941_vm13, 4294967295, %v18968_v43  ;;  %v4094_v30 = vmul.f32 %v14495_v53, %v4025_v29  ;;  %10250 = vmatprep.mubr.msk.bf16.mxu0 %vm14941_vm13, %v18781_v5  ;;  %vm18973_vm1 = vcmp.eq.s32.totalorder %v18941_v45, %v13855_v8  ;;  %vm18974_vm14 = vcmp.eq.s32.totalorder %v14508_v36, %v13855_v8  ;;  %v3898_v29 = vpop.permute.xlu0 %3897 }
 0x4b9   : > { %18970 = vst [vmem:[#allocation100_spill] sm:$0xff] %v18969_v43  ;;  %vm14963_vm12 = vmpackc.low %vm18974_vm14, %vm18973_vm1  ;;  %v18975_v42 = vmov 0  ;;  %v4297_v23 = vmul.f32 -0.5, %v4233_v22  ;;  %v4235_v59 = vadd.f32 %v4171_v55, %v13951_v20  ;;  %v4173_v40 = vmul.f32 %v4109_v25, %v4109_v25  ;;  %6565 = vperm.xlu1 %11749, %v14967_v16   ;;  %v14981_v20 = vpop.eup %12049 }
 0x4ba   : > { %v18976_v42 = vsel %vm14963_vm12, 4294967295, %v18975_v42  ;;  %18978 = vst [vmem:[#allocation41_spill] sm:$0xff] %v14967_v16  ;;  %v4111_v10 = vmul.f32 %v14495_v53, %v4042_v15  ;;  %10378 = vmatprep.mubr.msk.bf16.mxu1 %vm14963_vm12, %v18781_v5  ;;  %v4409_v43 = vmul.f32 1.442695, %v4295_v2  ;;  %v4158_v34 = vmul.f32 %v4094_v30, %v4094_v30  ;;  %18979 = vst [vmem:[#allocation101_spill] sm:$0xff] %v14981_v20  ;;  %v14990_v15 = vpop.eup %12051  ;;  %v18981_v30 = vld [vmem:[#allocation83_spill] sm:$0xff] }
 0x4bb   : > { %18977 = vst [vmem:[#allocation62_spill] sm:$0xff] %v18976_v42  ;;  %v4027_v22 = vsub.f32 %v3898_v29, %v14477_v56  ;;  %vm4782_vm1 = vcmp.eq.s32.totalorder %v14508_v36, %v13791_v37  ;;  %v4044_v55 = vsub.f32 %v13965_v44, %v14477_v56  ;;  %v4383_v25 = vmul.f32 1.442695, %v4282_v21  ;;  %18980 = vst [vmem:[#allocation102_spill] sm:$0xff] %v14990_v15  ;;  %v14995_v44 = vpop.eup %12053  ;;  %v14999_v7 = vpop.permute.xlu1 %4630 }
 0x4bc   : > { %12063 = vpow2.f32 %v4379_v49  ;;  %v4284_v2 = vmul.f32 -0.5, %v4220_v4  ;;  %v4222_v63 = vadd.f32 %v4158_v34, %v18981_v30  ;;  %18982 = vst [vmem:[#allocation83_spill] sm:$0xff] %v14995_v44  ;;  %v4413_v21 = vmul.f32 1.442695, %v4297_v23  ;;  %6640 = vperm.xlu0 %11750, %v14981_v20   ;;  %v3906_v27 = vpop.permute.xlu0 %3905 }
 0x4bd   : > { %v4096_v29 = vmul.f32 %v14495_v53, %v4027_v22  ;;  %v4299_v42 = vmul.f32 -0.5, %v4235_v59  ;;  %v4237_v24 = vadd.f32 %v4173_v40, %v13954_v38  ;;  %vm18983_vm6 = vcmp.eq.s32.totalorder %v18941_v45, %v13791_v37  ;;  %6575 = vperm.xlu1 %11749, %v14995_v44   ;;  %v18999_v22 = vld [vmem:[#allocation84_spill] sm:$0xff] }
 0x4be   : > { %vm15007_vm14 = vmpackc.low %vm4782_vm1, %vm18983_vm6  ;;  %v18984_v34 = vmov 0  ;;  %12065 = vpow2.f32 %v4409_v43  ;;  %v4175_v38 = vmul.f32 %v4111_v10, %v4111_v10  ;;  %v4029_v4 = vsub.f32 %v3906_v27, %v14477_v56  ;;  %v15028_v43 = vld [vmem:[%s17900_s5] ss:$0 sm:$0xff] }
 0x4bf   : > { %v18985_v34 = vsel %vm15007_vm14, 4294967295, %v18984_v34  ;;  %v4160_v49 = vmul.f32 %v4096_v29, %v4096_v29  ;;  %vm18987_vm13 = vcmp.eq.s32.totalorder %v18941_v45, %v13884_v13  ;;  %vm18988_vm10 = vcmp.eq.s32.totalorder %v14508_v36, %v13884_v13  ;;  %10252 = vmatmul.mubr.msk.bf16.gmra.mxu0 %vm15007_vm14, %v18781_v5 }
 0x4c0   : > { %18986 = vst [vmem:[#allocation103_spill] sm:$0xff] %v18985_v34  ;;  %vm15021_vm6 = vmpackc.low %vm18988_vm10, %vm18987_vm13  ;;  %v18989_v23 = vmov 0  ;;  %v18992_v59 = vsub.f32 %v13402_v31, %v13514_v51  ;;  %v4113_v40 = vmul.f32 %v14495_v53, %v4044_v55  ;;  %12067 = vpow2.f32 %v4383_v25  ;;  %v15050_v31 = vpop.eup %12055  ;;  %6650 = vperm.xlu0 %11750, %v14990_v15   ;;  %v3914_v29 = vpop.permute.xlu0 %3913 }
 0x4c1   : > { %v18990_v23 = vsel %vm15021_vm6, 4294967295, %v18989_v23  ;;  %vm18993_vm13 = vcmp.eq.s32.totalorder %v18971_v33, %v13822_v62  ;;  %vm18994_vm10 = vcmp.eq.s32.totalorder %v14581_v17, %v13822_v62  ;;  %v18995_v36 = vmov 0  ;;  %18998 = vst [vmem:[#allocation106_spill] sm:$0xff] %v15050_v31  ;;  %10380 = vmatmul.mubr.msk.bf16.gmra.mxu1 %vm15021_vm6, %v18781_v5  ;;  %6585 = vperm.xlu1 %11749, %v15050_v31  }
 0x4c2   : > { %18991 = vst [vmem:[#allocation104_spill] sm:$0xff] %v18990_v23  ;;  %v3591_v27 = vmul.f32 %v15028_v43, %v18992_v59  ;;  %vm15044_vm1 = vmpackc.low %vm18994_vm10, %vm18993_vm13  ;;  %vm4789_vm12 = vcmp.eq.s32.totalorder %v18971_v33, %v13855_v8  ;;  %v4387_v45 = vmul.f32 1.442695, %v4284_v2  ;;  %v4286_v10 = vmul.f32 -0.5, %v4222_v63 }
 0x4c3   : > { %v18996_v36 = vsel %vm15044_vm1, 4294967295, %v18995_v36  ;;  %v4224_v55 = vadd.f32 %v4160_v49, %v18999_v22  ;;  %v4098_v25 = vmul.f32 %v14495_v53, %v4029_v4  ;;  %10254 = vmatprep.mubr.msk.bf16.mxu0 %vm15044_vm1, %v18781_v5  ;;  %vm19000_vm13 = vcmp.eq.s32.totalorder %v14581_v17, %v13855_v8  ;;  %v15071_v49 = vpop.permute.xlu1 %4636 }
 0x4c4   : > { %18997 = vst [vmem:[#allocation105_spill] sm:$0xff] %v18996_v36  ;;  %vm15063_vm10 = vmpackc.low %vm19000_vm13, %vm4789_vm12  ;;  %v19001_v30 = vmov 0  ;;  %12069 = vpow2.f32 %v4413_v21  ;;  %v4417_v2 = vmul.f32 1.442695, %v4299_v42  ;;  %v4301_v63 = vmul.f32 -0.5, %v4237_v24  ;;  %v15080_v24 = vpop.eup %12057  ;;  %v3922_v34 = vpop.permute.xlu0 %3921 }
 0x4c5   : > { %v19002_v30 = vsel %vm15063_vm10, 4294967295, %v19001_v30  ;;  %10382 = vmatprep.mubr.msk.bf16.mxu1 %vm15063_vm10, %v18781_v5  ;;  %v4239_v4 = vadd.f32 %v4175_v38, %v13961_v1  ;;  %v4162_v59 = vmul.f32 %v4098_v25, %v4098_v25  ;;  %v4031_v42 = vsub.f32 %v3914_v29, %v14477_v56  ;;  %19004 = vst [vmem:[#allocation107_spill] sm:$0xff] %v15080_v24  ;;  %v11814_v1 = vld [vmem:[#allocation2 + $0x274] ss:$12 sps:$4 sm:$0xff]   ;;  %v15086_v38 = vpop.eup %12059 }
 0x4c6   : > { %19003 = vst [vmem:[#allocation84_spill] sm:$0xff] %v19002_v30  ;;  %vm4790_vm12 = vcmp.eq.s32.totalorder %v14581_v17, %v13791_v37  ;;  %v4177_v21 = vmul.f32 %v4113_v40, %v4113_v40  ;;  %v4288_v22 = vmul.f32 -0.5, %v4224_v55  ;;  %v11813_v30 = vld [vmem:[#allocation2 + $0xf4] ss:$12 sps:$4 sm:$0xff]   ;;  %19005 = vst [vmem:[#allocation108_spill] sm:$0xff] %v15086_v38  ;;  %12071 = vpow2.f32 %v4387_v45  ;;  %v15090_v23 = vpop.eup %12061  ;;  %6660 = vperm.xlu0 %11750, %v15080_v24  }
 0x4c7   : > { %v4391_v25 = vmul.f32 1.442695, %v4286_v10  ;;  %v4226_v29 = vadd.f32 %v4162_v59, %v13879_v35  ;;  %v4100_v36 = vmul.f32 %v14495_v53, %v4031_v42  ;;  %v3655_v40 = vmul.f32 %v3591_v27, %v3591_v27  ;;  %v15093_v15 = vpop.permute.xlu1 %4642  ;;  %7159 = vmatpush2.bf16.msra.mxu0 %v11813_v30  ;;  %6595 = vperm.xlu1 %11749, %v15090_v23   ;;  %v19014_v59 = vld [vmem:[#allocation63_spill] sm:$0xff] }
 0x4c8   : > { %v4421_v55 = vmul.f32 1.442695, %v4301_v63  ;;  %vm19006_vm1 = vcmp.eq.s32.totalorder %v18971_v33, %v13791_v37  ;;  %v19007_v45 = vmov 0  ;;  %vm4788_vm10 = vcmp.eq.s32.totalorder %v18971_v33, %v13884_v13  ;;  %7448 = vmatpush2.bf16.msra.mxu1 %v11814_v1  ;;  %v19024_v1 = vld [vmem:[#allocation46_spill] sm:$0xff]  ;;  %7160 = vmatprep.subr.bf16.mxu0 %v18721_v18 }
 0x4c9   : > { %vm15101_vm13 = vmpackc.low %vm4790_vm12, %vm19006_vm1  ;;  %v4303_v35 = vmul.f32 -0.5, %v4239_v4  ;;  %v4164_v27 = vmul.f32 %v4100_v36, %v4100_v36  ;;  %v4033_v10 = vsub.f32 %v3922_v34, %v14477_v56  ;;  %vm19010_vm14 = vcmp.eq.s32.totalorder %v14581_v17, %v13884_v13  ;;  %v15147_v42 = vpop.eup %12063  ;;  %7449 = vmatprep.subr.bf16.mxu1 %v18721_v18 }
 0x4ca   : > { %v19008_v45 = vsel %vm15101_vm13, 4294967295, %v19007_v45  ;;  %vm15114_vm1 = vmpackc.low %vm19010_vm14, %vm4788_vm10  ;;  %v19011_v63 = vmov 0  ;;  %vm4795_vm12 = vcmp.eq.s32.totalorder %v19014_v59, %v13822_v62  ;;  %12073 = vpow2.f32 %v4417_v2  ;;  %10256 = vmatmul.mubr.msk.bf16.gmra.mxu0 %vm15101_vm13, %v18781_v5  ;;  %6670 = vperm.xlu0 %11750, %v15086_v38  }
 0x4cb   : > { %19009 = vst [vmem:[#allocation109_spill] sm:$0xff] %v19008_v45  ;;  %v19012_v63 = vsel %vm15114_vm1, 4294967295, %v19011_v63  ;;  %v4241_v33 = vadd.f32 %v4177_v21, %v3655_v40  ;;  %v4395_v30 = vmul.f32 1.442695, %v4288_v22  ;;  %vm19015_vm6 = vcmp.eq.s32.totalorder %v14606_v50, %v13822_v62  ;;  %10384 = vmatmul.mubr.msk.bf16.gmra.mxu1 %vm15114_vm1, %v18781_v5  ;;  %v15156_v22 = vld [vmem:[%s17899_s4] ss:$0 sm:$0xff]  ;;  %v15164_v40 = vpop.permute.xlu1 %4648  ;;  %6605 = vperm.xlu1 %11749, %v15147_v42  }
 0x4cc   : > { %19013 = vst [vmem:[#allocation110_spill] sm:$0xff] %v19012_v63  ;;  %vm15126_vm0 = vmpackc.low %vm19015_vm6, %vm4795_vm12  ;;  %v19016_v17 = vmov 0  ;;  %vm4797_vm14 = vcmp.eq.s32.totalorder %v19014_v59, %v13855_v8  ;;  %12075 = vpow2.f32 %v4391_v25  ;;  %v4290_v34 = vmul.f32 -0.5, %v4226_v29  ;;  %v3930_v29 = vpop.permute.xlu0 %3929 }
 0x4cd   : > { %v19017_v17 = vsel %vm15126_vm0, 4294967295, %v19016_v17  ;;  %v4228_v36 = vadd.f32 %v4164_v27, %v13888_v19  ;;  %v4102_v2 = vmul.f32 %v14495_v53, %v4033_v10  ;;  %10258 = vmatprep.mubr.msk.bf16.mxu0 %vm15126_vm0, %v18781_v5  ;;  %vm19019_vm6 = vcmp.eq.s32.totalorder %v14606_v50, %v13855_v8 }
 0x4ce   : > { %19018 = vst [vmem:[#allocation63_spill] sm:$0xff] %v19017_v17  ;;  %vm15143_vm10 = vmpackc.low %vm19019_vm6, %vm4797_vm14  ;;  %v19020_v4 = vmov 0  ;;  %v19023_v19 = vsub.f32 %v18716_v48, %v13514_v51  ;;  %v3517_v25 = vsub.f32 %v19024_v1, %v15156_v22  ;;  %12077 = vpow2.f32 %v4421_v55  ;;  %v15173_v55 = vpop.eup %12065  ;;  %v19026_v1 = vld [vmem:[#allocation16_spill] sm:$0xff] }
 0x4cf   : > { %v19021_v4 = vsel %vm15143_vm10, 4294967295, %v19020_v4  ;;  %10386 = vmatprep.mubr.msk.bf16.mxu1 %vm15143_vm10, %v18781_v5  ;;  %v4425_v51 = vmul.f32 1.442695, %v4303_v35  ;;  %v4166_v48 = vmul.f32 %v4102_v2, %v4102_v2  ;;  %v4035_v27 = vsub.f32 %v3930_v29, %v14477_v56  ;;  %19025 = vst [vmem:[#allocation46_spill] sm:$0xff] %v15173_v55  ;;  %v15180_v35 = vpop.eup %12067  ;;  %6680 = vperm.xlu0 %11750, %v15173_v55   ;;  %v15188_v45 = vpop.permute.xlu1 %4654 }
 0x4d0   : > { %19022 = vst [vmem:[#allocation111_spill] sm:$0xff] %v19021_v4  ;;  %v3584_v21 = vmul.f32 %v15028_v43, %v19023_v19  ;;  %vm4798_vm14 = vcmp.eq.s32.totalorder %v14606_v50, %v13791_v37  ;;  %v4305_v10 = vmul.f32 -0.5, %v4241_v33  ;;  %12079 = vpow2.f32 %v4395_v30  ;;  %v19027_v33 = vld [vmem:[#allocation47_spill] sm:$0xff]  ;;  %v3938_v63 = vpop.permute.xlu0 %3937  ;;  %6615 = vperm.xlu1 %11749, %v15180_v35  }
 0x4d1   : > { %v4399_v2 = vmul.f32 1.442695, %v4290_v34  ;;  %v4292_v19 = vmul.f32 -0.5, %v4228_v36  ;;  %v4230_v29 = vadd.f32 %v4166_v48, %v19026_v1  ;;  %v4104_v4 = vmul.f32 %v14495_v53, %v4035_v27  ;;  %v15204_v36 = vpop.eup %12069 }
 0x4d2   : > { %v3586_v17 = vmul.f32 %v15028_v43, %v3517_v25  ;;  %v3519_v30 = vsub.f32 %v19027_v33, %v15156_v22  ;;  %vm19028_vm12 = vcmp.eq.s32.totalorder %v19014_v59, %v13791_v37  ;;  %v19029_v34 = vmov 0  ;;  %19032 = vst [vmem:[#allocation47_spill] sm:$0xff] %v15204_v36 }
 0x4d3   : > { %vm15196_vm6 = vmpackc.low %vm4798_vm14, %vm19028_vm12  ;;  %vm4796_vm10 = vcmp.eq.s32.totalorder %v19014_v59, %v13884_v13  ;;  %v3646_v25 = vmul.f32 %v13934_v57, %v13934_v57  ;;  %v4168_v48 = vmul.f32 %v4104_v4, %v4104_v4  ;;  %v4037_v27 = vsub.f32 %v3938_v63, %v14477_v56  ;;  %v19037_v59 = vld [vmem:[#allocation64_spill] sm:$0xff]  ;;  %6690 = vperm.xlu0 %11750, %v15204_v36  }
 0x4d4   : > { %v19030_v34 = vsel %vm15196_vm6, 4294967295, %v19029_v34  ;;  %vm19033_vm12 = vcmp.eq.s32.totalorder %v14606_v50, %v13884_v13  ;;  %v19034_v1 = vmov 0  ;;  %vm4803_vm0 = vcmp.eq.s32.totalorder %v19037_v59, %v13822_v62  ;;  %10260 = vmatmul.mubr.msk.bf16.gmra.mxu0 %vm15196_vm6, %v18781_v5 }
 0x4d5   : > { %19031 = vst [vmem:[#allocation16_spill] sm:$0xff] %v19030_v34  ;;  %vm15213_vm14 = vmpackc.low %vm19033_vm12, %vm4796_vm10  ;;  %12081 = vpow2.f32 %v4425_v51  ;;  %v4429_v33 = vmul.f32 1.442695, %v4305_v10  ;;  %v4294_v55 = vmul.f32 -0.5, %v4230_v29  ;;  %vm19038_vm1 = vcmp.eq.s32.totalorder %v14679_v61, %v13822_v62  ;;  %v15245_v10 = vpop.eup %12071 }
 0x4d6   : > { %v19035_v1 = vsel %vm15213_vm14, 4294967295, %v19034_v1  ;;  %vm15225_vm13 = vmpackc.low %vm19038_vm1, %vm4803_vm0  ;;  %v19039_v57 = vmov 0  ;;  %vm4805_vm10 = vcmp.eq.s32.totalorder %v19037_v59, %v13855_v8  ;;  %12083 = vpow2.f32 %v4399_v2  ;;  %10388 = vmatmul.mubr.msk.bf16.gmra.mxu1 %vm15213_vm14, %v18781_v5  ;;  %19046 = vst [vmem:[#allocation114_spill] sm:$0xff] %v15245_v10  ;;  %6625 = vperm.xlu1 %11749, %v15245_v10  }
 0x4d7   : > { %19036 = vst [vmem:[#allocation112_spill] sm:$0xff] %v19035_v1  ;;  %v19040_v57 = vsel %vm15225_vm13, 4294967295, %v19039_v57  ;;  %v4403_v50 = vmul.f32 1.442695, %v4292_v19  ;;  %v4232_v63 = vadd.f32 %v4168_v48, %v3646_v25  ;;  %v4106_v4 = vmul.f32 %v14495_v53, %v4037_v27  ;;  %10262 = vmatprep.mubr.msk.bf16.mxu0 %vm15225_vm13, %v18781_v5  ;;  %v3946_v25 = vpop.permute.xlu0 %3945  ;;  %v15252_v48 = vpop.permute.xlu1 %4660 }
 0x4d8   : > { %19041 = vst [vmem:[#allocation64_spill] sm:$0xff] %v19040_v57  ;;  %vm19042_vm0 = vcmp.eq.s32.totalorder %v14679_v61, %v13855_v8  ;;  %v19043_v51 = vmov 0  ;;  %v3648_v2 = vmul.f32 %v3584_v21, %v3584_v21  ;;  %v3650_v19 = vmul.f32 %v3586_v17, %v3586_v17  ;;  %v11815_v21 = vld [vmem:[#allocation2 + $0xdc] ss:$12 sps:$4 sm:$0xff]  }
 0x4d9   : > { %vm15241_vm1 = vmpackc.low %vm19042_vm0, %vm4805_vm10  ;;  %v3588_v29 = vmul.f32 %v15028_v43, %v3519_v30  ;;  %v4170_v27 = vmul.f32 %v4106_v4, %v4106_v4  ;;  %v4039_v57 = vsub.f32 %v3946_v25, %v14477_v56  ;;  %vm4802_vm12 = vcmp.eq.s32.totalorder %v19037_v59, %v13791_v37  ;;  %v11816_v30 = vld [vmem:[#allocation2 + $0x25c] ss:$12 sps:$4 sm:$0xff]   ;;  %v15264_v4 = vpop.eup %12073  ;;  %7161 = vmatpush2.bf16.msra.mxu0 %v11815_v21 }
 0x4da   : > { %v19044_v51 = vsel %vm15241_vm1, 4294967295, %v19043_v51  ;;  %10390 = vmatprep.mubr.msk.bf16.mxu1 %vm15241_vm1, %v18781_v5  ;;  %vm4806_vm10 = vcmp.eq.s32.totalorder %v14679_v61, %v13791_v37  ;;  %12085 = vpow2.f32 %v4429_v33  ;;  %v4407_v17 = vmul.f32 1.442695, %v4294_v55  ;;  %19047 = vst [vmem:[#allocation115_spill] sm:$0xff] %v15264_v4  ;;  %v15267_v34 = vpop.eup %12075  ;;  %v19048_v33 = vld [vmem:[#allocation49_spill] sm:$0xff]  ;;  %6700 = vperm.xlu0 %11750, %v15264_v4  }
 0x4db   : > { %19045 = vst [vmem:[#allocation113_spill] sm:$0xff] %v19044_v51  ;;  %12087 = vpow2.f32 %v4403_v50  ;;  %v4296_v25 = vmul.f32 -0.5, %v4232_v63  ;;  %v4234_v51 = vadd.f32 %v4170_v27, %v3648_v2  ;;  %v4108_v1 = vmul.f32 %v14495_v53, %v4039_v57  ;;  %v3954_v36 = vpop.permute.xlu0 %3953  ;;  %v15272_v38 = vpop.permute.xlu1 %4666  ;;  %vm15280_vm1 = vmpackc.low %vm4806_vm10, %vm4802_vm12  ;;  %6635 = vperm.xlu1 %11749, %v15267_v34   ;;  %7450 = vmatpush2.bf16.msra.mxu1 %v11816_v30 }
 0x4dc   : > { %v3521_v55 = vsub.f32 %v19048_v33, %v15156_v22  ;;  %v19049_v50 = vmov 0  ;;  %vm4804_vm0 = vcmp.eq.s32.totalorder %v19037_v59, %v13884_v13  ;;  %v15288_v57 = vpop.eup %12077  ;;  %v4041_v2 = vsub.f32 %v3954_v36, %v14477_v56  ;;  %v19057_v59 = vld [vmem:[#allocation65_spill] sm:$0xff]  ;;  %10264 = vmatmul.mubr.msk.bf16.gmra.mxu0 %vm15280_vm1, %v18781_v5  ;;  %7162 = vmatprep.subr.bf16.mxu0 %v18721_v18 }
 0x4dd   : > { %v19050_v50 = vsel %vm15280_vm1, 4294967295, %v19049_v50  ;;  %19052 = vst [vmem:[#allocation116_spill] sm:$0xff] %v15288_v57  ;;  %v4172_v63 = vmul.f32 %v4108_v1, %v4108_v1  ;;  %vm19053_vm12 = vcmp.eq.s32.totalorder %v14679_v61, %v13884_v13  ;;  %v19054_v27 = vmov 0  ;;  %v15313_v61 = vpop.eup %12079  ;;  %7451 = vmatprep.subr.bf16.mxu1 %v18721_v18 }
 0x4de   : > { %19051 = vst [vmem:[#allocation49_spill] sm:$0xff] %v19050_v50  ;;  %vm15295_vm10 = vmpackc.low %vm19053_vm12, %vm4804_vm0  ;;  %vm4811_vm14 = vcmp.eq.s32.totalorder %v19057_v59, %v13822_v62  ;;  %12089 = vpow2.f32 %v4407_v17  ;;  %vm19058_vm13 = vcmp.eq.s32.totalorder %v14704_v46, %v13822_v62  ;;  %v19059_v56 = vmov 0  ;;  %6710 = vperm.xlu0 %11750, %v15288_v57   ;;  %v19069_v57 = vld [vmem:[#allocation51_spill] sm:$0xff] }
 0x4df   : > { %v19055_v27 = vsel %vm15295_vm10, 4294967295, %v19054_v27  ;;  %vm15307_vm6 = vmpackc.low %vm19058_vm13, %vm4811_vm14  ;;  %vm4813_vm0 = vcmp.eq.s32.totalorder %v19057_v59, %v13855_v8  ;;  %19062 = vst [vmem:[#allocation118_spill] sm:$0xff] %v15313_v61  ;;  %v4411_v36 = vmul.f32 1.442695, %v4296_v25  ;;  %v4298_v1 = vmul.f32 -0.5, %v4234_v51  ;;  %10392 = vmatmul.mubr.msk.bf16.gmra.mxu1 %vm15295_vm10, %v18781_v5  ;;  %v3962_v33 = vpop.permute.xlu0 %3961  ;;  %6645 = vperm.xlu1 %11749, %v15313_v61  }
 0x4e0   : > { %19056 = vst [vmem:[#allocation117_spill] sm:$0xff] %v19055_v27  ;;  %v19060_v56 = vsel %vm15307_vm6, 4294967295, %v19059_v56  ;;  %v4236_v21 = vadd.f32 %v4172_v63, %v3650_v19  ;;  %v4110_v17 = vmul.f32 %v14495_v53, %v4041_v2  ;;  %10266 = vmatprep.mubr.msk.bf16.mxu0 %vm15307_vm6, %v18781_v5  ;;  %vm19063_vm13 = vcmp.eq.s32.totalorder %v14704_v46, %v13855_v8  ;;  %v19067_v53 = vld [vmem:[#allocation50_spill] sm:$0xff]  ;;  %v15336_v63 = vpop.permute.xlu1 %4672 }
 0x4e1   : > { %19061 = vst [vmem:[#allocation65_spill] sm:$0xff] %v19060_v56  ;;  %vm15325_vm14 = vmpackc.low %vm19063_vm13, %vm4813_vm0  ;;  %v19064_v30 = vmov 0  ;;  %v3652_v25 = vmul.f32 %v3588_v29, %v3588_v29  ;;  %v3590_v51 = vmul.f32 %v15028_v43, %v3521_v55  ;;  %v3523_v19 = vsub.f32 %v19067_v53, %v15156_v22  ;;  %v15342_v29 = vld [vmem:[%s17899_s4 + $0x1] ss:$0 sm:$0xff] }
 0x4e2   : > { %v19065_v30 = vsel %vm15325_vm14, 4294967295, %v19064_v30  ;;  %10394 = vmatprep.mubr.msk.bf16.mxu1 %vm15325_vm14, %v18781_v5  ;;  %v4174_v2 = vmul.f32 %v4110_v17, %v4110_v17  ;;  %v4043_v55 = vsub.f32 %v3962_v33, %v15342_v29  ;;  %vm4814_vm12 = vcmp.eq.s32.totalorder %v14704_v46, %v13791_v37  ;;  %v15355_v17 = vpop.eup %12081 }
 0x4e3   : > { %19066 = vst [vmem:[#allocation119_spill] sm:$0xff] %v19065_v30  ;;  %v4300_v53 = vmul.f32 -0.5, %v4236_v21  ;;  %vm4810_vm0 = vcmp.eq.s32.totalorder %v19057_v59, %v13791_v37  ;;  %19068 = vst [vmem:[#allocation50_spill] sm:$0xff] %v15355_v17  ;;  %12091 = vpow2.f32 %v4411_v36  ;;  %v4415_v33 = vmul.f32 1.442695, %v4298_v1  ;;  %v15363_v27 = vpop.eup %12083  ;;  %6720 = vperm.xlu0 %11750, %v15355_v17   ;;  %v3970_v24 = vpop.permute.xlu0 %3969 }
 0x4e4   : > { %v4238_v30 = vadd.f32 %v4174_v2, %v3652_v25  ;;  %v15360_v21 = vld [vmem:[%s17900_s5 + $0x1] ss:$0 sm:$0xff]  ;;  %v3654_v50 = vmul.f32 %v3590_v51, %v3590_v51  ;;  %v3524_v4 = vsub.f32 %v19069_v57, %v15156_v22  ;;  %v15368_v20 = vpop.permute.xlu1 %4678  ;;  %vm15376_vm14 = vmpackc.low %vm4814_vm12, %vm4810_vm0  ;;  %v19070_v36 = vmov 0  ;;  %6655 = vperm.xlu1 %11749, %v15363_v27  }
 0x4e5   : > { %v4112_v56 = vmul.f32 %v15360_v21, %v4043_v55  ;;  %v19071_v36 = vsel %vm15376_vm14, 4294967295, %v19070_v36  ;;  %vm4812_vm13 = vcmp.eq.s32.totalorder %v19057_v59, %v13884_v13  ;;  %v3592_v57 = vmul.f32 %v15028_v43, %v3523_v19  ;;  %v19077_v2 = vld [vmem:[#allocation66_spill] sm:$0xff]  ;;  %10268 = vmatmul.mubr.msk.bf16.gmra.mxu0 %vm15376_vm14, %v18781_v5 }
 0x4e6   : > { %19072 = vst [vmem:[#allocation51_spill] sm:$0xff] %v19071_v36  ;;  %v4045_v25 = vsub.f32 %v3970_v24, %v15342_v29  ;;  %vm19073_vm10 = vcmp.eq.s32.totalorder %v14704_v46, %v13884_v13  ;;  %v19074_v51 = vmov 0  ;;  %vm4819_vm0 = vcmp.eq.s32.totalorder %v19077_v2, %v13822_v62 }
 0x4e7   : > { %v4176_v1 = vmul.f32 %v4112_v56, %v4112_v56  ;;  %vm15390_vm12 = vmpackc.low %vm19073_vm10, %vm4812_vm13  ;;  %v4419_v59 = vmul.f32 1.442695, %v4300_v53  ;;  %vm19078_vm6 = vcmp.eq.s32.totalorder %v14779_v6, %v13822_v62  ;;  %v19079_v24 = vmov 0  ;;  %v15408_v46 = vpop.eup %12085 }
 0x4e8   : > { %v19075_v51 = vsel %vm15390_vm12, 4294967295, %v19074_v51  ;;  %vm15402_vm1 = vmpackc.low %vm19078_vm6, %vm4819_vm0  ;;  %vm4821_vm10 = vcmp.eq.s32.totalorder %v19077_v2, %v13855_v8  ;;  %19082 = vst [vmem:[#allocation121_spill] sm:$0xff] %v15408_v46  ;;  %12093 = vpow2.f32 %v4415_v33  ;;  %v4302_v56 = vmul.f32 -0.5, %v4238_v30  ;;  %10396 = vmatmul.mubr.msk.bf16.gmra.mxu1 %vm15390_vm12, %v18781_v5  ;;  %v15424_v33 = vpop.eup %12087  ;;  %6730 = vperm.xlu0 %11750, %v15408_v46   ;;  %v3974_v30 = vpop.permute.xlu0 %3973 }
 0x4e9   : > { %19076 = vst [vmem:[#allocation120_spill] sm:$0xff] %v19075_v51  ;;  %v19080_v24 = vsel %vm15402_vm1, 4294967295, %v19079_v24  ;;  %v4240_v19 = vadd.f32 %v4176_v1, %v3654_v50  ;;  %v4114_v55 = vmul.f32 %v15360_v21, %v4045_v25  ;;  %10270 = vmatprep.mubr.msk.bf16.mxu0 %vm15402_vm1, %v18781_v5  ;;  %vm19083_vm6 = vcmp.eq.s32.totalorder %v14779_v6, %v13855_v8  ;;  %v15431_v1 = vpop.permute.xlu1 %4684 }
 0x4ea   : > { %19081 = vst [vmem:[#allocation66_spill] sm:$0xff] %v19080_v24  ;;  %vm15420_vm13 = vmpackc.low %vm19083_vm6, %vm4821_vm10  ;;  %v19084_v53 = vmov 0  ;;  %v3593_v50 = vmul.f32 %v15028_v43, %v3524_v4  ;;  %v3656_v25 = vmul.f32 %v3592_v57, %v3592_v57  ;;  %6665 = vperm.xlu1 %11749, %v15424_v33   ;;  %v4046_v51 = vsub.f32 %v3974_v30, %v15342_v29  ;;  %v11817_v4 = vld [vmem:[#allocation2 + $0xc4] ss:$12 sps:$4 sm:$0xff]  }
 0x4eb   : > { %v19085_v53 = vsel %vm15420_vm13, 4294967295, %v19084_v53  ;;  %19087 = vst [vmem:[#allocation123_spill] sm:$0xff] %v15424_v33  ;;  %10398 = vmatprep.mubr.msk.bf16.mxu1 %vm15420_vm13, %v18781_v5  ;;  %v4178_v24 = vmul.f32 %v4114_v55, %v4114_v55  ;;  %vm4822_vm0 = vcmp.eq.s32.totalorder %v14779_v6, %v13791_v37  ;;  %12095 = vpow2.f32 %v4419_v59  ;;  %v11818_v57 = vld [vmem:[#allocation2 + $0x244] ss:$12 sps:$4 sm:$0xff]   ;;  %v15443_v55 = vpop.eup %12089  ;;  %7163 = vmatpush2.bf16.msra.mxu0 %v11817_v4 }
 0x4ec   : > { %19086 = vst [vmem:[#allocation122_spill] sm:$0xff] %v19085_v53  ;;  %vm4818_vm10 = vcmp.eq.s32.totalorder %v19077_v2, %v13791_v37  ;;  %19088 = vst [vmem:[#allocation124_spill] sm:$0xff] %v15443_v55  ;;  %v4423_v53 = vmul.f32 1.442695, %v4302_v56  ;;  %v4304_v36 = vmul.f32 -0.5, %v4240_v19  ;;  %v4115_v46 = vmul.f32 %v15360_v21, %v4046_v51  ;;  %7452 = vmatpush2.bf16.msra.mxu1 %v11818_v57 }
 0x4ed   : > { %v4242_v30 = vadd.f32 %v4178_v24, %v3656_v25  ;;  %v15446_v17 = vpop.permute.xlu1 %4690  ;;  %vm15448_vm1 = vmpackc.low %vm4822_vm0, %vm4818_vm10  ;;  %v19089_v59 = vmov 0  ;;  %vm4820_vm6 = vcmp.eq.s32.totalorder %v19077_v2, %v13884_v13  ;;  %v3657_v33 = vmul.f32 %v3593_v50, %v3593_v50  ;;  %v19096_v24 = vld [vmem:[#allocation68_spill] sm:$0xff]  ;;  %8350 = vmatprep.subr.bf16.mxu0 %v18721_v18  ;;  %8639 = vmatprep.subr.bf16.mxu1 %v18721_v18 }
 0x4ee   : > { %v19090_v59 = vsel %vm15448_vm1, 4294967295, %v19089_v59  ;;  %v4179_v56 = vmul.f32 %v4115_v46, %v4115_v46  ;;  %6675 = vperm.xlu1 %11749, %v15443_v55   ;;  %vm19092_vm12 = vcmp.eq.s32.totalorder %v14779_v6, %v13884_v13  ;;  %v19093_v51 = vmov 0  ;;  %10272 = vmatmul.mubr.msk.bf16.gmra.mxu0 %vm15448_vm1, %v18781_v5 }
 0x4ef   : > { %19091 = vst [vmem:[#allocation125_spill] sm:$0xff] %v19090_v59  ;;  %vm15460_vm14 = vmpackc.low %vm19092_vm12, %vm4820_vm6  ;;  %vm4827_vm0 = vcmp.eq.s32.totalorder %v19096_v24, %v13822_v62  ;;  %vm19097_vm10 = vcmp.eq.s32.totalorder %v14805_v60, %v13822_v62  ;;  %v19098_v2 = vmov 0  ;;  %vm4829_vm12 = vcmp.eq.s32.totalorder %v19096_v24, %v13855_v8 }
 0x4f0   : > { %v19094_v51 = vsel %vm15460_vm14, 4294967295, %v19093_v51  ;;  %vm15473_vm13 = vmpackc.low %vm19097_vm10, %vm4827_vm0  ;;  %12097 = vpow2.f32 %v4423_v53  ;;  %v4427_v6 = vmul.f32 1.442695, %v4304_v36  ;;  %v4306_v46 = vmul.f32 -0.5, %v4242_v30  ;;  %10400 = vmatmul.mubr.msk.bf16.gmra.mxu1 %vm15460_vm14, %v18781_v5  ;;  %v15493_v25 = vpop.eup %12091 }
 0x4f1   : > { %19095 = vst [vmem:[#allocation126_spill] sm:$0xff] %v19094_v51  ;;  %v19099_v2 = vsel %vm15473_vm13, 4294967295, %v19098_v2  ;;  %v4243_v19 = vadd.f32 %v4179_v56, %v3657_v33  ;;  %10274 = vmatprep.mubr.msk.bf16.mxu0 %vm15473_vm13, %v18781_v5  ;;  %vm19101_vm6 = vcmp.eq.s32.totalorder %v14805_v60, %v13855_v8  ;;  %v19102_v50 = vmov 0  ;;  %19105 = vst [vmem:[#allocation128_spill] sm:$0xff] %v15493_v25  ;;  %v15498_v36 = vpop.permute.xlu1 %4696  ;;  %v19106_v33 = vld [vmem:[#allocation52_spill] sm:$0xff] }
 0x4f2   : > { %19100 = vst [vmem:[#allocation68_spill] sm:$0xff] %v19099_v2  ;;  %vm15489_vm0 = vmpackc.low %vm19101_vm6, %vm4829_vm12  ;;  %6685 = vperm.xlu1 %11749, %v15493_v25   ;;  %vm4830_vm10 = vcmp.eq.s32.totalorder %v14805_v60, %v13791_v37  ;;  %v3525_v4 = vsub.f32 %v19106_v33, %v15156_v22  ;;  %vm4826_vm12 = vcmp.eq.s32.totalorder %v19096_v24, %v13791_v37  ;;  %12099 = vpow2.f32 %v4427_v6  ;;  %v19114_v6 = vld [vmem:[#allocation70_spill] sm:$0xff] }
 0x4f3   : > { %v19103_v50 = vsel %vm15489_vm0, 4294967295, %v19102_v50  ;;  %10402 = vmatprep.mubr.msk.bf16.mxu1 %vm15489_vm0, %v18781_v5  ;;  %v4307_v53 = vmul.f32 -0.5, %v4243_v19  ;;  %vm4832_vm6 = vcmp.eq.s32.totalorder %v14805_v60, %v13884_v13  ;;  %v4431_v57 = vmul.f32 1.442695, %v4306_v46  ;;  %vm15513_vm13 = vmpackc.low %vm4830_vm10, %vm4826_vm12 }
 0x4f4   : > { %19104 = vst [vmem:[#allocation127_spill] sm:$0xff] %v19103_v50  ;;  %vm4839_vm0 = vcmp.eq.s32.totalorder %v14881_v9, %v13822_v62  ;;  %v19108_v19 = vmov 0  ;;  %vm4828_vm14 = vcmp.eq.s32.totalorder %v19096_v24, %v13884_v13  ;;  %vm4841_vm1 = vcmp.eq.s32.totalorder %v14881_v9, %v13855_v8 }
 0x4f5   : > { %v4433_v30 = vmul.f32 1.442695, %v4307_v53  ;;  %v15511_v56 = vpop.eup %12093  ;;  %v19109_v19 = vsel %vm15513_vm13, 4294967295, %v19108_v19  ;;  %vm15522_vm5 = vmpackc.low %vm4832_vm6, %vm4828_vm14  ;;  %v19111_v60 = vmov 0  ;;  %v3978_v22 = vpop.permute.xlu1 %3977  ;;  %vm4835_vm10 = vcmp.eq.s32.totalorder %v19114_v6, %v13822_v62 }
 0x4f6   : > { %19107 = vst [vmem:[#allocation52_spill] sm:$0xff] %v15511_v56  ;;  %19110 = vst [vmem:[#allocation129_spill] sm:$0xff] %v19109_v19  ;;  %6695 = vperm.xlu1 %11749, %v15511_v56   ;;  %v19112_v60 = vsel %vm15522_vm5, 4294967295, %v19111_v60  ;;  %v3594_v46 = vmul.f32 %v15028_v43, %v3525_v4  ;;  %10276 = vmatmul.mubr.msk.bf16.gmra.mxu0 %vm15513_vm13, %v18781_v5  ;;  %v4047_v24 = vsub.f32 %v3978_v22, %v15342_v29  ;;  %v19115_v53 = vmov 0  ;;  %v19246_v19 = vld [vmem:[#allocation73_spill] sm:$0xff] }
 0x4f7   : > { %12101 = vpow2.f32 %v4433_v30  ;;  %19113 = vst [vmem:[#allocation130_spill] sm:$0xff] %v19112_v60  ;;  %vm15533_vm12 = vmpackc.low %vm4839_vm0, %vm4835_vm10  ;;  %vm4837_vm14 = vcmp.eq.s32.totalorder %v19114_v6, %v13855_v8  ;;  %v19119_v43 = vmov 0  ;;  %vm4838_vm6 = vcmp.eq.s32.totalorder %v14881_v9, %v13791_v37  ;;  %v15569_v30 = vpop.permute.xlu0 %6435 }
 0x4f8   : > { %v19116_v53 = vsel %vm15533_vm12, 4294967295, %v19115_v53  ;;  %v15539_v33 = vpop.eup %12095  ;;  %12103 = vpow2.f32 %v4431_v57  ;;  %10404 = vmatmul.mubr.msk.bf16.gmra.mxu1 %vm15522_vm5, %v18781_v5  ;;  %10278 = vmatprep.mubr.msk.bf16.mxu0 %vm15533_vm12, %v18781_v5  ;;  %vm15550_vm0 = vmpackc.low %vm4841_vm1, %vm4837_vm14  ;;  %v4116_v29 = vmul.f32 %v15360_v21, %v4047_v24  ;;  %v3658_v4 = vmul.f32 %v3594_v46, %v3594_v46  ;;  %19123 = vst [vmem:[#allocation134_spill] sm:$0xff] %v15569_v30  ;;  %v19130_v46 = vld [vmem:[#allocation72_spill] sm:$0xff] }
 0x4f9   : > { %19117 = vst [vmem:[#allocation70_spill] sm:$0xff] %v19116_v53  ;;  %19118 = vst [vmem:[#allocation131_spill] sm:$0xff] %v15539_v33  ;;  %v19120_v43 = vsel %vm15550_vm0, 4294967295, %v19119_v43  ;;  %10406 = vmatprep.mubr.msk.bf16.mxu1 %vm15550_vm0, %v18781_v5  ;;  %vm4840_vm10 = vcmp.eq.s32.totalorder %v14881_v9, %v13884_v13  ;;  %vm4834_vm1 = vcmp.eq.s32.totalorder %v19114_v6, %v13791_v37  ;;  %v19124_v24 = vmov 0 }
 0x4fa   : > { %19121 = vst [vmem:[#allocation132_spill] sm:$0xff] %v19120_v43  ;;  %6705 = vperm.xlu1 %11749, %v15539_v33   ;;  %v4180_v57 = vmul.f32 %v4116_v29, %v4116_v29  ;;  %vm4847_vm14 = vcmp.eq.s32.totalorder %v14906_v12, %v13822_v62  ;;  %vm15571_vm0 = vmpackc.low %vm4838_vm6, %vm4834_vm1  ;;  %vm4836_vm12 = vcmp.eq.s32.totalorder %v19114_v6, %v13884_v13  ;;  %v19127_v9 = vmov 0 }
 0x4fb   : > { %v19125_v24 = vsel %vm15571_vm0, 4294967295, %v19124_v24  ;;  %vm4849_vm5 = vcmp.eq.s32.totalorder %v14906_v12, %v13855_v8  ;;  %vm15580_vm13 = vmpackc.low %vm4840_vm10, %vm4836_vm12  ;;  %vm4843_vm2 = vcmp.eq.s32.totalorder %v19130_v46, %v13822_v62  ;;  %vm4845_vm1 = vcmp.eq.s32.totalorder %v19130_v46, %v13855_v8 }
 0x4fc   : > { %v4244_v22 = vadd.f32 %v4180_v57, %v3658_v4  ;;  %19126 = vst [vmem:[#allocation135_spill] sm:$0xff] %v19125_v24  ;;  %v19128_v9 = vsel %vm15580_vm13, 4294967295, %v19127_v9  ;;  %vm15589_vm6 = vmpackc.low %vm4847_vm14, %vm4843_vm2  ;;  %v19131_v4 = vmov 0  ;;  %v19134_v6 = vmov 0 }
 0x4fd   : > { %v15567_v21 = vpop.eup %12097  ;;  %19129 = vst [vmem:[#allocation136_spill] sm:$0xff] %v19128_v9  ;;  %v19132_v4 = vsel %vm15589_vm6, 4294967295, %v19131_v4  ;;  %vm15601_vm12 = vmpackc.low %vm4849_vm5, %vm4845_vm1  ;;  %vm4846_vm2 = vcmp.eq.s32.totalorder %v14906_v12, %v13791_v37  ;;  %vm4848_vm5 = vcmp.eq.s32.totalorder %v14906_v12, %v13884_v13  ;;  %vm4842_vm10 = vcmp.eq.s32.totalorder %v19130_v46, %v13791_v37 }
 0x4fe   : > { %19122 = vst [vmem:[#allocation133_spill] sm:$0xff] %v15567_v21  ;;  %6715 = vperm.xlu1 %11749, %v15567_v21   ;;  %v4308_v29 = vmul.f32 -0.5, %v4244_v22  ;;  %10280 = vmatmul.mubr.msk.bf16.gmra.mxu0 %vm15571_vm0, %v18781_v5  ;;  %19133 = vst [vmem:[#allocation72_spill] sm:$0xff] %v19132_v4  ;;  %v19135_v6 = vsel %vm15601_vm12, 4294967295, %v19134_v6  ;;  %v15615_v4 = vpop.permute.xlu0 %6450  ;;  %vm4855_vm14 = vcmp.eq.s32.totalorder %v14975_v28, %v13822_v62  ;;  %v19141_v9 = vmov 0 }
 0x4ff   : > { %10282 = vmatprep.mubr.msk.bf16.mxu0 %vm15589_vm6, %v18781_v5  ;;  %19136 = vst [vmem:[#allocation137_spill] sm:$0xff] %v19135_v6  ;;  %v15605_v57 = vpop.eup %12099  ;;  %19138 = vst [vmem:[#allocation139_spill] sm:$0xff] %v15615_v4  ;;  %v15626_v6 = vpop.permute.xlu1 %6430  ;;  %vm4857_vm6 = vcmp.eq.s32.totalorder %v14975_v28, %v13855_v8  ;;  %v19144_v12 = vmov 0  ;;  %v19148_v4 = vmov 0  ;;  %v19156_v24 = vmov 1  }
 0x500   : > { %10408 = vmatmul.mubr.msk.bf16.gmra.mxu1 %vm15580_vm13, %v18781_v5  ;;  %19137 = vst [vmem:[#allocation138_spill] sm:$0xff] %v15605_v57  ;;  %v4435_v22 = vmul.f32 1.442695, %v4308_v29  ;;  %19140 = vst [vmem:[#allocation141_spill] sm:$0xff] %v15626_v6  ;;  %v19256_v50 = vmov 0 }
 0x501   : > { %10410 = vmatprep.mubr.msk.bf16.mxu1 %vm15601_vm12, %v18781_v5  ;;  %vm15628_vm1 = vmpackc.low %vm4846_vm2, %vm4842_vm10  ;;  %vm4844_vm12 = vcmp.eq.s32.totalorder %v19130_v46, %v13884_v13  ;;  %v19151_v46 = vmov 0 }
 0x502   : > { %6725 = vperm.xlu1 %11749, %v15605_v57   ;;  %12105 = vpow2.f32 %v4435_v22  ;;  %v19142_v9 = vsel %vm15628_vm1, 4294967295, %v19141_v9  ;;  %vm15637_vm13 = vmpackc.low %vm4848_vm5, %vm4844_vm12  ;;  %v19147_v22 = vld [vmem:[#allocation22_spill] sm:$0xff]  ;;  %v15662_v6 = vpop.permute.xlu0 %6460 }
 0x503   : > { %19143 = vst [vmem:[#allocation142_spill] sm:$0xff] %v19142_v9  ;;  %v19145_v12 = vsel %vm15637_vm13, 4294967295, %v19144_v12  ;;  %vm4851_vm0 = vcmp.eq.s32.totalorder %v19147_v22, %v13822_v62  ;;  %vm4853_vm10 = vcmp.eq.s32.totalorder %v19147_v22, %v13855_v8  ;;  %19154 = vst [vmem:[#allocation145_spill] sm:$0xff] %v15662_v6  ;;  %v15667_v9 = vpop.permute.xlu1 %6440  ;;  %vm4850_vm5 = vcmp.eq.s32.totalorder %v19147_v22, %v13791_v37 }
 0x504   : > { %v15613_v30 = vpop.eup %12101  ;;  %19146 = vst [vmem:[#allocation143_spill] sm:$0xff] %v19145_v12  ;;  %vm15646_vm2 = vmpackc.low %vm4855_vm14, %vm4851_vm0  ;;  %v19157_v12 = vld [vmem:[#allocation55_spill] sm:$0xff]  ;;  %vm4854_vm0 = vcmp.eq.s32.totalorder %v14975_v28, %v13791_v37  ;;  %vm4863_vm14 = vcmp.eq.s32.totalorder %v14999_v7, %v13822_v62 }
 0x505   : > { %6740 = vperm.xlu0 %11750, %v15613_v30   ;;  %v15624_v29 = vpop.eup %12103  ;;  %v19149_v4 = vsel %vm15646_vm2, 4294967295, %v19148_v4  ;;  %vm15658_vm12 = vmpackc.low %vm4857_vm6, %vm4853_vm10  ;;  %19155 = vst [vmem:[#allocation146_spill] sm:$0xff] %v15667_v9  ;;  %vm4856_vm6 = vcmp.eq.s32.totalorder %v14975_v28, %v13884_v13  ;;  %v19159_v9 = vmov 0  ;;  %v19163_v28 = vmov 0 }
 0x506   : > { %19139 = vst [vmem:[#allocation140_spill] sm:$0xff] %v15624_v29  ;;  %6735 = vperm.xlu1 %11749, %v15624_v29   ;;  %10284 = vmatmul.mubr.msk.bf16.gmra.mxu0 %vm15628_vm1, %v18781_v5  ;;  %19150 = vst [vmem:[#allocation22_spill] sm:$0xff] %v19149_v4  ;;  %v19152_v46 = vsel %vm15658_vm12, 4294967295, %v19151_v46  ;;  %v19166_v4 = vld [vmem:[#allocation25_spill] sm:$0xff] }
 0x507   : > { %10286 = vmatprep.mubr.msk.bf16.mxu0 %vm15646_vm2, %v18781_v5  ;;  %19153 = vst [vmem:[#allocation144_spill] sm:$0xff] %v19152_v46  ;;  %v15679_v6 = vpop.permute.xlu1 %6445  ;;  %vm15681_vm10 = vmpackc.low %vm4854_vm0, %vm4850_vm5  ;;  %vm4865_vm2 = vcmp.eq.s32.totalorder %v14999_v7, %v13855_v8  ;;  %v19162_v46 = vld [vmem:[#allocation79_spill] sm:$0xff]  ;;  %vm4859_vm1 = vcmp.eq.s32.totalorder %v19166_v4, %v13822_v62  ;;  %vm4861_vm5 = vcmp.eq.s32.totalorder %v19166_v4, %v13855_v8 }
 0x508   : > { %10412 = vmatmul.mubr.msk.bf16.gmra.mxu1 %vm15637_vm13, %v18781_v5  ;;  %19158 = vst [vmem:[#allocation55_spill] sm:$0xff] %v15679_v6  ;;  %v19160_v9 = vsel %vm15681_vm10, 4294967295, %v19159_v9  ;;  %v15696_v6 = vpop.permute.xlu0 %6470  ;;  %vm15701_vm0 = vmpackc.low %vm4863_vm14, %vm4859_vm1  ;;  %vm4862_vm1 = vcmp.eq.s32.totalorder %v14999_v7, %v13791_v37  ;;  %vm4871_vm14 = vcmp.eq.s32.totalorder %v15071_v49, %v13822_v62 }
 0x509   : > { %10414 = vmatprep.mubr.msk.bf16.mxu1 %vm15658_vm12, %v18781_v5  ;;  %11751 = vset.pattern.permute.xlu0 %v19156_v24  ;;  %19161 = vst [vmem:[#allocation147_spill] sm:$0xff] %v19160_v9  ;;  %vm4852_vm12 = vcmp.eq.s32.totalorder %v19147_v22, %v13884_v13  ;;  %19167 = vst [vmem:[#allocation25_spill] sm:$0xff] %v15696_v6  ;;  %v19168_v22 = vmov 0  ;;  %v19172_v6 = vmov 0 }
 0x50a   : > { %7711 = vperm.xlu0 %11751, %v19157_v12   ;;  %vm15690_vm13 = vmpackc.low %vm4856_vm6, %vm4852_vm12  ;;  %v19169_v22 = vsel %vm15701_vm0, 4294967295, %v19168_v22  ;;  %vm4864_vm6 = vcmp.eq.s32.totalorder %v14999_v7, %v13884_v13  ;;  %v19181_v7 = vmov 0 }
 0x50b   : > { %v19164_v28 = vsel %vm15690_vm13, 4294967295, %v19163_v28  ;;  %19170 = vst [vmem:[#allocation148_spill] sm:$0xff] %v19169_v22  ;;  %vm15715_vm12 = vmpackc.low %vm4865_vm2, %vm4861_vm5  ;;  %v15722_v9 = vpop.permute.xlu1 %6455  ;;  %vm4858_vm2 = vcmp.eq.s32.totalorder %v19166_v4, %v13791_v37 }
 0x50c   : > { %19165 = vst [vmem:[#allocation79_spill] sm:$0xff] %v19164_v28  ;;  %v19173_v6 = vsel %vm15715_vm12, 4294967295, %v19172_v6  ;;  %19175 = vst [vmem:[#allocation151_spill] sm:$0xff] %v15722_v9  ;;  %v19178_v9 = vmov 0  ;;  %v19193_v28 = vld [vmem:[#allocation23_spill] sm:$0xff] }
 0x50d   : > { %19174 = vst [vmem:[#allocation150_spill] sm:$0xff] %v19173_v6  ;;  %v15734_v6 = vpop.permute.xlu0 %6480  ;;  %vm15738_vm5 = vmpackc.low %vm4862_vm1, %vm4858_vm2 }
 0x50e   : > { %7723 = vperm.xlu0 %11751, %v19162_v46   ;;  %10288 = vmatmul.mubr.msk.bf16.gmra.mxu0 %vm15681_vm10, %v18781_v5  ;;  %19176 = vst [vmem:[#allocation152_spill] sm:$0xff] %v15734_v6  ;;  %v19179_v9 = vsel %vm15738_vm5, 4294967295, %v19178_v9  ;;  %v19184_v6 = vld [vmem:[#allocation26_spill] sm:$0xff] }
 0x50f   : > { %v15707_v43 = vpop.eup %12105  ;;  %10290 = vmatprep.mubr.msk.bf16.mxu0 %vm15701_vm0, %v18781_v5  ;;  %v15736_v22 = vpop.permute.xlu1 %6465  ;;  %19180 = vst [vmem:[#allocation154_spill] sm:$0xff] %v19179_v9  ;;  %vm4873_vm0 = vcmp.eq.s32.totalorder %v15071_v49, %v13855_v8  ;;  %vm4867_vm1 = vcmp.eq.s32.totalorder %v19184_v6, %v13822_v62  ;;  %vm4869_vm10 = vcmp.eq.s32.totalorder %v19184_v6, %v13855_v8 }
 0x510   : > { %19171 = vst [vmem:[#allocation149_spill] sm:$0xff] %v15707_v43  ;;  %10416 = vmatmul.mubr.msk.bf16.gmra.mxu1 %vm15690_vm13, %v18781_v5  ;;  %6745 = vperm.xlu1 %11749, %v15707_v43   ;;  %19177 = vst [vmem:[#allocation153_spill] sm:$0xff] %v15736_v22  ;;  %v19185_v22 = vld [vmem:[#allocation17_spill] sm:$0xff] }
 0x511   : > { %10418 = vmatprep.mubr.msk.bf16.mxu1 %vm15715_vm12, %v18781_v5  ;;  %vm4860_vm12 = vcmp.eq.s32.totalorder %v19166_v4, %v13884_v13  ;;  %vm15758_vm2 = vmpackc.low %vm4871_vm14, %vm4867_vm1  ;;  %v19189_v4 = vmov 0  ;;  %vm4879_vm14 = vcmp.eq.s32.totalorder %v15093_v15, %v13822_v62 }
 0x512   : > { %7731 = vperm.xlu0 %11751, %v14394_v41   ;;  %vm15748_vm13 = vmpackc.low %vm4864_vm6, %vm4860_vm12  ;;  %vm4870_vm6 = vcmp.eq.s32.totalorder %v15071_v49, %v13791_v37 }
 0x513   : > { %v19182_v7 = vsel %vm15748_vm13, 4294967295, %v19181_v7  ;;  %vm15770_vm12 = vmpackc.low %vm4873_vm0, %vm4869_vm10  ;;  %v15777_v9 = vpop.permute.xlu1 %6475  ;;  %vm4872_vm10 = vcmp.eq.s32.totalorder %v15071_v49, %v13884_v13  ;;  %vm4866_vm0 = vcmp.eq.s32.totalorder %v19184_v6, %v13791_v37  ;;  %v19198_v49 = vmov 0 }
 0x514   : > { %11752 = vset.pattern.permute.xlu1 %v19156_v24  ;;  %19183 = vst [vmem:[#allocation155_spill] sm:$0xff] %v19182_v7  ;;  %v19186_v24 = vmov 0  ;;  %v19190_v4 = vsel %vm15770_vm12, 4294967295, %v19189_v4  ;;  %19192 = vst [vmem:[#allocation156_spill] sm:$0xff] %v15777_v9  ;;  %v15783_v7 = vpop.permute.xlu0 %6490  ;;  %v19195_v9 = vmov 0 }
 0x515   : > { %7715 = vperm.xlu1 %11752, %v19185_v22   ;;  %v19187_v24 = vsel %vm15758_vm2, 4294967295, %v19186_v24  ;;  %19191 = vst [vmem:[#allocation17_spill] sm:$0xff] %v19190_v4  ;;  %19194 = vst [vmem:[#allocation23_spill] sm:$0xff] %v15783_v7  ;;  %v19201_v7 = vld [vmem:[#allocation8_spill] sm:$0xff]  ;;  %v19202_v4 = vld [vmem:[#allocation67_spill] sm:$0xff] }
 0x516   : > { %7739 = vperm.xlu0 %11751, %v14445_v32   ;;  %10292 = vmatmul.mubr.msk.bf16.gmra.mxu0 %vm15738_vm5, %v18781_v5  ;;  %19188 = vst [vmem:[#allocation26_spill] sm:$0xff] %v19187_v24  ;;  %vm15791_vm1 = vmpackc.low %vm4870_vm6, %vm4866_vm0  ;;  %vm4875_vm5 = vcmp.eq.s32.totalorder %v19201_v7, %v13822_v62  ;;  %vm4877_vm0 = vcmp.eq.s32.totalorder %v19201_v7, %v13855_v8 }
 0x517   : > { %10294 = vmatprep.mubr.msk.bf16.mxu0 %vm15758_vm2, %v18781_v5  ;;  %v19196_v9 = vsel %vm15791_vm1, 4294967295, %v19195_v9  ;;  %vm4881_vm2 = vcmp.eq.s32.totalorder %v15093_v15, %v13855_v8  ;;  %vm15810_vm6 = vmpackc.low %vm4879_vm14, %vm4875_vm5  ;;  %v15816_v24 = vpop.permute.xlu1 %6485  ;;  %vm4878_vm5 = vcmp.eq.s32.totalorder %v15093_v15, %v13791_v37  ;;  %vm4887_vm14 = vcmp.eq.s32.totalorder %v15164_v40, %v13822_v62 }
 0x518   : > { %10420 = vmatmul.mubr.msk.bf16.gmra.mxu1 %vm15748_vm13, %v18781_v5  ;;  %19197 = vst [vmem:[#allocation157_spill] sm:$0xff] %v19196_v9  ;;  %19206 = vst [vmem:[#allocation67_spill] sm:$0xff] %v15816_v24  ;;  %v19207_v9 = vmov 0  ;;  %v15828_v53 = vpop.permute.xlu0 %6500  ;;  %v19211_v24 = vld [vmem:[#allocation53_spill] sm:$0xff] }
 0x519   : > { %10422 = vmatprep.mubr.msk.bf16.mxu1 %vm15770_vm12, %v18781_v5  ;;  %7719 = vperm.xlu1 %11752, %v19193_v28   ;;  %vm4868_vm12 = vcmp.eq.s32.totalorder %v19184_v6, %v13884_v13  ;;  %v19203_v6 = vmov 0  ;;  %19210 = vst [vmem:[#allocation160_spill] sm:$0xff] %v15828_v53  ;;  %v19212_v53 = vmov 0 }
 0x51a   : > { %7747 = vperm.xlu0 %11751, %v14501_v11   ;;  %vm15800_vm13 = vmpackc.low %vm4872_vm10, %vm4868_vm12  ;;  %v19204_v6 = vsel %vm15810_vm6, 4294967295, %v19203_v6  ;;  %vm4880_vm10 = vcmp.eq.s32.totalorder %v15093_v15, %v13884_v13  ;;  %v19216_v15 = vmov 0 }
 0x51b   : > { %v19199_v49 = vsel %vm15800_vm13, 4294967295, %v19198_v49  ;;  %19205 = vst [vmem:[#allocation8_spill] sm:$0xff] %v19204_v6  ;;  %vm15824_vm12 = vmpackc.low %vm4881_vm2, %vm4877_vm0  ;;  %vm4874_vm2 = vcmp.eq.s32.totalorder %v19201_v7, %v13791_v37  ;;  %v19219_v6 = vld [vmem:[#allocation9_spill] sm:$0xff] }
 0x51c   : > { %19200 = vst [vmem:[#allocation158_spill] sm:$0xff] %v19199_v49  ;;  %v19208_v9 = vsel %vm15824_vm12, 4294967295, %v19207_v9  ;;  %vm15843_vm0 = vmpackc.low %vm4878_vm5, %vm4874_vm2  ;;  %vm4883_vm5 = vcmp.eq.s32.totalorder %v19219_v6, %v13822_v62  ;;  %v19220_v49 = vld [vmem:[#allocation20_spill] sm:$0xff]  ;;  %v15861_v60 = vpop.permute.xlu0 %6510 }
 0x51d   : > { %7727 = vperm.xlu1 %11752, %v19202_v4   ;;  %19209 = vst [vmem:[#allocation159_spill] sm:$0xff] %v19208_v9  ;;  %v19213_v53 = vsel %vm15843_vm0, 4294967295, %v19212_v53  ;;  %v15851_v9 = vpop.permute.xlu1 %6495  ;;  %19221 = vst [vmem:[#allocation9_spill] sm:$0xff] %v15861_v60  ;;  %v19225_v60 = vmov 0 }
 0x51e   : > { %7755 = vperm.xlu0 %11751, %v14572_v52   ;;  %10296 = vmatmul.mubr.msk.bf16.gmra.mxu0 %vm15791_vm1, %v18781_v5  ;;  %19214 = vst [vmem:[#allocation53_spill] sm:$0xff] %v19213_v53  ;;  %19215 = vst [vmem:[#allocation161_spill] sm:$0xff] %v15851_v9  ;;  %v19228_v9 = vld [vmem:[#allocation86_spill] sm:$0xff]  ;;  %v19242_v53 = vmov 0 }
 0x51f   : > { %10298 = vmatprep.mubr.msk.bf16.mxu0 %vm15810_vm6, %v18781_v5  ;;  %vm4889_vm6 = vcmp.eq.s32.totalorder %v15164_v40, %v13855_v8  ;;  %vm15866_vm2 = vmpackc.low %vm4887_vm14, %vm4883_vm5  ;;  %vm4886_vm14 = vcmp.eq.s32.totalorder %v15164_v40, %v13791_v37  ;;  %vm4888_vm5 = vcmp.eq.s32.totalorder %v15164_v40, %v13884_v13  ;;  %v19234_v40 = vmov 0 }
 0x520   : > { %10424 = vmatmul.mubr.msk.bf16.gmra.mxu1 %vm15800_vm13, %v18781_v5 }
 0x521   : > { %10426 = vmatprep.mubr.msk.bf16.mxu1 %vm15824_vm12, %v18781_v5  ;;  %7735 = vperm.xlu1 %11752, %v19211_v24   ;;  %vm4876_vm12 = vcmp.eq.s32.totalorder %v19201_v7, %v13884_v13  ;;  %v19222_v7 = vmov 0 }
 0x522   : > { %7763 = vperm.xlu0 %11751, %v14595_v58   ;;  %vm15854_vm13 = vmpackc.low %vm4880_vm10, %vm4876_vm12  ;;  %v19223_v7 = vsel %vm15866_vm2, 4294967295, %v19222_v7  ;;  %vm4885_vm12 = vcmp.eq.s32.totalorder %v19219_v6, %v13855_v8 }
 0x523   : > { %v19217_v15 = vsel %vm15854_vm13, 4294967295, %v19216_v15  ;;  %19224 = vst [vmem:[#allocation20_spill] sm:$0xff] %v19223_v7  ;;  %vm15878_vm10 = vmpackc.low %vm4889_vm6, %vm4885_vm12  ;;  %v15891_v7 = vpop.permute.xlu1 %6505  ;;  %vm4882_vm6 = vcmp.eq.s32.totalorder %v19219_v6, %v13791_v37  ;;  %vm4895_vm12 = vcmp.eq.s32.totalorder %v15188_v45, %v13822_v62 }
 0x524   : > { %19218 = vst [vmem:[#allocation162_spill] sm:$0xff] %v19217_v15  ;;  %v19226_v60 = vsel %vm15878_vm10, 4294967295, %v19225_v60  ;;  %19229 = vst [vmem:[#allocation86_spill] sm:$0xff] %v15891_v7  ;;  %v19231_v15 = vmov 0  ;;  %v19237_v7 = vld [vmem:[#allocation10_spill] sm:$0xff] }
 0x525   : > { %7743 = vperm.xlu1 %11752, %v19220_v49   ;;  %19227 = vst [vmem:[#allocation163_spill] sm:$0xff] %v19226_v60  ;;  %v15897_v60 = vpop.permute.xlu0 %6520  ;;  %vm4891_vm1 = vcmp.eq.s32.totalorder %v19237_v7, %v13822_v62 }
 0x526   : > { %7771 = vperm.xlu0 %11751, %v14670_v0   ;;  %10300 = vmatmul.mubr.msk.bf16.gmra.mxu0 %vm15843_vm0, %v18781_v5  ;;  %19230 = vst [vmem:[#allocation164_spill] sm:$0xff] %v15897_v60  ;;  %v19238_v60 = vld [vmem:[#allocation87_spill] sm:$0xff] }
 0x527   : > { %10302 = vmatprep.mubr.msk.bf16.mxu0 %vm15866_vm2, %v18781_v5  ;;  %vm4884_vm2 = vcmp.eq.s32.totalorder %v19219_v6, %v13884_v13  ;;  %v19239_v6 = vmov 0 }
 0x528   : > { %10428 = vmatmul.mubr.msk.bf16.gmra.mxu1 %vm15854_vm13, %v18781_v5  ;;  %vm4897_vm13 = vcmp.eq.s32.totalorder %v15188_v45, %v13855_v8  ;;  %vm15908_vm0 = vmpackc.low %vm4888_vm5, %vm4884_vm2  ;;  %vm4890_vm5 = vcmp.eq.s32.totalorder %v19237_v7, %v13791_v37 }
 0x529   : > { %10430 = vmatprep.mubr.msk.bf16.mxu1 %vm15878_vm10, %v18781_v5  ;;  %7751 = vperm.xlu1 %11752, %v19228_v9   ;;  %vm15899_vm10 = vmpackc.low %vm4886_vm14, %vm4882_vm6  ;;  %v19235_v40 = vsel %vm15908_vm0, 4294967295, %v19234_v40  ;;  %vm4893_vm6 = vcmp.eq.s32.totalorder %v19237_v7, %v13855_v8 }
 0x52a   : > { %7779 = vperm.xlu0 %11751, %v14699_v3   ;;  %v19232_v15 = vsel %vm15899_vm10, 4294967295, %v19231_v15  ;;  %19236 = vst [vmem:[#allocation166_spill] sm:$0xff] %v19235_v40  ;;  %vm15918_vm14 = vmpackc.low %vm4895_vm12, %vm4891_vm1  ;;  %vm4894_vm1 = vcmp.eq.s32.totalorder %v15188_v45, %v13791_v37  ;;  %v15943_v40 = vpop.permute.xlu0 %6530  ;;  %vm4903_vm12 = vcmp.eq.s32.totalorder %v15252_v48, %v13822_v62 }
 0x52b   : > { %19233 = vst [vmem:[#allocation165_spill] sm:$0xff] %v19232_v15  ;;  %v19240_v6 = vsel %vm15918_vm14, 4294967295, %v19239_v6  ;;  %vm15930_vm2 = vmpackc.low %vm4897_vm13, %vm4893_vm6  ;;  %v15937_v15 = vpop.permute.xlu1 %6515  ;;  %vm4896_vm13 = vcmp.eq.s32.totalorder %v15188_v45, %v13884_v13  ;;  %v19251_v45 = vmov 0 }
 0x52c   : > { %19241 = vst [vmem:[#allocation10_spill] sm:$0xff] %v19240_v6  ;;  %v19243_v53 = vsel %vm15930_vm2, 4294967295, %v19242_v53  ;;  %19245 = vst [vmem:[#allocation167_spill] sm:$0xff] %v15937_v15  ;;  %v19248_v15 = vmov 0  ;;  %v19255_v6 = vld [vmem:[#allocation90_spill] sm:$0xff] }
 0x52d   : > { %7759 = vperm.xlu1 %11752, %v19238_v60   ;;  %19244 = vst [vmem:[#allocation87_spill] sm:$0xff] %v19243_v53  ;;  %19247 = vst [vmem:[#allocation73_spill] sm:$0xff] %v15943_v40  ;;  %v5884_v40 = vpop.f32.mrf.mxu0  ;;  %v19254_v53 = vld [vmem:[#allocation38_spill] sm:$0xff] }
 0x52e   : > { %7787 = vperm.xlu0 %11751, %v14752_v47   ;;  %10304 = vmatmul.mubr.msk.bf16.gmra.mxu0 %vm15899_vm10, %v18781_v5  ;;  %vm15951_vm6 = vmpackc.low %vm4894_vm1, %vm4890_vm5  ;;  %vm4899_vm10 = vcmp.eq.s32.totalorder %v19254_v53, %v13822_v62  ;;  %vm4898_vm5 = vcmp.eq.s32.totalorder %v19254_v53, %v13791_v37 }
 0x52f   : > { %10306 = vmatprep.mubr.msk.bf16.mxu0 %vm15918_vm14, %v18781_v5  ;;  %v19249_v15 = vsel %vm15951_vm6, 4294967295, %v19248_v15  ;;  %vm4905_vm14 = vcmp.eq.s32.totalorder %v15252_v48, %v13855_v8  ;;  %vm15970_vm1 = vmpackc.low %vm4903_vm12, %vm4899_vm10  ;;  %v15976_v2 = vpop.permute.xlu1 %6525  ;;  %v5886_v59 = vpop.f32.mrf.mxu0  ;;  %vm4902_vm10 = vcmp.eq.s32.totalorder %v15252_v48, %v13791_v37  ;;  %vm4911_vm12 = vcmp.eq.s32.totalorder %v15272_v38, %v13822_v62 }
 0x530   : > { %10432 = vmatmul.mubr.msk.bf16.gmra.mxu1 %vm15908_vm0, %v18781_v5  ;;  %19250 = vst [vmem:[#allocation168_spill] sm:$0xff] %v19249_v15  ;;  %v19257_v50 = vsel %vm15970_vm1, 4294967295, %v19256_v50  ;;  %19259 = vst [vmem:[#allocation90_spill] sm:$0xff] %v15976_v2  ;;  %v19261_v15 = vmov 0  ;;  %v19265_v2 = vld [vmem:[#allocation21_spill] sm:$0xff] }
 0x531   : > { %10434 = vmatprep.mubr.msk.bf16.mxu1 %vm15930_vm2, %v18781_v5  ;;  %7767 = vperm.xlu1 %11752, %v19246_v19   ;;  %vm4892_vm2 = vcmp.eq.s32.totalorder %v19237_v7, %v13884_v13  ;;  %v6173_v7 = vpop.f32.mrf.mxu1  ;;  %19258 = vst [vmem:[#allocation38_spill] sm:$0xff] %v19257_v50 }
 0x532   : > { %7795 = vperm.xlu0 %11751, %v14800_v54   ;;  %vm15960_vm0 = vmpackc.low %vm4896_vm13, %vm4892_vm2  ;;  %vm4901_vm2 = vcmp.eq.s32.totalorder %v19254_v53, %v13855_v8  ;;  %v15978_v51 = vadd.f32 %v6173_v7, %v5884_v40  ;;  %v5887_v7 = vpop.f32.mrf.mxu0 }
 0x533   : > { %v19252_v45 = vsel %vm15960_vm0, 4294967295, %v19251_v45  ;;  %vm15986_vm13 = vmpackc.low %vm4905_vm14, %vm4901_vm2  ;;  %v6175_v40 = vpop.f32.mrf.mxu1  ;;  %vm4904_vm14 = vcmp.eq.s32.totalorder %v15252_v48, %v13884_v13  ;;  %v16015_v48 = vpop.permute.xlu1 %6535 }
 0x534   : > { %19253 = vst [vmem:[#allocation169_spill] sm:$0xff] %v19252_v45  ;;  %19260 = vst [vmem:[#allocation170_spill] sm:$0xff] %v15978_v51  ;;  %v19262_v15 = vsel %vm15986_vm13, 4294967295, %v19261_v15 }
 0x535   : > { %7775 = vperm.xlu1 %11752, %v19255_v6   ;;  %19263 = vst [vmem:[#allocation171_spill] sm:$0xff] %v19262_v15  ;;  %v6176_v51 = vpop.f32.mrf.mxu1  ;;  %vm16007_vm2 = vmpackc.low %vm4902_vm10, %vm4898_vm5  ;;  %v19267_v15 = vmov 0 }
 0x536   : > { %7803 = vperm.xlu0 %11751, %v14871_v39   ;;  %10308 = vmatmul.mubr.msk.bf16.gmra.mxu0 %vm15951_vm6, %v18781_v5  ;;  %v15990_v39 = vpop.permute.xlu0 %6540  ;;  %v16001_v59 = vadd.f32 %v6176_v51, %v5887_v7  ;;  %v19268_v15 = vsel %vm16007_vm2, 4294967295, %v19267_v15  ;;  %19270 = vst [vmem:[#allocation174_spill] sm:$0xff] %v16015_v48  ;;  %v19274_v51 = vld [vmem:[#allocation82_spill] sm:$0xff]  ;;  %v19275_v7 = vld [vmem:[#allocation39_spill] sm:$0xff] }
 0x537   : > { %10310 = vmatprep.mubr.msk.bf16.mxu0 %vm15970_vm1, %v18781_v5  ;;  %19264 = vst [vmem:[#allocation172_spill] sm:$0xff] %v15990_v39  ;;  %v5889_v39 = vpop.f32.mrf.mxu0  ;;  %v6178_v40 = vpop.f32.mrf.mxu1  ;;  %19269 = vst [vmem:[#allocation173_spill] sm:$0xff] %v19268_v15  ;;  %vm4913_vm1 = vcmp.eq.s32.totalorder %v15272_v38, %v13855_v8  ;;  %vm4907_vm10 = vcmp.eq.s32.totalorder %v19274_v51, %v13822_v62 }
 0x538   : > { %10436 = vmatmul.mubr.msk.bf16.gmra.mxu1 %vm15960_vm0, %v18781_v5  ;;  %19266 = vst [vmem:[#allocation21_spill] sm:$0xff] %v16001_v59  ;;  %v19271_v39 = vmov 0  ;;  %vm16030_vm5 = vmpackc.low %vm4911_vm12, %vm4907_vm10  ;;  %vm4910_vm12 = vcmp.eq.s32.totalorder %v15272_v38, %v13791_v37  ;;  %vm4906_vm10 = vcmp.eq.s32.totalorder %v19274_v51, %v13791_v37 }
 0x539   : > { %10438 = vmatprep.mubr.msk.bf16.mxu1 %vm15986_vm13, %v18781_v5  ;;  %7783 = vperm.xlu1 %11752, %v19265_v2   ;;  %vm4900_vm13 = vcmp.eq.s32.totalorder %v19254_v53, %v13884_v13  ;;  %v5892_v59 = vpop.f32.mrf.mxu0  ;;  %v19277_v53 = vmov 0  ;;  %v6181_v48 = vpop.f32.mrf.mxu1 }
 0x53a   : > { %7811 = vperm.xlu0 %11751, %v14894_v26   ;;  %vm16018_vm0 = vmpackc.low %vm4904_vm14, %vm4900_vm13  ;;  %v16025_v40 = vpop.permute.xlu0 %6550  ;;  %v19278_v53 = vsel %vm16030_vm5, 4294967295, %v19277_v53  ;;  %vm4909_vm13 = vcmp.eq.s32.totalorder %v19274_v51, %v13855_v8  ;;  %v16046_v15 = vadd.f32 %v6181_v48, %v5892_v59 }
 0x53b   : > { %v19272_v39 = vsel %vm16018_vm0, 4294967295, %v19271_v39  ;;  %19276 = vst [vmem:[#allocation82_spill] sm:$0xff] %v16025_v40  ;;  %19279 = vst [vmem:[#allocation39_spill] sm:$0xff] %v19278_v53  ;;  %v19280_v40 = vmov 0  ;;  %v5894_v50 = vpop.f32.mrf.mxu0  ;;  %v6183_v45 = vpop.f32.mrf.mxu1 }
 0x53c   : > { %19273 = vst [vmem:[#allocation175_spill] sm:$0xff] %v19272_v39  ;;  %vm16042_vm14 = vmpackc.low %vm4913_vm1, %vm4909_vm13  ;;  %v19284_v39 = vld [vmem:[#allocation29_spill] sm:$0xff]  ;;  %vm4912_vm1 = vcmp.eq.s32.totalorder %v15272_v38, %v13884_v13  ;;  %vm4919_vm13 = vcmp.eq.s32.totalorder %v15336_v63, %v13822_v62 }
 0x53d   : > { %7791 = vperm.xlu1 %11752, %v19275_v7   ;;  %v19281_v40 = vsel %vm16042_vm14, 4294967295, %v19280_v40  ;;  %19283 = vst [vmem:[#allocation177_spill] sm:$0xff] %v16046_v15  ;;  %v5895_v53 = vpop.f32.mrf.mxu0  ;;  %v6184_v59 = vpop.f32.mrf.mxu1  ;;  %v19288_v15 = vmov 0 }
 0x53e   : > { %7819 = vperm.xlu0 %11751, %v14967_v16   ;;  %10312 = vmatmul.mubr.msk.bf16.gmra.mxu0 %vm16007_vm2, %v18781_v5  ;;  %19282 = vst [vmem:[#allocation176_spill] sm:$0xff] %v19281_v40  ;;  %v16057_v16 = vpop.permute.xlu1 %6545  ;;  %v16063_v50 = vpop.permute.xlu0 %6560  ;;  %v16065_v45 = vadd.f32 %v6184_v59, %v5895_v53  ;;  %v19294_v53 = vld [vmem:[#allocation13_spill] sm:$0xff]  ;;  %v19295_v59 = vld [vmem:[#allocation31_spill] sm:$0xff] }
 0x53f   : > { %10314 = vmatprep.mubr.msk.bf16.mxu0 %vm16030_vm5, %v18781_v5  ;;  %19285 = vst [vmem:[#allocation29_spill] sm:$0xff] %v16057_v16  ;;  %19286 = vst [vmem:[#allocation178_spill] sm:$0xff] %v16063_v50  ;;  %v5897_v48 = vpop.f32.mrf.mxu0  ;;  %vm4908_vm5 = vcmp.eq.s32.totalorder %v19274_v51, %v13884_v13  ;;  %v6186_v38 = vpop.f32.mrf.mxu1  ;;  %v19291_v16 = vmov 0  ;;  %vm4915_vm6 = vcmp.eq.s32.totalorder %v19294_v53, %v13822_v62  ;;  %v19296_v51 = vmov 0 }
 0x540   : > { %10440 = vmatmul.mubr.msk.bf16.gmra.mxu1 %vm16018_vm0, %v18781_v5  ;;  %19287 = vst [vmem:[#allocation179_spill] sm:$0xff] %v16065_v45  ;;  %vm4921_vm0 = vcmp.eq.s32.totalorder %v15336_v63, %v13855_v8  ;;  %vm16076_vm2 = vmpackc.low %vm4912_vm1, %vm4908_vm5  ;;  %vm4917_vm5 = vcmp.eq.s32.totalorder %v19294_v53, %v13855_v8  ;;  %v19299_v50 = vmov 0 }
 0x541   : > { %10442 = vmatprep.mubr.msk.bf16.mxu1 %vm16042_vm14, %v18781_v5  ;;  %7799 = vperm.xlu1 %11752, %v19284_v39   ;;  %vm16067_vm14 = vmpackc.low %vm4910_vm12, %vm4906_vm10  ;;  %v19292_v16 = vsel %vm16076_vm2, 4294967295, %v19291_v16  ;;  %v5900_v48 = vpop.f32.mrf.mxu0  ;;  %v6189_v38 = vpop.f32.mrf.mxu1  ;;  %vm4914_vm10 = vcmp.eq.s32.totalorder %v19294_v53, %v13791_v37 }
 0x542   : > { %7827 = vperm.xlu0 %11751, %v14995_v44   ;;  %v19289_v15 = vsel %vm16067_vm14, 4294967295, %v19288_v15  ;;  %19293 = vst [vmem:[#allocation181_spill] sm:$0xff] %v19292_v16  ;;  %vm16086_vm12 = vmpackc.low %vm4919_vm13, %vm4915_vm6  ;;  %v16107_v40 = vpop.permute.xlu1 %6555  ;;  %v19304_v16 = vld [vmem:[#allocation92_spill] sm:$0xff]  ;;  %vm4920_vm6 = vcmp.eq.s32.totalorder %v15336_v63, %v13884_v13  ;;  %vm4927_vm13 = vcmp.eq.s32.totalorder %v15368_v20, %v13822_v62 }
 0x543   : > { %19290 = vst [vmem:[#allocation180_spill] sm:$0xff] %v19289_v15  ;;  %v19297_v51 = vsel %vm16086_vm12, 4294967295, %v19296_v51  ;;  %vm16098_vm1 = vmpackc.low %vm4921_vm0, %vm4917_vm5  ;;  %v16102_v15 = vadd.f32 %v6189_v38, %v5900_v48  ;;  %v5902_v45 = vpop.f32.mrf.mxu0  ;;  %vm4918_vm0 = vcmp.eq.s32.totalorder %v15336_v63, %v13791_v37  ;;  %v19307_v38 = vmov 0 }
 0x544   : > { %19298 = vst [vmem:[#allocation13_spill] sm:$0xff] %v19297_v51  ;;  %v19300_v50 = vsel %vm16098_vm1, 4294967295, %v19299_v50  ;;  %19303 = vst [vmem:[#allocation183_spill] sm:$0xff] %v16107_v40  ;;  %v16113_v51 = vpop.permute.xlu0 %6570 }
 0x545   : > { %7807 = vperm.xlu1 %11752, %v19295_v59   ;;  %19301 = vst [vmem:[#allocation31_spill] sm:$0xff] %v19300_v50  ;;  %19302 = vst [vmem:[#allocation182_spill] sm:$0xff] %v16102_v15  ;;  %v5903_v44 = vpop.f32.mrf.mxu0 }
 0x546   : > { %7835 = vperm.xlu0 %11751, %v15050_v31   ;;  %10316 = vmatmul.mubr.msk.bf16.gmra.mxu0 %vm16067_vm14, %v18781_v5  ;;  %v6191_v31 = vpop.f32.mrf.mxu1  ;;  %19305 = vst [vmem:[#allocation92_spill] sm:$0xff] %v16113_v51  ;;  %vm16123_vm5 = vmpackc.low %vm4918_vm0, %vm4914_vm10  ;;  %v19310_v51 = vmov 0 }
 0x547   : > { %10318 = vmatprep.mubr.msk.bf16.mxu0 %vm16086_vm12, %v18781_v5  ;;  %v5905_v45 = vpop.f32.mrf.mxu0  ;;  %v19308_v38 = vsel %vm16123_vm5, 4294967295, %v19307_v38  ;;  %vm4929_vm12 = vcmp.eq.s32.totalorder %v15368_v20, %v13855_v8 }
 0x548   : > { %10444 = vmatmul.mubr.msk.bf16.gmra.mxu1 %vm16076_vm2, %v18781_v5  ;;  %v6192_v48 = vpop.f32.mrf.mxu1  ;;  %19309 = vst [vmem:[#allocation185_spill] sm:$0xff] %v19308_v38  ;;  %v19319_v38 = vmov 0 }
 0x549   : > { %10446 = vmatprep.mubr.msk.bf16.mxu1 %vm16098_vm1, %v18781_v5  ;;  %7815 = vperm.xlu1 %11752, %v19304_v16   ;;  %v16121_v31 = vadd.f32 %v6192_v48, %v5903_v44  ;;  %vm4916_vm1 = vcmp.eq.s32.totalorder %v19294_v53, %v13884_v13  ;;  %v19313_v44 = vld [vmem:[#allocation14_spill] sm:$0xff]  ;;  %v19314_v48 = vld [vmem:[#allocation33_spill] sm:$0xff]  ;;  %v5908_v45 = vpop.f32.mrf.mxu0  ;;  %v19315_v53 = vmov 0 }
 0x54a   : > { %7843 = vperm.xlu0 %11751, %v15090_v23   ;;  %v6194_v63 = vpop.f32.mrf.mxu1  ;;  %vm16132_vm2 = vmpackc.low %vm4920_vm6, %vm4916_vm1  ;;  %vm4923_vm14 = vcmp.eq.s32.totalorder %v19313_v44, %v13822_v62  ;;  %vm4925_vm1 = vcmp.eq.s32.totalorder %v19313_v44, %v13855_v8  ;;  %vm4922_vm10 = vcmp.eq.s32.totalorder %v19313_v44, %v13791_v37 }
 0x54b   : > { %19306 = vst [vmem:[#allocation184_spill] sm:$0xff] %v16121_v31  ;;  %v19311_v51 = vsel %vm16132_vm2, 4294967295, %v19310_v51  ;;  %vm16142_vm0 = vmpackc.low %vm4927_vm13, %vm4923_vm14  ;;  %v16148_v63 = vpop.permute.xlu1 %6565  ;;  %v16160_v31 = vpop.permute.xlu0 %6580  ;;  %vm4926_vm14 = vcmp.eq.s32.totalorder %v15368_v20, %v13791_v37  ;;  %vm4935_vm13 = vcmp.eq.s32.totalorder %v15431_v1, %v13822_v62 }
 0x54c   : > { %19312 = vst [vmem:[#allocation186_spill] sm:$0xff] %v19311_v51  ;;  %v19316_v53 = vsel %vm16142_vm0, 4294967295, %v19315_v53  ;;  %19318 = vst [vmem:[#allocation33_spill] sm:$0xff] %v16148_v63  ;;  %v6197_v40 = vpop.f32.mrf.mxu1  ;;  %v5910_v63 = vpop.f32.mrf.mxu0  ;;  %v19324_v51 = vld [vmem:[#allocation93_spill] sm:$0xff] }
 0x54d   : > { %7823 = vperm.xlu1 %11752, %v19314_v48   ;;  %19317 = vst [vmem:[#allocation14_spill] sm:$0xff] %v19316_v53  ;;  %vm16156_vm6 = vmpackc.low %vm4929_vm12, %vm4925_vm1  ;;  %v16162_v15 = vadd.f32 %v6197_v40, %v5908_v45  ;;  %vm4928_vm12 = vcmp.eq.s32.totalorder %v15368_v20, %v13884_v13  ;;  %v19326_v45 = vmov 0 }
 0x54e   : > { %7851 = vperm.xlu0 %11751, %v15147_v42   ;;  %10320 = vmatmul.mubr.msk.bf16.gmra.mxu0 %vm16123_vm5, %v18781_v5  ;;  %v19320_v38 = vsel %vm16156_vm6, 4294967295, %v19319_v38  ;;  %19322 = vst [vmem:[#allocation188_spill] sm:$0xff] %v16160_v31  ;;  %v6199_v50 = vpop.f32.mrf.mxu1  ;;  %v5911_v53 = vpop.f32.mrf.mxu0  ;;  %vm16179_vm1 = vmpackc.low %vm4926_vm14, %vm4922_vm10 }
 0x54f   : > { %10322 = vmatprep.mubr.msk.bf16.mxu0 %vm16142_vm0, %v18781_v5  ;;  %19321 = vst [vmem:[#allocation187_spill] sm:$0xff] %v19320_v38  ;;  %19323 = vst [vmem:[#allocation189_spill] sm:$0xff] %v16162_v15  ;;  %v19327_v45 = vsel %vm16179_vm1, 4294967295, %v19326_v45  ;;  %vm4937_vm0 = vcmp.eq.s32.totalorder %v15431_v1, %v13855_v8  ;;  %v16187_v20 = vpop.permute.xlu1 %6575  ;;  %v19330_v15 = vmov 0  ;;  %v19343_v38 = vld [vmem:[#allocation11_spill] sm:$0xff] }
 0x550   : > { %10448 = vmatmul.mubr.msk.bf16.gmra.mxu1 %vm16132_vm2, %v18781_v5  ;;  %v6200_v31 = vpop.f32.mrf.mxu1  ;;  %v5913_v50 = vpop.f32.mrf.mxu0  ;;  %19328 = vst [vmem:[#allocation190_spill] sm:$0xff] %v19327_v45  ;;  %19329 = vst [vmem:[#allocation191_spill] sm:$0xff] %v16187_v20 }
 0x551   : > { %10450 = vmatprep.mubr.msk.bf16.mxu1 %vm16156_vm6, %v18781_v5  ;;  %7831 = vperm.xlu1 %11752, %v19324_v51   ;;  %v16177_v40 = vadd.f32 %v6200_v31, %v5911_v53  ;;  %vm4924_vm6 = vcmp.eq.s32.totalorder %v19313_v44, %v13884_v13  ;;  %v19333_v31 = vld [vmem:[#allocation15_spill] sm:$0xff]  ;;  %v19334_v53 = vld [vmem:[#allocation94_spill] sm:$0xff]  ;;  %v16197_v50 = vpop.permute.xlu0 %6590 }
 0x552   : > { %7859 = vperm.xlu0 %11751, %v15180_v35   ;;  %v6202_v63 = vpop.f32.mrf.mxu1  ;;  %vm16190_vm2 = vmpackc.low %vm4928_vm12, %vm4924_vm6  ;;  %vm4931_vm14 = vcmp.eq.s32.totalorder %v19333_v31, %v13822_v62  ;;  %19335 = vst [vmem:[#allocation15_spill] sm:$0xff] %v16197_v50  ;;  %v5916_v44 = vpop.f32.mrf.mxu0  ;;  %vm4933_vm6 = vcmp.eq.s32.totalorder %v19333_v31, %v13855_v8  ;;  %v19339_v50 = vmov 0 }
 0x553   : > { %19325 = vst [vmem:[#allocation93_spill] sm:$0xff] %v16177_v40  ;;  %v19331_v15 = vsel %vm16190_vm2, 4294967295, %v19330_v15  ;;  %vm16205_vm10 = vmpackc.low %vm4935_vm13, %vm4931_vm14  ;;  %v19336_v63 = vmov 0  ;;  %vm4934_vm13 = vcmp.eq.s32.totalorder %v15431_v1, %v13791_v37  ;;  %vm4930_vm14 = vcmp.eq.s32.totalorder %v19333_v31, %v13791_v37 }
 0x554   : > { %19332 = vst [vmem:[#allocation192_spill] sm:$0xff] %v19331_v15  ;;  %v19337_v63 = vsel %vm16205_vm10, 4294967295, %v19336_v63  ;;  %v6205_v20 = vpop.f32.mrf.mxu1  ;;  %vm16220_vm12 = vmpackc.low %vm4937_vm0, %vm4933_vm6  ;;  %v5918_v40 = vpop.f32.mrf.mxu0  ;;  %vm4936_vm0 = vcmp.eq.s32.totalorder %v15431_v1, %v13884_v13  ;;  %vm4943_vm6 = vcmp.eq.s32.totalorder %v15446_v17, %v13822_v62 }
 0x555   : > { %7839 = vperm.xlu1 %11752, %v19334_v53   ;;  %19338 = vst [vmem:[#allocation94_spill] sm:$0xff] %v19337_v63  ;;  %v19340_v50 = vsel %vm16220_vm12, 4294967295, %v19339_v50  ;;  %v16224_v45 = vadd.f32 %v6205_v20, %v5916_v44 }
 0x556   : > { %7867 = vperm.xlu0 %11751, %v15245_v10   ;;  %10324 = vmatmul.mubr.msk.bf16.gmra.mxu0 %vm16179_vm1, %v18781_v5  ;;  %19341 = vst [vmem:[#allocation193_spill] sm:$0xff] %v19340_v50  ;;  %v6207_v15 = vpop.f32.mrf.mxu1  ;;  %v5919_v63 = vpop.f32.mrf.mxu0 }
 0x557   : > { %10326 = vmatprep.mubr.msk.bf16.mxu0 %vm16205_vm10, %v18781_v5  ;;  %19342 = vst [vmem:[#allocation194_spill] sm:$0xff] %v16224_v45  ;;  %v16235_v10 = vpop.permute.xlu1 %6585  ;;  %v16241_v15 = vpop.permute.xlu0 %6600  ;;  %v19347_v45 = vmov 0  ;;  %vm4932_vm10 = vcmp.eq.s32.totalorder %v19333_v31, %v13884_v13  ;;  %v19354_v31 = vmov 0 }
 0x558   : > { %10452 = vmatmul.mubr.msk.bf16.gmra.mxu1 %vm16190_vm2, %v18781_v5  ;;  %19344 = vst [vmem:[#allocation11_spill] sm:$0xff] %v16235_v10  ;;  %v6208_v20 = vpop.f32.mrf.mxu1  ;;  %19345 = vst [vmem:[#allocation195_spill] sm:$0xff] %v16241_v15  ;;  %v5921_v44 = vpop.f32.mrf.mxu0  ;;  %vm4945_vm2 = vcmp.eq.s32.totalorder %v15446_v17, %v13855_v8  ;;  %v19350_v10 = vmov 0 }
 0x559   : > { %10454 = vmatprep.mubr.msk.bf16.mxu1 %vm16220_vm12, %v18781_v5  ;;  %7847 = vperm.xlu1 %11752, %v19343_v38   ;;  %v16243_v40 = vadd.f32 %v6208_v20, %v5919_v63  ;;  %vm16245_vm12 = vmpackc.low %vm4934_vm13, %vm4930_vm14  ;;  %v19353_v63 = vld [vmem:[#allocation44_spill] sm:$0xff] }
 0x55a   : > { %7875 = vperm.xlu0 %11751, %v15267_v34   ;;  %v19348_v45 = vsel %vm16245_vm12, 4294967295, %v19347_v45  ;;  %v6210_v1 = vpop.f32.mrf.mxu1  ;;  %vm16254_vm1 = vmpackc.low %vm4936_vm0, %vm4932_vm10  ;;  %vm4939_vm5 = vcmp.eq.s32.totalorder %v19353_v63, %v13822_v62  ;;  %v5924_v20 = vpop.f32.mrf.mxu0  ;;  %vm4941_vm10 = vcmp.eq.s32.totalorder %v19353_v63, %v13855_v8  ;;  %vm4938_vm14 = vcmp.eq.s32.totalorder %v19353_v63, %v13791_v37 }
 0x55b   : > { %19346 = vst [vmem:[#allocation196_spill] sm:$0xff] %v16243_v40  ;;  %19349 = vst [vmem:[#allocation197_spill] sm:$0xff] %v19348_v45  ;;  %v19351_v10 = vsel %vm16254_vm1, 4294967295, %v19350_v10  ;;  %v19357_v1 = vmov 0  ;;  %v16285_v40 = vpop.permute.xlu1 %6595 }
 0x55c   : > { %19352 = vst [vmem:[#allocation198_spill] sm:$0xff] %v19351_v10  ;;  %vm16264_vm13 = vmpackc.low %vm4943_vm6, %vm4939_vm5  ;;  %v6213_v44 = vpop.f32.mrf.mxu1  ;;  %v5926_v45 = vpop.f32.mrf.mxu0  ;;  %v19362_v10 = vld [vmem:[#allocation95_spill] sm:$0xff]  ;;  %vm4944_vm5 = vcmp.eq.s32.totalorder %v15446_v17, %v13884_v13  ;;  %vm4951_vm6 = vcmp.eq.s32.totalorder %v15498_v36, %v13822_v62 }
 0x55d   : > { %7855 = vperm.xlu1 %11752, %v14793_v14   ;;  %v19355_v31 = vsel %vm16264_vm13, 4294967295, %v19354_v31  ;;  %vm16276_vm0 = vmpackc.low %vm4945_vm2, %vm4941_vm10  ;;  %v16280_v15 = vadd.f32 %v6213_v44, %v5924_v20  ;;  %19361 = vst [vmem:[#allocation201_spill] sm:$0xff] %v16285_v40  ;;  %vm4942_vm2 = vcmp.eq.s32.totalorder %v15446_v17, %v13791_v37  ;;  %v19365_v44 = vmov 0 }
 0x55e   : > { %7883 = vperm.xlu0 %11751, %v15313_v61   ;;  %10328 = vmatmul.mubr.msk.bf16.gmra.mxu0 %vm16245_vm12, %v18781_v5  ;;  %19356 = vst [vmem:[#allocation44_spill] sm:$0xff] %v19355_v31  ;;  %v19358_v1 = vsel %vm16276_vm0, 4294967295, %v19357_v1  ;;  %v6215_v50 = vpop.f32.mrf.mxu1  ;;  %v16291_v31 = vpop.permute.xlu0 %6610  ;;  %vm16301_vm10 = vmpackc.low %vm4942_vm2, %vm4938_vm14  ;;  %v19369_v40 = vmov 0 }
 0x55f   : > { %10330 = vmatprep.mubr.msk.bf16.mxu0 %vm16264_vm13, %v18781_v5  ;;  %19359 = vst [vmem:[#allocation199_spill] sm:$0xff] %v19358_v1  ;;  %19360 = vst [vmem:[#allocation200_spill] sm:$0xff] %v16280_v15  ;;  %v5927_v61 = vpop.f32.mrf.mxu0  ;;  %v19366_v44 = vsel %vm16301_vm10, 4294967295, %v19365_v44  ;;  %vm4953_vm13 = vcmp.eq.s32.totalorder %v15498_v36, %v13855_v8 }
 0x560   : > { %10456 = vmatmul.mubr.msk.bf16.gmra.mxu1 %vm16254_vm1, %v18781_v5  ;;  %19363 = vst [vmem:[#allocation95_spill] sm:$0xff] %v16291_v31  ;;  %v6216_v20 = vpop.f32.mrf.mxu1  ;;  %19367 = vst [vmem:[#allocation203_spill] sm:$0xff] %v19366_v44  ;;  %v19368_v31 = vld [vmem:[#allocation123_spill] sm:$0xff] }
 0x561   : > { %10458 = vmatprep.mubr.msk.bf16.mxu1 %vm16276_vm0, %v18781_v5  ;;  %7863 = vperm.xlu1 %11752, %v19362_v10   ;;  %v16299_v45 = vadd.f32 %v6216_v20, %v5927_v61  ;;  %v5929_v50 = vpop.f32.mrf.mxu0  ;;  %vm4940_vm0 = vcmp.eq.s32.totalorder %v19353_v63, %v13884_v13  ;;  %v19372_v61 = vld [vmem:[#allocation48_spill] sm:$0xff]  ;;  %v19373_v20 = vld [vmem:[#allocation98_spill] sm:$0xff]  ;;  %v19374_v63 = vmov 0 }
 0x562   : > { %7891 = vperm.xlu0 %11751, %v15363_v27   ;;  %v6218_v17 = vpop.f32.mrf.mxu1  ;;  %vm16310_vm1 = vmpackc.low %vm4944_vm5, %vm4940_vm0  ;;  %vm4947_vm12 = vcmp.eq.s32.totalorder %v19372_v61, %v13822_v62  ;;  %vm4949_vm0 = vcmp.eq.s32.totalorder %v19372_v61, %v13855_v8  ;;  %v19378_v62 = vmov 0  ;;  %v16338_v44 = vpop.permute.xlu0 %6620  ;;  %vm4946_vm14 = vcmp.eq.s32.totalorder %v19372_v61, %v13791_v37 }
 0x563   : > { %19364 = vst [vmem:[#allocation202_spill] sm:$0xff] %v16299_v45  ;;  %v19370_v40 = vsel %vm16310_vm1, 4294967295, %v19369_v40  ;;  %v5932_v50 = vpop.f32.mrf.mxu0  ;;  %vm16320_vm2 = vmpackc.low %vm4951_vm6, %vm4947_vm12  ;;  %v16326_v17 = vpop.permute.xlu1 %6605  ;;  %vm4950_vm12 = vcmp.eq.s32.totalorder %v15498_v36, %v13791_v37  ;;  %v19391_v37 = vmov 0 }
 0x564   : > { %19371 = vst [vmem:[#allocation123_spill] sm:$0xff] %v19370_v40  ;;  %v19375_v63 = vsel %vm16320_vm2, 4294967295, %v19374_v63  ;;  %19377 = vst [vmem:[#allocation98_spill] sm:$0xff] %v16326_v17  ;;  %v6221_v45 = vpop.f32.mrf.mxu1  ;;  %v19383_v40 = vld [vmem:[#allocation101_spill] sm:$0xff] }
 0x565   : > { %7871 = vperm.xlu1 %11752, %v19373_v20   ;;  %19376 = vst [vmem:[#allocation48_spill] sm:$0xff] %v19375_v63  ;;  %vm16334_vm5 = vmpackc.low %vm4953_vm13, %vm4949_vm0  ;;  %v16340_v15 = vadd.f32 %v6221_v45, %v5932_v50  ;;  %v5934_v8 = vpop.f32.mrf.mxu0  ;;  %vm4952_vm13 = vcmp.eq.s32.totalorder %v15498_v36, %v13884_v13  ;;  %vm4948_vm0 = vcmp.eq.s32.totalorder %v19372_v61, %v13884_v13 }
 0x566   : > { %7899 = vperm.xlu0 %11751, %v19368_v31   ;;  %10332 = vmatmul.mubr.msk.bf16.gmra.mxu0 %vm16301_vm10, %v18781_v5  ;;  %v19379_v62 = vsel %vm16334_vm5, 4294967295, %v19378_v62  ;;  %19381 = vst [vmem:[#allocation205_spill] sm:$0xff] %v16338_v44  ;;  %v6223_v17 = vpop.f32.mrf.mxu1  ;;  %vm16358_vm6 = vmpackc.low %vm4950_vm12, %vm4946_vm14  ;;  %v19386_v44 = vmov 0  ;;  %v16365_v36 = vpop.permute.xlu0 %6630 }
 0x567   : > { %10334 = vmatprep.mubr.msk.bf16.mxu0 %vm16320_vm2, %v18781_v5  ;;  %19380 = vst [vmem:[#allocation204_spill] sm:$0xff] %v19379_v62  ;;  %19382 = vst [vmem:[#allocation206_spill] sm:$0xff] %v16340_v15  ;;  %v5935_v63 = vpop.f32.mrf.mxu0  ;;  %v16355_v8 = vpop.permute.xlu1 %6615  ;;  %v19387_v44 = vsel %vm16358_vm6, 4294967295, %v19386_v44  ;;  %v19389_v15 = vld [vmem:[#allocation102_spill] sm:$0xff]  ;;  %v11819_v62 = vld [vmem:[#allocation2 + $0xb0] ss:$12 sps:$4 sm:$0xff]  }
 0x568   : > { %10460 = vmatmul.mubr.msk.bf16.gmra.mxu1 %vm16310_vm1, %v18781_v5  ;;  %v6224_v1 = vpop.f32.mrf.mxu1  ;;  %19385 = vst [vmem:[#allocation207_spill] sm:$0xff] %v16355_v8  ;;  %19388 = vst [vmem:[#allocation208_spill] sm:$0xff] %v19387_v44  ;;  %v19397_v8 = vld [vmem:[#allocation107_spill] sm:$0xff] }
 0x569   : > { %10462 = vmatprep.mubr.msk.bf16.mxu1 %vm16334_vm5, %v18781_v5  ;;  %7879 = vperm.xlu1 %11752, %v19383_v40   ;;  %v16351_v45 = vadd.f32 %v6224_v1, %v5935_v63  ;;  %v5937_v50 = vpop.f32.mrf.mxu0  ;;  %19390 = vst [vmem:[#allocation102_spill] sm:$0xff] %v16365_v36  ;;  %vm16370_vm5 = vmpackc.low %vm4952_vm13, %vm4948_vm0 }
 0x56a   : > { %7907 = vperm.xlu0 %11751, %v15443_v55   ;;  %v6226_v17 = vpop.f32.mrf.mxu1  ;;  %v19392_v37 = vsel %vm16370_vm5, 4294967295, %v19391_v37  ;;  %v19422_v55 = vld [vmem:[#allocation115_spill] sm:$0xff] }
 0x56b   : > { %19384 = vst [vmem:[#allocation101_spill] sm:$0xff] %v16351_v45  ;;  %v5940_v1 = vpop.f32.mrf.mxu0  ;;  %19393 = vst [vmem:[#allocation209_spill] sm:$0xff] %v19392_v37  ;;  %v16387_v45 = vpop.permute.xlu1 %6625 }
 0x56c   : > { %v6229_v63 = vpop.f32.mrf.mxu1  ;;  %19398 = vst [vmem:[#allocation107_spill] sm:$0xff] %v16387_v45  ;;  %v19412_v45 = vld [vmem:[#allocation47_spill] sm:$0xff] }
 0x56d   : > { %7887 = vperm.xlu1 %11752, %v19389_v15   ;;  %v16380_v61 = vadd.f32 %v6229_v63, %v5940_v1  ;;  %v5942_v17 = vpop.f32.mrf.mxu0  ;;  %v11820_v63 = vld [vmem:[#allocation2 + $0x230] ss:$12 sps:$4 sm:$0xff]  }
 0x56e   : > { %7915 = vperm.xlu0 %11751, %v15493_v25   ;;  %10336 = vmatmul.mubr.msk.bf16.gmra.mxu0 %vm16358_vm6, %v18781_v5  ;;  %v6231_v36 = vpop.f32.mrf.mxu1  ;;  %v16389_v25 = vpop.permute.xlu0 %6640  ;;  %v19401_v17 = vld [vmem:[#allocation108_spill] sm:$0xff] }
 0x56f   : > { %10498 = vmatprep.mubr.msk.bf16.mxu0 %vm13992_vm4, %v18781_v5  ;;  %19395 = vst [vmem:[#allocation210_spill] sm:$0xff] %v16380_v61  ;;  %v5943_v44 = vpop.f32.mrf.mxu0  ;;  %19399 = vst [vmem:[#allocation211_spill] sm:$0xff] %v16389_v25  ;;  %v11822_v25 = vld [vmem:[#allocation2 + $0x218] ss:$12 sps:$4 sm:$0xff]  }
 0x570   : > { %10464 = vmatmul.mubr.msk.bf16.gmra.mxu1 %vm16370_vm5, %v18781_v5  ;;  %v6232_v37 = vpop.f32.mrf.mxu1 }
 0x571   : > { %10626 = vmatprep.mubr.msk.bf16.mxu1 %vm14008_vm7, %v18781_v5  ;;  %7895 = vperm.xlu1 %11752, %v19397_v8   ;;  %v16391_v13 = vadd.f32 %v6232_v37, %v5943_v44  ;;  %v5945_v1 = vpop.f32.mrf.mxu0  ;;  %v11821_v44 = vld [vmem:[#allocation2 + $0x98] ss:$12 sps:$4 sm:$0xff]  }
 0x572   : > { %7923 = vperm.xlu0 %11751, %v15511_v56   ;;  %v6234_v61 = vpop.f32.mrf.mxu1 }
 0x573   : > { %19400 = vst [vmem:[#allocation212_spill] sm:$0xff] %v16391_v13  ;;  %v5948_v36 = vpop.f32.mrf.mxu0  ;;  %v16406_v13 = vpop.permute.xlu1 %6635  ;;  %v19420_v61 = vld [vmem:[#allocation71_spill] sm:$0xff] }
 0x574   : > { %v6237_v56 = vpop.f32.mrf.mxu1  ;;  %19406 = vst [vmem:[#allocation213_spill] sm:$0xff] %v16406_v13  ;;  %vm19421_vm14 = vnez %v19420_v61  ;;  %v19428_v61 = vld [vmem:[#allocation116_spill] sm:$0xff] }
 0x575   : > { %7903 = vperm.xlu1 %11752, %v19401_v17   ;;  %v16401_v37 = vadd.f32 %v6237_v56, %v5948_v36  ;;  %v5950_v1 = vpop.f32.mrf.mxu0  ;;  %v19409_v36 = vld [vmem:[#allocation46_spill] sm:$0xff] }
 0x576   : > { %7931 = vperm.xlu0 %11751, %v15539_v33   ;;  %10500 = vmatmul.mubr.msk.bf16.vlgmr.msra.gmra.mxu0 %vm14025_vm9, %v18781_v5  ;;  %v6239_v33 = vpop.f32.mrf.mxu1 }
 0x577   : > { %8351 = vmatpush1.bf16.msra.mxu0 %v11819_v62  ;;  %19404 = vst [vmem:[#allocation108_spill] sm:$0xff] %v16401_v37  ;;  %10502 = vmatprep.mubr.msk.bf16.mxu0 %vm14082_vm3, %v18781_v5  ;;  %v16412_v62 = vpop.permute.xlu0 %6650  ;;  %v5951_v56 = vpop.f32.mrf.mxu0  ;;  %v11823_v33 = vld [vmem:[#allocation2 + $0x80] ss:$12 sps:$4 sm:$0xff]  }
 0x578   : > { %10628 = vmatmul.mubr.msk.bf16.vlgmr.msra.gmra.mxu1 %vm14037_vm11, %v18781_v5  ;;  %19408 = vst [vmem:[#allocation214_spill] sm:$0xff] %v16412_v62  ;;  %8352 = vmatprep.subr.bf16.mxu0 %v18721_v18  ;;  %v11824_v62 = vld [vmem:[#allocation2 + $0x200] ss:$12 sps:$4 sm:$0xff]  }
 0x579   : > { %8640 = vmatpush1.bf16.msra.mxu1 %v11820_v63  ;;  %10630 = vmatprep.mubr.msk.bf16.mxu1 %vm14100_vm8, %v18781_v5  ;;  %v6240_v63 = vpop.f32.mrf.mxu1  ;;  %v5953_v13 = vpop.f32.mrf.mxu0 }
 0x57a   : > { %7939 = vperm.xlu0 %11751, %v15567_v21   ;;  %7911 = vperm.xlu1 %11752, %v19409_v36   ;;  %v16417_v1 = vadd.f32 %v6240_v63, %v5951_v56 }
 0x57b   : > { %8641 = vmatprep.subr.bf16.mxu1 %v18721_v18  ;;  %8353 = vmatpush1.bf16.msra.mxu0 %v11821_v44  ;;  %v6242_v37 = vpop.f32.mrf.mxu1  ;;  %v5956_v50 = vpop.f32.mrf.mxu0 }
 0x57c   : > { %19410 = vst [vmem:[#allocation46_spill] sm:$0xff] %v16417_v1  ;;  %8354 = vmatprep.subr.bf16.mxu0 %v18721_v18  ;;  %v16426_v44 = vpop.permute.xlu1 %6645  ;;  %v19416_v37 = vld [vmem:[#allocation6_spill] sm:$0xff]  ;;  %v16434_v56 = vpop.permute.xlu0 %6660 }
 0x57d   : > { %8642 = vmatpush1.bf16.msra.mxu1 %v11822_v25  ;;  %19413 = vst [vmem:[#allocation47_spill] sm:$0xff] %v16426_v44  ;;  %v6245_v13 = vpop.f32.mrf.mxu1  ;;  %v19414_v25 = vld [vmem:[#allocation54_spill] sm:$0xff]  ;;  %vm19417_vm13 = vnez %v19416_v37  ;;  %19418 = vst [vmem:[#allocation215_spill] sm:$0xff] %v16434_v56  ;;  %v5958_v1 = vpop.f32.mrf.mxu0  ;;  %v11825_v44 = vld [vmem:[#allocation2 + $0x68] ss:$12 sps:$4 sm:$0xff]  }
 0x57e   : > { %7947 = vperm.xlu0 %11751, %v15605_v57   ;;  %8643 = vmatprep.subr.bf16.mxu1 %v18721_v18  ;;  %vm19415_vm12 = vnez %v19414_v25  ;;  %v16436_v63 = vadd.f32 %v6245_v13, %v5956_v50  ;;  %v11826_v25 = vld [vmem:[#allocation2 + $0x1e8] ss:$12 sps:$4 sm:$0xff]  }
 0x57f   : > { %10504 = vmatmul.mubr.msk.bf16.gmra.mxu0 %vm14116_vm15, %v18781_v5  ;;  %7919 = vperm.xlu1 %11752, %v19412_v45   ;;  %v6247_v57 = vpop.f32.mrf.mxu1  ;;  %v5959_v21 = vpop.f32.mrf.mxu0 }
 0x580   : > { %10632 = vmatmul.mubr.msk.bf16.gmra.mxu1 %vm19415_vm12, %v18781_v5  ;;  %10506 = vmatprep.mubr.msk.bf16.mxu0 %vm19417_vm13, %v18781_v5  ;;  %19419 = vst [vmem:[#allocation216_spill] sm:$0xff] %v16436_v63  ;;  %v16447_v1 = vpop.permute.xlu1 %6655  ;;  %v16450_v57 = vpop.permute.xlu0 %6670  ;;  %v19426_v63 = vld [vmem:[#allocation75_spill] sm:$0xff] }
 0x581   : > { %10634 = vmatprep.mubr.msk.bf16.mxu1 %vm19421_vm14, %v18781_v5  ;;  %8355 = vmatpush1.bf16.msra.mxu0 %v11823_v33  ;;  %v6248_v56 = vpop.f32.mrf.mxu1  ;;  %v5961_v13 = vpop.f32.mrf.mxu0  ;;  %19424 = vst [vmem:[#allocation217_spill] sm:$0xff] %v16447_v1  ;;  %19425 = vst [vmem:[#allocation218_spill] sm:$0xff] %v16450_v57  ;;  %vm19427_vm0 = vnez %v19426_v63  ;;  %v12179_v63 = vmov 2  }
 0x582   : > { %7955 = vperm.xlu0 %11751, %v15624_v29   ;;  %8644 = vmatpush1.bf16.msra.mxu1 %v11824_v62  ;;  %v16445_v50 = vadd.f32 %v6248_v56, %v5959_v21  ;;  %v19429_v21 = vld [vmem:[#allocation88_spill] sm:$0xff] }
 0x583   : > { %7927 = vperm.xlu1 %11752, %v19422_v55   ;;  %8356 = vmatprep.subr.bf16.mxu0 %v18721_v18  ;;  %v6250_v33 = vpop.f32.mrf.mxu1  ;;  %v5964_v62 = vpop.f32.mrf.mxu0  ;;  %vm19430_vm14 = vnez %v19429_v21  ;;  %v11827_v56 = vld [vmem:[#allocation2 + $0x50] ss:$12 sps:$4 sm:$0xff]  }
 0x584   : > { %8645 = vmatprep.subr.bf16.mxu1 %v18721_v18  ;;  %19423 = vst [vmem:[#allocation115_spill] sm:$0xff] %v16445_v50  ;;  %v19434_v33 = vld [vmem:[#allocation27_spill] sm:$0xff]  ;;  %v16471_v50 = vpop.permute.xlu1 %6665  ;;  %v19440_v29 = vld [vmem:[#allocation28_spill] sm:$0xff] }
 0x585   : > { %8357 = vmatpush1.bf16.msra.mxu0 %v11825_v44  ;;  %v6253_v37 = vpop.f32.mrf.mxu1  ;;  %v19431_v44 = vld [vmem:[#allocation89_spill] sm:$0xff]  ;;  %vm19435_vm12 = vnez %v19434_v33  ;;  %v5966_v57 = vpop.f32.mrf.mxu0 }
 0x586   : > { %7963 = vperm.xlu0 %11751, %v15707_v43   ;;  %8646 = vmatpush1.bf16.msra.mxu1 %v11826_v25  ;;  %vm19432_vm13 = vnez %v19431_v44  ;;  %v11828_v25 = vld [vmem:[#allocation2 + $0x1d0] ss:$12 sps:$4 sm:$0xff]   ;;  %v16462_v13 = vadd.f32 %v6253_v37, %v5964_v62  ;;  %v19436_v44 = vld [vmem:[#allocation50_spill] sm:$0xff]  ;;  %v16473_v62 = vpop.permute.xlu0 %6680 }
 0x587   : > { %10508 = vmatmul.mubr.msk.bf16.gmra.mxu0 %vm19427_vm0, %v18781_v5  ;;  %7935 = vperm.xlu1 %11752, %v19428_v61   ;;  %v6255_v1 = vpop.f32.mrf.mxu1  ;;  %v5967_v21 = vpop.f32.mrf.mxu0  ;;  %19437 = vst [vmem:[#allocation50_spill] sm:$0xff] %v16471_v50  ;;  %19438 = vst [vmem:[#allocation219_spill] sm:$0xff] %v16473_v62  ;;  %v11829_v33 = vld [vmem:[#allocation2 + $0x38] ss:$12 sps:$4 sm:$0xff]  }
 0x588   : > { %10636 = vmatmul.mubr.msk.bf16.gmra.mxu1 %vm19430_vm14, %v18781_v5  ;;  %10510 = vmatprep.mubr.msk.bf16.mxu0 %vm19432_vm13, %v18781_v5  ;;  %19433 = vst [vmem:[#allocation116_spill] sm:$0xff] %v16462_v13  ;;  %v11830_v43 = vld [vmem:[#allocation2 + $0x1b8] ss:$12 sps:$4 sm:$0xff]   ;;  %v16495_v50 = vpop.permute.xlu1 %6675 }
 0x589   : > { %10638 = vmatprep.mubr.msk.bf16.mxu1 %vm19435_vm12, %v18781_v5  ;;  %8358 = vmatprep.subr.bf16.mxu0 %v18721_v18  ;;  %v6256_v37 = vpop.f32.mrf.mxu1  ;;  %v5969_v13 = vpop.f32.mrf.mxu0  ;;  %vm19441_vm12 = vnez %v19440_v29  ;;  %v11832_v29 = vld [vmem:[#allocation2 + $0x1a0] ss:$12 sps:$4 sm:$0xff]  }
 0x58a   : > { %11754 = vset.pattern.permute.xlu0 %v12179_v63  ;;  %8647 = vmatprep.subr.bf16.mxu1 %v18721_v18  ;;  %v16475_v57 = vadd.f32 %v6256_v37, %v5967_v21  ;;  %v19444_v21 = vld [vmem:[#allocation7_spill] sm:$0xff]  ;;  %v19446_v37 = vld [vmem:[#allocation56_spill] sm:$0xff] }
 0x58b   : > { %8933 = vperm.xlu0 %11754, %v19185_v22   ;;  %7943 = vperm.xlu1 %11752, %v19436_v44   ;;  %v6258_v1 = vpop.f32.mrf.mxu1  ;;  %v5972_v22 = vpop.f32.mrf.mxu0  ;;  %vm19445_vm14 = vnez %v19444_v21  ;;  %vm19447_vm0 = vnez %v19446_v37  ;;  %19449 = vst [vmem:[#allocation56_spill] sm:$0xff] %v16495_v50  ;;  %v19454_v50 = vld [vmem:[#allocation30_spill] sm:$0xff] }
 0x58c   : > { %8359 = vmatpush1.bf16.msra.mxu0 %v11827_v56  ;;  %8648 = vmatpush1.bf16.msra.mxu1 %v11828_v25  ;;  %19439 = vst [vmem:[#allocation220_spill] sm:$0xff] %v16475_v57  ;;  %v19442_v25 = vld [vmem:[#allocation76_spill] sm:$0xff]  ;;  %v19448_v1 = vld [vmem:[#allocation121_spill] sm:$0xff]  ;;  %v16497_v57 = vpop.permute.xlu0 %6690 }
 0x58d   : > { %8360 = vmatprep.subr.bf16.mxu0 %v18721_v18  ;;  %8649 = vmatprep.subr.bf16.mxu1 %v18721_v18  ;;  %v6261_v56 = vpop.f32.mrf.mxu1  ;;  %vm19443_vm13 = vnez %v19442_v25  ;;  %v5974_v62 = vpop.f32.mrf.mxu0  ;;  %v11831_v25 = vld [vmem:[#allocation2 + $0x20] ss:$12 sps:$4 sm:$0xff]   ;;  %19450 = vst [vmem:[#allocation121_spill] sm:$0xff] %v16497_v57 }
 0x58e   : > { %v16489_v13 = vadd.f32 %v6261_v56, %v5972_v22 }
 0x58f   : > { %10512 = vmatmul.mubr.msk.bf16.gmra.mxu0 %vm19441_vm12, %v18781_v5  ;;  %8945 = vperm.xlu0 %11754, %v19202_v4   ;;  %v6263_v4 = vpop.f32.mrf.mxu1  ;;  %v5975_v21 = vpop.f32.mrf.mxu0 }
 0x590   : > { %10640 = vmatmul.mubr.msk.bf16.gmra.mxu1 %vm19443_vm13, %v18781_v5  ;;  %10514 = vmatprep.mubr.msk.bf16.mxu0 %vm19445_vm14, %v18781_v5  ;;  %vm19455_vm14 = vnez %v19454_v50 }
 0x591   : > { %10642 = vmatprep.mubr.msk.bf16.mxu1 %vm19447_vm0, %v18781_v5  ;;  %7951 = vperm.xlu1 %11752, %v19448_v1   ;;  %v6264_v22 = vpop.f32.mrf.mxu1  ;;  %v5977_v62 = vpop.f32.mrf.mxu0 }
 0x592   : > { %8361 = vmatpush1.bf16.msra.mxu0 %v11829_v33  ;;  %8650 = vmatpush1.bf16.msra.mxu1 %v11830_v43  ;;  %v16502_v56 = vadd.f32 %v6264_v22, %v5975_v21  ;;  %v19451_v33 = vld [vmem:[#allocation77_spill] sm:$0xff]  ;;  %v19456_v21 = vld [vmem:[#allocation91_spill] sm:$0xff]  ;;  %v16517_v22 = vpop.permute.xlu0 %6700 }
 0x593   : > { %8953 = vperm.xlu0 %11754, %v19211_v24   ;;  %8362 = vmatprep.subr.bf16.mxu0 %v18721_v18  ;;  %v6266_v4 = vpop.f32.mrf.mxu1  ;;  %vm19452_vm0 = vnez %v19451_v33  ;;  %v16509_v24 = vpop.permute.xlu1 %6685  ;;  %vm19457_vm13 = vnez %v19456_v21  ;;  %19458 = vst [vmem:[#allocation221_spill] sm:$0xff] %v16517_v22 }
 0x594   : > { %8651 = vmatprep.subr.bf16.mxu1 %v18721_v18  ;;  %v5980_v43 = vpop.f32.mrf.mxu0  ;;  %19453 = vst [vmem:[#allocation77_spill] sm:$0xff] %v16509_v24  ;;  %v19459_v4 = vld [vmem:[#allocation57_spill] sm:$0xff] }
 0x595   : > { %7959 = vperm.xlu1 %11752, %v15613_v30  }
 0x596   : > { %8363 = vmatpush1.bf16.msra.mxu0 %v11831_v25  ;;  %8652 = vmatpush1.bf16.msra.mxu1 %v11832_v29  ;;  %v6269_v57 = vpop.f32.mrf.mxu1  ;;  %v11833_v25 = vld [vmem:[#allocation2 + $0x8] ss:$12 sps:$4 sm:$0xff]  }
 0x597   : > { %10516 = vmatmul.mubr.msk.bf16.gmra.mxu0 %vm19452_vm0, %v18781_v5  ;;  %8961 = vperm.xlu0 %11754, %v19220_v49   ;;  %v11834_v29 = vld [vmem:[#allocation2 + $0x188] ss:$12 sps:$4 sm:$0xff]   ;;  %v16519_v62 = vadd.f32 %v6269_v57, %v5980_v43  ;;  %vm19460_vm0 = vnez %v19459_v4  ;;  %v5982_v49 = vpop.f32.mrf.mxu0 }
 0x598   : > { %10644 = vmatmul.mubr.msk.bf16.gmra.mxu1 %vm19455_vm14, %v18781_v5  ;;  %10518 = vmatprep.mubr.msk.bf16.mxu0 %vm19457_vm13, %v18781_v5  ;;  %v6271_v24 = vpop.f32.mrf.mxu1  ;;  %v11836_v49 = vld [vmem:[#allocation2 + $0x2f0] ss:$12 sps:$4 sm:$0xff]  }
 0x599   : > { %10646 = vmatprep.mubr.msk.bf16.mxu1 %vm19460_vm0, %v18781_v5  ;;  %11753 = vset.pattern.permute.xlu1 %v12179_v63  ;;  %v5983_v50 = vpop.f32.mrf.mxu0  ;;  %v11835_v63 = vld [vmem:[#allocation2 + $0x170] ss:$12 sps:$4 sm:$0xff]   ;;  %v16532_v24 = vpop.permute.xlu1 %6695 }
 0x59a   : > { %8929 = vperm.xlu1 %11753, %v19157_v12   ;;  %8364 = vmatprep.subr.bf16.mxu0 %v18721_v18  ;;  %v6272_v21 = vpop.f32.mrf.mxu1  ;;  %19461 = vst [vmem:[#allocation57_spill] sm:$0xff] %v16532_v24 }
 0x59b   : > { %8969 = vperm.xlu0 %11754, %v19228_v9   ;;  %8653 = vmatprep.subr.bf16.mxu1 %v18721_v18  ;;  %v16528_v57 = vadd.f32 %v6272_v21, %v5983_v50  ;;  %v5985_v43 = vpop.f32.mrf.mxu0  ;;  %v16535_v9 = vpop.permute.xlu0 %6710  ;;  %v19465_v21 = vld [vmem:[#allocation78_spill] sm:$0xff] }
 0x59c   : > { %8365 = vmatpush1.bf16.msra.mxu0 %v11833_v25  ;;  %8654 = vmatpush1.bf16.msra.mxu1 %v11834_v29  ;;  %v6274_v12 = vpop.f32.mrf.mxu1  ;;  %19462 = vst [vmem:[#allocation222_spill] sm:$0xff] %v16535_v9  ;;  %v19463_v25 = vld [vmem:[#allocation32_spill] sm:$0xff]  ;;  %vm19466_vm13 = vnez %v19465_v21  ;;  %v19467_v29 = vld [vmem:[#allocation35_spill] sm:$0xff]  ;;  %v19470_v43 = vld [vmem:[#allocation58_spill] sm:$0xff] }
 0x59d   : > { %8366 = vmatprep.subr.bf16.mxu0 %v18721_v18  ;;  %8655 = vmatprep.subr.bf16.mxu1 %v18721_v18  ;;  %v5988_v22 = vpop.f32.mrf.mxu0  ;;  %vm19464_vm0 = vnez %v19463_v25  ;;  %vm19468_vm14 = vnez %v19467_v29  ;;  %vm19471_vm12 = vnez %v19470_v43  ;;  %v11837_v9 = vld [vmem:[#allocation2 + $0x158] ss:$12 sps:$4 sm:$0xff]   ;;  %v16555_v29 = vpop.permute.xlu1 %6705 }
 0x59e   : > { %8937 = vperm.xlu1 %11753, %v19193_v28   ;;  %19472 = vst [vmem:[#allocation58_spill] sm:$0xff] %v16555_v29 }
 0x59f   : > { %10520 = vmatmul.mubr.msk.bf16.gmra.mxu0 %vm19464_vm0, %v18781_v5  ;;  %8977 = vperm.xlu0 %11754, %v19238_v60   ;;  %v6277_v50 = vpop.f32.mrf.mxu1  ;;  %v5990_v12 = vpop.f32.mrf.mxu0  ;;  %v11838_v60 = vld [vmem:[#allocation2 + $0x2d8] ss:$12 sps:$4 sm:$0xff]  }
 0x5a0   : > { %10648 = vmatmul.mubr.msk.bf16.gmra.mxu1 %vm19466_vm13, %v18781_v5  ;;  %10522 = vmatprep.mubr.msk.bf16.mxu0 %vm19468_vm14, %v18781_v5  ;;  %v16547_v28 = vadd.f32 %v6277_v50, %v5988_v22  ;;  %v16558_v50 = vpop.permute.xlu0 %6720 }
 0x5a1   : > { %10650 = vmatprep.mubr.msk.bf16.mxu1 %vm19471_vm12, %v18781_v5  ;;  %8367 = vmatpush2.bf16.msra.mxu0 %v11835_v63  ;;  %v6279_v24 = vpop.f32.mrf.mxu1  ;;  %v5991_v21 = vpop.f32.mrf.mxu0  ;;  %19473 = vst [vmem:[#allocation223_spill] sm:$0xff] %v16558_v50 }
 0x5a2   : > { %19469 = vst [vmem:[#allocation32_spill] sm:$0xff] %v16547_v28  ;;  %8941 = vperm.xlu1 %11753, %v19162_v46   ;;  %8656 = vmatpush2.bf16.msra.mxu1 %v11836_v49  ;;  %v11839_v49 = vld [vmem:[#allocation2 + $0x140] ss:$12 sps:$4 sm:$0xff]  }
 0x5a3   : > { %8985 = vperm.xlu0 %11754, %v19246_v19   ;;  %8368 = vmatprep.subr.bf16.mxu0 %v18721_v18  ;;  %v6280_v22 = vpop.f32.mrf.mxu1  ;;  %v5993_v63 = vpop.f32.mrf.mxu0  ;;  %v19474_v19 = vld [vmem:[#allocation80_spill] sm:$0xff]  ;;  %v19476_v28 = vld [vmem:[#allocation34_spill] sm:$0xff] }
 0x5a4   : > { %8657 = vmatprep.subr.bf16.mxu1 %v18721_v18  ;;  %v16560_v12 = vadd.f32 %v6280_v22, %v5991_v21  ;;  %vm19475_vm12 = vnez %v19474_v19  ;;  %vm19477_vm14 = vnez %v19476_v28  ;;  %v19478_v21 = vld [vmem:[#allocation59_spill] sm:$0xff] }
 0x5a5   : > { %8369 = vmatpush2.bf16.msra.mxu0 %v11837_v9  ;;  %v6282_v24 = vpop.f32.mrf.mxu1  ;;  %v5996_v46 = vpop.f32.mrf.mxu0  ;;  %vm19479_vm13 = vnez %v19478_v21  ;;  %v11840_v9 = vld [vmem:[#allocation2 + $0x2c0] ss:$12 sps:$4 sm:$0xff]  }
 0x5a6   : > { %8949 = vperm.xlu1 %11753, %v14394_v41   ;;  %8658 = vmatpush2.bf16.msra.mxu1 %v11838_v60  ;;  %v19481_v60 = vld [vmem:[#allocation36_spill] sm:$0xff]  ;;  %v16583_v24 = vpop.permute.xlu0 %6730 }
 0x5a7   : > { %10524 = vmatmul.mubr.msk.bf16.gmra.mxu0 %vm19475_vm12, %v18781_v5  ;;  %8993 = vperm.xlu0 %11754, %v19255_v6   ;;  %vm19482_vm0 = vnez %v19481_v60  ;;  %v5998_v22 = vpop.f32.mrf.mxu0  ;;  %v16579_v6 = vpop.permute.xlu1 %6715  ;;  %19484 = vst [vmem:[#allocation59_spill] sm:$0xff] %v16583_v24 }
 0x5a8   : > { %v6285_v29 = vpop.f32.mrf.mxu1  ;;  %10652 = vmatmul.mubr.msk.bf16.gmra.mxu1 %vm19477_vm14, %v18781_v5  ;;  %10526 = vmatprep.mubr.msk.bf16.mxu0 %vm19479_vm13, %v18781_v5  ;;  %19483 = vst [vmem:[#allocation34_spill] sm:$0xff] %v16579_v6 }
 0x5a9   : > { %v16573_v41 = vadd.f32 %v6285_v29, %v5996_v46  ;;  %10654 = vmatprep.mubr.msk.bf16.mxu1 %vm19482_vm0, %v18781_v5  ;;  %8370 = vmatprep.subr.bf16.mxu0 %v18721_v18  ;;  %v5999_v50 = vpop.f32.mrf.mxu0 }
 0x5aa   : > { %v6287_v63 = vpop.f32.mrf.mxu1  ;;  %8957 = vperm.xlu1 %11753, %v14445_v32   ;;  %8659 = vmatprep.subr.bf16.mxu1 %v18721_v18  ;;  %v11842_v32 = vld [vmem:[#allocation2 + $0x2a8] ss:$12 sps:$4 sm:$0xff]  }
 0x5ab   : > { %19480 = vst [vmem:[#allocation80_spill] sm:$0xff] %v16573_v41  ;;  %9001 = vperm.xlu0 %11754, %v19265_v2   ;;  %8371 = vmatpush2.bf16.msra.mxu0 %v11839_v49  ;;  %v6001_v22 = vpop.f32.mrf.mxu0  ;;  %v11841_v63 = vld [vmem:[#allocation2 + $0x128] ss:$12 sps:$4 sm:$0xff]   ;;  %v16591_v41 = vpop.permute.xlu0 %6740  ;;  %v19486_v2 = vld [vmem:[#allocation37_spill] sm:$0xff] }
 0x5ac   : > { %v6288_v29 = vpop.f32.mrf.mxu1  ;;  %8660 = vmatpush2.bf16.msra.mxu1 %v11840_v9  ;;  %8372 = vmatprep.subr.bf16.mxu0 %v18721_v18  ;;  %19485 = vst [vmem:[#allocation36_spill] sm:$0xff] %v16591_v41  ;;  %vm19487_vm0 = vnez %v19486_v2  ;;  %v16597_v49 = vpop.permute.xlu1 %6725  ;;  %v19489_v9 = vld [vmem:[#allocation42_spill] sm:$0xff] }
 0x5ad   : > { %v16587_v46 = vadd.f32 %v6288_v29, %v5999_v50  ;;  %8661 = vmatprep.subr.bf16.mxu1 %v18721_v18  ;;  %19488 = vst [vmem:[#allocation37_spill] sm:$0xff] %v16597_v49  ;;  %vm19490_vm13 = vnez %v19489_v9  ;;  %v19494_v29 = vld [vmem:[#allocation60_spill] sm:$0xff] }
 0x5ae   : > { %v6290_v6 = vpop.f32.mrf.mxu1  ;;  %8965 = vperm.xlu1 %11753, %v14501_v11   ;;  %v6004_v24 = vpop.f32.mrf.mxu0  ;;  %vm19495_vm12 = vnez %v19494_v29 }
 0x5af   : > { %10528 = vmatmul.mubr.msk.bf16.gmra.mxu0 %vm19487_vm0, %v18781_v5  ;;  %9009 = vperm.xlu0 %11754, %v19275_v7   ;;  %v19491_v6 = vld [vmem:[#allocation43_spill] sm:$0xff] }
 0x5b0   : > { %v6293_v50 = vpop.f32.mrf.mxu1  ;;  %10656 = vmatmul.mubr.msk.bf16.gmra.mxu1 %vm19490_vm13, %v18781_v5  ;;  %vm19492_vm14 = vnez %v19491_v6  ;;  %v6006_v22 = vpop.f32.mrf.mxu0  ;;  %8373 = vmatpush2.bf16.msra.mxu0 %v11841_v63  ;;  %v19685_v6 = vld [vmem:[#allocation21_spill] sm:$0xff] }
 0x5b1   : > { %10530 = vmatprep.mubr.msk.bf16.mxu0 %vm19492_vm14, %v18781_v5  ;;  %v16605_v11 = vadd.f32 %v6293_v50, %v6004_v24  ;;  %10658 = vmatprep.mubr.msk.bf16.mxu1 %vm19495_vm12, %v18781_v5  ;;  %v16614_v24 = vpop.permute.xlu0 %7711  ;;  %v16618_v29 = vpop.permute.xlu1 %6735  ;;  %v19500_v22 = vld [vmem:[#allocation96_spill] sm:$0xff] }
 0x5b2   : > { %v6295_v7 = vpop.f32.mrf.mxu1  ;;  %8973 = vperm.xlu1 %11753, %v14572_v52   ;;  %8662 = vmatpush2.bf16.msra.mxu1 %v11842_v32  ;;  %v6007_v41 = vpop.f32.mrf.mxu0  ;;  %19497 = vst [vmem:[#allocation226_spill] sm:$0xff] %v16618_v29  ;;  %v19498_v32 = vld [vmem:[#allocation40_spill] sm:$0xff]  ;;  %vm19501_vm14 = vnez %v19500_v22 }
 0x5b3   : > { %19493 = vst [vmem:[#allocation224_spill] sm:$0xff] %v16605_v11  ;;  %9017 = vperm.xlu0 %11754, %v19284_v39   ;;  %8374 = vmatprep.subr.bf16.mxu0 %v18721_v18  ;;  %vm19499_vm12 = vnez %v19498_v32  ;;  %v19654_v32 = vld [vmem:[#allocation53_spill] sm:$0xff] }
 0x5b4   : > { %v6296_v49 = vpop.f32.mrf.mxu1  ;;  %8663 = vmatprep.subr.bf16.mxu1 %v18721_v18  ;;  %v6009_v11 = vpop.f32.mrf.mxu0 }
 0x5b5   : > { %v16616_v50 = vadd.f32 %v6296_v49, %v6007_v41  ;;  %v19502_v41 = vld [vmem:[#allocation61_spill] sm:$0xff]  ;;  %v16636_v7 = vpop.permute.xlu1 %6745 }
 0x5b6   : > { %v6298_v63 = vpop.f32.mrf.mxu1  ;;  %8981 = vperm.xlu1 %11753, %v14595_v58   ;;  %v6012_v52 = vpop.f32.mrf.mxu0  ;;  %vm19503_vm13 = vnez %v19502_v41  ;;  %v19505_v58 = vld [vmem:[#allocation12_spill] sm:$0xff]  ;;  %19507 = vst [vmem:[#allocation228_spill] sm:$0xff] %v16636_v7  ;;  %v19509_v7 = vld [vmem:[#allocation81_spill] sm:$0xff] }
 0x5b7   : > { %19496 = vst [vmem:[#allocation225_spill] sm:$0xff] %v16616_v50  ;;  %10532 = vmatmul.mubr.msk.bf16.gmra.mxu0 %vm19499_vm12, %v18781_v5  ;;  %9025 = vperm.xlu0 %11754, %v19295_v59   ;;  %vm19506_vm0 = vnez %v19505_v58  ;;  %v16639_v59 = vpop.permute.xlu0 %7723  ;;  %v11844_v58 = vld [vmem:[#allocation2 + $0x290] ss:$12 sps:$4 sm:$0xff]  }
 0x5b8   : > { %v6301_v39 = vpop.f32.mrf.mxu1  ;;  %10660 = vmatmul.mubr.msk.bf16.gmra.mxu1 %vm19501_vm14, %v18781_v5  ;;  %10534 = vmatprep.mubr.msk.bf16.mxu0 %vm19503_vm13, %v18781_v5  ;;  %v6014_v11 = vpop.f32.mrf.mxu0 }
 0x5b9   : > { %v16631_v49 = vadd.f32 %v6301_v39, %v6012_v52  ;;  %10662 = vmatprep.mubr.msk.bf16.mxu1 %vm19506_vm0, %v18781_v5  ;;  %v11843_v39 = vld [vmem:[#allocation2 + $0x110] ss:$12 sps:$4 sm:$0xff]   ;;  %vm19510_vm0 = vnez %v19509_v7  ;;  %8664 = vmatpush2.bf16.msra.mxu1 %v11844_v58  ;;  %v19519_v58 = vld [vmem:[#allocation103_spill] sm:$0xff] }
 0x5ba   : > { %v6303_v63 = vpop.f32.mrf.mxu1  ;;  %8989 = vperm.xlu1 %11753, %v14670_v0   ;;  %v6015_v29 = vpop.f32.mrf.mxu0  ;;  %8375 = vmatpush2.bf16.msra.mxu0 %v11843_v39  ;;  %v11847_v7 = vld [vmem:[#allocation2 + $0xe0] ss:$12 sps:$4 sm:$0xff]  }
 0x5bb   : > { %19504 = vst [vmem:[#allocation227_spill] sm:$0xff] %v16631_v49  ;;  %9033 = vperm.xlu0 %11754, %v19304_v16   ;;  %v16649_v0 = vpop.permute.xlu1 %7715  ;;  %v19511_v16 = vld [vmem:[#allocation99_spill] sm:$0xff]  ;;  %8376 = vmatprep.subr.bf16.mxu0 %v18721_v18 }
 0x5bc   : > { %v6304_v22 = vpop.f32.mrf.mxu1  ;;  %v6017_v52 = vpop.f32.mrf.mxu0  ;;  %vm19512_vm13 = vnez %v19511_v16  ;;  %8665 = vmatprep.subr.bf16.mxu1 %v18721_v18 }
 0x5bd   : > { %v16642_v41 = vadd.f32 %v6304_v22, %v6015_v29  ;;  %v19513_v29 = vld [vmem:[#allocation100_spill] sm:$0xff] }
 0x5be   : > { %v6306_v49 = vpop.f32.mrf.mxu1  ;;  %8997 = vperm.xlu1 %11753, %v14699_v3   ;;  %v6020_v11 = vpop.f32.mrf.mxu0  ;;  %vm19514_vm14 = vnez %v19513_v29 }
 0x5bf   : > { %19508 = vst [vmem:[#allocation229_spill] sm:$0xff] %v16642_v41  ;;  %10536 = vmatmul.mubr.msk.bf16.gmra.mxu0 %vm19510_vm0, %v18781_v5  ;;  %9041 = vperm.xlu0 %11754, %v19314_v48   ;;  %v16657_v3 = vpop.permute.xlu0 %7731  ;;  %v19516_v49 = vld [vmem:[#allocation62_spill] sm:$0xff] }
 0x5c0   : > { %v6309_v63 = vpop.f32.mrf.mxu1  ;;  %10664 = vmatmul.mubr.msk.bf16.gmra.mxu1 %vm19512_vm13, %v18781_v5  ;;  %10538 = vmatprep.mubr.msk.bf16.mxu0 %vm19514_vm14, %v18781_v5  ;;  %vm19517_vm0 = vnez %v19516_v49  ;;  %v6022_v48 = vpop.f32.mrf.mxu0 }
 0x5c1   : > { %v16659_v22 = vadd.f32 %v6309_v63, %v6020_v11  ;;  %10666 = vmatprep.mubr.msk.bf16.mxu1 %vm19517_vm0, %v18781_v5  ;;  %vm19520_vm0 = vnez %v19519_v58  ;;  %v19521_v48 = vld [vmem:[#allocation104_spill] sm:$0xff] }
 0x5c2   : > { %v6311_v52 = vpop.f32.mrf.mxu1  ;;  %9005 = vperm.xlu1 %11753, %v14752_v47   ;;  %v6023_v16 = vpop.f32.mrf.mxu0  ;;  %vm19522_vm14 = vnez %v19521_v48 }
 0x5c3   : > { %19515 = vst [vmem:[#allocation230_spill] sm:$0xff] %v16659_v22  ;;  %9049 = vperm.xlu0 %11754, %v19324_v51   ;;  %v16670_v22 = vpop.permute.xlu1 %7719  ;;  %v16673_v39 = vpop.permute.xlu0 %7739 }
 0x5c4   : > { %v6312_v29 = vpop.f32.mrf.mxu1  ;;  %v6025_v63 = vpop.f32.mrf.mxu0 }
 0x5c5   : > { %v16668_v11 = vadd.f32 %v6312_v29, %v6023_v16  ;;  %v19523_v16 = vld [vmem:[#allocation105_spill] sm:$0xff] }
 0x5c6   : > { %v6314_v49 = vpop.f32.mrf.mxu1  ;;  %9013 = vperm.xlu1 %11753, %v14800_v54   ;;  %v6028_v47 = vpop.f32.mrf.mxu0  ;;  %vm19524_vm13 = vnez %v19523_v16  ;;  %v19526_v54 = vld [vmem:[#allocation84_spill] sm:$0xff]  ;;  %v19528_v63 = vld [vmem:[#allocation97_spill] sm:$0xff] }
 0x5c7   : > { %19518 = vst [vmem:[#allocation231_spill] sm:$0xff] %v16668_v11  ;;  %10540 = vmatmul.mubr.msk.bf16.gmra.mxu0 %vm19520_vm0, %v18781_v5  ;;  %9057 = vperm.xlu0 %11754, %v19334_v53   ;;  %vm19527_vm12 = vnez %v19526_v54  ;;  %v16692_v58 = vpop.permute.xlu1 %7727  ;;  %v16694_v11 = vpop.permute.xlu0 %7747  ;;  %v11846_v54 = vld [vmem:[#allocation2 + $0x278] ss:$12 sps:$4 sm:$0xff]  }
 0x5c8   : > { %v6317_v51 = vpop.f32.mrf.mxu1  ;;  %10668 = vmatmul.mubr.msk.bf16.gmra.mxu1 %vm19522_vm14, %v18781_v5  ;;  %10542 = vmatprep.mubr.msk.bf16.mxu0 %vm19524_vm13, %v18781_v5  ;;  %v6030_v49 = vpop.f32.mrf.mxu0 }
 0x5c9   : > { %v16685_v29 = vadd.f32 %v6317_v51, %v6028_v47  ;;  %10670 = vmatprep.mubr.msk.bf16.mxu1 %vm19527_vm12, %v18781_v5  ;;  %v11845_v51 = vld [vmem:[#allocation2 + $0xf8] ss:$12 sps:$4 sm:$0xff]   ;;  %8666 = vmatpush2.bf16.msra.mxu1 %v11846_v54 }
 0x5ca   : > { %v6319_v52 = vpop.f32.mrf.mxu1  ;;  %9021 = vperm.xlu1 %11753, %v19528_v63   ;;  %v6031_v53 = vpop.f32.mrf.mxu0  ;;  %v19532_v63 = vld [vmem:[#allocation110_spill] sm:$0xff]  ;;  %8377 = vmatpush2.bf16.msra.mxu0 %v11845_v51 }
 0x5cb   : > { %19525 = vst [vmem:[#allocation232_spill] sm:$0xff] %v16685_v29  ;;  %9065 = vperm.xlu0 %11754, %v19343_v38   ;;  %v19530_v52 = vld [vmem:[#allocation109_spill] sm:$0xff]  ;;  %vm19533_vm13 = vnez %v19532_v63  ;;  %v16717_v63 = vpop.permute.xlu0 %7755  ;;  %8378 = vmatprep.subr.bf16.mxu0 %v18721_v18 }
 0x5cc   : > { %v6320_v48 = vpop.f32.mrf.mxu1  ;;  %v6033_v47 = vpop.f32.mrf.mxu0  ;;  %vm19531_vm12 = vnez %v19530_v52  ;;  %v19539_v52 = vld [vmem:[#allocation41_spill] sm:$0xff]  ;;  %8667 = vmatprep.subr.bf16.mxu1 %v18721_v18 }
 0x5cd   : > { %v16696_v16 = vadd.f32 %v6320_v48, %v6031_v53  ;;  %v19534_v48 = vld [vmem:[#allocation63_spill] sm:$0xff]  ;;  %v16714_v47 = vpop.permute.xlu1 %7735 }
 0x5ce   : > { %v6322_v29 = vpop.f32.mrf.mxu1  ;;  %9029 = vperm.xlu1 %11753, %v14894_v26   ;;  %v6036_v49 = vpop.f32.mrf.mxu0  ;;  %vm19535_vm14 = vnez %v19534_v48  ;;  %v19537_v26 = vld [vmem:[#allocation111_spill] sm:$0xff]  ;;  %8379 = vmatpush2.bf16.msra.mxu0 %v11847_v7 }
 0x5cf   : > { %19529 = vst [vmem:[#allocation97_spill] sm:$0xff] %v16696_v16  ;;  %10544 = vmatmul.mubr.msk.bf16.gmra.mxu0 %vm19531_vm12, %v18781_v5  ;;  %9073 = vperm.xlu0 %11754, %v14793_v14   ;;  %vm19538_vm0 = vnez %v19537_v26  ;;  %v19544_v26 = vld [vmem:[#allocation112_spill] sm:$0xff] }
 0x5d0   : > { %v6325_v38 = vpop.f32.mrf.mxu1  ;;  %10672 = vmatmul.mubr.msk.bf16.gmra.mxu1 %vm19533_vm13, %v18781_v5  ;;  %10546 = vmatprep.mubr.msk.bf16.mxu0 %vm19535_vm14, %v18781_v5  ;;  %v6038_v53 = vpop.f32.mrf.mxu0  ;;  %vm19545_vm14 = vnez %v19544_v26 }
 0x5d1   : > { %v16709_v29 = vadd.f32 %v6325_v38, %v6036_v49  ;;  %10674 = vmatprep.mubr.msk.bf16.mxu1 %vm19538_vm0, %v18781_v5  ;;  %v16729_v54 = vpop.permute.xlu1 %7743  ;;  %8380 = vmatprep.subr.bf16.mxu0 %v18721_v18 }
 0x5d2   : > { %v6327_v14 = vpop.f32.mrf.mxu1  ;;  %9037 = vperm.xlu1 %11753, %v19539_v52   ;;  %v6039_v16 = vpop.f32.mrf.mxu0  ;;  %v19542_v52 = vld [vmem:[#allocation16_spill] sm:$0xff] }
 0x5d3   : > { %19536 = vst [vmem:[#allocation233_spill] sm:$0xff] %v16709_v29  ;;  %9081 = vperm.xlu0 %11754, %v19362_v10   ;;  %v19541_v29 = vld [vmem:[#allocation83_spill] sm:$0xff]  ;;  %vm19543_vm0 = vnez %v19542_v52  ;;  %v19551_v52 = vld [vmem:[#allocation106_spill] sm:$0xff] }
 0x5d4   : > { %v6328_v49 = vpop.f32.mrf.mxu1  ;;  %v6041_v53 = vpop.f32.mrf.mxu0 }
 0x5d5   : > { %v16722_v38 = vadd.f32 %v6328_v49, %v6039_v16  ;;  %v19546_v16 = vld [vmem:[#allocation64_spill] sm:$0xff]  ;;  %v16737_v49 = vpop.permute.xlu0 %7763  ;;  %v19549_v53 = vld [vmem:[#allocation113_spill] sm:$0xff]  ;;  %v16748_v41 = vpop.permute.xlu1 %7751 }
 0x5d6   : > { %v6330_v51 = vpop.f32.mrf.mxu1  ;;  %9045 = vperm.xlu1 %11753, %v19541_v29   ;;  %v6044_v14 = vpop.f32.mrf.mxu0  ;;  %vm19547_vm13 = vnez %v19546_v16 }
 0x5d7   : > { %19540 = vst [vmem:[#allocation41_spill] sm:$0xff] %v16722_v38  ;;  %10548 = vmatmul.mubr.msk.bf16.gmra.mxu0 %vm19543_vm0, %v18781_v5  ;;  %9089 = vperm.xlu0 %11754, %v19373_v20   ;;  %vm19550_vm0 = vnez %v19549_v53 }
 0x5d8   : > { %v6333_v10 = vpop.f32.mrf.mxu1  ;;  %10676 = vmatmul.mubr.msk.bf16.gmra.mxu1 %vm19545_vm14, %v18781_v5  ;;  %10550 = vmatprep.mubr.msk.bf16.mxu0 %vm19547_vm13, %v18781_v5  ;;  %v6046_v20 = vpop.f32.mrf.mxu0 }
 0x5d9   : > { %v16739_v29 = vadd.f32 %v6333_v10, %v6044_v14  ;;  %10678 = vmatprep.mubr.msk.bf16.mxu1 %vm19550_vm0, %v18781_v5  ;;  %v11848_v10 = vld [vmem:[#allocation2 + $0x260] ss:$12 sps:$4 sm:$0xff]  }
 0x5da   : > { %v6335_v51 = vpop.f32.mrf.mxu1  ;;  %9053 = vperm.xlu1 %11753, %v19551_v52   ;;  %v6047_v38 = vpop.f32.mrf.mxu0  ;;  %v19560_v52 = vld [vmem:[#allocation119_spill] sm:$0xff]  ;;  %8668 = vmatpush2.bf16.msra.mxu1 %v11848_v10 }
 0x5db   : > { %19548 = vst [vmem:[#allocation83_spill] sm:$0xff] %v16739_v29  ;;  %9097 = vperm.xlu0 %11754, %v19383_v40   ;;  %v16751_v29 = vpop.permute.xlu0 %7771  ;;  %v19553_v51 = vld [vmem:[#allocation49_spill] sm:$0xff]  ;;  %vm19561_vm12 = vnez %v19560_v52  ;;  %8669 = vmatprep.subr.bf16.mxu1 %v18721_v18  ;;  %v19563_v10 = vld [vmem:[#allocation51_spill] sm:$0xff]  ;;  %v19567_v18 = vld [vmem:[#allocation66_spill] sm:$0xff] }
 0x5dc   : > { %v6336_v26 = vpop.f32.mrf.mxu1  ;;  %v6049_v16 = vpop.f32.mrf.mxu0  ;;  %vm19554_vm0 = vnez %v19553_v51 }
 0x5dd   : > { %v16746_v48 = vadd.f32 %v6336_v26, %v6047_v38  ;;  %v19555_v26 = vld [vmem:[#allocation117_spill] sm:$0xff] }
 0x5de   : > { %v6338_v14 = vpop.f32.mrf.mxu1  ;;  %9061 = vperm.xlu1 %11753, %v15090_v23   ;;  %v6052_v20 = vpop.f32.mrf.mxu0  ;;  %vm19556_vm13 = vnez %v19555_v26  ;;  %v19557_v38 = vld [vmem:[#allocation65_spill] sm:$0xff] }
 0x5df   : > { %19552 = vst [vmem:[#allocation106_spill] sm:$0xff] %v16746_v48  ;;  %10552 = vmatmul.mubr.msk.bf16.gmra.mxu0 %vm19554_vm0, %v18781_v5  ;;  %9105 = vperm.xlu0 %11754, %v19389_v15   ;;  %vm19558_vm14 = vnez %v19557_v38  ;;  %v16771_v26 = vpop.permute.xlu1 %7759 }
 0x5e0   : > { %v6341_v40 = vpop.f32.mrf.mxu1  ;;  %10680 = vmatmul.mubr.msk.bf16.gmra.mxu1 %vm19556_vm13, %v18781_v5  ;;  %10554 = vmatprep.mubr.msk.bf16.mxu0 %vm19558_vm14, %v18781_v5  ;;  %v6054_v16 = vpop.f32.mrf.mxu0  ;;  %vm19568_vm13 = vnez %v19567_v18 }
 0x5e1   : > { %v16763_v23 = vadd.f32 %v6341_v40, %v6052_v20  ;;  %10682 = vmatprep.mubr.msk.bf16.mxu1 %vm19561_vm12, %v18781_v5  ;;  %v16774_v20 = vpop.permute.xlu0 %7779  ;;  %vm19564_vm12 = vnez %v19563_v10 }
 0x5e2   : > { %v6343_v14 = vpop.f32.mrf.mxu1  ;;  %9069 = vperm.xlu1 %11753, %v15147_v42   ;;  %v6055_v15 = vpop.f32.mrf.mxu0 }
 0x5e3   : > { %19559 = vst [vmem:[#allocation234_spill] sm:$0xff] %v16763_v23  ;;  %9113 = vperm.xlu0 %11754, %v19397_v8   ;;  %v19565_v14 = vld [vmem:[#allocation120_spill] sm:$0xff]  ;;  %v19574_v23 = vld [vmem:[#allocation125_spill] sm:$0xff] }
 0x5e4   : > { %v6344_v38 = vpop.f32.mrf.mxu1  ;;  %v6057_v16 = vpop.f32.mrf.mxu0  ;;  %vm19566_vm14 = vnez %v19565_v14 }
 0x5e5   : > { %v16776_v40 = vadd.f32 %v6344_v38, %v6055_v15  ;;  %v16794_v16 = vpop.permute.xlu1 %7767  ;;  %v16797_v10 = vpop.permute.xlu0 %7787 }
 0x5e6   : > { %v6346_v7 = vpop.f32.mrf.mxu1  ;;  %9077 = vperm.xlu1 %11753, %v15180_v35   ;;  %v6060_v42 = vpop.f32.mrf.mxu0  ;;  %v19570_v35 = vld [vmem:[#allocation122_spill] sm:$0xff] }
 0x5e7   : > { %19562 = vst [vmem:[#allocation235_spill] sm:$0xff] %v16776_v40  ;;  %10556 = vmatmul.mubr.msk.bf16.gmra.mxu0 %vm19564_vm12, %v18781_v5  ;;  %9121 = vperm.xlu0 %11754, %v19401_v17   ;;  %vm19571_vm0 = vnez %v19570_v35  ;;  %v19572_v17 = vld [vmem:[#allocation114_spill] sm:$0xff]  ;;  %v11850_v35 = vld [vmem:[#allocation2 + $0x248] ss:$12 sps:$4 sm:$0xff]  }
 0x5e8   : > { %v6349_v8 = vpop.f32.mrf.mxu1  ;;  %10684 = vmatmul.mubr.msk.bf16.gmra.mxu1 %vm19566_vm14, %v18781_v5  ;;  %10558 = vmatprep.mubr.msk.bf16.mxu0 %vm19568_vm13, %v18781_v5  ;;  %v6062_v15 = vpop.f32.mrf.mxu0 }
 0x5e9   : > { %v16789_v38 = vadd.f32 %v6349_v8, %v6060_v42  ;;  %10686 = vmatprep.mubr.msk.bf16.mxu1 %vm19571_vm0, %v18781_v5  ;;  %v11849_v8 = vld [vmem:[#allocation2 + $0xc8] ss:$12 sps:$4 sm:$0xff]   ;;  %vm19575_vm0 = vnez %v19574_v23  ;;  %v19583_v23 = vld [vmem:[#allocation118_spill] sm:$0xff]  ;;  %8670 = vmatpush2.bf16.msra.mxu1 %v11850_v35 }
 0x5ea   : > { %v6351_v7 = vpop.f32.mrf.mxu1  ;;  %9085 = vperm.xlu1 %11753, %v19572_v17   ;;  %v6063_v14 = vpop.f32.mrf.mxu0  ;;  %8381 = vmatpush2.bf16.msra.mxu0 %v11849_v8  ;;  %v19585_v8 = vld [vmem:[#allocation129_spill] sm:$0xff] }
 0x5eb   : > { %19569 = vst [vmem:[#allocation236_spill] sm:$0xff] %v16789_v38  ;;  %9129 = vperm.xlu0 %11754, %v19409_v36   ;;  %v16807_v7 = vpop.permute.xlu1 %7775  ;;  %v19576_v36 = vld [vmem:[#allocation126_spill] sm:$0xff] }
 0x5ec   : > { %v6352_v40 = vpop.f32.mrf.mxu1  ;;  %v6065_v42 = vpop.f32.mrf.mxu0  ;;  %vm19577_vm13 = vnez %v19576_v36 }
 0x5ed   : > { %v16800_v18 = vadd.f32 %v6352_v40, %v6063_v14  ;;  %v19578_v40 = vld [vmem:[#allocation68_spill] sm:$0xff] }
 0x5ee   : > { %v6354_v38 = vpop.f32.mrf.mxu1  ;;  %9093 = vperm.xlu1 %11753, %v15267_v34   ;;  %v6068_v15 = vpop.f32.mrf.mxu0  ;;  %vm19579_vm14 = vnez %v19578_v40 }
 0x5ef   : > { %19573 = vst [vmem:[#allocation114_spill] sm:$0xff] %v16800_v18  ;;  %10560 = vmatmul.mubr.msk.bf16.gmra.mxu0 %vm19575_vm0, %v18781_v5  ;;  %9137 = vperm.xlu0 %11754, %v19412_v45   ;;  %v16815_v34 = vpop.permute.xlu0 %7795  ;;  %v19581_v38 = vld [vmem:[#allocation127_spill] sm:$0xff]  ;;  %v16826_v51 = vpop.permute.xlu1 %7783 }
 0x5f0   : > { %v6357_v17 = vpop.f32.mrf.mxu1  ;;  %10688 = vmatmul.mubr.msk.bf16.gmra.mxu1 %vm19577_vm13, %v18781_v5  ;;  %10562 = vmatprep.mubr.msk.bf16.mxu0 %vm19579_vm14, %v18781_v5  ;;  %vm19582_vm0 = vnez %v19581_v38  ;;  %v6070_v45 = vpop.f32.mrf.mxu0 }
 0x5f1   : > { %v16817_v14 = vadd.f32 %v6357_v17, %v6068_v15  ;;  %10690 = vmatprep.mubr.msk.bf16.mxu1 %vm19582_vm0, %v18781_v5  ;;  %vm19586_vm0 = vnez %v19585_v8  ;;  %v19610_v8 = vld [vmem:[#allocation143_spill] sm:$0xff] }
 0x5f2   : > { %v6359_v42 = vpop.f32.mrf.mxu1  ;;  %9101 = vperm.xlu1 %11753, %v19583_v23   ;;  %v6071_v36 = vpop.f32.mrf.mxu0 }
 0x5f3   : > { %19580 = vst [vmem:[#allocation237_spill] sm:$0xff] %v16817_v14  ;;  %9145 = vperm.xlu0 %11754, %v19422_v55   ;;  %v16829_v17 = vpop.permute.xlu0 %7803  ;;  %v19587_v55 = vld [vmem:[#allocation130_spill] sm:$0xff]  ;;  %v16848_v42 = vpop.permute.xlu1 %7791 }
 0x5f4   : > { %v6360_v18 = vpop.f32.mrf.mxu1  ;;  %v6073_v52 = vpop.f32.mrf.mxu0  ;;  %vm19588_vm14 = vnez %v19587_v55 }
 0x5f5   : > { %v16824_v40 = vadd.f32 %v6360_v18, %v6071_v36  ;;  %v19589_v52 = vld [vmem:[#allocation70_spill] sm:$0xff] }
 0x5f6   : > { %v6362_v15 = vpop.f32.mrf.mxu1  ;;  %9109 = vperm.xlu1 %11753, %v15363_v27   ;;  %v6076_v45 = vpop.f32.mrf.mxu0  ;;  %vm19590_vm13 = vnez %v19589_v52  ;;  %v19592_v27 = vld [vmem:[#allocation132_spill] sm:$0xff] }
 0x5f7   : > { %19584 = vst [vmem:[#allocation118_spill] sm:$0xff] %v16824_v40  ;;  %10564 = vmatmul.mubr.msk.bf16.gmra.mxu0 %vm19586_vm0, %v18781_v5  ;;  %9153 = vperm.xlu0 %11754, %v19428_v61   ;;  %vm19593_vm12 = vnez %v19592_v27  ;;  %v16850_v55 = vpop.permute.xlu0 %7811 }
 0x5f8   : > { %v6365_v23 = vpop.f32.mrf.mxu1  ;;  %10692 = vmatmul.mubr.msk.bf16.gmra.mxu1 %vm19588_vm14, %v18781_v5  ;;  %10566 = vmatprep.mubr.msk.bf16.mxu0 %vm19590_vm13, %v18781_v5  ;;  %v6078_v35 = vpop.f32.mrf.mxu0 }
 0x5f9   : > { %v16841_v18 = vadd.f32 %v6365_v23, %v6076_v45  ;;  %10694 = vmatprep.mubr.msk.bf16.mxu1 %vm19593_vm12, %v18781_v5  ;;  %v19596_v35 = vld [vmem:[#allocation135_spill] sm:$0xff] }
 0x5fa   : > { %v6367_v36 = vpop.f32.mrf.mxu1  ;;  %9117 = vperm.xlu1 %11753, %v19368_v31   ;;  %v6079_v61 = vpop.f32.mrf.mxu0  ;;  %vm19597_vm12 = vnez %v19596_v35 }
 0x5fb   : > { %19591 = vst [vmem:[#allocation238_spill] sm:$0xff] %v16841_v18  ;;  %9161 = vperm.xlu0 %11754, %v19436_v44   ;;  %v19595_v18 = vld [vmem:[#allocation124_spill] sm:$0xff]  ;;  %v16873_v35 = vpop.permute.xlu0 %7819 }
 0x5fc   : > { %v6368_v15 = vpop.f32.mrf.mxu1  ;;  %v6081_v45 = vpop.f32.mrf.mxu0  ;;  %v19598_v44 = vld [vmem:[#allocation136_spill] sm:$0xff] }
 0x5fd   : > { %v16852_v52 = vadd.f32 %v6368_v15, %v6079_v61  ;;  %vm19599_vm13 = vnez %v19598_v44  ;;  %v19600_v36 = vld [vmem:[#allocation72_spill] sm:$0xff]  ;;  %v16870_v45 = vpop.permute.xlu1 %7799 }
 0x5fe   : > { %v6370_v23 = vpop.f32.mrf.mxu1  ;;  %9125 = vperm.xlu1 %11753, %v19595_v18   ;;  %v6084_v27 = vpop.f32.mrf.mxu0  ;;  %vm19601_vm14 = vnez %v19600_v36  ;;  %v19603_v18 = vld [vmem:[#allocation137_spill] sm:$0xff] }
 0x5ff   : > { %19594 = vst [vmem:[#allocation239_spill] sm:$0xff] %v16852_v52  ;;  %10568 = vmatmul.mubr.msk.bf16.gmra.mxu0 %vm19597_vm12, %v18781_v5  ;;  %9169 = vperm.xlu0 %11754, %v19448_v1   ;;  %vm19604_vm0 = vnez %v19603_v18  ;;  %v19605_v1 = vld [vmem:[#allocation128_spill] sm:$0xff] }
 0x600   : > { %v6373_v31 = vpop.f32.mrf.mxu1  ;;  %10696 = vmatmul.mubr.msk.bf16.gmra.mxu1 %vm19599_vm13, %v18781_v5  ;;  %10570 = vmatprep.mubr.msk.bf16.mxu0 %vm19601_vm14, %v18781_v5  ;;  %v6086_v15 = vpop.f32.mrf.mxu0  ;;  %vm19611_vm14 = vnez %v19610_v8 }
 0x601   : > { %v16865_v61 = vadd.f32 %v6373_v31, %v6084_v27  ;;  %10698 = vmatprep.mubr.msk.bf16.mxu1 %vm19604_vm0, %v18781_v5  ;;  %v19608_v15 = vld [vmem:[#allocation142_spill] sm:$0xff] }
 0x602   : > { %v6375_v23 = vpop.f32.mrf.mxu1  ;;  %9133 = vperm.xlu1 %11753, %v19605_v1   ;;  %v6087_v44 = vpop.f32.mrf.mxu0  ;;  %vm19609_vm0 = vnez %v19608_v15 }
 0x603   : > { %19602 = vst [vmem:[#allocation124_spill] sm:$0xff] %v16865_v61  ;;  %9177 = vperm.xlu0 %11754, %v15613_v30   ;;  %v19607_v61 = vld [vmem:[#allocation52_spill] sm:$0xff]  ;;  %v16882_v23 = vpop.permute.xlu1 %7807  ;;  %v19612_v30 = vld [vmem:[#allocation22_spill] sm:$0xff] }
 0x604   : > { %v6376_v52 = vpop.f32.mrf.mxu1  ;;  %v6089_v27 = vpop.f32.mrf.mxu0  ;;  %vm19613_vm13 = vnez %v19612_v30  ;;  %v19619_v30 = vld [vmem:[#allocation133_spill] sm:$0xff] }
 0x605   : > { %v16876_v36 = vadd.f32 %v6376_v52, %v6087_v44  ;;  %v19615_v44 = vld [vmem:[#allocation144_spill] sm:$0xff] }
 0x606   : > { %v6378_v31 = vpop.f32.mrf.mxu1  ;;  %9141 = vperm.xlu1 %11753, %v19607_v61   ;;  %v6092_v18 = vpop.f32.mrf.mxu0  ;;  %vm19616_vm12 = vnez %v19615_v44 }
 0x607   : > { %19606 = vst [vmem:[#allocation128_spill] sm:$0xff] %v16876_v36  ;;  %10572 = vmatmul.mubr.msk.bf16.gmra.mxu0 %vm19609_vm0, %v18781_v5  ;;  %v19617_v31 = vld [vmem:[#allocation131_spill] sm:$0xff]  ;;  %v16898_v14 = vpop.permute.xlu1 %7815 }
 0x608   : > { %v6381_v1 = vpop.f32.mrf.mxu1  ;;  %10700 = vmatmul.mubr.msk.bf16.gmra.mxu1 %vm19611_vm14, %v18781_v5  ;;  %10574 = vmatprep.mubr.msk.bf16.mxu0 %vm19613_vm13, %v18781_v5  ;;  %v6094_v61 = vpop.f32.mrf.mxu0 }
 0x609   : > { %v16890_v52 = vadd.f32 %v6381_v1, %v6092_v18  ;;  %10702 = vmatprep.mubr.msk.bf16.mxu1 %vm19616_vm12, %v18781_v5  ;;  %v19620_v1 = vld [vmem:[#allocation147_spill] sm:$0xff] }
 0x60a   : > { %v6383_v27 = vpop.f32.mrf.mxu1  ;;  %9149 = vperm.xlu1 %11753, %v19617_v31   ;;  %v6095_v15 = vpop.f32.mrf.mxu0  ;;  %vm19621_vm13 = vnez %v19620_v1  ;;  %v19622_v61 = vld [vmem:[#allocation79_spill] sm:$0xff] }
 0x60b   : > { %19614 = vst [vmem:[#allocation52_spill] sm:$0xff] %v16890_v52  ;;  %vm19623_vm12 = vnez %v19622_v61  ;;  %v19624_v27 = vld [vmem:[#allocation148_spill] sm:$0xff]  ;;  %v16916_v1 = vpop.permute.xlu1 %7823 }
 0x60c   : > { %v6384_v36 = vpop.f32.mrf.mxu1  ;;  %v6097_v8 = vpop.f32.mrf.mxu0  ;;  %vm19625_vm14 = vnez %v19624_v27  ;;  %v19631_v27 = vld [vmem:[#allocation140_spill] sm:$0xff] }
 0x60d   : > { %v16896_v40 = vadd.f32 %v6384_v36, %v6095_v15 }
 0x60e   : > { %v6386_v38 = vpop.f32.mrf.mxu1  ;;  %9157 = vperm.xlu1 %11753, %v19619_v30   ;;  %v6100_v18 = vpop.f32.mrf.mxu0  ;;  %v19629_v30 = vld [vmem:[#allocation138_spill] sm:$0xff] }
 0x60f   : > { %19618 = vst [vmem:[#allocation131_spill] sm:$0xff] %v16896_v40  ;;  %10576 = vmatmul.mubr.msk.bf16.gmra.mxu0 %vm19621_vm13, %v18781_v5  ;;  %v19627_v38 = vld [vmem:[#allocation150_spill] sm:$0xff] }
 0x610   : > { %v6389_v52 = vpop.f32.mrf.mxu1  ;;  %10704 = vmatmul.mubr.msk.bf16.gmra.mxu1 %vm19623_vm12, %v18781_v5  ;;  %10578 = vmatprep.mubr.msk.bf16.mxu0 %vm19625_vm14, %v18781_v5  ;;  %vm19628_vm0 = vnez %v19627_v38  ;;  %v6102_v36 = vpop.f32.mrf.mxu0 }
 0x611   : > { %v16910_v8 = vadd.f32 %v6389_v52, %v6100_v18  ;;  %10706 = vmatprep.mubr.msk.bf16.mxu1 %vm19628_vm0, %v18781_v5  ;;  %v19632_v18 = vld [vmem:[#allocation154_spill] sm:$0xff]  ;;  %v19634_v36 = vld [vmem:[#allocation155_spill] sm:$0xff] }
 0x612   : > { %v6391_v15 = vpop.f32.mrf.mxu1  ;;  %9165 = vperm.xlu1 %11753, %v19629_v30   ;;  %v6103_v31 = vpop.f32.mrf.mxu0  ;;  %vm19633_vm14 = vnez %v19632_v18  ;;  %vm19635_vm0 = vnez %v19634_v36 }
 0x613   : > { %19626 = vst [vmem:[#allocation133_spill] sm:$0xff] %v16910_v8  ;;  %v19636_v15 = vld [vmem:[#allocation26_spill] sm:$0xff] }
 0x614   : > { %v6392_v40 = vpop.f32.mrf.mxu1  ;;  %v6105_v44 = vpop.f32.mrf.mxu0  ;;  %vm19637_vm12 = vnez %v19636_v15 }
 0x615   : > { %v16918_v61 = vadd.f32 %v6392_v40, %v6103_v31  ;;  %v19642_v31 = vld [vmem:[#allocation149_spill] sm:$0xff] }
 0x616   : > { %v6394_v48 = vpop.f32.mrf.mxu1  ;;  %9173 = vperm.xlu1 %11753, %v19631_v27   ;;  %v6108_v52 = vpop.f32.mrf.mxu0 }
 0x617   : > { %19630 = vst [vmem:[#allocation138_spill] sm:$0xff] %v16918_v61  ;;  %10580 = vmatmul.mubr.msk.bf16.gmra.mxu0 %vm19633_vm14, %v18781_v5  ;;  %v19639_v48 = vld [vmem:[#allocation17_spill] sm:$0xff]  ;;  %v16935_v27 = vpop.permute.xlu1 %7831 }
 0x618   : > { %v6397_v8 = vpop.f32.mrf.mxu1  ;;  %10708 = vmatmul.mubr.msk.bf16.gmra.mxu1 %vm19635_vm0, %v18781_v5  ;;  %10582 = vmatprep.mubr.msk.bf16.mxu0 %vm19637_vm12, %v18781_v5  ;;  %vm19640_vm13 = vnez %v19639_v48  ;;  %v6110_v44 = vpop.f32.mrf.mxu0  ;;  %19641 = vst [vmem:[#allocation240_spill] sm:$0xff] %v16935_v27 }
 0x619   : > { %v16930_v40 = vadd.f32 %v6397_v8, %v6108_v52  ;;  %10710 = vmatprep.mubr.msk.bf16.mxu1 %vm19640_vm13, %v18781_v5  ;;  %v19644_v8 = vld [vmem:[#allocation157_spill] sm:$0xff]  ;;  %v19648_v44 = vld [vmem:[#allocation8_spill] sm:$0xff] }
 0x61a   : > { %v6399_v30 = vpop.f32.mrf.mxu1  ;;  %9181 = vperm.xlu1 %11753, %v19642_v31   ;;  %v6111_v18 = vpop.f32.mrf.mxu0  ;;  %vm19645_vm12 = vnez %v19644_v8  ;;  %vm19649_vm0 = vnez %v19648_v44 }
 0x61b   : > { %19638 = vst [vmem:[#allocation140_spill] sm:$0xff] %v16930_v40  ;;  %v19646_v40 = vld [vmem:[#allocation158_spill] sm:$0xff] }
 0x61c   : > { %v6400_v61 = vpop.f32.mrf.mxu1  ;;  %v6113_v38 = vpop.f32.mrf.mxu0  ;;  %vm19647_vm13 = vnez %v19646_v40 }
 0x61d   : > { %v16938_v36 = vadd.f32 %v6400_v61, %v6111_v18  ;;  %v19651_v61 = vld [vmem:[#allocation159_spill] sm:$0xff] }
 0x61e   : > { %v6402_v53 = vpop.f32.mrf.mxu1  ;;  %v6116_v15 = vpop.f32.mrf.mxu0  ;;  %vm19652_vm14 = vnez %v19651_v61  ;;  %v19664_v61 = vld [vmem:[#allocation165_spill] sm:$0xff] }
 0x61f   : > { %19643 = vst [vmem:[#allocation149_spill] sm:$0xff] %v16938_v36  ;;  %10584 = vmatmul.mubr.msk.bf16.gmra.mxu0 %vm19645_vm12, %v18781_v5 }
 0x620   : > { %v6405_v52 = vpop.f32.mrf.mxu1  ;;  %10712 = vmatmul.mubr.msk.bf16.gmra.mxu1 %vm19647_vm13, %v18781_v5  ;;  %10586 = vmatprep.mubr.msk.bf16.mxu0 %vm19649_vm0, %v18781_v5  ;;  %v6118_v53 = vpop.f32.mrf.mxu0  ;;  %vm19655_vm13 = vnez %v19654_v32 }
 0x621   : > { %v16949_v30 = vadd.f32 %v6405_v52, %v6116_v15  ;;  %10714 = vmatprep.mubr.msk.bf16.mxu1 %vm19652_vm14, %v18781_v5  ;;  %v19656_v15 = vld [vmem:[#allocation162_spill] sm:$0xff]  ;;  %v19658_v52 = vld [vmem:[#allocation20_spill] sm:$0xff] }
 0x622   : > { %v6407_v38 = vpop.f32.mrf.mxu1  ;;  %v6119_v18 = vpop.f32.mrf.mxu0  ;;  %vm19657_vm0 = vnez %v19656_v15  ;;  %vm19659_vm14 = vnez %v19658_v52 }
 0x623   : > { %19650 = vst [vmem:[#allocation241_spill] sm:$0xff] %v16949_v30  ;;  %v19661_v38 = vld [vmem:[#allocation163_spill] sm:$0xff] }
 0x624   : > { %v6408_v31 = vpop.f32.mrf.mxu1  ;;  %v6121_v36 = vpop.f32.mrf.mxu0  ;;  %vm19662_vm12 = vnez %v19661_v38  ;;  %v19674_v38 = vld [vmem:[#allocation168_spill] sm:$0xff] }
 0x625   : > { %v16954_v8 = vadd.f32 %v6408_v31, %v6119_v18 }
 0x626   : > { %v6410_v48 = vpop.f32.mrf.mxu1  ;;  %v6124_v40 = vpop.f32.mrf.mxu0 }
 0x627   : > { %19653 = vst [vmem:[#allocation242_spill] sm:$0xff] %v16954_v8  ;;  %10588 = vmatmul.mubr.msk.bf16.gmra.mxu0 %vm19655_vm13, %v18781_v5 }
 0x628   : > { %v6413_v44 = vpop.f32.mrf.mxu1  ;;  %10716 = vmatmul.mubr.msk.bf16.gmra.mxu1 %vm19657_vm0, %v18781_v5  ;;  %10590 = vmatprep.mubr.msk.bf16.mxu0 %vm19659_vm14, %v18781_v5  ;;  %v6126_v36 = vpop.f32.mrf.mxu0  ;;  %vm19665_vm0 = vnez %v19664_v61 }
 0x629   : > { %v16965_v53 = vadd.f32 %v6413_v44, %v6124_v40  ;;  %10718 = vmatprep.mubr.msk.bf16.mxu1 %vm19662_vm12, %v18781_v5  ;;  %v19666_v40 = vld [vmem:[#allocation166_spill] sm:$0xff] }
 0x62a   : > { %v6415_v48 = vpop.f32.mrf.mxu1  ;;  %v6127_v18 = vpop.f32.mrf.mxu0  ;;  %vm19667_vm14 = vnez %v19666_v40  ;;  %v19668_v44 = vld [vmem:[#allocation10_spill] sm:$0xff] }
 0x62b   : > { %19660 = vst [vmem:[#allocation243_spill] sm:$0xff] %v16965_v53  ;;  %vm19669_vm12 = vnez %v19668_v44  ;;  %v19671_v48 = vld [vmem:[#allocation87_spill] sm:$0xff] }
 0x62c   : > { %v6416_v31 = vpop.f32.mrf.mxu1  ;;  %v6129_v8 = vpop.f32.mrf.mxu0  ;;  %vm19672_vm13 = vnez %v19671_v48 }
 0x62d   : > { %v16970_v32 = vadd.f32 %v6416_v31, %v6127_v18 }
 0x62e   : > { %v6418_v30 = vpop.f32.mrf.mxu1  ;;  %v6132_v15 = vpop.f32.mrf.mxu0 }
 0x62f   : > { %19663 = vst [vmem:[#allocation244_spill] sm:$0xff] %v16970_v32  ;;  %10592 = vmatmul.mubr.msk.bf16.gmra.mxu0 %vm19665_vm0, %v18781_v5 }
 0x630   : > { %v6421_v52 = vpop.f32.mrf.mxu1  ;;  %10720 = vmatmul.mubr.msk.bf16.gmra.mxu1 %vm19667_vm14, %v18781_v5  ;;  %10594 = vmatprep.mubr.msk.bf16.mxu0 %vm19669_vm12, %v18781_v5  ;;  %v6134_v8 = vpop.f32.mrf.mxu0  ;;  %vm19675_vm14 = vnez %v19674_v38 }
 0x631   : > { %v16981_v36 = vadd.f32 %v6421_v52, %v6132_v15  ;;  %10722 = vmatprep.mubr.msk.bf16.mxu1 %vm19672_vm13, %v18781_v5  ;;  %v19676_v15 = vld [vmem:[#allocation169_spill] sm:$0xff]  ;;  %v19678_v52 = vld [vmem:[#allocation38_spill] sm:$0xff] }
 0x632   : > { %v6423_v30 = vpop.f32.mrf.mxu1  ;;  %v6135_v18 = vpop.f32.mrf.mxu0  ;;  %vm19677_vm12 = vnez %v19676_v15  ;;  %vm19679_vm13 = vnez %v19678_v52 }
 0x633   : > { %19670 = vst [vmem:[#allocation245_spill] sm:$0xff] %v16981_v36  ;;  %v19680_v30 = vld [vmem:[#allocation171_spill] sm:$0xff] }
 0x634   : > { %v6424_v31 = vpop.f32.mrf.mxu1  ;;  %v6137_v32 = vpop.f32.mrf.mxu0  ;;  %vm19681_vm0 = vnez %v19680_v30 }
 0x635   : > { %v16986_v61 = vadd.f32 %v6424_v31, %v6135_v18  ;;  %v19682_v18 = vld [vmem:[#allocation170_spill] sm:$0xff]  ;;  %v19683_v31 = vld [vmem:[#allocation141_spill] sm:$0xff] }
 0x636   : > { %v6426_v53 = vpop.f32.mrf.mxu1  ;;  %v7166_v40 = vpop.f32.mrf.mxu0  ;;  %v6748_v38 = vmul.f32 %v19683_v31, %v19682_v18 }
 0x637   : > { %19673 = vst [vmem:[#allocation246_spill] sm:$0xff] %v16986_v61  ;;  %10596 = vmatmul.mubr.msk.bf16.gmra.mxu0 %vm19675_vm14, %v18781_v5 }
 0x638   : > { %v7455_v44 = vpop.f32.mrf.mxu1  ;;  %10724 = vmatmul.mubr.msk.bf16.gmra.mxu1 %vm19677_vm12, %v18781_v5  ;;  %10598 = vmatprep.mubr.msk.bf16.mxu0 %vm19679_vm13, %v18781_v5  ;;  %v7168_v32 = vpop.f32.mrf.mxu0 }
 0x639   : > { %v7456_v8 = vadd.f32 %v7455_v44, %v7166_v40  ;;  %10726 = vmatprep.mubr.msk.bf16.mxu1 %vm19681_vm0, %v18781_v5  ;;  %v19686_v40 = vld [vmem:[#allocation134_spill] sm:$0xff]  ;;  %v19687_v32 = vld [vmem:[#allocation173_spill] sm:$0xff] }
 0x63a   : > { %v7457_v53 = vpop.f32.mrf.mxu1  ;;  %v7169_v36 = vpop.f32.mrf.mxu0  ;;  %v6749_v44 = vmul.f32 %v19686_v40, %v19685_v6  ;;  %vm19688_vm0 = vnez %v19687_v32  ;;  %v19694_v6 = vld [vmem:[#allocation176_spill] sm:$0xff] }
 0x63b   : > { %v7966_v61 = vmul.f32 %v16614_v24, %v7456_v8  ;;  %v19689_v24 = vld [vmem:[#allocation175_spill] sm:$0xff]  ;;  %vm19695_vm14 = vnez %v19694_v6 }
 0x63c   : > { %v7458_v48 = vpop.f32.mrf.mxu1  ;;  %v7171_v27 = vpop.f32.mrf.mxu0  ;;  %vm19690_vm13 = vnez %v19689_v24 }
 0x63d   : > { %v17003_v15 = vadd.f32 %v7966_v61, %v6748_v38  ;;  %v7459_v50 = vadd.f32 %v7458_v48, %v7169_v36  ;;  %v19691_v61 = vld [vmem:[#allocation39_spill] sm:$0xff]  ;;  %v19696_v36 = vld [vmem:[#allocation177_spill] sm:$0xff]  ;;  %v19697_v48 = vld [vmem:[#allocation146_spill] sm:$0xff] }
 0x63e   : > { %v7460_v52 = vpop.f32.mrf.mxu1  ;;  %vm19692_vm12 = vnez %v19691_v61 }
 0x63f   : > { %19684 = vst [vmem:[#allocation170_spill] sm:$0xff] %v17003_v15  ;;  %v7967_v30 = vmul.f32 %v16649_v0, %v7459_v50  ;;  %v7174_v9 = vpop.f32.mrf.mxu0  ;;  %10600 = vmatmul.mubr.msk.bf16.gmra.mxu0 %vm19688_vm0, %v18781_v5  ;;  %v6750_v52 = vmul.f32 %v19697_v48, %v19696_v36  ;;  %v19708_v48 = vld [vmem:[#allocation31_spill] sm:$0xff] }
 0x640   : > { %v7463_v53 = vpop.f32.mrf.mxu1  ;;  %10728 = vmatmul.mubr.msk.bf16.gmra.mxu1 %vm19690_vm13, %v18781_v5  ;;  %10602 = vmatprep.mubr.msk.bf16.mxu0 %vm19692_vm12, %v18781_v5  ;;  %vm19709_vm0 = vnez %v19708_v48 }
 0x641   : > { %v17017_v27 = vadd.f32 %v7967_v30, %v6749_v44  ;;  %v7464_v38 = vadd.f32 %v7463_v53, %v7174_v9  ;;  %10730 = vmatprep.mubr.msk.bf16.mxu1 %vm19695_vm14, %v18781_v5  ;;  %v7176_v50 = vpop.f32.mrf.mxu0  ;;  %v19699_v44 = vld [vmem:[#allocation179_spill] sm:$0xff] }
 0x642   : > { %v7465_v0 = vpop.f32.mrf.mxu1  ;;  %v19700_v9 = vld [vmem:[#allocation55_spill] sm:$0xff]  ;;  %v19701_v50 = vld [vmem:[#allocation180_spill] sm:$0xff] }
 0x643   : > { %19693 = vst [vmem:[#allocation141_spill] sm:$0xff] %v17017_v27  ;;  %v7968_v8 = vmul.f32 %v16670_v22, %v7464_v38  ;;  %v7177_v18 = vpop.f32.mrf.mxu0  ;;  %v6751_v53 = vmul.f32 %v19700_v9, %v19699_v44  ;;  %vm19702_vm14 = vnez %v19701_v50  ;;  %v19703_v22 = vld [vmem:[#allocation181_spill] sm:$0xff] }
 0x644   : > { %v7466_v31 = vpop.f32.mrf.mxu1  ;;  %vm19704_vm12 = vnez %v19703_v22  ;;  %v19705_v38 = vld [vmem:[#allocation13_spill] sm:$0xff] }
 0x645   : > { %v17025_v40 = vadd.f32 %v7968_v8, %v6750_v52  ;;  %v7467_v15 = vadd.f32 %v7466_v31, %v7177_v18  ;;  %v7179_v61 = vpop.f32.mrf.mxu0  ;;  %vm19706_vm13 = vnez %v19705_v38  ;;  %v19710_v52 = vld [vmem:[#allocation182_spill] sm:$0xff]  ;;  %v19711_v8 = vld [vmem:[#allocation139_spill] sm:$0xff] }
 0x646   : > { %v7468_v30 = vpop.f32.mrf.mxu1  ;;  %v6752_v18 = vmul.f32 %v19711_v8, %v19710_v52  ;;  %v19722_v8 = vld [vmem:[#allocation187_spill] sm:$0xff] }
 0x647   : > { %19698 = vst [vmem:[#allocation21_spill] sm:$0xff] %v17025_v40  ;;  %v7969_v6 = vmul.f32 %v16639_v59, %v7467_v15  ;;  %v7182_v27 = vpop.f32.mrf.mxu0  ;;  %10604 = vmatmul.mubr.msk.bf16.gmra.mxu0 %vm19702_vm14, %v18781_v5  ;;  %vm19723_vm14 = vnez %v19722_v8 }
 0x648   : > { %v7471_v0 = vpop.f32.mrf.mxu1  ;;  %10732 = vmatmul.mubr.msk.bf16.gmra.mxu1 %vm19704_vm12, %v18781_v5  ;;  %10606 = vmatprep.mubr.msk.bf16.mxu0 %vm19706_vm13, %v18781_v5 }
 0x649   : > { %v17039_v61 = vadd.f32 %v7969_v6, %v6751_v53  ;;  %v7472_v36 = vadd.f32 %v7471_v0, %v7182_v27  ;;  %10734 = vmatprep.mubr.msk.bf16.mxu1 %vm19709_vm0, %v18781_v5  ;;  %v7184_v59 = vpop.f32.mrf.mxu0  ;;  %v19713_v53 = vld [vmem:[#allocation184_spill] sm:$0xff]  ;;  %v19714_v27 = vld [vmem:[#allocation151_spill] sm:$0xff] }
 0x64a   : > { %v7473_v15 = vpop.f32.mrf.mxu1  ;;  %v6753_v0 = vmul.f32 %v19714_v27, %v19713_v53  ;;  %v19715_v59 = vld [vmem:[#allocation185_spill] sm:$0xff] }
 0x64b   : > { %19707 = vst [vmem:[#allocation134_spill] sm:$0xff] %v17039_v61  ;;  %v7970_v31 = vmul.f32 %v16692_v58, %v7472_v36  ;;  %v7185_v30 = vpop.f32.mrf.mxu0  ;;  %vm19716_vm0 = vnez %v19715_v59  ;;  %v19717_v58 = vld [vmem:[#allocation186_spill] sm:$0xff] }
 0x64c   : > { %v7474_v44 = vpop.f32.mrf.mxu1  ;;  %vm19718_vm13 = vnez %v19717_v58  ;;  %v19719_v36 = vld [vmem:[#allocation14_spill] sm:$0xff] }
 0x64d   : > { %v17047_v9 = vadd.f32 %v7970_v31, %v6752_v18  ;;  %v7475_v40 = vadd.f32 %v7474_v44, %v7185_v30  ;;  %v7187_v38 = vpop.f32.mrf.mxu0  ;;  %vm19720_vm12 = vnez %v19719_v36  ;;  %v19724_v18 = vld [vmem:[#allocation189_spill] sm:$0xff] }
 0x64e   : > { %v7476_v6 = vpop.f32.mrf.mxu1  ;;  %v19725_v31 = vld [vmem:[#allocation145_spill] sm:$0xff] }
 0x64f   : > { %19712 = vst [vmem:[#allocation173_spill] sm:$0xff] %v17047_v9  ;;  %v7971_v48 = vmul.f32 %v16657_v3, %v7475_v40  ;;  %v7190_v61 = vpop.f32.mrf.mxu0  ;;  %10608 = vmatmul.mubr.msk.bf16.gmra.mxu0 %vm19716_vm0, %v18781_v5  ;;  %v6754_v30 = vmul.f32 %v19725_v31, %v19724_v18  ;;  %v19736_v31 = vld [vmem:[#allocation193_spill] sm:$0xff] }
 0x650   : > { %v7479_v15 = vpop.f32.mrf.mxu1  ;;  %10736 = vmatmul.mubr.msk.bf16.gmra.mxu1 %vm19718_vm13, %v18781_v5  ;;  %10610 = vmatprep.mubr.msk.bf16.mxu0 %vm19720_vm12, %v18781_v5  ;;  %vm19737_vm0 = vnez %v19736_v31 }
 0x651   : > { %v17061_v38 = vadd.f32 %v7971_v48, %v6753_v0  ;;  %v7480_v52 = vadd.f32 %v7479_v15, %v7190_v61  ;;  %10738 = vmatprep.mubr.msk.bf16.mxu1 %vm19723_vm14, %v18781_v5  ;;  %v7192_v3 = vpop.f32.mrf.mxu0  ;;  %v19727_v0 = vld [vmem:[#allocation93_spill] sm:$0xff] }
 0x652   : > { %v7481_v40 = vpop.f32.mrf.mxu1  ;;  %v19728_v61 = vld [vmem:[#allocation153_spill] sm:$0xff]  ;;  %v19729_v3 = vld [vmem:[#allocation190_spill] sm:$0xff] }
 0x653   : > { %19721 = vst [vmem:[#allocation175_spill] sm:$0xff] %v17061_v38  ;;  %v7972_v44 = vmul.f32 %v16714_v47, %v7480_v52  ;;  %v7193_v6 = vpop.f32.mrf.mxu0  ;;  %v6755_v15 = vmul.f32 %v19728_v61, %v19727_v0  ;;  %vm19730_vm14 = vnez %v19729_v3  ;;  %v19731_v47 = vld [vmem:[#allocation192_spill] sm:$0xff]  ;;  %v19733_v52 = vld [vmem:[#allocation94_spill] sm:$0xff] }
 0x654   : > { %v7482_v53 = vpop.f32.mrf.mxu1  ;;  %vm19732_vm12 = vnez %v19731_v47  ;;  %vm19734_vm13 = vnez %v19733_v52 }
 0x655   : > { %v17069_v27 = vadd.f32 %v7972_v44, %v6754_v30  ;;  %v7483_v9 = vadd.f32 %v7482_v53, %v7193_v6  ;;  %v7195_v36 = vpop.f32.mrf.mxu0  ;;  %v19738_v30 = vld [vmem:[#allocation194_spill] sm:$0xff]  ;;  %v19739_v44 = vld [vmem:[#allocation25_spill] sm:$0xff] }
 0x656   : > { %v7484_v48 = vpop.f32.mrf.mxu1  ;;  %v6756_v6 = vmul.f32 %v19739_v44, %v19738_v30  ;;  %v19750_v44 = vld [vmem:[#allocation199_spill] sm:$0xff] }
 0x657   : > { %19726 = vst [vmem:[#allocation177_spill] sm:$0xff] %v17069_v27  ;;  %v7973_v8 = vmul.f32 %v16673_v39, %v7483_v9  ;;  %v7198_v38 = vpop.f32.mrf.mxu0  ;;  %10612 = vmatmul.mubr.msk.bf16.gmra.mxu0 %vm19730_vm14, %v18781_v5  ;;  %vm19751_vm14 = vnez %v19750_v44 }
 0x658   : > { %v7487_v40 = vpop.f32.mrf.mxu1  ;;  %10740 = vmatmul.mubr.msk.bf16.gmra.mxu1 %vm19732_vm12, %v18781_v5  ;;  %10614 = vmatprep.mubr.msk.bf16.mxu0 %vm19734_vm13, %v18781_v5 }
 0x659   : > { %v17083_v36 = vadd.f32 %v7973_v8, %v6755_v15  ;;  %v7488_v18 = vadd.f32 %v7487_v40, %v7198_v38  ;;  %10742 = vmatprep.mubr.msk.bf16.mxu1 %vm19737_vm0, %v18781_v5  ;;  %v7200_v39 = vpop.f32.mrf.mxu0  ;;  %v19741_v15 = vld [vmem:[#allocation196_spill] sm:$0xff] }
 0x65a   : > { %v7489_v9 = vpop.f32.mrf.mxu1  ;;  %v19742_v38 = vld [vmem:[#allocation156_spill] sm:$0xff]  ;;  %v19743_v39 = vld [vmem:[#allocation197_spill] sm:$0xff] }
 0x65b   : > { %19735 = vst [vmem:[#allocation146_spill] sm:$0xff] %v17083_v36  ;;  %v7974_v53 = vmul.f32 %v16729_v54, %v7488_v18  ;;  %v7201_v48 = vpop.f32.mrf.mxu0  ;;  %v6757_v40 = vmul.f32 %v19742_v38, %v19741_v15  ;;  %vm19744_vm0 = vnez %v19743_v39  ;;  %v19745_v54 = vld [vmem:[#allocation198_spill] sm:$0xff]  ;;  %v19747_v18 = vld [vmem:[#allocation44_spill] sm:$0xff] }
 0x65c   : > { %v7490_v0 = vpop.f32.mrf.mxu1  ;;  %vm19746_vm13 = vnez %v19745_v54  ;;  %vm19748_vm12 = vnez %v19747_v18 }
 0x65d   : > { %v17091_v61 = vadd.f32 %v7974_v53, %v6756_v6  ;;  %v7491_v27 = vadd.f32 %v7490_v0, %v7201_v48  ;;  %v7203_v52 = vpop.f32.mrf.mxu0  ;;  %v19752_v6 = vld [vmem:[#allocation200_spill] sm:$0xff] }
 0x65e   : > { %v7492_v8 = vpop.f32.mrf.mxu1  ;;  %v19753_v53 = vld [vmem:[#allocation152_spill] sm:$0xff] }
 0x65f   : > { %19740 = vst [vmem:[#allocation179_spill] sm:$0xff] %v17091_v61  ;;  %v7975_v31 = vmul.f32 %v16694_v11, %v7491_v27  ;;  %v7206_v36 = vpop.f32.mrf.mxu0  ;;  %10616 = vmatmul.mubr.msk.bf16.gmra.mxu0 %vm19744_vm0, %v18781_v5  ;;  %v6758_v48 = vmul.f32 %v19753_v53, %v19752_v6  ;;  %v19761_v53 = vld [vmem:[#allocation204_spill] sm:$0xff] }
 0x660   : > { %v7495_v9 = vpop.f32.mrf.mxu1  ;;  %10744 = vmatmul.mubr.msk.bf16.gmra.mxu1 %vm19746_vm13, %v18781_v5  ;;  %10618 = vmatprep.mubr.msk.bf16.mxu0 %vm19748_vm12, %v18781_v5 }
 0x661   : > { %v17105_v52 = vadd.f32 %v7975_v31, %v6757_v40  ;;  %v7496_v30 = vadd.f32 %v7495_v9, %v7206_v36  ;;  %10746 = vmatprep.mubr.msk.bf16.mxu1 %vm19751_vm14, %v18781_v5  ;;  %v7208_v11 = vpop.f32.mrf.mxu0  ;;  %v19755_v40 = vld [vmem:[#allocation202_spill] sm:$0xff]  ;;  %v19756_v36 = vld [vmem:[#allocation67_spill] sm:$0xff]  ;;  %vm19762_vm14 = vnez %v19761_v53 }
 0x662   : > { %v7497_v27 = vpop.f32.mrf.mxu1  ;;  %v6759_v9 = vmul.f32 %v19756_v36, %v19755_v40 }
 0x663   : > { %19749 = vst [vmem:[#allocation55_spill] sm:$0xff] %v17105_v52  ;;  %v7976_v0 = vmul.f32 %v16748_v41, %v7496_v30  ;;  %v7209_v8 = vpop.f32.mrf.mxu0 }
 0x664   : > { %v7498_v15 = vpop.f32.mrf.mxu1 }
 0x665   : > { %v17113_v38 = vadd.f32 %v7976_v0, %v6758_v48  ;;  %v7499_v61 = vadd.f32 %v7498_v15, %v7209_v8  ;;  %v7211_v18 = vpop.f32.mrf.mxu0  ;;  %v19763_v48 = vld [vmem:[#allocation206_spill] sm:$0xff]  ;;  %v19764_v0 = vld [vmem:[#allocation23_spill] sm:$0xff] }
 0x666   : > { %v7500_v31 = vpop.f32.mrf.mxu1  ;;  %v6760_v8 = vmul.f32 %v19764_v0, %v19763_v48 }
 0x667   : > { %19754 = vst [vmem:[#allocation180_spill] sm:$0xff] %v17113_v38  ;;  %v7977_v44 = vmul.f32 %v16717_v63, %v7499_v61  ;;  %v7214_v52 = vpop.f32.mrf.mxu0  ;;  %10620 = vmatmul.mubr.msk.bf16.gmra.mxu0 %vm16301_vm10, %v18781_v5 }
 0x668   : > { %v7503_v27 = vpop.f32.mrf.mxu1  ;;  %10748 = vmatmul.mubr.msk.bf16.gmra.mxu1 %vm16310_vm1, %v18781_v5  ;;  %10622 = vmatprep.mubr.msk.bf16.mxu0 %vm16320_vm2, %v18781_v5 }
 0x669   : > { %v17127_v18 = vadd.f32 %v7977_v44, %v6759_v9  ;;  %v7504_v6 = vadd.f32 %v7503_v27, %v7214_v52  ;;  %10750 = vmatprep.mubr.msk.bf16.mxu1 %vm19762_vm14, %v18781_v5  ;;  %v7216_v63 = vpop.f32.mrf.mxu0  ;;  %v19766_v9 = vld [vmem:[#allocation101_spill] sm:$0xff] }
 0x66a   : > { %v7505_v61 = vpop.f32.mrf.mxu1  ;;  %v19767_v52 = vld [vmem:[#allocation161_spill] sm:$0xff] }
 0x66b   : > { %19760 = vst [vmem:[#allocation181_spill] sm:$0xff] %v17127_v18  ;;  %v7978_v15 = vmul.f32 %v16771_v26, %v7504_v6  ;;  %v7217_v31 = vpop.f32.mrf.mxu0  ;;  %v6761_v27 = vmul.f32 %v19767_v52, %v19766_v9 }
 0x66c   : > { %v7506_v40 = vpop.f32.mrf.mxu1 }
 0x66d   : > { %v17135_v36 = vadd.f32 %v7978_v15, %v6760_v8  ;;  %v7507_v38 = vadd.f32 %v7506_v40, %v7217_v31  ;;  %v7219_v30 = vpop.f32.mrf.mxu0  ;;  %v19773_v8 = vld [vmem:[#allocation210_spill] sm:$0xff]  ;;  %v19774_v15 = vld [vmem:[#allocation160_spill] sm:$0xff] }
 0x66e   : > { %v7508_v44 = vpop.f32.mrf.mxu1  ;;  %v6762_v31 = vmul.f32 %v19774_v15, %v19773_v8 }
 0x66f   : > { %19765 = vst [vmem:[#allocation182_spill] sm:$0xff] %v17135_v36  ;;  %v7979_v53 = vmul.f32 %v16737_v49, %v7507_v38  ;;  %v7222_v18 = vpop.f32.mrf.mxu0  ;;  %10624 = vmatmul.mubr.msk.bf16.gmra.mxu0 %vm16358_vm6, %v18781_v5 }
 0x670   : > { %v7511_v61 = vpop.f32.mrf.mxu1  ;;  %10752 = vmatmul.mubr.msk.bf16.gmra.mxu1 %vm16370_vm5, %v18781_v5  ;;  %10786 = vmatprep.mubr.msk.bf16.mxu0 %vm13992_vm4, %v18781_v5 }
 0x671   : > { %v17149_v30 = vadd.f32 %v7979_v53, %v6761_v27  ;;  %v7512_v48 = vadd.f32 %v7511_v61, %v7222_v18  ;;  %10914 = vmatprep.mubr.msk.bf16.mxu1 %vm14008_vm7, %v18781_v5  ;;  %v7224_v49 = vpop.f32.mrf.mxu0  ;;  %v19775_v27 = vld [vmem:[#allocation212_spill] sm:$0xff]  ;;  %v19776_v18 = vld [vmem:[#allocation86_spill] sm:$0xff] }
 0x672   : > { %v7513_v38 = vpop.f32.mrf.mxu1  ;;  %v6763_v61 = vmul.f32 %v19776_v18, %v19775_v27 }
 0x673   : > { %19771 = vst [vmem:[#allocation139_spill] sm:$0xff] %v17149_v30  ;;  %v7980_v40 = vmul.f32 %v16794_v16, %v7512_v48  ;;  %v7225_v44 = vpop.f32.mrf.mxu0 }
 0x674   : > { %v7514_v9 = vpop.f32.mrf.mxu1 }
 0x675   : > { %v17157_v52 = vadd.f32 %v7980_v40, %v6762_v31  ;;  %v7515_v6 = vadd.f32 %v7514_v9, %v7225_v44  ;;  %v7227_v36 = vpop.f32.mrf.mxu0  ;;  %v19781_v40 = vld [vmem:[#allocation108_spill] sm:$0xff]  ;;  %v19782_v44 = vld [vmem:[#allocation9_spill] sm:$0xff] }
 0x676   : > { %v7516_v53 = vpop.f32.mrf.mxu1  ;;  %v6764_v9 = vmul.f32 %v19782_v44, %v19781_v40 }
 0x677   : > { %v7981_v0 = vmul.f32 %v16751_v29, %v7515_v6  ;;  %v7230_v30 = vpop.f32.mrf.mxu0  ;;  %10788 = vmatmul.mubr.msk.bf16.vlgmr.msra.gmra.mxu0 %vm14025_vm9, %v18781_v5 }
 0x678   : > { %v7519_v38 = vpop.f32.mrf.mxu1  ;;  %10916 = vmatmul.mubr.msk.bf16.vlgmr.msra.gmra.mxu1 %vm14037_vm11, %v18781_v5  ;;  %10790 = vmatprep.mubr.msk.bf16.mxu0 %vm14082_vm3, %v18781_v5 }
 0x679   : > { %v17171_v36 = vadd.f32 %v7981_v0, %v6763_v61  ;;  %v7520_v8 = vadd.f32 %v7519_v38, %v7230_v30  ;;  %10918 = vmatprep.mubr.msk.bf16.mxu1 %vm14100_vm8, %v18781_v5  ;;  %v7232_v29 = vpop.f32.mrf.mxu0  ;;  %v19783_v0 = vld [vmem:[#allocation46_spill] sm:$0xff]  ;;  %v19784_v30 = vld [vmem:[#allocation167_spill] sm:$0xff] }
 0x67a   : > { %v7521_v31 = vpop.f32.mrf.mxu1  ;;  %v6765_v38 = vmul.f32 %v19784_v30, %v19783_v0 }
 0x67b   : > { %v7982_v6 = vmul.f32 %v16807_v7, %v7520_v8  ;;  %v7233_v53 = vpop.f32.mrf.mxu0  ;;  %v19786_v7 = vld [vmem:[#allocation54_spill] sm:$0xff] }
 0x67c   : > { %v7522_v27 = vpop.f32.mrf.mxu1  ;;  %vm19787_vm4 = vnez %v19786_v7  ;;  %v19788_v8 = vld [vmem:[#allocation6_spill] sm:$0xff] }
 0x67d   : > { %v17179_v18 = vadd.f32 %v7982_v6, %v6764_v9  ;;  %v7523_v49 = vadd.f32 %v7522_v27, %v7233_v53  ;;  %v7235_v16 = vpop.f32.mrf.mxu0  ;;  %vm19789_vm7 = vnez %v19788_v8  ;;  %v19790_v9 = vld [vmem:[#allocation71_spill] sm:$0xff]  ;;  %v19792_v53 = vld [vmem:[#allocation216_spill] sm:$0xff] }
 0x67e   : > { %v7524_v61 = vpop.f32.mrf.mxu1  ;;  %vm19791_vm9 = vnez %v19790_v9  ;;  %v19793_v27 = vld [vmem:[#allocation164_spill] sm:$0xff] }
 0x67f   : > { %v7983_v48 = vmul.f32 %v16774_v20, %v7523_v49  ;;  %v7238_v15 = vpop.f32.mrf.mxu0  ;;  %10792 = vmatmul.mubr.msk.bf16.gmra.mxu0 %vm14116_vm15, %v18781_v5  ;;  %v6766_v49 = vmul.f32 %v19793_v27, %v19792_v53 }
 0x680   : > { %v7527_v31 = vpop.f32.mrf.mxu1  ;;  %10920 = vmatmul.mubr.msk.bf16.gmra.mxu1 %vm19787_vm4, %v18781_v5  ;;  %10794 = vmatprep.mubr.msk.bf16.mxu0 %vm19789_vm7, %v18781_v5 }
 0x681   : > { %v17193_v40 = vadd.f32 %v7983_v48, %v6765_v38  ;;  %v7528_v44 = vadd.f32 %v7527_v31, %v7238_v15  ;;  %10922 = vmatprep.mubr.msk.bf16.mxu1 %vm19791_vm9, %v18781_v5  ;;  %v7240_v20 = vpop.f32.mrf.mxu0  ;;  %v19794_v48 = vld [vmem:[#allocation115_spill] sm:$0xff]  ;;  %v19795_v15 = vld [vmem:[#allocation90_spill] sm:$0xff] }
 0x682   : > { %v7529_v6 = vpop.f32.mrf.mxu1  ;;  %v6767_v31 = vmul.f32 %v19795_v15, %v19794_v48  ;;  %v19796_v20 = vld [vmem:[#allocation75_spill] sm:$0xff] }
 0x683   : > { %v7984_v16 = vmul.f32 %v16826_v51, %v7528_v44  ;;  %v7241_v61 = vpop.f32.mrf.mxu0  ;;  %vm19797_vm11 = vnez %v19796_v20  ;;  %v19798_v51 = vld [vmem:[#allocation88_spill] sm:$0xff]  ;;  %v19800_v44 = vld [vmem:[#allocation89_spill] sm:$0xff] }
 0x684   : > { %v7530_v0 = vpop.f32.mrf.mxu1  ;;  %vm19799_vm3 = vnez %v19798_v51  ;;  %vm19801_vm8 = vnez %v19800_v44 }
 0x685   : > { %v17201_v30 = vadd.f32 %v7984_v16, %v6766_v49  ;;  %v7531_v29 = vadd.f32 %v7530_v0, %v7241_v61  ;;  %v7243_v7 = vpop.f32.mrf.mxu0  ;;  %v19802_v49 = vld [vmem:[#allocation27_spill] sm:$0xff]  ;;  %v19804_v61 = vld [vmem:[#allocation116_spill] sm:$0xff]  ;;  %v19805_v0 = vld [vmem:[#allocation73_spill] sm:$0xff] }
 0x686   : > { %v7532_v38 = vpop.f32.mrf.mxu1  ;;  %vm19803_vm15 = vnez %v19802_v49 }
 0x687   : > { %v7985_v8 = vmul.f32 %v16797_v10, %v7531_v29  ;;  %v7246_v9 = vpop.f32.mrf.mxu0  ;;  %10796 = vmatmul.mubr.msk.bf16.gmra.mxu0 %vm19797_vm11, %v18781_v5  ;;  %v6768_v29 = vmul.f32 %v19805_v0, %v19804_v61  ;;  %vm19814_vm11 = vnez %v19446_v37 }
 0x688   : > { %v7535_v6 = vpop.f32.mrf.mxu1  ;;  %10924 = vmatmul.mubr.msk.bf16.gmra.mxu1 %vm19799_vm3, %v18781_v5  ;;  %10798 = vmatprep.mubr.msk.bf16.mxu0 %vm19801_vm8, %v18781_v5  ;;  %vm19817_vm3 = vnez %v19451_v33  ;;  %v19823_v33 = vld [vmem:[#allocation82_spill] sm:$0xff] }
 0x689   : > { %v17215_v53 = vadd.f32 %v7985_v8, %v6767_v31  ;;  %v7536_v27 = vadd.f32 %v7535_v6, %v7246_v9  ;;  %10926 = vmatprep.mubr.msk.bf16.mxu1 %vm19803_vm15, %v18781_v5  ;;  %v7248_v10 = vpop.f32.mrf.mxu0  ;;  %v19806_v8 = vld [vmem:[#allocation220_spill] sm:$0xff]  ;;  %v19807_v9 = vld [vmem:[#allocation174_spill] sm:$0xff] }
 0x68a   : > { %v7537_v16 = vpop.f32.mrf.mxu1  ;;  %v6769_v6 = vmul.f32 %v19807_v9, %v19806_v8  ;;  %v19808_v10 = vld [vmem:[#allocation28_spill] sm:$0xff] }
 0x68b   : > { %v7986_v7 = vmul.f32 %v16848_v42, %v7536_v27  ;;  %v7249_v38 = vpop.f32.mrf.mxu0  ;;  %vm19809_vm4 = vnez %v19808_v10  ;;  %v19810_v42 = vld [vmem:[#allocation76_spill] sm:$0xff]  ;;  %v19812_v27 = vld [vmem:[#allocation7_spill] sm:$0xff] }
 0x68c   : > { %v7538_v48 = vpop.f32.mrf.mxu1  ;;  %vm19811_vm7 = vnez %v19810_v42  ;;  %vm19813_vm9 = vnez %v19812_v27 }
 0x68d   : > { %v17223_v15 = vadd.f32 %v7986_v7, %v6768_v29  ;;  %v7539_v20 = vadd.f32 %v7538_v48, %v7249_v38  ;;  %v7251_v51 = vpop.f32.mrf.mxu0  ;;  %v19815_v7 = vld [vmem:[#allocation172_spill] sm:$0xff] }
 0x68e   : > { %v7540_v31 = vpop.f32.mrf.mxu1  ;;  %v6770_v38 = vmul.f32 %v19815_v7, %v16489_v13 }
 0x68f   : > { %v7987_v44 = vmul.f32 %v16815_v34, %v7539_v20  ;;  %v7254_v49 = vpop.f32.mrf.mxu0  ;;  %10800 = vmatmul.mubr.msk.bf16.gmra.mxu0 %vm19809_vm4, %v18781_v5  ;;  %vm19822_vm4 = vnez %v19459_v4 }
 0x690   : > { %v7543_v16 = vpop.f32.mrf.mxu1  ;;  %10928 = vmatmul.mubr.msk.bf16.gmra.mxu1 %vm19811_vm7, %v18781_v5  ;;  %10802 = vmatprep.mubr.msk.bf16.mxu0 %vm19813_vm9, %v18781_v5  ;;  %vm19825_vm7 = vnez %v19463_v25  ;;  %v19831_v25 = vld [vmem:[#allocation32_spill] sm:$0xff] }
 0x691   : > { %v17237_v61 = vadd.f32 %v7987_v44, %v6769_v6  ;;  %v7544_v0 = vadd.f32 %v7543_v16, %v7254_v49  ;;  %10930 = vmatprep.mubr.msk.bf16.mxu1 %vm19814_vm11, %v18781_v5  ;;  %v7256_v34 = vpop.f32.mrf.mxu0  ;;  %v19816_v44 = vld [vmem:[#allocation29_spill] sm:$0xff]  ;;  %v19820_v16 = vld [vmem:[#allocation91_spill] sm:$0xff] }
 0x692   : > { %v7545_v29 = vpop.f32.mrf.mxu1  ;;  %v6771_v49 = vmul.f32 %v19816_v44, %v16502_v56  ;;  %vm19821_vm15 = vnez %v19820_v16  ;;  %v19828_v44 = vld [vmem:[#allocation35_spill] sm:$0xff] }
 0x693   : > { %v7988_v48 = vmul.f32 %v16870_v45, %v7544_v0  ;;  %v7257_v20 = vpop.f32.mrf.mxu0  ;;  %v19818_v45 = vld [vmem:[#allocation30_spill] sm:$0xff]  ;;  %v6772_v0 = vmul.f32 %v19823_v33, %v16519_v62  ;;  %vm19829_vm11 = vnez %v19828_v44 }
 0x694   : > { %v7546_v51 = vpop.f32.mrf.mxu1  ;;  %vm19819_vm8 = vnez %v19818_v45 }
 0x695   : > { %v17245_v31 = vadd.f32 %v7988_v48, %v6770_v38  ;;  %v7547_v8 = vadd.f32 %v7546_v51, %v7257_v20  ;;  %v7259_v9 = vpop.f32.mrf.mxu0 }
 0x696   : > { %v7548_v6 = vpop.f32.mrf.mxu1 }
 0x697   : > { %v7989_v37 = vmul.f32 %v16829_v17, %v7547_v8  ;;  %v7262_v10 = vpop.f32.mrf.mxu0  ;;  %10804 = vmatmul.mubr.msk.bf16.gmra.mxu0 %vm19817_vm3, %v18781_v5  ;;  %v19824_v8 = vld [vmem:[#allocation183_spill] sm:$0xff]  ;;  %vm19830_vm3 = vnez %v19470_v43 }
 0x698   : > { %v7551_v13 = vpop.f32.mrf.mxu1  ;;  %10932 = vmatmul.mubr.msk.bf16.gmra.mxu1 %vm19819_vm8, %v18781_v5  ;;  %10806 = vmatprep.mubr.msk.bf16.mxu0 %vm19821_vm15, %v18781_v5  ;;  %v6773_v9 = vmul.f32 %v19824_v8, %v16528_v57  ;;  %vm19834_vm8 = vnez %v19474_v19  ;;  %vm19835_vm15 = vnez %v19476_v28  ;;  %v19838_v19 = vld [vmem:[#allocation80_spill] sm:$0xff] }
 0x699   : > { %v17259_v42 = vadd.f32 %v7989_v37, %v6771_v49  ;;  %v7552_v27 = vadd.f32 %v7551_v13, %v7262_v10  ;;  %10934 = vmatprep.mubr.msk.bf16.mxu1 %vm19822_vm4, %v18781_v5  ;;  %v7264_v56 = vpop.f32.mrf.mxu0  ;;  %v19832_v10 = vld [vmem:[#allocation178_spill] sm:$0xff]  ;;  %vm19836_vm4 = vnez %v19478_v21 }
 0x69a   : > { %v7553_v17 = vpop.f32.mrf.mxu1  ;;  %v6774_v13 = vmul.f32 %v19832_v10, %v19831_v25  ;;  %v19844_v10 = vld [vmem:[#allocation43_spill] sm:$0xff] }
 0x69b   : > { %v7990_v34 = vmul.f32 %v16882_v23, %v7552_v27  ;;  %v7265_v29 = vpop.f32.mrf.mxu0  ;;  %v19826_v23 = vld [vmem:[#allocation78_spill] sm:$0xff] }
 0x69c   : > { %v7554_v7 = vpop.f32.mrf.mxu1  ;;  %vm19827_vm9 = vnez %v19826_v23  ;;  %v7828_v23 = vpop.permute.xlu0 %7827 }
 0x69d   : > { %v17267_v38 = vadd.f32 %v7990_v34, %v6772_v0  ;;  %v7555_v48 = vadd.f32 %v7554_v7, %v7265_v29  ;;  %v7267_v20 = vpop.f32.mrf.mxu0  ;;  %v19833_v34 = vld [vmem:[#allocation33_spill] sm:$0xff] }
 0x69e   : > { %v7556_v51 = vpop.f32.mrf.mxu1  ;;  %v6775_v29 = vmul.f32 %v19833_v34, %v16560_v12 }
 0x69f   : > { %v7991_v4 = vmul.f32 %v16850_v55, %v7555_v48  ;;  %v7270_v6 = vpop.f32.mrf.mxu0  ;;  %10808 = vmatmul.mubr.msk.bf16.gmra.mxu0 %vm19825_vm7, %v18781_v5  ;;  %vm19837_vm7 = vnez %v19481_v60  ;;  %v19839_v51 = vld [vmem:[#allocation92_spill] sm:$0xff] }
 0x6a0   : > { %v7559_v62 = vpop.f32.mrf.mxu1  ;;  %10936 = vmatmul.mubr.msk.bf16.gmra.mxu1 %vm19827_vm9, %v18781_v5  ;;  %10810 = vmatprep.mubr.msk.bf16.mxu0 %vm19829_vm11, %v18781_v5  ;;  %v6776_v8 = vmul.f32 %v19839_v51, %v19838_v19  ;;  %vm19841_vm9 = vnez %v19486_v2  ;;  %v19848_v2 = vld [vmem:[#allocation224_spill] sm:$0xff]  ;;  %v19851_v19 = vld [vmem:[#allocation225_spill] sm:$0xff]  ;;  %v19852_v51 = vld [vmem:[#allocation11_spill] sm:$0xff] }
 0x6a1   : > { %v17281_v49 = vadd.f32 %v7991_v4, %v6773_v9  ;;  %v7560_v37 = vadd.f32 %v7559_v62, %v7270_v6  ;;  %10938 = vmatprep.mubr.msk.bf16.mxu1 %vm19830_vm3, %v18781_v5  ;;  %v7272_v57 = vpop.f32.mrf.mxu0  ;;  %vm19845_vm3 = vnez %v19844_v10  ;;  %v19862_v10 = vld [vmem:[#allocation15_spill] sm:$0xff] }
 0x6a2   : > { %v7561_v55 = vpop.f32.mrf.mxu1 }
 0x6a3   : > { %v7992_v45 = vmul.f32 %v16898_v14, %v7560_v37  ;;  %v7273_v16 = vpop.f32.mrf.mxu0  ;;  %v19840_v37 = vld [vmem:[#allocation191_spill] sm:$0xff] }
 0x6a4   : > { %v7562_v27 = vpop.f32.mrf.mxu1  ;;  %v6777_v57 = vmul.f32 %v19840_v37, %v16587_v46  ;;  %v19846_v46 = vld [vmem:[#allocation60_spill] sm:$0xff] }
 0x6a5   : > { %v17289_v56 = vadd.f32 %v7992_v45, %v6774_v13  ;;  %v7563_v17 = vadd.f32 %v7562_v27, %v7273_v16  ;;  %v7275_v33 = vpop.f32.mrf.mxu0 }
 0x6a6   : > { %v7564_v0 = vpop.f32.mrf.mxu1 }
 0x6a7   : > { %v7993_v43 = vmul.f32 %v16873_v35, %v7563_v17  ;;  %v7278_v7 = vpop.f32.mrf.mxu0  ;;  %10812 = vmatmul.mubr.msk.bf16.gmra.mxu0 %vm19834_vm8, %v18781_v5  ;;  %vm19847_vm8 = vnez %v19846_v46  ;;  %v19849_v17 = vld [vmem:[#allocation188_spill] sm:$0xff] }
 0x6a8   : > { %v7567_v48 = vpop.f32.mrf.mxu1  ;;  %10940 = vmatmul.mubr.msk.bf16.gmra.mxu1 %vm19835_vm15, %v18781_v5  ;;  %10814 = vmatprep.mubr.msk.bf16.mxu0 %vm19836_vm4, %v18781_v5  ;;  %v6778_v33 = vmul.f32 %v19849_v17, %v19848_v2  ;;  %v19850_v0 = vld [vmem:[#allocation240_spill] sm:$0xff] }
 0x6a9   : > { %v17303_v14 = vadd.f32 %v7993_v43, %v6775_v29  ;;  %v7568_v20 = vadd.f32 %v7567_v48, %v7278_v7  ;;  %10942 = vmatprep.mubr.msk.bf16.mxu1 %vm19837_vm7, %v18781_v5  ;;  %v7280_v12 = vpop.f32.mrf.mxu0 }
 0x6aa   : > { %v7569_v35 = vpop.f32.mrf.mxu1  ;;  %v7836_v12 = vpop.permute.xlu0 %7835 }
 0x6ab   : > { %v7994_v9 = vmul.f32 %v16916_v1, %v7568_v20  ;;  %v7281_v28 = vpop.f32.mrf.mxu0  ;;  %v19842_v1 = vld [vmem:[#allocation42_spill] sm:$0xff] }
 0x6ac   : > { %v7570_v4 = vpop.f32.mrf.mxu1  ;;  %vm19843_vm11 = vnez %v19842_v1  ;;  %v19861_v1 = vld [vmem:[#allocation227_spill] sm:$0xff] }
 0x6ad   : > { %v17311_v6 = vadd.f32 %v7994_v9, %v6776_v8  ;;  %v7571_v21 = vadd.f32 %v7570_v4, %v7281_v28  ;;  %v7283_v62 = vpop.f32.mrf.mxu0  ;;  %v6779_v8 = vmul.f32 %v19852_v51, %v19851_v19  ;;  %v19853_v4 = vld [vmem:[#allocation40_spill] sm:$0xff]  ;;  %v19867_v51 = vld [vmem:[#allocation99_spill] sm:$0xff] }
 0x6ae   : > { %v7572_v44 = vpop.f32.mrf.mxu1  ;;  %vm19854_vm15 = vnez %v19853_v4  ;;  %v19855_v62 = vld [vmem:[#allocation96_spill] sm:$0xff]  ;;  %v19871_v4 = vld [vmem:[#allocation62_spill] sm:$0xff] }
 0x6af   : > { %v7995_v60 = vmul.f32 %v7828_v23, %v7571_v21  ;;  %v7286_v55 = vpop.f32.mrf.mxu0  ;;  %10816 = vmatmul.mubr.msk.bf16.gmra.mxu0 %vm19841_vm9, %v18781_v5  ;;  %vm19856_vm4 = vnez %v19855_v62  ;;  %v19857_v23 = vld [vmem:[#allocation61_spill] sm:$0xff] }
 0x6b0   : > { %v7575_v25 = vpop.f32.mrf.mxu1  ;;  %10944 = vmatmul.mubr.msk.bf16.gmra.mxu1 %vm19843_vm11, %v18781_v5  ;;  %10818 = vmatprep.mubr.msk.bf16.mxu0 %vm19845_vm3, %v18781_v5  ;;  %vm19858_vm7 = vnez %v19857_v23  ;;  %vm19868_vm3 = vnez %v19867_v51  ;;  %v19883_v51 = vld [vmem:[#allocation84_spill] sm:$0xff] }
 0x6b1   : > { %v17324_v13 = vadd.f32 %v7995_v60, %v6777_v57  ;;  %v7576_v45 = vadd.f32 %v7575_v25, %v7286_v55  ;;  %10946 = vmatprep.mubr.msk.bf16.mxu1 %vm19847_vm8, %v18781_v5  ;;  %v7288_v16 = vpop.f32.mrf.mxu0  ;;  %v19859_v57 = vld [vmem:[#allocation12_spill] sm:$0xff]  ;;  %v7840_v55 = vpop.permute.xlu1 %7839 }
 0x6b2   : > { %v7577_v27 = vpop.f32.mrf.mxu1  ;;  %vm19860_vm9 = vnez %v19859_v57  ;;  %v19874_v57 = vld [vmem:[#allocation195_spill] sm:$0xff] }
 0x6b3   : > { %v7996_v34 = vmul.f32 %v19850_v0, %v7576_v45  ;;  %v7289_v29 = vpop.f32.mrf.mxu0  ;;  %v6780_v45 = vmul.f32 %v19862_v10, %v19861_v1  ;;  %v7844_v0 = vpop.permute.xlu0 %7843 }
 0x6b4   : > { %v7578_v43 = vpop.f32.mrf.mxu1 }
 0x6b5   : > { %v17332_v7 = vadd.f32 %v7996_v34, %v6778_v33  ;;  %v7579_v48 = vadd.f32 %v7578_v43, %v7289_v29  ;;  %v7291_v20 = vpop.f32.mrf.mxu0  ;;  %v19863_v29 = vld [vmem:[#allocation229_spill] sm:$0xff]  ;;  %v7848_v62 = vpop.permute.xlu1 %7847 }
 0x6b6   : > { %v7580_v35 = vpop.f32.mrf.mxu1  ;;  %v19864_v43 = vld [vmem:[#allocation201_spill] sm:$0xff] }
 0x6b7   : > { %v7997_v9 = vmul.f32 %v7836_v12, %v7579_v48  ;;  %v7294_v28 = vpop.f32.mrf.mxu0  ;;  %10820 = vmatmul.mubr.msk.bf16.gmra.mxu0 %vm19854_vm15, %v18781_v5  ;;  %v6781_v48 = vmul.f32 %v19864_v43, %v19863_v29  ;;  %v19865_v35 = vld [vmem:[#allocation81_spill] sm:$0xff]  ;;  %vm19872_vm15 = vnez %v19871_v4  ;;  %v19877_v43 = vld [vmem:[#allocation103_spill] sm:$0xff] }
 0x6b8   : > { %v7583_v21 = vpop.f32.mrf.mxu1  ;;  %10948 = vmatmul.mubr.msk.bf16.gmra.mxu1 %vm19856_vm4, %v18781_v5  ;;  %10822 = vmatprep.mubr.msk.bf16.mxu0 %vm19858_vm7, %v18781_v5  ;;  %vm19866_vm11 = vnez %v19865_v35  ;;  %vm19878_vm4 = vnez %v19877_v43  ;;  %v19891_v43 = vld [vmem:[#allocation110_spill] sm:$0xff] }
 0x6b9   : > { %v17345_v44 = vadd.f32 %v7997_v9, %v6779_v8  ;;  %v7584_v37 = vadd.f32 %v7583_v21, %v7294_v28  ;;  %10950 = vmatprep.mubr.msk.bf16.mxu1 %vm19860_vm9, %v18781_v5  ;;  %v7296_v60 = vpop.f32.mrf.mxu0  ;;  %v19869_v8 = vld [vmem:[#allocation100_spill] sm:$0xff] }
 0x6ba   : > { %v7585_v25 = vpop.f32.mrf.mxu1  ;;  %vm19870_vm8 = vnez %v19869_v8 }
 0x6bb   : > { %v7998_v46 = vmul.f32 %v7840_v55, %v7584_v37  ;;  %v7297_v16 = vpop.f32.mrf.mxu0  ;;  %v19873_v37 = vld [vmem:[#allocation230_spill] sm:$0xff] }
 0x6bc   : > { %v7586_v27 = vpop.f32.mrf.mxu1  ;;  %v6782_v60 = vmul.f32 %v19874_v57, %v19873_v37 }
 0x6bd   : > { %v17352_v2 = vadd.f32 %v7998_v46, %v6780_v45  ;;  %v7587_v17 = vadd.f32 %v7586_v27, %v7297_v16  ;;  %v7299_v33 = vpop.f32.mrf.mxu0  ;;  %v7852_v16 = vpop.permute.xlu0 %7851 }
 0x6be   : > { %v7588_v34 = vpop.f32.mrf.mxu1  ;;  %v19876_v33 = vld [vmem:[#allocation98_spill] sm:$0xff] }
 0x6bf   : > { %v7999_v20 = vmul.f32 %v7844_v0, %v7587_v17  ;;  %v7302_v12 = vpop.f32.mrf.mxu0  ;;  %10824 = vmatmul.mubr.msk.bf16.gmra.mxu0 %vm19866_vm11, %v18781_v5  ;;  %v19875_v17 = vld [vmem:[#allocation231_spill] sm:$0xff]  ;;  %vm19884_vm11 = vnez %v19883_v51 }
 0x6c0   : > { %v7591_v19 = vpop.f32.mrf.mxu1  ;;  %10952 = vmatmul.mubr.msk.bf16.gmra.mxu1 %vm19868_vm3, %v18781_v5  ;;  %10826 = vmatprep.mubr.msk.bf16.mxu0 %vm19870_vm8, %v18781_v5  ;;  %v6783_v0 = vmul.f32 %v19876_v33, %v19875_v17  ;;  %vm19892_vm8 = vnez %v19891_v43  ;;  %v19903_v43 = vld [vmem:[#allocation112_spill] sm:$0xff] }
 0x6c1   : > { %v17365_v9 = vadd.f32 %v7999_v20, %v6781_v48  ;;  %v7592_v28 = vadd.f32 %v7591_v19, %v7302_v12  ;;  %10954 = vmatprep.mubr.msk.bf16.mxu1 %vm19872_vm15, %v18781_v5  ;;  %v7304_v21 = vpop.f32.mrf.mxu0  ;;  %v19879_v20 = vld [vmem:[#allocation104_spill] sm:$0xff]  ;;  %v19881_v12 = vld [vmem:[#allocation105_spill] sm:$0xff] }
 0x6c2   : > { %v7593_v23 = vpop.f32.mrf.mxu1  ;;  %vm19880_vm7 = vnez %v19879_v20  ;;  %vm19882_vm9 = vnez %v19881_v12  ;;  %v19885_v21 = vld [vmem:[#allocation232_spill] sm:$0xff] }
 0x6c3   : > { %v8000_v55 = vmul.f32 %v7848_v62, %v7592_v28  ;;  %v7305_v25 = vpop.f32.mrf.mxu0  ;;  %v7856_v28 = vpop.permute.xlu1 %7855  ;;  %v19886_v62 = vld [vmem:[#allocation95_spill] sm:$0xff] }
 0x6c4   : > { %v7594_v1 = vpop.f32.mrf.mxu1  ;;  %v6784_v23 = vmul.f32 %v19886_v62, %v19885_v21  ;;  %v19898_v21 = vld [vmem:[#allocation205_spill] sm:$0xff] }
 0x6c5   : > { %v17372_v10 = vadd.f32 %v8000_v55, %v6782_v60  ;;  %v7595_v45 = vadd.f32 %v7594_v1, %v7305_v25  ;;  %v7307_v46 = vpop.f32.mrf.mxu0 }
 0x6c6   : > { %v7596_v27 = vpop.f32.mrf.mxu1 }
 0x6c7   : > { %v8001_v34 = vmul.f32 %v7852_v16, %v7595_v45  ;;  %v7310_v29 = vpop.f32.mrf.mxu0  ;;  %10828 = vmatmul.mubr.msk.bf16.gmra.mxu0 %vm19878_vm4, %v18781_v5  ;;  %v7860_v45 = vpop.permute.xlu0 %7859  ;;  %v19887_v16 = vld [vmem:[#allocation97_spill] sm:$0xff]  ;;  %v19888_v27 = vld [vmem:[#allocation207_spill] sm:$0xff] }
 0x6c8   : > { %v7599_v48 = vpop.f32.mrf.mxu1  ;;  %10956 = vmatmul.mubr.msk.bf16.gmra.mxu1 %vm19880_vm7, %v18781_v5  ;;  %10830 = vmatprep.mubr.msk.bf16.mxu0 %vm19882_vm9, %v18781_v5  ;;  %v6785_v17 = vmul.f32 %v19888_v27, %v19887_v16  ;;  %v19899_v16 = vld [vmem:[#allocation41_spill] sm:$0xff]  ;;  %v19900_v27 = vld [vmem:[#allocation107_spill] sm:$0xff]  ;;  %vm19904_vm9 = vnez %v19903_v43 }
 0x6c9   : > { %v17385_v35 = vadd.f32 %v8001_v34, %v6783_v0  ;;  %v7600_v19 = vadd.f32 %v7599_v48, %v7310_v29  ;;  %10958 = vmatprep.mubr.msk.bf16.mxu1 %vm19884_vm11, %v18781_v5  ;;  %v7312_v8 = vpop.f32.mrf.mxu0  ;;  %v19889_v34 = vld [vmem:[#allocation109_spill] sm:$0xff]  ;;  %v19893_v48 = vld [vmem:[#allocation63_spill] sm:$0xff] }
 0x6ca   : > { %v7601_v4 = vpop.f32.mrf.mxu1  ;;  %vm19890_vm3 = vnez %v19889_v34  ;;  %vm19894_vm15 = vnez %v19893_v48  ;;  %v7864_v8 = vpop.permute.xlu1 %7863  ;;  %v19901_v34 = vld [vmem:[#allocation16_spill] sm:$0xff]  ;;  %v19913_v43 = vld [vmem:[#allocation49_spill] sm:$0xff] }
 0x6cb   : > { %v8002_v37 = vmul.f32 %v7856_v28, %v7600_v19  ;;  %v7313_v57 = vpop.f32.mrf.mxu0  ;;  %v19895_v19 = vld [vmem:[#allocation111_spill] sm:$0xff]  ;;  %v19897_v4 = vld [vmem:[#allocation233_spill] sm:$0xff]  ;;  %vm19902_vm7 = vnez %v19901_v34  ;;  %v19905_v48 = vld [vmem:[#allocation64_spill] sm:$0xff] }
 0x6cc   : > { %v7602_v60 = vpop.f32.mrf.mxu1  ;;  %vm19896_vm4 = vnez %v19895_v19  ;;  %v6786_v62 = vmul.f32 %v19898_v21, %v19897_v4  ;;  %vm19906_vm11 = vnez %v19905_v48  ;;  %v19909_v21 = vld [vmem:[#allocation83_spill] sm:$0xff] }
 0x6cd   : > { %v17392_v55 = vadd.f32 %v8002_v37, %v6784_v23  ;;  %v7603_v25 = vadd.f32 %v7602_v60, %v7313_v57  ;;  %v7315_v1 = vpop.f32.mrf.mxu0 }
 0x6ce   : > { %v7604_v46 = vpop.f32.mrf.mxu1 }
 0x6cf   : > { %v8003_v33 = vmul.f32 %v7860_v45, %v7603_v25  ;;  %v7318_v0 = vpop.f32.mrf.mxu0  ;;  %10832 = vmatmul.mubr.msk.bf16.gmra.mxu0 %vm19890_vm3, %v18781_v5  ;;  %v7868_v45 = vpop.permute.xlu0 %7867 }
 0x6d0   : > { %v7607_v29 = vpop.f32.mrf.mxu1  ;;  %10960 = vmatmul.mubr.msk.bf16.gmra.mxu1 %vm19892_vm8, %v18781_v5  ;;  %10834 = vmatprep.mubr.msk.bf16.mxu0 %vm19894_vm15, %v18781_v5  ;;  %vm19914_vm8 = vnez %v19913_v43  ;;  %v19924_v43 = vld [vmem:[#allocation47_spill] sm:$0xff] }
 0x6d1   : > { %v17405_v20 = vadd.f32 %v8003_v33, %v6785_v17  ;;  %v7608_v12 = vadd.f32 %v7607_v29, %v7318_v0  ;;  %10962 = vmatprep.mubr.msk.bf16.mxu1 %vm19896_vm4, %v18781_v5  ;;  %v7320_v51 = vpop.f32.mrf.mxu0  ;;  %v6787_v17 = vmul.f32 %v19900_v27, %v19899_v16 }
 0x6d2   : > { %v7609_v28 = vpop.f32.mrf.mxu1  ;;  %v19907_v51 = vld [vmem:[#allocation113_spill] sm:$0xff] }
 0x6d3   : > { %v8004_v23 = vmul.f32 %v7864_v8, %v7608_v12  ;;  %v7321_v37 = vpop.f32.mrf.mxu0  ;;  %vm19908_vm3 = vnez %v19907_v51  ;;  %v7872_v28 = vpop.permute.xlu1 %7871  ;;  %v19917_v51 = vld [vmem:[#allocation65_spill] sm:$0xff] }
 0x6d4   : > { %v7610_v57 = vpop.f32.mrf.mxu1  ;;  %v7876_v16 = vpop.permute.xlu0 %7875  ;;  %vm19918_vm4 = vnez %v19917_v51 }
 0x6d5   : > { %v17412_v60 = vadd.f32 %v8004_v23, %v6786_v62  ;;  %v7611_v25 = vadd.f32 %v7610_v57, %v7321_v37  ;;  %v7323_v1 = vpop.f32.mrf.mxu0  ;;  %v19910_v62 = vld [vmem:[#allocation102_spill] sm:$0xff] }
 0x6d6   : > { %v7612_v46 = vpop.f32.mrf.mxu1  ;;  %v6788_v23 = vmul.f32 %v19910_v62, %v19909_v21 }
 0x6d7   : > { %v8005_v33 = vmul.f32 %v7868_v45, %v7611_v25  ;;  %v7326_v0 = vpop.f32.mrf.mxu0  ;;  %10836 = vmatmul.mubr.msk.bf16.gmra.mxu0 %vm19902_vm7, %v18781_v5  ;;  %v7880_v62 = vpop.permute.xlu1 %7879 }
 0x6d8   : > { %v7615_v29 = vpop.f32.mrf.mxu1  ;;  %10964 = vmatmul.mubr.msk.bf16.gmra.mxu1 %vm19904_vm9, %v18781_v5  ;;  %10838 = vmatprep.mubr.msk.bf16.mxu0 %vm19906_vm11, %v18781_v5 }
 0x6d9   : > { %v17425_v12 = vadd.f32 %v8005_v33, %v6787_v17  ;;  %v7616_v19 = vadd.f32 %v7615_v29, %v7326_v0  ;;  %10966 = vmatprep.mubr.msk.bf16.mxu1 %vm19908_vm3, %v18781_v5  ;;  %v7328_v8 = vpop.f32.mrf.mxu0  ;;  %v19911_v17 = vld [vmem:[#allocation106_spill] sm:$0xff]  ;;  %v19912_v33 = vld [vmem:[#allocation213_spill] sm:$0xff] }
 0x6da   : > { %v7617_v4 = vpop.f32.mrf.mxu1  ;;  %v6789_v0 = vmul.f32 %v19912_v33, %v19911_v17 }
 0x6db   : > { %v8006_v37 = vmul.f32 %v7872_v28, %v7616_v19  ;;  %v7329_v57 = vpop.f32.mrf.mxu0  ;;  %v19915_v19 = vld [vmem:[#allocation117_spill] sm:$0xff]  ;;  %v19919_v4 = vld [vmem:[#allocation119_spill] sm:$0xff] }
 0x6dc   : > { %v7618_v25 = vpop.f32.mrf.mxu1  ;;  %vm19916_vm15 = vnez %v19915_v19  ;;  %vm19920_vm7 = vnez %v19919_v4  ;;  %v19925_v4 = vld [vmem:[#allocation51_spill] sm:$0xff] }
 0x6dd   : > { %v17432_v1 = vadd.f32 %v8006_v37, %v6788_v23  ;;  %v7619_v45 = vadd.f32 %v7618_v25, %v7329_v57  ;;  %v7331_v46 = vpop.f32.mrf.mxu0  ;;  %v19921_v37 = vld [vmem:[#allocation234_spill] sm:$0xff]  ;;  %v19922_v57 = vld [vmem:[#allocation211_spill] sm:$0xff]  ;;  %vm19926_vm9 = vnez %v19925_v4 }
 0x6de   : > { %v7620_v27 = vpop.f32.mrf.mxu1  ;;  %v6790_v25 = vmul.f32 %v19922_v57, %v19921_v37  ;;  %v19932_v57 = vld [vmem:[#allocation122_spill] sm:$0xff] }
 0x6df   : > { %v8007_v34 = vmul.f32 %v7876_v16, %v7619_v45  ;;  %v7334_v29 = vpop.f32.mrf.mxu0  ;;  %10840 = vmatmul.mubr.msk.bf16.gmra.mxu0 %vm19914_vm8, %v18781_v5  ;;  %vm19933_vm8 = vnez %v19932_v57 }
 0x6e0   : > { %v7623_v48 = vpop.f32.mrf.mxu1  ;;  %10968 = vmatmul.mubr.msk.bf16.gmra.mxu1 %vm19916_vm15, %v18781_v5  ;;  %10842 = vmatprep.mubr.msk.bf16.mxu0 %vm19918_vm4, %v18781_v5 }
 0x6e1   : > { %v17445_v8 = vadd.f32 %v8007_v34, %v6789_v0  ;;  %v7624_v28 = vadd.f32 %v7623_v48, %v7334_v29  ;;  %10970 = vmatprep.mubr.msk.bf16.mxu1 %vm19920_vm7, %v18781_v5  ;;  %v7336_v21 = vpop.f32.mrf.mxu0  ;;  %v7884_v0 = vpop.permute.xlu0 %7883  ;;  %v19923_v29 = vld [vmem:[#allocation235_spill] sm:$0xff] }
 0x6e2   : > { %v7625_v23 = vpop.f32.mrf.mxu1  ;;  %v6791_v48 = vmul.f32 %v19924_v43, %v19923_v29 }
 0x6e3   : > { %v8008_v45 = vmul.f32 %v7880_v62, %v7624_v28  ;;  %v7337_v46 = vpop.f32.mrf.mxu0  ;;  %v19927_v28 = vld [vmem:[#allocation120_spill] sm:$0xff]  ;;  %v19929_v62 = vld [vmem:[#allocation66_spill] sm:$0xff] }
 0x6e4   : > { %v7626_v16 = vpop.f32.mrf.mxu1  ;;  %vm19928_vm11 = vnez %v19927_v28  ;;  %vm19930_vm3 = vnez %v19929_v62 }
 0x6e5   : > { %v17452_v27 = vadd.f32 %v8008_v45, %v6790_v25  ;;  %v7627_v17 = vadd.f32 %v7626_v16, %v7337_v46  ;;  %v7339_v33 = vpop.f32.mrf.mxu0  ;;  %v7888_v45 = vpop.permute.xlu1 %7887  ;;  %v19934_v16 = vld [vmem:[#allocation236_spill] sm:$0xff] }
 0x6e6   : > { %v7628_v34 = vpop.f32.mrf.mxu1 }
 0x6e7   : > { %v8009_v19 = vmul.f32 %v7884_v0, %v7627_v17  ;;  %v7342_v51 = vpop.f32.mrf.mxu0  ;;  %10844 = vmatmul.mubr.msk.bf16.gmra.mxu0 %vm19926_vm9, %v18781_v5  ;;  %v19935_v17 = vld [vmem:[#allocation214_spill] sm:$0xff] }
 0x6e8   : > { %v7631_v21 = vpop.f32.mrf.mxu1  ;;  %10972 = vmatmul.mubr.msk.bf16.gmra.mxu1 %vm19928_vm11, %v18781_v5  ;;  %10846 = vmatprep.mubr.msk.bf16.mxu0 %vm19930_vm3, %v18781_v5  ;;  %v6792_v33 = vmul.f32 %v19935_v17, %v19934_v16 }
 0x6e9   : > { %v17465_v23 = vadd.f32 %v8009_v19, %v6791_v48  ;;  %v7632_v37 = vadd.f32 %v7631_v21, %v7342_v51  ;;  %10974 = vmatprep.mubr.msk.bf16.mxu1 %vm19933_vm8, %v18781_v5  ;;  %v7344_v25 = vpop.f32.mrf.mxu0  ;;  %v7892_v48 = vpop.permute.xlu0 %7891  ;;  %v19937_v51 = vld [vmem:[#allocation114_spill] sm:$0xff]  ;;  %v19938_v21 = vld [vmem:[#allocation217_spill] sm:$0xff] }
 0x6ea   : > { %v7633_v46 = vpop.f32.mrf.mxu1  ;;  %v6793_v62 = vmul.f32 %v19938_v21, %v19937_v51  ;;  %v19939_v25 = vld [vmem:[#allocation125_spill] sm:$0xff] }
 0x6eb   : > { %19931 = vst [vmem:[#allocation184_spill] sm:$0xff] %v17465_v23  ;;  %v8010_v0 = vmul.f32 %v7888_v45, %v7632_v37  ;;  %v7345_v34 = vpop.f32.mrf.mxu0  ;;  %vm19940_vm15 = vnez %v19939_v25  ;;  %v19941_v37 = vld [vmem:[#allocation126_spill] sm:$0xff]  ;;  %v19943_v45 = vld [vmem:[#allocation68_spill] sm:$0xff] }
 0x6ec   : > { %v7634_v29 = vpop.f32.mrf.mxu1  ;;  %vm19942_vm4 = vnez %v19941_v37  ;;  %vm19944_vm7 = vnez %v19943_v45 }
 0x6ed   : > { %v17472_v43 = vadd.f32 %v8010_v0, %v6792_v33  ;;  %v7635_v4 = vadd.f32 %v7634_v29, %v7345_v34  ;;  %v7347_v28 = vpop.f32.mrf.mxu0  ;;  %v19946_v33 = vld [vmem:[#allocation127_spill] sm:$0xff]  ;;  %v7896_v34 = vpop.permute.xlu1 %7895 }
 0x6ee   : > { %v7636_v19 = vpop.f32.mrf.mxu1  ;;  %vm19947_vm9 = vnez %v19946_v33  ;;  %v19949_v28 = vld [vmem:[#allocation215_spill] sm:$0xff] }
 0x6ef   : > { %19936 = vst [vmem:[#allocation151_spill] sm:$0xff] %v17472_v43  ;;  %v8011_v57 = vmul.f32 %v7892_v48, %v7635_v4  ;;  %v7350_v23 = vpop.f32.mrf.mxu0  ;;  %10848 = vmatmul.mubr.msk.bf16.gmra.mxu0 %vm19940_vm15, %v18781_v5  ;;  %v19948_v4 = vld [vmem:[#allocation237_spill] sm:$0xff] }
 0x6f0   : > { %v7639_v46 = vpop.f32.mrf.mxu1  ;;  %10976 = vmatmul.mubr.msk.bf16.gmra.mxu1 %vm19942_vm4, %v18781_v5  ;;  %10850 = vmatprep.mubr.msk.bf16.mxu0 %vm19944_vm7, %v18781_v5  ;;  %v6794_v48 = vmul.f32 %v19949_v28, %v19948_v4 }
 0x6f1   : > { %v17485_v16 = vadd.f32 %v8011_v57, %v6793_v62  ;;  %v7640_v17 = vadd.f32 %v7639_v46, %v7350_v23  ;;  %10978 = vmatprep.mubr.msk.bf16.mxu1 %vm19947_vm9, %v18781_v5  ;;  %v7352_v0 = vpop.f32.mrf.mxu0  ;;  %v7900_v62 = vpop.permute.xlu0 %7899  ;;  %v19951_v23 = vld [vmem:[#allocation118_spill] sm:$0xff] }
 0x6f2   : > { %v7641_v29 = vpop.f32.mrf.mxu1  ;;  %v19952_v46 = vld [vmem:[#allocation50_spill] sm:$0xff]  ;;  %v19953_v0 = vld [vmem:[#allocation129_spill] sm:$0xff] }
 0x6f3   : > { %19945 = vst [vmem:[#allocation185_spill] sm:$0xff] %v17485_v16  ;;  %v8012_v19 = vmul.f32 %v7896_v34, %v7640_v17  ;;  %v7353_v51 = vpop.f32.mrf.mxu0  ;;  %v6795_v16 = vmul.f32 %v19952_v46, %v19951_v23  ;;  %vm19954_vm11 = vnez %v19953_v0  ;;  %v19955_v17 = vld [vmem:[#allocation130_spill] sm:$0xff] }
 0x6f4   : > { %v7642_v21 = vpop.f32.mrf.mxu1  ;;  %vm19956_vm3 = vnez %v19955_v17  ;;  %v19957_v34 = vld [vmem:[#allocation70_spill] sm:$0xff] }
 0x6f5   : > { %v17492_v25 = vadd.f32 %v8012_v19, %v6794_v48  ;;  %v7643_v37 = vadd.f32 %v7642_v21, %v7353_v51  ;;  %v7355_v45 = vpop.f32.mrf.mxu0  ;;  %vm19958_vm8 = vnez %v19957_v34  ;;  %v19960_v48 = vld [vmem:[#allocation132_spill] sm:$0xff]  ;;  %v7904_v51 = vpop.permute.xlu1 %7903 }
 0x6f6   : > { %v7644_v57 = vpop.f32.mrf.mxu1  ;;  %vm19961_vm15 = vnez %v19960_v48  ;;  %v19963_v45 = vld [vmem:[#allocation218_spill] sm:$0xff] }
 0x6f7   : > { %19950 = vst [vmem:[#allocation186_spill] sm:$0xff] %v17492_v25  ;;  %v8013_v33 = vmul.f32 %v7900_v62, %v7643_v37  ;;  %v7358_v43 = vpop.f32.mrf.mxu0  ;;  %10852 = vmatmul.mubr.msk.bf16.gmra.mxu0 %vm19954_vm11, %v18781_v5  ;;  %v19962_v37 = vld [vmem:[#allocation238_spill] sm:$0xff] }
 0x6f8   : > { %v7647_v29 = vpop.f32.mrf.mxu1  ;;  %10980 = vmatmul.mubr.msk.bf16.gmra.mxu1 %vm19956_vm3, %v18781_v5  ;;  %10854 = vmatprep.mubr.msk.bf16.mxu0 %vm19958_vm8, %v18781_v5  ;;  %v6796_v62 = vmul.f32 %v19963_v45, %v19962_v37 }
 0x6f9   : > { %v17505_v4 = vadd.f32 %v8013_v33, %v6795_v16  ;;  %v7648_v28 = vadd.f32 %v7647_v29, %v7358_v43  ;;  %10982 = vmatprep.mubr.msk.bf16.mxu1 %vm19961_vm15, %v18781_v5  ;;  %v7360_v19 = vpop.f32.mrf.mxu0  ;;  %v7908_v16 = vpop.permute.xlu0 %7907  ;;  %v19965_v43 = vld [vmem:[#allocation239_spill] sm:$0xff]  ;;  %v19966_v29 = vld [vmem:[#allocation56_spill] sm:$0xff] }
 0x6fa   : > { %v7649_v21 = vpop.f32.mrf.mxu1  ;;  %v19967_v19 = vld [vmem:[#allocation135_spill] sm:$0xff] }
 0x6fb   : > { %19959 = vst [vmem:[#allocation189_spill] sm:$0xff] %v17505_v4  ;;  %v8014_v57 = vmul.f32 %v7904_v51, %v7648_v28  ;;  %v7361_v23 = vpop.f32.mrf.mxu0  ;;  %v6797_v4 = vmul.f32 %v19966_v29, %v19965_v43  ;;  %vm19968_vm4 = vnez %v19967_v19  ;;  %v19969_v28 = vld [vmem:[#allocation136_spill] sm:$0xff] }
 0x6fc   : > { %v7650_v46 = vpop.f32.mrf.mxu1  ;;  %vm19970_vm7 = vnez %v19969_v28  ;;  %v19971_v51 = vld [vmem:[#allocation72_spill] sm:$0xff] }
 0x6fd   : > { %v17512_v0 = vadd.f32 %v8014_v57, %v6796_v62  ;;  %v7651_v17 = vadd.f32 %v7650_v46, %v7361_v23  ;;  %v7363_v34 = vpop.f32.mrf.mxu0  ;;  %vm19972_vm9 = vnez %v19971_v51  ;;  %v19974_v62 = vld [vmem:[#allocation137_spill] sm:$0xff]  ;;  %v7912_v23 = vpop.permute.xlu1 %7911 }
 0x6fe   : > { %v7652_v33 = vpop.f32.mrf.mxu1  ;;  %vm19975_vm11 = vnez %v19974_v62  ;;  %v19977_v34 = vld [vmem:[#allocation219_spill] sm:$0xff] }
 0x6ff   : > { %19964 = vst [vmem:[#allocation145_spill] sm:$0xff] %v17512_v0  ;;  %v8015_v48 = vmul.f32 %v7908_v16, %v7651_v17  ;;  %v7366_v25 = vpop.f32.mrf.mxu0  ;;  %10856 = vmatmul.mubr.msk.bf16.gmra.mxu0 %vm19968_vm4, %v18781_v5  ;;  %v19976_v17 = vld [vmem:[#allocation124_spill] sm:$0xff] }
 0x700   : > { %v7655_v21 = vpop.f32.mrf.mxu1  ;;  %10984 = vmatmul.mubr.msk.bf16.gmra.mxu1 %vm19970_vm7, %v18781_v5  ;;  %10858 = vmatprep.mubr.msk.bf16.mxu0 %vm19972_vm9, %v18781_v5  ;;  %v6798_v16 = vmul.f32 %v19977_v34, %v19976_v17 }
 0x701   : > { %v17525_v37 = vadd.f32 %v8015_v48, %v6797_v4  ;;  %v7656_v45 = vadd.f32 %v7655_v21, %v7366_v25  ;;  %10986 = vmatprep.mubr.msk.bf16.mxu1 %vm19975_vm11, %v18781_v5  ;;  %v7368_v57 = vpop.f32.mrf.mxu0  ;;  %v7916_v4 = vpop.permute.xlu0 %7915  ;;  %v19979_v25 = vld [vmem:[#allocation128_spill] sm:$0xff]  ;;  %v19980_v21 = vld [vmem:[#allocation77_spill] sm:$0xff] }
 0x702   : > { %v7657_v46 = vpop.f32.mrf.mxu1  ;;  %v19981_v57 = vld [vmem:[#allocation142_spill] sm:$0xff] }
 0x703   : > { %19973 = vst [vmem:[#allocation93_spill] sm:$0xff] %v17525_v37  ;;  %v8016_v33 = vmul.f32 %v7912_v23, %v7656_v45  ;;  %v7369_v43 = vpop.f32.mrf.mxu0  ;;  %v6799_v37 = vmul.f32 %v19980_v21, %v19979_v25  ;;  %vm19982_vm3 = vnez %v19981_v57  ;;  %v19983_v45 = vld [vmem:[#allocation143_spill] sm:$0xff]  ;;  %v19985_v23 = vld [vmem:[#allocation22_spill] sm:$0xff] }
 0x704   : > { %v7658_v29 = vpop.f32.mrf.mxu1  ;;  %vm19984_vm8 = vnez %v19983_v45  ;;  %vm19986_vm15 = vnez %v19985_v23 }
 0x705   : > { %v17532_v19 = vadd.f32 %v8016_v33, %v6798_v16  ;;  %v7659_v28 = vadd.f32 %v7658_v29, %v7369_v43  ;;  %v7371_v51 = vpop.f32.mrf.mxu0  ;;  %v19988_v16 = vld [vmem:[#allocation144_spill] sm:$0xff]  ;;  %v7920_v43 = vpop.permute.xlu1 %7919 }
 0x706   : > { %v7660_v48 = vpop.f32.mrf.mxu1  ;;  %vm19989_vm4 = vnez %v19988_v16  ;;  %v19991_v51 = vld [vmem:[#allocation121_spill] sm:$0xff] }
 0x707   : > { %19978 = vst [vmem:[#allocation153_spill] sm:$0xff] %v17532_v19  ;;  %v8017_v62 = vmul.f32 %v7916_v4, %v7659_v28  ;;  %v7374_v0 = vpop.f32.mrf.mxu0  ;;  %10860 = vmatmul.mubr.msk.bf16.gmra.mxu0 %vm19982_vm3, %v18781_v5  ;;  %v19990_v28 = vld [vmem:[#allocation52_spill] sm:$0xff] }
 0x708   : > { %v7663_v46 = vpop.f32.mrf.mxu1  ;;  %10988 = vmatmul.mubr.msk.bf16.gmra.mxu1 %vm19984_vm8, %v18781_v5  ;;  %10862 = vmatprep.mubr.msk.bf16.mxu0 %vm19986_vm15, %v18781_v5  ;;  %v6800_v4 = vmul.f32 %v19991_v51, %v19990_v28 }
 0x709   : > { %v17545_v17 = vadd.f32 %v8017_v62, %v6799_v37  ;;  %v7664_v34 = vadd.f32 %v7663_v46, %v7374_v0  ;;  %10990 = vmatprep.mubr.msk.bf16.mxu1 %vm19989_vm4, %v18781_v5  ;;  %v7376_v33 = vpop.f32.mrf.mxu0  ;;  %v7924_v37 = vpop.permute.xlu0 %7923  ;;  %v19993_v0 = vld [vmem:[#allocation131_spill] sm:$0xff]  ;;  %v19994_v46 = vld [vmem:[#allocation57_spill] sm:$0xff] }
 0x70a   : > { %v7665_v29 = vpop.f32.mrf.mxu1  ;;  %v19995_v33 = vld [vmem:[#allocation147_spill] sm:$0xff] }
 0x70b   : > { %19987 = vst [vmem:[#allocation190_spill] sm:$0xff] %v17545_v17  ;;  %v8018_v48 = vmul.f32 %v7920_v43, %v7664_v34  ;;  %v7377_v25 = vpop.f32.mrf.mxu0  ;;  %v6801_v17 = vmul.f32 %v19994_v46, %v19993_v0  ;;  %vm19996_vm7 = vnez %v19995_v33  ;;  %v19997_v34 = vld [vmem:[#allocation79_spill] sm:$0xff]  ;;  %v19999_v43 = vld [vmem:[#allocation148_spill] sm:$0xff] }
 0x70c   : > { %v7666_v21 = vpop.f32.mrf.mxu1  ;;  %vm19998_vm9 = vnez %v19997_v34  ;;  %vm20000_vm11 = vnez %v19999_v43 }
 0x70d   : > { %v17552_v57 = vadd.f32 %v8018_v48, %v6800_v4  ;;  %v7667_v45 = vadd.f32 %v7666_v21, %v7377_v25  ;;  %v7379_v23 = vpop.f32.mrf.mxu0  ;;  %v20002_v4 = vld [vmem:[#allocation150_spill] sm:$0xff]  ;;  %v7928_v25 = vpop.permute.xlu1 %7927 }
 0x70e   : > { %v7668_v62 = vpop.f32.mrf.mxu1  ;;  %vm20003_vm3 = vnez %v20002_v4  ;;  %v20005_v23 = vld [vmem:[#allocation221_spill] sm:$0xff] }
 0x70f   : > { %19992 = vst [vmem:[#allocation192_spill] sm:$0xff] %v17552_v57  ;;  %v8019_v16 = vmul.f32 %v7924_v37, %v7667_v45  ;;  %v7382_v19 = vpop.f32.mrf.mxu0  ;;  %10864 = vmatmul.mubr.msk.bf16.gmra.mxu0 %vm19996_vm7, %v18781_v5  ;;  %v20004_v45 = vld [vmem:[#allocation133_spill] sm:$0xff] }
 0x710   : > { %v7671_v29 = vpop.f32.mrf.mxu1  ;;  %10992 = vmatmul.mubr.msk.bf16.gmra.mxu1 %vm19998_vm9, %v18781_v5  ;;  %10866 = vmatprep.mubr.msk.bf16.mxu0 %vm20000_vm11, %v18781_v5  ;;  %v6802_v37 = vmul.f32 %v20005_v23, %v20004_v45 }
 0x711   : > { %v17565_v28 = vadd.f32 %v8019_v16, %v6801_v17  ;;  %v7672_v51 = vadd.f32 %v7671_v29, %v7382_v19  ;;  %10994 = vmatprep.mubr.msk.bf16.mxu1 %vm20003_vm3, %v18781_v5  ;;  %v7384_v48 = vpop.f32.mrf.mxu0  ;;  %v7932_v17 = vpop.permute.xlu0 %7931  ;;  %v20007_v19 = vld [vmem:[#allocation138_spill] sm:$0xff] }
 0x712   : > { %v7673_v21 = vpop.f32.mrf.mxu1  ;;  %v20008_v29 = vld [vmem:[#allocation58_spill] sm:$0xff] }
 0x713   : > { %20001 = vst [vmem:[#allocation194_spill] sm:$0xff] %v17565_v28  ;;  %v8020_v62 = vmul.f32 %v7928_v25, %v7672_v51  ;;  %v7385_v0 = vpop.f32.mrf.mxu0  ;;  %v6803_v28 = vmul.f32 %v20008_v29, %v20007_v19  ;;  %v20009_v48 = vld [vmem:[#allocation154_spill] sm:$0xff]  ;;  %v20011_v51 = vld [vmem:[#allocation155_spill] sm:$0xff] }
 0x714   : > { %v7674_v46 = vpop.f32.mrf.mxu1  ;;  %vm20010_vm8 = vnez %v20009_v48  ;;  %vm20012_vm15 = vnez %v20011_v51  ;;  %v20013_v25 = vld [vmem:[#allocation26_spill] sm:$0xff] }
 0x715   : > { %v17572_v33 = vadd.f32 %v8020_v62, %v6802_v37  ;;  %v7675_v34 = vadd.f32 %v7674_v46, %v7385_v0  ;;  %v7387_v43 = vpop.f32.mrf.mxu0  ;;  %vm20014_vm4 = vnez %v20013_v25  ;;  %v20016_v37 = vld [vmem:[#allocation17_spill] sm:$0xff]  ;;  %v7936_v0 = vpop.permute.xlu1 %7935 }
 0x716   : > { %v7676_v16 = vpop.f32.mrf.mxu1  ;;  %vm20017_vm7 = vnez %v20016_v37  ;;  %v20019_v43 = vld [vmem:[#allocation222_spill] sm:$0xff] }
 0x717   : > { %20006 = vst [vmem:[#allocation25_spill] sm:$0xff] %v17572_v33  ;;  %v8021_v4 = vmul.f32 %v7932_v17, %v7675_v34  ;;  %v7390_v57 = vpop.f32.mrf.mxu0  ;;  %10868 = vmatmul.mubr.msk.bf16.gmra.mxu0 %vm20010_vm8, %v18781_v5  ;;  %v20018_v34 = vld [vmem:[#allocation140_spill] sm:$0xff] }
 0x718   : > { %v7679_v21 = vpop.f32.mrf.mxu1  ;;  %10996 = vmatmul.mubr.msk.bf16.gmra.mxu1 %vm20012_vm15, %v18781_v5  ;;  %10870 = vmatprep.mubr.msk.bf16.mxu0 %vm20014_vm4, %v18781_v5  ;;  %v6804_v17 = vmul.f32 %v20019_v43, %v20018_v34 }
 0x719   : > { %v17585_v45 = vadd.f32 %v8021_v4, %v6803_v28  ;;  %v7680_v23 = vadd.f32 %v7679_v21, %v7390_v57  ;;  %10998 = vmatprep.mubr.msk.bf16.mxu1 %vm20017_vm7, %v18781_v5  ;;  %v7392_v62 = vpop.f32.mrf.mxu0  ;;  %v7940_v28 = vpop.permute.xlu0 %7939  ;;  %v20021_v57 = vld [vmem:[#allocation149_spill] sm:$0xff]  ;;  %v20022_v21 = vld [vmem:[#allocation34_spill] sm:$0xff] }
 0x71a   : > { %v7681_v46 = vpop.f32.mrf.mxu1  ;;  %v20023_v62 = vld [vmem:[#allocation157_spill] sm:$0xff] }
 0x71b   : > { %20015 = vst [vmem:[#allocation196_spill] sm:$0xff] %v17585_v45  ;;  %v8022_v16 = vmul.f32 %v7936_v0, %v7680_v23  ;;  %v7393_v19 = vpop.f32.mrf.mxu0  ;;  %v6805_v45 = vmul.f32 %v20022_v21, %v20021_v57  ;;  %vm20024_vm9 = vnez %v20023_v62  ;;  %v20025_v23 = vld [vmem:[#allocation158_spill] sm:$0xff]  ;;  %v20027_v0 = vld [vmem:[#allocation8_spill] sm:$0xff] }
 0x71c   : > { %v7682_v29 = vpop.f32.mrf.mxu1  ;;  %vm20026_vm11 = vnez %v20025_v23  ;;  %vm20028_vm3 = vnez %v20027_v0 }
 0x71d   : > { %v17592_v48 = vadd.f32 %v8022_v16, %v6804_v17  ;;  %v7683_v51 = vadd.f32 %v7682_v29, %v7393_v19  ;;  %v7395_v25 = vpop.f32.mrf.mxu0  ;;  %v20030_v17 = vld [vmem:[#allocation159_spill] sm:$0xff]  ;;  %v7944_v19 = vpop.permute.xlu1 %7943 }
 0x71e   : > { %v7684_v4 = vpop.f32.mrf.mxu1  ;;  %vm20031_vm8 = vnez %v20030_v17  ;;  %v20033_v25 = vld [vmem:[#allocation223_spill] sm:$0xff] }
 0x71f   : > { %20020 = vst [vmem:[#allocation156_spill] sm:$0xff] %v17592_v48  ;;  %v8023_v37 = vmul.f32 %v7940_v28, %v7683_v51  ;;  %v7398_v33 = vpop.f32.mrf.mxu0  ;;  %10872 = vmatmul.mubr.msk.bf16.gmra.mxu0 %vm20024_vm9, %v18781_v5  ;;  %v20032_v51 = vld [vmem:[#allocation241_spill] sm:$0xff] }
 0x720   : > { %v7687_v46 = vpop.f32.mrf.mxu1  ;;  %11000 = vmatmul.mubr.msk.bf16.gmra.mxu1 %vm20026_vm11, %v18781_v5  ;;  %10874 = vmatprep.mubr.msk.bf16.mxu0 %vm20028_vm3, %v18781_v5  ;;  %v6806_v28 = vmul.f32 %v20033_v25, %v20032_v51 }
 0x721   : > { %v17605_v34 = vadd.f32 %v8023_v37, %v6805_v45  ;;  %v7688_v43 = vadd.f32 %v7687_v46, %v7398_v33  ;;  %11002 = vmatprep.mubr.msk.bf16.mxu1 %vm20031_vm8, %v18781_v5  ;;  %v7400_v16 = vpop.f32.mrf.mxu0  ;;  %v7948_v45 = vpop.permute.xlu0 %7947  ;;  %v20035_v33 = vld [vmem:[#allocation242_spill] sm:$0xff]  ;;  %v20036_v46 = vld [vmem:[#allocation37_spill] sm:$0xff] }
 0x722   : > { %v7689_v29 = vpop.f32.mrf.mxu1  ;;  %v20037_v16 = vld [vmem:[#allocation53_spill] sm:$0xff] }
 0x723   : > { %20029 = vst [vmem:[#allocation197_spill] sm:$0xff] %v17605_v34  ;;  %v8024_v4 = vmul.f32 %v7944_v19, %v7688_v43  ;;  %v7401_v57 = vpop.f32.mrf.mxu0  ;;  %v6807_v34 = vmul.f32 %v20036_v46, %v20035_v33  ;;  %vm20038_vm15 = vnez %v20037_v16  ;;  %v20039_v43 = vld [vmem:[#allocation162_spill] sm:$0xff]  ;;  %v20041_v19 = vld [vmem:[#allocation20_spill] sm:$0xff] }
 0x724   : > { %v7690_v21 = vpop.f32.mrf.mxu1  ;;  %vm20040_vm4 = vnez %v20039_v43  ;;  %vm20042_vm7 = vnez %v20041_v19 }
 0x725   : > { %v17612_v62 = vadd.f32 %v8024_v4, %v6806_v28  ;;  %v7691_v23 = vadd.f32 %v7690_v21, %v7401_v57  ;;  %v7403_v0 = vpop.f32.mrf.mxu0  ;;  %v20044_v28 = vld [vmem:[#allocation163_spill] sm:$0xff]  ;;  %v7952_v57 = vpop.permute.xlu1 %7951 }
 0x726   : > { %v7692_v37 = vpop.f32.mrf.mxu1  ;;  %vm20045_vm9 = vnez %v20044_v28  ;;  %v20047_v0 = vld [vmem:[#allocation59_spill] sm:$0xff] }
 0x727   : > { %20034 = vst [vmem:[#allocation198_spill] sm:$0xff] %v17612_v62  ;;  %v8025_v17 = vmul.f32 %v7948_v45, %v7691_v23  ;;  %v7406_v48 = vpop.f32.mrf.mxu0  ;;  %10876 = vmatmul.mubr.msk.bf16.gmra.mxu0 %vm20038_vm15, %v18781_v5  ;;  %v20046_v23 = vld [vmem:[#allocation243_spill] sm:$0xff] }
 0x728   : > { %v7695_v29 = vpop.f32.mrf.mxu1  ;;  %11004 = vmatmul.mubr.msk.bf16.gmra.mxu1 %vm20040_vm4, %v18781_v5  ;;  %10878 = vmatprep.mubr.msk.bf16.mxu0 %vm20042_vm7, %v18781_v5  ;;  %v6808_v45 = vmul.f32 %v20047_v0, %v20046_v23 }
 0x729   : > { %v17625_v51 = vadd.f32 %v8025_v17, %v6807_v34  ;;  %v7696_v25 = vadd.f32 %v7695_v29, %v7406_v48  ;;  %11006 = vmatprep.mubr.msk.bf16.mxu1 %vm20045_vm9, %v18781_v5  ;;  %v7408_v4 = vpop.f32.mrf.mxu0  ;;  %v7956_v34 = vpop.permute.xlu0 %7955  ;;  %v20049_v48 = vld [vmem:[#allocation244_spill] sm:$0xff]  ;;  %v20050_v29 = vld [vmem:[#allocation226_spill] sm:$0xff] }
 0x72a   : > { %v7697_v21 = vpop.f32.mrf.mxu1  ;;  %v20051_v4 = vld [vmem:[#allocation165_spill] sm:$0xff] }
 0x72b   : > { %20043 = vst [vmem:[#allocation200_spill] sm:$0xff] %v17625_v51  ;;  %v8026_v37 = vmul.f32 %v7952_v57, %v7696_v25  ;;  %v7409_v33 = vpop.f32.mrf.mxu0  ;;  %v6809_v51 = vmul.f32 %v20050_v29, %v20049_v48  ;;  %vm20052_vm11 = vnez %v20051_v4  ;;  %v20053_v25 = vld [vmem:[#allocation166_spill] sm:$0xff] }
 0x72c   : > { %v7698_v46 = vpop.f32.mrf.mxu1  ;;  %vm20054_vm3 = vnez %v20053_v25  ;;  %v20055_v57 = vld [vmem:[#allocation10_spill] sm:$0xff] }
 0x72d   : > { %v17632_v16 = vadd.f32 %v8026_v37, %v6808_v45  ;;  %v7699_v43 = vadd.f32 %v7698_v46, %v7409_v33  ;;  %v7411_v19 = vpop.f32.mrf.mxu0  ;;  %vm20056_vm8 = vnez %v20055_v57  ;;  %v20058_v45 = vld [vmem:[#allocation87_spill] sm:$0xff]  ;;  %v7960_v33 = vpop.permute.xlu1 %7959 }
 0x72e   : > { %v7700_v17 = vpop.f32.mrf.mxu1  ;;  %vm20059_vm15 = vnez %v20058_v45  ;;  %v20061_v19 = vld [vmem:[#allocation36_spill] sm:$0xff] }
 0x72f   : > { %20048 = vst [vmem:[#allocation152_spill] sm:$0xff] %v17632_v16  ;;  %v8027_v28 = vmul.f32 %v7956_v34, %v7699_v43  ;;  %v7414_v62 = vpop.f32.mrf.mxu0  ;;  %10880 = vmatmul.mubr.msk.bf16.gmra.mxu0 %vm20052_vm11, %v18781_v5  ;;  %v20060_v43 = vld [vmem:[#allocation245_spill] sm:$0xff] }
 0x730   : > { %v7703_v21 = vpop.f32.mrf.mxu1  ;;  %11008 = vmatmul.mubr.msk.bf16.gmra.mxu1 %vm20054_vm3, %v18781_v5  ;;  %10882 = vmatprep.mubr.msk.bf16.mxu0 %vm20056_vm8, %v18781_v5  ;;  %v6810_v34 = vmul.f32 %v20061_v19, %v20060_v43  ;;  %vm20074_vm3 = vnez %v19687_v32  ;;  %vm20075_vm8 = vnez %v19689_v24 }
 0x731   : > { %v17645_v23 = vadd.f32 %v8027_v28, %v6809_v51  ;;  %v7704_v0 = vadd.f32 %v7703_v21, %v7414_v62  ;;  %11010 = vmatprep.mubr.msk.bf16.mxu1 %vm20059_vm15, %v18781_v5  ;;  %v7416_v37 = vpop.f32.mrf.mxu0  ;;  %v7964_v51 = vpop.permute.xlu0 %7963  ;;  %v20063_v62 = vld [vmem:[#allocation246_spill] sm:$0xff]  ;;  %v20064_v21 = vld [vmem:[#allocation228_spill] sm:$0xff] }
 0x732   : > { %v7705_v46 = vpop.f32.mrf.mxu1  ;;  %v20065_v37 = vld [vmem:[#allocation168_spill] sm:$0xff] }
 0x733   : > { %20057 = vst [vmem:[#allocation202_spill] sm:$0xff] %v17645_v23  ;;  %v8028_v17 = vmul.f32 %v7960_v33, %v7704_v0  ;;  %v7417_v48 = vpop.f32.mrf.mxu0  ;;  %v6811_v23 = vmul.f32 %v20064_v21, %v20063_v62  ;;  %vm20066_vm4 = vnez %v20065_v37  ;;  %v20067_v0 = vld [vmem:[#allocation169_spill] sm:$0xff]  ;;  %v20069_v33 = vld [vmem:[#allocation38_spill] sm:$0xff] }
 0x734   : > { %v7706_v29 = vpop.f32.mrf.mxu1  ;;  %vm20068_vm7 = vnez %v20067_v0  ;;  %vm20070_vm9 = vnez %v20069_v33 }
 0x735   : > { %v17652_v4 = vadd.f32 %v8028_v17, %v6810_v34  ;;  %v7707_v25 = vadd.f32 %v7706_v29, %v7417_v48  ;;  %v7419_v57 = vpop.f32.mrf.mxu0  ;;  %v20072_v34 = vld [vmem:[#allocation171_spill] sm:$0xff]  ;;  %v8930_v48 = vpop.permute.xlu1 %8929 }
 0x736   : > { %v7708_v28 = vpop.f32.mrf.mxu1  ;;  %vm20073_vm11 = vnez %v20072_v34  ;;  %v8934_v21 = vpop.permute.xlu0 %8933  ;;  %v20079_v34 = vld [vmem:[#allocation141_spill] sm:$0xff] }
 0x737   : > { %20062 = vst [vmem:[#allocation67_spill] sm:$0xff] %v17652_v4  ;;  %v8029_v45 = vmul.f32 %v7964_v51, %v7707_v25  ;;  %v8384_v16 = vpop.f32.mrf.mxu0  ;;  %10884 = vmatmul.mubr.msk.bf16.gmra.mxu0 %vm20066_vm4, %v18781_v5 }
 0x738   : > { %v8673_v46 = vpop.f32.mrf.mxu1  ;;  %11012 = vmatmul.mubr.msk.bf16.gmra.mxu1 %vm20068_vm7, %v18781_v5  ;;  %10886 = vmatprep.mubr.msk.bf16.mxu0 %vm20070_vm9, %v18781_v5  ;;  %vm20082_vm7 = vnez %v19701_v50  ;;  %vm20083_vm9 = vnez %v19703_v22 }
 0x739   : > { %v17665_v43 = vadd.f32 %v8029_v45, %v6811_v23  ;;  %v8674_v19 = vadd.f32 %v8673_v46, %v8384_v16  ;;  %11014 = vmatprep.mubr.msk.bf16.mxu1 %vm20073_vm11, %v18781_v5  ;;  %v8386_v17 = vpop.f32.mrf.mxu0  ;;  %v8938_v16 = vpop.permute.xlu1 %8937  ;;  %v20076_v45 = vld [vmem:[#allocation39_spill] sm:$0xff]  ;;  %v20078_v46 = vld [vmem:[#allocation170_spill] sm:$0xff] }
 0x73a   : > { %v8675_v29 = vpop.f32.mrf.mxu1  ;;  %vm20077_vm15 = vnez %v20076_v45 }
 0x73b   : > { %20071 = vst [vmem:[#allocation203_spill] sm:$0xff] %v17665_v43  ;;  %v8387_v25 = vpop.f32.mrf.mxu0  ;;  %v9184_v51 = vmul.f32 %v8930_v48, %v8674_v19  ;;  %v20080_v29 = vld [vmem:[#allocation176_spill] sm:$0xff] }
 0x73c   : > { %v8676_v57 = vpop.f32.mrf.mxu1  ;;  %vm20081_vm4 = vnez %v20080_v29 }
 0x73d   : > { %v8677_v28 = vadd.f32 %v8676_v57, %v8387_v25  ;;  %v8389_v62 = vpop.f32.mrf.mxu0  ;;  %v9248_v19 = vadd.f32 %v9184_v51, %v20078_v46  ;;  %v8942_v45 = vpop.permute.xlu1 %8941  ;;  %v20087_v46 = vld [vmem:[#allocation134_spill] sm:$0xff] }
 0x73e   : > { %v8678_v37 = vpop.f32.mrf.mxu1 }
 0x73f   : > { %v9185_v0 = vmul.f32 %v8934_v21, %v8677_v28  ;;  %v8392_v33 = vpop.f32.mrf.mxu0  ;;  %10888 = vmatmul.mubr.msk.bf16.gmra.mxu0 %vm20074_vm3, %v18781_v5 }
 0x740   : > { %v8681_v23 = vpop.f32.mrf.mxu1  ;;  %11016 = vmatmul.mubr.msk.bf16.gmra.mxu1 %vm20075_vm8, %v18781_v5  ;;  %10890 = vmatprep.mubr.msk.bf16.mxu0 %vm20077_vm15, %v18781_v5  ;;  %vm20090_vm8 = vnez %v19715_v59  ;;  %vm20091_vm15 = vnez %v19717_v58 }
 0x741   : > { %v9249_v17 = vadd.f32 %v9185_v0, %v20079_v34  ;;  %v8682_v48 = vadd.f32 %v8681_v23, %v8392_v33  ;;  %11018 = vmatprep.mubr.msk.bf16.mxu1 %vm20081_vm4, %v18781_v5  ;;  %v8394_v32 = vpop.f32.mrf.mxu0  ;;  %v20084_v33 = vld [vmem:[#allocation13_spill] sm:$0xff]  ;;  %v20088_v34 = vld [vmem:[#allocation31_spill] sm:$0xff] }
 0x742   : > { %v8683_v25 = vpop.f32.mrf.mxu1  ;;  %vm20085_vm11 = vnez %v20084_v33  ;;  %vm20089_vm3 = vnez %v20088_v34  ;;  %v8946_v32 = vpop.permute.xlu0 %8945  ;;  %v20095_v33 = vld [vmem:[#allocation175_spill] sm:$0xff] }
 0x743   : > { %v11306_v57 = vpack.c.bf16 %v9249_v17, %v9248_v19  ;;  %v8395_v28 = vpop.f32.mrf.mxu0  ;;  %v9186_v24 = vmul.f32 %v8938_v16, %v8682_v48  ;;  %v20086_v16 = vld [vmem:[#allocation21_spill] sm:$0xff] }
 0x744   : > { %v8684_v62 = vpop.f32.mrf.mxu1 }
 0x745   : > { %11307 = vst [vmem:[%s12290_s10] sm:$0xff] %v11306_v57   ;;  %v8685_v21 = vadd.f32 %v8684_v62, %v8395_v28  ;;  %v8397_v37 = vpop.f32.mrf.mxu0  ;;  %v9250_v23 = vadd.f32 %v9186_v24, %v20086_v16  ;;  %v8950_v62 = vpop.permute.xlu1 %8949 }
 0x746   : > { %v8686_v43 = vpop.f32.mrf.mxu1 }
 0x747   : > { %v9187_v4 = vmul.f32 %v8942_v45, %v8685_v21  ;;  %v8400_v51 = vpop.f32.mrf.mxu0  ;;  %10892 = vmatmul.mubr.msk.bf16.gmra.mxu0 %vm20082_vm7, %v18781_v5  ;;  %v20092_v45 = vld [vmem:[#allocation14_spill] sm:$0xff] }
 0x748   : > { %v8689_v0 = vpop.f32.mrf.mxu1  ;;  %11020 = vmatmul.mubr.msk.bf16.gmra.mxu1 %vm20083_vm9, %v18781_v5  ;;  %10894 = vmatprep.mubr.msk.bf16.mxu0 %vm20085_vm11, %v18781_v5  ;;  %vm20093_vm4 = vnez %v20092_v45  ;;  %vm20098_vm9 = vnez %v19729_v3  ;;  %vm20099_vm11 = vnez %v19731_v47 }
 0x749   : > { %v9251_v43 = vadd.f32 %v9187_v4, %v20087_v46  ;;  %v8690_v19 = vadd.f32 %v8689_v0, %v8400_v51  ;;  %11022 = vmatprep.mubr.msk.bf16.mxu1 %vm20089_vm3, %v18781_v5  ;;  %v8402_v50 = vpop.f32.mrf.mxu0  ;;  %v20094_v51 = vld [vmem:[#allocation173_spill] sm:$0xff]  ;;  %v20096_v46 = vld [vmem:[#allocation187_spill] sm:$0xff] }
 0x74a   : > { %v8691_v17 = vpop.f32.mrf.mxu1  ;;  %vm20097_vm7 = vnez %v20096_v46  ;;  %v8954_v50 = vpop.permute.xlu0 %8953 }
 0x74b   : > { %v11311_v48 = vpack.c.bf16 %v9251_v43, %v9250_v23  ;;  %v8403_v29 = vpop.f32.mrf.mxu0  ;;  %v9188_v25 = vmul.f32 %v8946_v32, %v8690_v19  ;;  %v8958_v32 = vpop.permute.xlu1 %8957 }
 0x74c   : > { %v8692_v22 = vpop.f32.mrf.mxu1 }
 0x74d   : > { %11463 = vst [vmem:[%s12290_s10 + $0x8] sm:$0xff] %v11311_v48   ;;  %v8693_v57 = vadd.f32 %v8692_v22, %v8403_v29  ;;  %v8405_v28 = vpop.f32.mrf.mxu0  ;;  %v9252_v0 = vadd.f32 %v9188_v25, %v20094_v51  ;;  %v20104_v51 = vld [vmem:[#allocation193_spill] sm:$0xff] }
 0x74e   : > { %v8694_v21 = vpop.f32.mrf.mxu1 }
 0x74f   : > { %v9189_v24 = vmul.f32 %v8950_v62, %v8693_v57  ;;  %v8408_v4 = vpop.f32.mrf.mxu0  ;;  %10896 = vmatmul.mubr.msk.bf16.gmra.mxu0 %vm20090_vm8, %v18781_v5  ;;  %v20100_v62 = vld [vmem:[#allocation94_spill] sm:$0xff]  ;;  %v20102_v21 = vld [vmem:[#allocation177_spill] sm:$0xff]  ;;  %vm20105_vm8 = vnez %v20104_v51 }
 0x750   : > { %v8697_v37 = vpop.f32.mrf.mxu1  ;;  %11024 = vmatmul.mubr.msk.bf16.gmra.mxu1 %vm20091_vm15, %v18781_v5  ;;  %10898 = vmatprep.mubr.msk.bf16.mxu0 %vm20093_vm4, %v18781_v5  ;;  %vm20101_vm3 = vnez %v20100_v62 }
 0x751   : > { %v9253_v16 = vadd.f32 %v9189_v24, %v20095_v33  ;;  %v8698_v23 = vadd.f32 %v8697_v37, %v8408_v4  ;;  %11026 = vmatprep.mubr.msk.bf16.mxu1 %vm20097_vm7, %v18781_v5  ;;  %v8410_v59 = vpop.f32.mrf.mxu0  ;;  %v20103_v4 = vld [vmem:[#allocation146_spill] sm:$0xff] }
 0x752   : > { %v8699_v43 = vpop.f32.mrf.mxu1 }
 0x753   : > { %v11316_v19 = vpack.c.bf16 %v9253_v16, %v9252_v0  ;;  %v8411_v34 = vpop.f32.mrf.mxu0  ;;  %v9190_v17 = vmul.f32 %v8954_v50, %v8698_v23  ;;  %v8962_v23 = vpop.permute.xlu0 %8961 }
 0x754   : > { %v8700_v58 = vpop.f32.mrf.mxu1 }
 0x755   : > { %11464 = vst [vmem:[%s12290_s10 + $0x10] sm:$0xff] %v11316_v19   ;;  %v8701_v48 = vadd.f32 %v8700_v58, %v8411_v34  ;;  %v8413_v29 = vpop.f32.mrf.mxu0  ;;  %v9254_v24 = vadd.f32 %v9190_v17, %v20102_v21  ;;  %v8966_v19 = vpop.permute.xlu1 %8965 }
 0x756   : > { %v8702_v22 = vpop.f32.mrf.mxu1  ;;  %v20107_v29 = vld [vmem:[#allocation179_spill] sm:$0xff] }
 0x757   : > { %v9191_v25 = vmul.f32 %v8958_v32, %v8701_v48  ;;  %v8416_v57 = vpop.f32.mrf.mxu0  ;;  %10900 = vmatmul.mubr.msk.bf16.gmra.mxu0 %vm20098_vm9, %v18781_v5  ;;  %v20108_v22 = vld [vmem:[#allocation55_spill] sm:$0xff] }
 0x758   : > { %v8705_v28 = vpop.f32.mrf.mxu1  ;;  %11028 = vmatmul.mubr.msk.bf16.gmra.mxu1 %vm20099_vm11, %v18781_v5  ;;  %10902 = vmatprep.mubr.msk.bf16.mxu0 %vm20101_vm3, %v18781_v5 }
 0x759   : > { %v9255_v37 = vadd.f32 %v9191_v25, %v20103_v4  ;;  %v8706_v45 = vadd.f32 %v8705_v28, %v8416_v57  ;;  %11030 = vmatprep.mubr.msk.bf16.mxu1 %vm20105_vm8, %v18781_v5  ;;  %v8418_v3 = vpop.f32.mrf.mxu0  ;;  %v20109_v28 = vld [vmem:[#allocation199_spill] sm:$0xff]  ;;  %v8970_v4 = vpop.permute.xlu0 %8969 }
 0x75a   : > { %v8707_v0 = vpop.f32.mrf.mxu1  ;;  %vm20110_vm15 = vnez %v20109_v28  ;;  %v8974_v3 = vpop.permute.xlu1 %8973 }
 0x75b   : > { %v11321_v33 = vpack.c.bf16 %v9255_v37, %v9254_v24  ;;  %v8419_v16 = vpop.f32.mrf.mxu0  ;;  %v9192_v46 = vmul.f32 %v8962_v23, %v8706_v45 }
 0x75c   : > { %v8708_v47 = vpop.f32.mrf.mxu1 }
 0x75d   : > { %11465 = vst [vmem:[%s12290_s10 + $0x18] sm:$0xff] %v11321_v33   ;;  %v8709_v59 = vadd.f32 %v8708_v47, %v8419_v16  ;;  %v8421_v43 = vpop.f32.mrf.mxu0  ;;  %v9256_v32 = vadd.f32 %v9192_v46, %v20107_v29  ;;  %v20112_v46 = vld [vmem:[#allocation180_spill] sm:$0xff]  ;;  %v8978_v29 = vpop.permute.xlu0 %8977 }
 0x75e   : > { %v8710_v34 = vpop.f32.mrf.mxu1  ;;  %v20113_v43 = vld [vmem:[#allocation181_spill] sm:$0xff] }
 0x75f   : > { %v9193_v50 = vmul.f32 %v8966_v19, %v8709_v59  ;;  %v8424_v58 = vpop.f32.mrf.mxu0  ;;  %10904 = vmatmul.mubr.msk.bf16.gmra.mxu0 %vm19744_vm0, %v18781_v5 }
 0x760   : > { %v8713_v17 = vpop.f32.mrf.mxu1  ;;  %11032 = vmatmul.mubr.msk.bf16.gmra.mxu1 %vm19746_vm13, %v18781_v5  ;;  %10906 = vmatprep.mubr.msk.bf16.mxu0 %vm19748_vm12, %v18781_v5 }
 0x761   : > { %v9257_v25 = vadd.f32 %v9193_v50, %v20108_v22  ;;  %v8714_v57 = vadd.f32 %v8713_v17, %v8424_v58  ;;  %11034 = vmatprep.mubr.msk.bf16.mxu1 %vm20110_vm15, %v18781_v5  ;;  %v8426_v39 = vpop.f32.mrf.mxu0 }
 0x762   : > { %v8715_v62 = vpop.f32.mrf.mxu1 }
 0x763   : > { %v11326_v21 = vpack.c.bf16 %v9257_v25, %v9256_v32  ;;  %v8427_v24 = vpop.f32.mrf.mxu0  ;;  %v9194_v37 = vmul.f32 %v8970_v4, %v8714_v57  ;;  %v8982_v57 = vpop.permute.xlu1 %8981 }
 0x764   : > { %v8716_v54 = vpop.f32.mrf.mxu1 }
 0x765   : > { %11466 = vst [vmem:[%s12290_s10 + $0x20] sm:$0xff] %v11326_v21   ;;  %v8717_v45 = vadd.f32 %v8716_v54, %v8427_v24  ;;  %v8429_v51 = vpop.f32.mrf.mxu0  ;;  %v9258_v59 = vadd.f32 %v9194_v37, %v20112_v46  ;;  %v20115_v24 = vld [vmem:[#allocation182_spill] sm:$0xff]  ;;  %v20116_v54 = vld [vmem:[#allocation139_spill] sm:$0xff] }
 0x766   : > { %v8718_v0 = vpop.f32.mrf.mxu1 }
 0x767   : > { %v9195_v33 = vmul.f32 %v8974_v3, %v8717_v45  ;;  %v8432_v16 = vpop.f32.mrf.mxu0  ;;  %10908 = vmatmul.mubr.msk.bf16.gmra.mxu0 %vm16301_vm10, %v18781_v5 }
 0x768   : > { %v8721_v23 = vpop.f32.mrf.mxu1  ;;  %11036 = vmatmul.mubr.msk.bf16.gmra.mxu1 %vm16310_vm1, %v18781_v5  ;;  %10910 = vmatprep.mubr.msk.bf16.mxu0 %vm16320_vm2, %v18781_v5 }
 0x769   : > { %v9259_v19 = vadd.f32 %v9195_v33, %v20113_v43  ;;  %v8722_v34 = vadd.f32 %v8721_v23, %v8432_v16  ;;  %11038 = vmatprep.mubr.msk.bf16.mxu1 %vm19762_vm14, %v18781_v5  ;;  %v8434_v11 = vpop.f32.mrf.mxu0  ;;  %v8986_v16 = vpop.permute.xlu0 %8985 }
 0x76a   : > { %v8723_v58 = vpop.f32.mrf.mxu1 }
 0x76b   : > { %v11331_v17 = vpack.c.bf16 %v9259_v19, %v9258_v59  ;;  %v8435_v48 = vpop.f32.mrf.mxu0  ;;  %v9196_v32 = vmul.f32 %v8978_v29, %v8722_v34  ;;  %v8990_v59 = vpop.permute.xlu1 %8989 }
 0x76c   : > { %v8724_v41 = vpop.f32.mrf.mxu1 }
 0x76d   : > { %11467 = vst [vmem:[%s12290_s10 + $0x28] sm:$0xff] %v11331_v17   ;;  %v8725_v22 = vadd.f32 %v8724_v41, %v8435_v48  ;;  %v8437_v25 = vpop.f32.mrf.mxu0  ;;  %v9260_v4 = vadd.f32 %v9196_v32, %v20115_v24  ;;  %v8994_v41 = vpop.permute.xlu0 %8993 }
 0x76e   : > { %v8726_v28 = vpop.f32.mrf.mxu1 }
 0x76f   : > { %v9197_v39 = vmul.f32 %v8982_v57, %v8725_v22  ;;  %v8440_v62 = vpop.f32.mrf.mxu0  ;;  %10912 = vmatmul.mubr.msk.bf16.gmra.mxu0 %vm16358_vm6, %v18781_v5  ;;  %v8998_v28 = vpop.permute.xlu1 %8997 }
 0x770   : > { %v8729_v21 = vpop.f32.mrf.mxu1  ;;  %11040 = vmatmul.mubr.msk.bf16.gmra.mxu1 %vm16370_vm5, %v18781_v5 }
 0x771   : > { %v9261_v37 = vadd.f32 %v9197_v39, %v20116_v54  ;;  %v8730_v45 = vadd.f32 %v8729_v21, %v8440_v62  ;;  %v8442_v51 = vpop.f32.mrf.mxu0 }
 0x772   : > { %v8731_v3 = vpop.f32.mrf.mxu1 }
 0x773   : > { %v11336_v0 = vpack.c.bf16 %v9261_v37, %v9260_v4  ;;  %v8443_v33 = vpop.f32.mrf.mxu0  ;;  %v9198_v47 = vmul.f32 %v8986_v16, %v8730_v45  ;;  %v9002_v3 = vpop.permute.xlu0 %9001 }
 0x774   : > { %v8732_v23 = vpop.f32.mrf.mxu1 }
 0x775   : > { %11468 = vst [vmem:[%s12290_s10 + $0x30] sm:$0xff] %v11336_v0   ;;  %v8733_v63 = vadd.f32 %v8732_v23, %v8443_v33  ;;  %v8445_v46 = vpop.f32.mrf.mxu0  ;;  %v9262_v34 = vadd.f32 %v9198_v47, %v17157_v52  ;;  %v9006_v47 = vpop.permute.xlu1 %9005 }
 0x776   : > { %v8734_v43 = vpop.f32.mrf.mxu1 }
 0x777   : > { %v9199_v26 = vmul.f32 %v8990_v59, %v8733_v63  ;;  %v8448_v5 = vpop.f32.mrf.mxu0 }
 0x778   : > { %v8737_v19 = vpop.f32.mrf.mxu1 }
 0x779   : > { %v9263_v50 = vadd.f32 %v9199_v26, %v17171_v36  ;;  %v8738_v11 = vadd.f32 %v8737_v19, %v8448_v5  ;;  %v8450_v58 = vpop.f32.mrf.mxu0 }
 0x77a   : > { %v8739_v17 = vpop.f32.mrf.mxu1 }
 0x77b   : > { %v11341_v48 = vpack.c.bf16 %v9263_v50, %v9262_v34  ;;  %v8451_v29 = vpop.f32.mrf.mxu0  ;;  %v9200_v22 = vmul.f32 %v8994_v41, %v8738_v11  ;;  %v9010_v11 = vpop.permute.xlu0 %9009 }
 0x77c   : > { %v8740_v32 = vpop.f32.mrf.mxu1  ;;  %v9014_v41 = vpop.permute.xlu1 %9013 }
 0x77d   : > { %11469 = vst [vmem:[%s12290_s10 + $0x38] sm:$0xff] %v11341_v48   ;;  %v8741_v25 = vadd.f32 %v8740_v32, %v8451_v29  ;;  %v8453_v57 = vpop.f32.mrf.mxu0  ;;  %v9264_v52 = vadd.f32 %v9200_v22, %v17179_v18 }
 0x77e   : > { %v8742_v39 = vpop.f32.mrf.mxu1 }
 0x77f   : > { %v9201_v62 = vmul.f32 %v8998_v28, %v8741_v25  ;;  %v8456_v21 = vpop.f32.mrf.mxu0 }
 0x780   : > { %v8745_v24 = vpop.f32.mrf.mxu1 }
 0x781   : > { %v9265_v36 = vadd.f32 %v9201_v62, %v17193_v40  ;;  %v8746_v4 = vadd.f32 %v8745_v24, %v8456_v21  ;;  %v8458_v54 = vpop.f32.mrf.mxu0 }
 0x782   : > { %v8747_v37 = vpop.f32.mrf.mxu1 }
 0x783   : > { %v11346_v45 = vpack.c.bf16 %v9265_v36, %v9264_v52  ;;  %v8459_v51 = vpop.f32.mrf.mxu0  ;;  %v9202_v33 = vmul.f32 %v9002_v3, %v8746_v4  ;;  %v9018_v52 = vpop.permute.xlu0 %9017 }
 0x784   : > { %v8748_v0 = vpop.f32.mrf.mxu1 }
 0x785   : > { %11470 = vst [vmem:[%s12290_s10 + $0x40] sm:$0xff] %v11346_v45   ;;  %v8749_v16 = vadd.f32 %v8748_v0, %v8459_v51  ;;  %v8461_v23 = vpop.f32.mrf.mxu0  ;;  %v9266_v18 = vadd.f32 %v9202_v33, %v17201_v30  ;;  %v9022_v45 = vpop.permute.xlu1 %9021 }
 0x786   : > { %v8750_v63 = vpop.f32.mrf.mxu1 }
 0x787   : > { %v9203_v46 = vmul.f32 %v9006_v47, %v8749_v16  ;;  %v8464_v59 = vpop.f32.mrf.mxu0 }
 0x788   : > { %v8753_v43 = vpop.f32.mrf.mxu1 }
 0x789   : > { %v9267_v40 = vadd.f32 %v9203_v46, %v17215_v53  ;;  %v8754_v26 = vadd.f32 %v8753_v43, %v8464_v59  ;;  %v8466_v5 = vpop.f32.mrf.mxu0  ;;  %v9026_v59 = vpop.permute.xlu0 %9025 }
 0x78a   : > { %v8755_v19 = vpop.f32.mrf.mxu1  ;;  %v9030_v5 = vpop.permute.xlu1 %9029 }
 0x78b   : > { %v11351_v34 = vpack.c.bf16 %v9267_v40, %v9266_v18  ;;  %v8467_v50 = vpop.f32.mrf.mxu0  ;;  %v9204_v17 = vmul.f32 %v9010_v11, %v8754_v26 }
 0x78c   : > { %v8756_v58 = vpop.f32.mrf.mxu1 }
 0x78d   : > { %11471 = vst [vmem:[%s12290_s10 + $0x48] sm:$0xff] %v11351_v34   ;;  %v8757_v48 = vadd.f32 %v8756_v58, %v8467_v50  ;;  %v8469_v29 = vpop.f32.mrf.mxu0  ;;  %v9268_v30 = vadd.f32 %v9204_v17, %v17223_v15 }
 0x78e   : > { %v8758_v32 = vpop.f32.mrf.mxu1 }
 0x78f   : > { %v9205_v22 = vmul.f32 %v9014_v41, %v8757_v48  ;;  %v8472_v25 = vpop.f32.mrf.mxu0  ;;  %v9034_v32 = vpop.permute.xlu0 %9033 }
 0x790   : > { %v8761_v57 = vpop.f32.mrf.mxu1 }
 0x791   : > { %v9269_v53 = vadd.f32 %v9205_v22, %v17237_v61  ;;  %v8762_v28 = vadd.f32 %v8761_v57, %v8472_v25  ;;  %v8474_v39 = vpop.f32.mrf.mxu0 }
 0x792   : > { %v8763_v62 = vpop.f32.mrf.mxu1 }
 0x793   : > { %v11356_v21 = vpack.c.bf16 %v9269_v53, %v9268_v30  ;;  %v8475_v24 = vpop.f32.mrf.mxu0  ;;  %v9206_v4 = vmul.f32 %v9018_v52, %v8762_v28  ;;  %v9038_v53 = vpop.permute.xlu1 %9037 }
 0x794   : > { %v8764_v36 = vpop.f32.mrf.mxu1 }
 0x795   : > { %11472 = vst [vmem:[%s12290_s10 + $0x50] sm:$0xff] %v11356_v21   ;;  %v8765_v54 = vadd.f32 %v8764_v36, %v8475_v24  ;;  %v8477_v37 = vpop.f32.mrf.mxu0  ;;  %v9270_v15 = vadd.f32 %v9206_v4, %v17245_v31 }
 0x796   : > { %v8766_v51 = vpop.f32.mrf.mxu1  ;;  %v9042_v37 = vpop.permute.xlu0 %9041 }
 0x797   : > { %v9207_v3 = vmul.f32 %v9022_v45, %v8765_v54  ;;  %v8480_v0 = vpop.f32.mrf.mxu0 }
 0x798   : > { %v8769_v33 = vpop.f32.mrf.mxu1 }
 0x799   : > { %v9271_v61 = vadd.f32 %v9207_v3, %v17259_v42  ;;  %v8770_v16 = vadd.f32 %v8769_v33, %v8480_v0  ;;  %v8482_v23 = vpop.f32.mrf.mxu0  ;;  %v9046_v33 = vpop.permute.xlu1 %9045 }
 0x79a   : > { %v8771_v47 = vpop.f32.mrf.mxu1 }
 0x79b   : > { %v11361_v63 = vpack.c.bf16 %v9271_v61, %v9270_v15  ;;  %v8483_v46 = vpop.f32.mrf.mxu0  ;;  %v9208_v18 = vmul.f32 %v9026_v59, %v8770_v16 }
 0x79c   : > { %v8772_v43 = vpop.f32.mrf.mxu1 }
 0x79d   : > { %11473 = vst [vmem:[%s12290_s10 + $0x58] sm:$0xff] %v11361_v63   ;;  %v8773_v40 = vadd.f32 %v8772_v43, %v8483_v46  ;;  %v8485_v26 = vpop.f32.mrf.mxu0  ;;  %v9272_v31 = vadd.f32 %v9208_v18, %v17267_v38  ;;  %v9050_v18 = vpop.permute.xlu0 %9049 }
 0x79e   : > { %v8774_v19 = vpop.f32.mrf.mxu1 }
 0x79f   : > { %v9209_v34 = vmul.f32 %v9030_v5, %v8773_v40  ;;  %v8488_v50 = vpop.f32.mrf.mxu0 }
 0x7a0   : > { %v8777_v11 = vpop.f32.mrf.mxu1 }
 0x7a1   : > { %v9273_v42 = vadd.f32 %v9209_v34, %v17281_v49  ;;  %v8778_v58 = vadd.f32 %v8777_v11, %v8488_v50  ;;  %v8490_v17 = vpop.f32.mrf.mxu0  ;;  %v9054_v34 = vpop.permute.xlu1 %9053 }
 0x7a2   : > { %v8779_v48 = vpop.f32.mrf.mxu1 }
 0x7a3   : > { %v11366_v29 = vpack.c.bf16 %v9273_v42, %v9272_v31  ;;  %v8491_v41 = vpop.f32.mrf.mxu0  ;;  %v9210_v25 = vmul.f32 %v9034_v32, %v8778_v58  ;;  %v9058_v32 = vpop.permute.xlu0 %9057 }
 0x7a4   : > { %v8780_v22 = vpop.f32.mrf.mxu1 }
 0x7a5   : > { %11474 = vst [vmem:[%s12290_s10 + $0x60] sm:$0xff] %v11366_v29   ;;  %v8781_v57 = vadd.f32 %v8780_v22, %v8491_v41  ;;  %v8493_v30 = vpop.f32.mrf.mxu0  ;;  %v9274_v38 = vadd.f32 %v9210_v25, %v17289_v56 }
 0x7a6   : > { %v8782_v28 = vpop.f32.mrf.mxu1 }
 0x7a7   : > { %v9211_v39 = vmul.f32 %v9038_v53, %v8781_v57  ;;  %v8496_v62 = vpop.f32.mrf.mxu0  ;;  %v9062_v53 = vpop.permute.xlu1 %9061 }
 0x7a8   : > { %v8785_v21 = vpop.f32.mrf.mxu1 }
 0x7a9   : > { %v9275_v49 = vadd.f32 %v9211_v39, %v17303_v14  ;;  %v8786_v24 = vadd.f32 %v8785_v21, %v8496_v62  ;;  %v8498_v52 = vpop.f32.mrf.mxu0 }
 0x7aa   : > { %v8787_v36 = vpop.f32.mrf.mxu1 }
 0x7ab   : > { %v11371_v4 = vpack.c.bf16 %v9275_v49, %v9274_v38  ;;  %v8499_v54 = vpop.f32.mrf.mxu0  ;;  %v9212_v51 = vmul.f32 %v9042_v37, %v8786_v24 }
 0x7ac   : > { %v8788_v45 = vpop.f32.mrf.mxu1 }
 0x7ad   : > { %11475 = vst [vmem:[%s12290_s10 + $0x68] sm:$0xff] %v11371_v4   ;;  %v8789_v3 = vadd.f32 %v8788_v45, %v8499_v54  ;;  %v8501_v0 = vpop.f32.mrf.mxu0  ;;  %v9276_v56 = vadd.f32 %v9212_v51, %v17311_v6  ;;  %v9066_v4 = vpop.permute.xlu0 %9065 }
 0x7ae   : > { %v8790_v15 = vpop.f32.mrf.mxu1 }
 0x7af   : > { %v9213_v61 = vmul.f32 %v9046_v33, %v8789_v3  ;;  %v8504_v16 = vpop.f32.mrf.mxu0  ;;  %v9070_v3 = vpop.permute.xlu1 %9069 }
 0x7b0   : > { %v8793_v23 = vpop.f32.mrf.mxu1 }
 0x7b1   : > { %v9277_v14 = vadd.f32 %v9213_v61, %v17324_v13  ;;  %v8794_v47 = vadd.f32 %v8793_v23, %v8504_v16  ;;  %v8506_v63 = vpop.f32.mrf.mxu0 }
 0x7b2   : > { %v8795_v46 = vpop.f32.mrf.mxu1  ;;  %v9074_v63 = vpop.permute.xlu0 %9073 }
 0x7b3   : > { %v11376_v59 = vpack.c.bf16 %v9277_v14, %v9276_v56  ;;  %v8507_v43 = vpop.f32.mrf.mxu0  ;;  %v9214_v26 = vmul.f32 %v9050_v18, %v8794_v47 }
 0x7b4   : > { %v8796_v40 = vpop.f32.mrf.mxu1 }
 0x7b5   : > { %11476 = vst [vmem:[%s12290_s10 + $0x70] sm:$0xff] %v11376_v59   ;;  %v8797_v5 = vadd.f32 %v8796_v40, %v8507_v43  ;;  %v8509_v19 = vpop.f32.mrf.mxu0  ;;  %v9278_v6 = vadd.f32 %v9214_v26, %v17332_v7  ;;  %v9078_v40 = vpop.permute.xlu1 %9077 }
 0x7b6   : > { %v8798_v50 = vpop.f32.mrf.mxu1 }
 0x7b7   : > { %v9215_v11 = vmul.f32 %v9054_v34, %v8797_v5  ;;  %v8512_v31 = vpop.f32.mrf.mxu0 }
 0x7b8   : > { %v8801_v42 = vpop.f32.mrf.mxu1 }
 0x7b9   : > { %v9279_v13 = vadd.f32 %v9215_v11, %v17345_v44  ;;  %v8802_v58 = vadd.f32 %v8801_v42, %v8512_v31  ;;  %v8514_v17 = vpop.f32.mrf.mxu0 }
 0x7ba   : > { %v8803_v48 = vpop.f32.mrf.mxu1 }
 0x7bb   : > { %v11381_v29 = vpack.c.bf16 %v9279_v13, %v9278_v6  ;;  %v8515_v41 = vpop.f32.mrf.mxu0  ;;  %v9216_v25 = vmul.f32 %v9058_v32, %v8802_v58  ;;  %v9082_v13 = vpop.permute.xlu0 %9081 }
 0x7bc   : > { %v8804_v22 = vpop.f32.mrf.mxu1 }
 0x7bd   : > { %11477 = vst [vmem:[%s12290_s10 + $0x78] sm:$0xff] %v11381_v29   ;;  %v8805_v57 = vadd.f32 %v8804_v22, %v8515_v41  ;;  %v8517_v30 = vpop.f32.mrf.mxu0  ;;  %v9280_v7 = vadd.f32 %v9216_v25, %v17352_v2  ;;  %v9086_v41 = vpop.permute.xlu1 %9085 }
 0x7be   : > { %v8806_v28 = vpop.f32.mrf.mxu1 }
 0x7bf   : > { %v9217_v39 = vmul.f32 %v9062_v53, %v8805_v57  ;;  %v8520_v62 = vpop.f32.mrf.mxu0 }
 0x7c0   : > { %v8809_v21 = vpop.f32.mrf.mxu1 }
 0x7c1   : > { %v9281_v44 = vadd.f32 %v9217_v39, %v17365_v9  ;;  %v8810_v38 = vadd.f32 %v8809_v21, %v8520_v62  ;;  %v8522_v49 = vpop.f32.mrf.mxu0  ;;  %v9090_v21 = vpop.permute.xlu0 %9089 }
 0x7c2   : > { %v8811_v24 = vpop.f32.mrf.mxu1 }
 0x7c3   : > { %v11386_v52 = vpack.c.bf16 %v9281_v44, %v9280_v7  ;;  %v8523_v36 = vpop.f32.mrf.mxu0  ;;  %v9218_v37 = vmul.f32 %v9066_v4, %v8810_v38  ;;  %v9094_v24 = vpop.permute.xlu1 %9093 }
 0x7c4   : > { %v8812_v54 = vpop.f32.mrf.mxu1 }
 0x7c5   : > { %11478 = vst [vmem:[%s12290_s10 + $0x80] sm:$0xff] %v11386_v52   ;;  %v8813_v45 = vadd.f32 %v8812_v54, %v8523_v36  ;;  %v8525_v51 = vpop.f32.mrf.mxu0  ;;  %v9282_v2 = vadd.f32 %v9218_v37, %v17372_v10 }
 0x7c6   : > { %v8814_v0 = vpop.f32.mrf.mxu1 }
 0x7c7   : > { %v9219_v33 = vmul.f32 %v9070_v3, %v8813_v45  ;;  %v8528_v15 = vpop.f32.mrf.mxu0 }
 0x7c8   : > { %v8817_v61 = vpop.f32.mrf.mxu1 }
 0x7c9   : > { %v9283_v9 = vadd.f32 %v9219_v33, %v17385_v35  ;;  %v8818_v16 = vadd.f32 %v8817_v61, %v8528_v15  ;;  %v8530_v23 = vpop.f32.mrf.mxu0  ;;  %v9098_v33 = vpop.permute.xlu0 %9097 }
 0x7ca   : > { %v8819_v56 = vpop.f32.mrf.mxu1 }
 0x7cb   : > { %v11391_v14 = vpack.c.bf16 %v9283_v9, %v9282_v2  ;;  %v8531_v47 = vpop.f32.mrf.mxu0  ;;  %v9220_v59 = vmul.f32 %v9074_v63, %v8818_v16  ;;  %v9102_v16 = vpop.permute.xlu1 %9101 }
 0x7cc   : > { %v8820_v46 = vpop.f32.mrf.mxu1 }
 0x7cd   : > { %11479 = vst [vmem:[%s12290_s10 + $0x88] sm:$0xff] %v11391_v14   ;;  %v8821_v43 = vadd.f32 %v8820_v46, %v8531_v47  ;;  %v8533_v18 = vpop.f32.mrf.mxu0  ;;  %v9284_v10 = vadd.f32 %v9220_v59, %v17392_v55 }
 0x7ce   : > { %v8822_v26 = vpop.f32.mrf.mxu1 }
 0x7cf   : > { %v9221_v5 = vmul.f32 %v9078_v40, %v8821_v43  ;;  %v8536_v19 = vpop.f32.mrf.mxu0  ;;  %v9106_v26 = vpop.permute.xlu0 %9105 }
 0x7d0   : > { %v8825_v34 = vpop.f32.mrf.mxu1 }
 0x7d1   : > { %v9285_v35 = vadd.f32 %v9221_v5, %v17405_v20  ;;  %v8826_v50 = vadd.f32 %v8825_v34, %v8536_v19  ;;  %v8538_v11 = vpop.f32.mrf.mxu0 }
 0x7d2   : > { %v8827_v31 = vpop.f32.mrf.mxu1 }
 0x7d3   : > { %v11396_v42 = vpack.c.bf16 %v9285_v35, %v9284_v10  ;;  %v8539_v6 = vpop.f32.mrf.mxu0  ;;  %v9222_v17 = vmul.f32 %v9082_v13, %v8826_v50  ;;  %v9110_v35 = vpop.permute.xlu1 %9109  ;;  %v20119_v13 = vld [vmem:[#allocation185_spill] sm:$0xff] }
 0x7d4   : > { %v8828_v58 = vpop.f32.mrf.mxu1 }
 0x7d5   : > { %11480 = vst [vmem:[%s12290_s10 + $0x90] sm:$0xff] %v11396_v42   ;;  %v8829_v48 = vadd.f32 %v8828_v58, %v8539_v6  ;;  %v8541_v29 = vpop.f32.mrf.mxu0  ;;  %v9286_v55 = vadd.f32 %v9222_v17, %v17412_v60 }
 0x7d6   : > { %v8830_v32 = vpop.f32.mrf.mxu1 }
 0x7d7   : > { %v9223_v22 = vmul.f32 %v9086_v41, %v8829_v48  ;;  %v8544_v25 = vpop.f32.mrf.mxu0 }
 0x7d8   : > { %v8833_v57 = vpop.f32.mrf.mxu1 }
 0x7d9   : > { %v9287_v20 = vadd.f32 %v9223_v22, %v17425_v12  ;;  %v8834_v30 = vadd.f32 %v8833_v57, %v8544_v25  ;;  %v8546_v53 = vpop.f32.mrf.mxu0  ;;  %v9114_v22 = vpop.permute.xlu0 %9113 }
 0x7da   : > { %v8835_v28 = vpop.f32.mrf.mxu1 }
 0x7db   : > { %v11401_v39 = vpack.c.bf16 %v9287_v20, %v9286_v55  ;;  %v8547_v62 = vpop.f32.mrf.mxu0  ;;  %v9224_v44 = vmul.f32 %v9090_v21, %v8834_v30  ;;  %v9118_v30 = vpop.permute.xlu1 %9117  ;;  %v20120_v21 = vld [vmem:[#allocation186_spill] sm:$0xff] }
 0x7dc   : > { %v8836_v7 = vpop.f32.mrf.mxu1 }
 0x7dd   : > { %11481 = vst [vmem:[%s12290_s10 + $0x98] sm:$0xff] %v11401_v39   ;;  %v8837_v38 = vadd.f32 %v8836_v7, %v8547_v62  ;;  %v8549_v49 = vpop.f32.mrf.mxu0  ;;  %v9288_v60 = vadd.f32 %v9224_v44, %v17432_v1  ;;  %v20121_v44 = vld [vmem:[#allocation189_spill] sm:$0xff] }
 0x7de   : > { %v8838_v52 = vpop.f32.mrf.mxu1 }
 0x7df   : > { %v9225_v36 = vmul.f32 %v9094_v24, %v8837_v38  ;;  %v8552_v4 = vpop.f32.mrf.mxu0 }
 0x7e0   : > { %v8841_v54 = vpop.f32.mrf.mxu1 }
 0x7e1   : > { %v9289_v12 = vadd.f32 %v9225_v36, %v17445_v8  ;;  %v8842_v37 = vadd.f32 %v8841_v54, %v8552_v4  ;;  %v8554_v45 = vpop.f32.mrf.mxu0  ;;  %v20117_v8 = vld [vmem:[#allocation184_spill] sm:$0xff]  ;;  %v9122_v54 = vpop.permute.xlu0 %9121 }
 0x7e2   : > { %v8843_v51 = vpop.f32.mrf.mxu1 }
 0x7e3   : > { %v11406_v3 = vpack.c.bf16 %v9289_v12, %v9288_v60  ;;  %v8555_v0 = vpop.f32.mrf.mxu0  ;;  %v9226_v61 = vmul.f32 %v9098_v33, %v8842_v37  ;;  %v9126_v51 = vpop.permute.xlu1 %9125 }
 0x7e4   : > { %v8844_v15 = vpop.f32.mrf.mxu1 }
 0x7e5   : > { %11482 = vst [vmem:[%s12290_s10 + $0xa0] sm:$0xff] %v11406_v3   ;;  %v8845_v2 = vadd.f32 %v8844_v15, %v8555_v0  ;;  %v8557_v9 = vpop.f32.mrf.mxu0  ;;  %v9290_v1 = vadd.f32 %v9226_v61, %v17452_v27  ;;  %v20118_v27 = vld [vmem:[#allocation151_spill] sm:$0xff]  ;;  %v20122_v61 = vld [vmem:[#allocation145_spill] sm:$0xff] }
 0x7e6   : > { %v8846_v23 = vpop.f32.mrf.mxu1  ;;  %v20123_v9 = vld [vmem:[#allocation93_spill] sm:$0xff] }
 0x7e7   : > { %v9227_v56 = vmul.f32 %v9102_v16, %v8845_v2  ;;  %v8560_v14 = vpop.f32.mrf.mxu0 }
 0x7e8   : > { %v8849_v47 = vpop.f32.mrf.mxu1 }
 0x7e9   : > { %v9291_v63 = vadd.f32 %v9227_v56, %v20117_v8  ;;  %v8850_v46 = vadd.f32 %v8849_v47, %v8560_v14  ;;  %v8562_v59 = vpop.f32.mrf.mxu0  ;;  %v9130_v8 = vpop.permute.xlu0 %9129 }
 0x7ea   : > { %v8851_v43 = vpop.f32.mrf.mxu1 }
 0x7eb   : > { %v11411_v18 = vpack.c.bf16 %v9291_v63, %v9290_v1  ;;  %v8563_v40 = vpop.f32.mrf.mxu0  ;;  %v9228_v19 = vmul.f32 %v9106_v26, %v8850_v46 }
 0x7ec   : > { %v8852_v5 = vpop.f32.mrf.mxu1 }
 0x7ed   : > { %11483 = vst [vmem:[%s12290_s10 + $0xa8] sm:$0xff] %v11411_v18   ;;  %v8853_v34 = vadd.f32 %v8852_v5, %v8563_v40  ;;  %v8565_v10 = vpop.f32.mrf.mxu0  ;;  %v9292_v6 = vadd.f32 %v9228_v19, %v20118_v27  ;;  %v9134_v18 = vpop.permute.xlu1 %9133 }
 0x7ee   : > { %v8854_v50 = vpop.f32.mrf.mxu1 }
 0x7ef   : > { %v9229_v11 = vmul.f32 %v9110_v35, %v8853_v34  ;;  %v8568_v31 = vpop.f32.mrf.mxu0  ;;  %v20124_v34 = vld [vmem:[#allocation153_spill] sm:$0xff]  ;;  %v20125_v35 = vld [vmem:[#allocation190_spill] sm:$0xff] }
 0x7f0   : > { %v8857_v42 = vpop.f32.mrf.mxu1 }
 0x7f1   : > { %v9293_v58 = vadd.f32 %v9229_v11, %v20119_v13  ;;  %v8858_v17 = vadd.f32 %v8857_v42, %v8568_v31  ;;  %v8570_v48 = vpop.f32.mrf.mxu0  ;;  %v9138_v13 = vpop.permute.xlu0 %9137 }
 0x7f2   : > { %v8859_v29 = vpop.f32.mrf.mxu1 }
 0x7f3   : > { %v11416_v41 = vpack.c.bf16 %v9293_v58, %v9292_v6  ;;  %v8571_v32 = vpop.f32.mrf.mxu0  ;;  %v9230_v57 = vmul.f32 %v9114_v22, %v8858_v17 }
 0x7f4   : > { %v8860_v25 = vpop.f32.mrf.mxu1 }
 0x7f5   : > { %11484 = vst [vmem:[%s12290_s10 + $0xb0] sm:$0xff] %v11416_v41   ;;  %v8861_v55 = vadd.f32 %v8860_v25, %v8571_v32  ;;  %v8573_v20 = vpop.f32.mrf.mxu0  ;;  %v9294_v7 = vadd.f32 %v9230_v57, %v20120_v21  ;;  %v9142_v41 = vpop.permute.xlu1 %9141 }
 0x7f6   : > { %v8862_v53 = vpop.f32.mrf.mxu1 }
 0x7f7   : > { %v9231_v28 = vmul.f32 %v9118_v30, %v8861_v55  ;;  %v8576_v39 = vpop.f32.mrf.mxu0  ;;  %v20126_v55 = vld [vmem:[#allocation192_spill] sm:$0xff]  ;;  %v20127_v30 = vld [vmem:[#allocation194_spill] sm:$0xff] }
 0x7f8   : > { %v8865_v62 = vpop.f32.mrf.mxu1 }
 0x7f9   : > { %v9295_v38 = vadd.f32 %v9231_v28, %v20121_v44  ;;  %v8866_v49 = vadd.f32 %v8865_v62, %v8576_v39  ;;  %v8578_v24 = vpop.f32.mrf.mxu0  ;;  %v9146_v44 = vpop.permute.xlu0 %9145 }
 0x7fa   : > { %v8867_v52 = vpop.f32.mrf.mxu1 }
 0x7fb   : > { %v11421_v36 = vpack.c.bf16 %v9295_v38, %v9294_v7  ;;  %v8579_v4 = vpop.f32.mrf.mxu0  ;;  %v9232_v12 = vmul.f32 %v9122_v54, %v8866_v49 }
 0x7fc   : > { %v8868_v60 = vpop.f32.mrf.mxu1 }
 0x7fd   : > { %11485 = vst [vmem:[%s12290_s10 + $0xb8] sm:$0xff] %v11421_v36   ;;  %v8869_v37 = vadd.f32 %v8868_v60, %v8579_v4  ;;  %v8581_v45 = vpop.f32.mrf.mxu0  ;;  %v9296_v2 = vadd.f32 %v9232_v12, %v20122_v61  ;;  %v9150_v36 = vpop.permute.xlu1 %9149 }
 0x7fe   : > { %v8870_v3 = vpop.f32.mrf.mxu1 }
 0x7ff   : > { %v9233_v0 = vmul.f32 %v9126_v51, %v8869_v37  ;;  %v8584_v33 = vpop.f32.mrf.mxu0  ;;  %v20128_v37 = vld [vmem:[#allocation25_spill] sm:$0xff]  ;;  %v20129_v51 = vld [vmem:[#allocation196_spill] sm:$0xff] }
 0x800   : > { %v8873_v15 = vpop.f32.mrf.mxu1 }
 0x801   : > { %v9297_v16 = vadd.f32 %v9233_v0, %v20123_v9  ;;  %v8874_v23 = vadd.f32 %v8873_v15, %v8584_v33  ;;  %v8586_v56 = vpop.f32.mrf.mxu0  ;;  %v9154_v9 = vpop.permute.xlu0 %9153 }
 0x802   : > { %v8875_v14 = vpop.f32.mrf.mxu1 }
 0x803   : > { %v11426_v47 = vpack.c.bf16 %v9297_v16, %v9296_v2  ;;  %v8587_v1 = vpop.f32.mrf.mxu0  ;;  %v9234_v46 = vmul.f32 %v9130_v8, %v8874_v23 }
 0x804   : > { %v8876_v63 = vpop.f32.mrf.mxu1 }
 0x805   : > { %11486 = vst [vmem:[%s12290_s10 + $0xc0] sm:$0xff] %v11426_v47   ;;  %v8877_v59 = vadd.f32 %v8876_v63, %v8587_v1  ;;  %v8589_v43 = vpop.f32.mrf.mxu0  ;;  %v9298_v10 = vadd.f32 %v9234_v46, %v20124_v34  ;;  %v9158_v47 = vpop.permute.xlu1 %9157 }
 0x806   : > { %v8878_v40 = vpop.f32.mrf.mxu1 }
 0x807   : > { %v9235_v26 = vmul.f32 %v9134_v18, %v8877_v59  ;;  %v8592_v5 = vpop.f32.mrf.mxu0  ;;  %v20130_v59 = vld [vmem:[#allocation156_spill] sm:$0xff]  ;;  %v20131_v18 = vld [vmem:[#allocation197_spill] sm:$0xff] }
 0x808   : > { %v8881_v19 = vpop.f32.mrf.mxu1 }
 0x809   : > { %v9299_v50 = vadd.f32 %v9235_v26, %v20125_v35  ;;  %v8882_v11 = vadd.f32 %v8881_v19, %v8592_v5  ;;  %v8594_v31 = vpop.f32.mrf.mxu0  ;;  %v9162_v35 = vpop.permute.xlu0 %9161 }
 0x80a   : > { %v8883_v42 = vpop.f32.mrf.mxu1 }
 0x80b   : > { %v11431_v27 = vpack.c.bf16 %v9299_v50, %v9298_v10  ;;  %v8595_v6 = vpop.f32.mrf.mxu0  ;;  %v9236_v17 = vmul.f32 %v9138_v13, %v8882_v11 }
 0x80c   : > { %v8884_v58 = vpop.f32.mrf.mxu1 }
 0x80d   : > { %11487 = vst [vmem:[%s12290_s10 + $0xc8] sm:$0xff] %v11431_v27   ;;  %v8885_v48 = vadd.f32 %v8884_v58, %v8595_v6  ;;  %v8597_v29 = vpop.f32.mrf.mxu0  ;;  %v9300_v20 = vadd.f32 %v9236_v17, %v20126_v55  ;;  %v9166_v27 = vpop.permute.xlu1 %9165 }
 0x80e   : > { %v8886_v32 = vpop.f32.mrf.mxu1 }
 0x80f   : > { %v9237_v22 = vmul.f32 %v9142_v41, %v8885_v48  ;;  %v8600_v25 = vpop.f32.mrf.mxu0  ;;  %v20132_v48 = vld [vmem:[#allocation198_spill] sm:$0xff]  ;;  %v20133_v41 = vld [vmem:[#allocation200_spill] sm:$0xff] }
 0x810   : > { %v8889_v57 = vpop.f32.mrf.mxu1 }
 0x811   : > { %v9301_v53 = vadd.f32 %v9237_v22, %v20127_v30  ;;  %v8890_v28 = vadd.f32 %v8889_v57, %v8600_v25  ;;  %v8602_v39 = vpop.f32.mrf.mxu0  ;;  %v9170_v30 = vpop.permute.xlu0 %9169 }
 0x812   : > { %v8891_v62 = vpop.f32.mrf.mxu1 }
 0x813   : > { %v11436_v21 = vpack.c.bf16 %v9301_v53, %v9300_v20  ;;  %v8603_v7 = vpop.f32.mrf.mxu0  ;;  %v9238_v49 = vmul.f32 %v9146_v44, %v8890_v28 }
 0x814   : > { %v8892_v38 = vpop.f32.mrf.mxu1 }
 0x815   : > { %11488 = vst [vmem:[%s12290_s10 + $0xd0] sm:$0xff] %v11436_v21   ;;  %v8893_v24 = vadd.f32 %v8892_v38, %v8603_v7  ;;  %v8605_v52 = vpop.f32.mrf.mxu0  ;;  %v9302_v45 = vadd.f32 %v9238_v49, %v20128_v37  ;;  %v9174_v21 = vpop.permute.xlu1 %9173 }
 0x816   : > { %v8894_v4 = vpop.f32.mrf.mxu1 }
 0x817   : > { %v9239_v54 = vmul.f32 %v9150_v36, %v8893_v24  ;;  %v8608_v60 = vpop.f32.mrf.mxu0  ;;  %v20134_v24 = vld [vmem:[#allocation152_spill] sm:$0xff]  ;;  %v20135_v36 = vld [vmem:[#allocation202_spill] sm:$0xff] }
 0x818   : > { %v8897_v12 = vpop.f32.mrf.mxu1 }
 0x819   : > { %v9303_v3 = vadd.f32 %v9239_v54, %v20129_v51  ;;  %v8898_v0 = vadd.f32 %v8897_v12, %v8608_v60  ;;  %v8610_v33 = vpop.f32.mrf.mxu0  ;;  %v9178_v51 = vpop.permute.xlu0 %9177 }
 0x81a   : > { %v8899_v15 = vpop.f32.mrf.mxu1 }
 0x81b   : > { %v11441_v61 = vpack.c.bf16 %v9303_v3, %v9302_v45  ;;  %v8611_v2 = vpop.f32.mrf.mxu0  ;;  %v9240_v23 = vmul.f32 %v9154_v9, %v8898_v0 }
 0x81c   : > { %v8900_v16 = vpop.f32.mrf.mxu1 }
 0x81d   : > { %11489 = vst [vmem:[%s12290_s10 + $0xd8] sm:$0xff] %v11441_v61   ;;  %v8901_v56 = vadd.f32 %v8900_v16, %v8611_v2  ;;  %v8613_v14 = vpop.f32.mrf.mxu0  ;;  %v9304_v43 = vadd.f32 %v9240_v23, %v20130_v59  ;;  %v9182_v61 = vpop.permute.xlu1 %9181  ;;  %v20136_v16 = vld [vmem:[#allocation67_spill] sm:$0xff] }
 0x81e   : > { %v8902_v1 = vpop.f32.mrf.mxu1 }
 0x81f   : > { %v9241_v8 = vmul.f32 %v9158_v47, %v8901_v56  ;;  %v8616_v63 = vpop.f32.mrf.mxu0  ;;  %v20137_v56 = vld [vmem:[#allocation203_spill] sm:$0xff] }
 0x820   : > { %v8905_v46 = vpop.f32.mrf.mxu1 }
 0x821   : > { %v9305_v40 = vadd.f32 %v9241_v8, %v20131_v18  ;;  %v8906_v26 = vadd.f32 %v8905_v46, %v8616_v63  ;;  %v8618_v5 = vpop.f32.mrf.mxu0 }
 0x822   : > { %v8907_v19 = vpop.f32.mrf.mxu1 }
 0x823   : > { %v11446_v34 = vpack.c.bf16 %v9305_v40, %v9304_v43  ;;  %v8619_v10 = vpop.f32.mrf.mxu0  ;;  %v9242_v11 = vmul.f32 %v9162_v35, %v8906_v26 }
 0x824   : > { %v8908_v50 = vpop.f32.mrf.mxu1 }
 0x825   : > { %11490 = vst [vmem:[%s12290_s10 + $0xe0] sm:$0xff] %v11446_v34   ;;  %v8909_v31 = vadd.f32 %v8908_v50, %v8619_v10  ;;  %v8621_v42 = vpop.f32.mrf.mxu0  ;;  %v9306_v29 = vadd.f32 %v9242_v11, %v20132_v48 }
 0x826   : > { %v8910_v6 = vpop.f32.mrf.mxu1 }
 0x827   : > { %v9243_v13 = vmul.f32 %v9166_v27, %v8909_v31  ;;  %v8624_v58 = vpop.f32.mrf.mxu0 }
 0x828   : > { %v8913_v17 = vpop.f32.mrf.mxu1 }
 0x829   : > { %v9307_v32 = vadd.f32 %v9243_v13, %v20133_v41  ;;  %v8914_v22 = vadd.f32 %v8913_v17, %v8624_v58  ;;  %v8626_v25 = vpop.f32.mrf.mxu0 }
 0x82a   : > { %v8915_v57 = vpop.f32.mrf.mxu1 }
 0x82b   : > { %v11451_v55 = vpack.c.bf16 %v9307_v32, %v9306_v29  ;;  %v8627_v20 = vpop.f32.mrf.mxu0  ;;  %v9244_v28 = vmul.f32 %v9170_v30, %v8914_v22 }
 0x82c   : > { %v8916_v53 = vpop.f32.mrf.mxu1 }
 0x82d   : > { %11491 = vst [vmem:[%s12290_s10 + $0xe8] sm:$0xff] %v11451_v55   ;;  %v8917_v39 = vadd.f32 %v8916_v53, %v8627_v20  ;;  %v8629_v62 = vpop.f32.mrf.mxu0  ;;  %v9308_v52 = vadd.f32 %v9244_v28, %v20134_v24 }
 0x82e   : > { %v8918_v7 = vpop.f32.mrf.mxu1 }
 0x82f   : > { %v9245_v44 = vmul.f32 %v9174_v21, %v8917_v39  ;;  %v8632_v38 = vpop.f32.mrf.mxu0 }
 0x830   : > { %v8921_v49 = vpop.f32.mrf.mxu1 }
 0x831   : > { %v9309_v4 = vadd.f32 %v9245_v44, %v20135_v36  ;;  %v8922_v54 = vadd.f32 %v8921_v49, %v8632_v38  ;;  %v8634_v60 = vpop.f32.mrf.mxu0 }
 0x832   : > { %v8923_v12 = vpop.f32.mrf.mxu1 }
 0x833   : > { %v11456_v37 = vpack.c.bf16 %v9309_v4, %v9308_v52  ;;  %v8635_v45 = vpop.f32.mrf.mxu0  ;;  %v9246_v0 = vmul.f32 %v9178_v51, %v8922_v54 }
 0x834   : > { %v8924_v3 = vpop.f32.mrf.mxu1 }
 0x835   : > { %11492 = vst [vmem:[%s12290_s10 + $0xf0] sm:$0xff] %v11456_v37   ;;  %v8925_v33 = vadd.f32 %v8924_v3, %v8635_v45  ;;  %v8637_v15 = vpop.f32.mrf.mxu0  ;;  %v9310_v23 = vadd.f32 %v9246_v0, %v20136_v16 }
 0x836   : > { %v8926_v2 = vpop.f32.mrf.mxu1 }
 0x837   : > { %v9247_v9 = vmul.f32 %v9182_v61, %v8925_v33 }
 0x839   : > { %v9311_v14 = vadd.f32 %v9247_v9, %v20137_v56 }
 0x83b   : > { %v11461_v47 = vpack.c.bf16 %v9311_v14, %v9310_v23 }
 0x83d   : > { %11493 = vst [vmem:[%s12290_s10 + $0xf8] sm:$0xff] %v11461_v47  }
 0x83e   : > { %12126 = shalt.err (!%p12123_p4)
}
 0x83f   : > { %s12127_s10 = scalar_lea.hbm %s17848_s22, 4096  ;;  %s12131_s23 = scalar_lea.hbm %s17903_s8, 12288 }
 0x840   : > { %p12128_p7 = scmp.ne.s32.totalorder %s17848_s22, %s12127_s10  ;;  %p12132_p10 = scmp.lt.s32.totalorder %s17848_s22, %s17903_s8 }
 0x841   : > { %p12133_p11 = scmp.lt.s32.totalorder %s12131_s23, %s12127_s10 }
 0x842   : > { %p12129_p8 = pnand %p12128_p7, %p12266_p5 }
 0x843   : > { %p12134_p12 = por %p12133_p11, %p12132_p10 }
 0x844   : > { %p12130_p9 = pneg %p12129_p8 }
 0x846   : > { %p12135_p13 = pnand %p12134_p12, %p12130_p9 }
 0x848   : > { %12138 = shalt.err (!%p12135_p13)
}
 0x849   : > { %s12181_s17 = smov 64   ;;  %s12182_s9 = smov 4  }
 0x84a   : > { %11630 = dma.vmem_to_hbm [thread:$0]  (%p12266_p5), %s17850_s20, 4096, %s17848_s22, %s17855_s24, %s12181_s17, %s12181_s17, %s12182_s9  }
 0x84b PF: > { %p11636_p0 = scmp.ge.s32.totalorder %s12173_s30, 2  ;;  %s9661_s25 = sand.u32 1, %s12161_s27  }
 0x84c   : > { %s9662_s12 = scalar_lea.sflag [#allocation4], %s9661_s25 }
 0x84d   : > { %p11633_p1 = pnand %p11636_p0, %p12270_p6 }
 0x84f   : > { %p11634_p2 = pneg %p11633_p1 }
 0x851   : > { %12156 = dma.done.wait (%p11634_p2), %s9662_s12, 4096  }
 0x852   : > { %12158 = vsyncadd (%p11634_p2), %s9662_s12, 4294963200  ;;  %p18_p3 = scmp.ge.s32.totalorder %s12253_s11, 5   ;;  %s20139_s27 = smov %s12165_s28 }
 0x853   : > { %s20140_s28 = smov %s12169_s29  ;;  %s20141_s29 = smov %s12264_s14 }
 0x854   : > { %s20142_s30 = smov %s12253_s11  ;;  %20 = sbr.rel (!%p18_p3) target bundleno = 3 (0x3), region = 94 }
 0x859   :  { %9667 = vsyncpa [#allocation4], 1 }
 0x85a   :  { %9669 = vsyncpa [#allocation4 + $0x1], 1 }

</bundles_post_ra>
